<compile_context>
chip_gen: v6e
topology: v6e:2x2x1
jax: 0.10.0
libtpu: 0.0.40
codegen_flags: <defaults>
</compile_context>

<pallas_src>
import functools
import math

import jax
import jax.numpy as jnp
from jax.experimental import pallas as pl
from jax.experimental.pallas import tpu as pltpu


# ------------------------------------------------------------------ in-kernel helpers


def _ln(x, w, b, eps):
    mu = jnp.mean(x, axis=-1, keepdims=True)
    var = jnp.mean((x - mu) ** 2, axis=-1, keepdims=True)
    return (x - mu) * jax.lax.rsqrt(var + eps) * w + b


def _gelu(x):  # exact (erf) GELU == torch.nn.functional.gelu default
    return 0.5 * x * (1.0 + jax.lax.erf(x * 0.7071067811865476))


def _mxu(a, w):  # bf16 MXU operands, f32 accumulation
    return jnp.dot(a.astype(jnp.bfloat16), w.astype(jnp.bfloat16),
                   preferred_element_type=jnp.float32)


# ------------------------------------------------------------------------- kernels


def _patch_embed_kernel(p_ref, w_ref, b_ref, pos_ref, o_ref):
    # p: (1, P, K) f32 patches, w: (K, D) bf16, b: (1, D) f32, pos: (P, D) f32
    acc = jnp.dot(p_ref[0].astype(jnp.bfloat16), w_ref[...],
                  preferred_element_type=jnp.float32)
    o_ref[0] = acc + b_ref[...] + pos_ref[...]


def _encoder_kernel(x_ref, ln1w_ref, ln1b_ref,
                    wq_ref, bq_ref, wk_ref, bk_ref, wv_ref, bv_ref,
                    wo_ref, bo_ref, ln2w_ref, ln2b_ref,
                    f1w_ref, f1b_ref, f2w_ref, f2b_ref,
                    encw_ref, encb_ref, out_ref, *, num_heads, head_dim):
    layer = pl.program_id(1)

    @pl.when(layer == 0)
    def _():
        out_ref[...] = x_ref[...]          # seed the resident state with the tokens

    x = out_ref[0]                          # (P, D) running hidden state, f32

    # ---------------- attention sub-layer (pre-norm) ------------------------------
    h = _ln(x, ln1w_ref[0], ln1b_ref[0], 1e-6)
    hb = h.astype(jnp.bfloat16)
    scale = 1.0 / math.sqrt(head_dim)
    attn_out = jnp.zeros_like(x)
    for hh in range(num_heads):             # static unroll; all slices lane-aligned
        q = _mxu(hb, wq_ref[0, hh]) + bq_ref[0, hh]     # (P, dh)
        k = _mxu(hb, wk_ref[0, hh]) + bk_ref[0, hh]
        v = _mxu(hb, wv_ref[0, hh]) + bv_ref[0, hh]
        s = jax.lax.dot_general(
            q.astype(jnp.bfloat16), k.astype(jnp.bfloat16),
            (((1,), (1,)), ((), ())),
            preferred_element_type=jnp.float32) * scale  # (P, P)
        m = jnp.max(s, axis=-1, keepdims=True)
        e = jnp.exp(s - m)
        probs = e * pl.reciprocal(jnp.sum(e, axis=-1, keepdims=True), approx=True)
        ctx = _mxu(probs, v)                             # (P, dh)
        attn_out = attn_out + _mxu(ctx, wo_ref[0, hh])   # per-head output projection
    x = x + attn_out + bo_ref[0]

    # ---------------- MLP sub-layer (pre-norm) -------------------------------------
    h2 = _ln(x, ln2w_ref[0], ln2b_ref[0], 1e-6)
    g = _gelu(_mxu(h2, f1w_ref[0]) + f1b_ref[0])
    x = x + _mxu(g, f2w_ref[0]) + f2b_ref[0]

    out_ref[0] = x

    @pl.when(layer == pl.num_programs(1) - 1)
    def _():
        out_ref[0] = _ln(x, encw_ref[...], encb_ref[...], 1e-6)   # final encoder_norm


# ------------------------------------------------------------------------- wrappers


def patch_embed(x, params, ph, pw):
    B, C, H, W = x.shape
    gh, gw = H // ph, W // pw
    P, K = gh * gw, C * ph * pw
    conv_w = params["conv_w"]                               # (D, C, ph, pw) bf16
    D = conv_w.shape[0]
    # strided conv with kernel == stride  ==  patch extraction + matmul
    patches = (x.reshape(B, C, gh, ph, gw, pw)
                .transpose(0, 2, 4, 1, 3, 5)
                .reshape(B, P, K))                          # last-axis order (c, kh, kw)
    w_r = conv_w.reshape(D, K).T                            # (K, D) bf16
    return pl.pallas_call(
        _patch_embed_kernel,
        out_shape=jax.ShapeDtypeStruct((B, P, D), jnp.float32),
        grid=(B,),
        in_specs=[
            pl.BlockSpec((1, P, K), lambda b: (b, 0, 0)),
            pl.BlockSpec((K, D), lambda b: (0, 0)),
            pl.BlockSpec((1, D), lambda b: (0, 0)),
            pl.BlockSpec((P, D), lambda b: (0, 0)),
        ],
        out_specs=pl.BlockSpec((1, P, D), lambda b: (b, 0, 0)),
        compiler_params=pltpu.CompilerParams(dimension_semantics=("parallel",)),
    )(patches, w_r, params["conv_b"].reshape(1, D), params["pos"])


def encode(tokens, p, num_heads):
    B, P, D = tokens.shape
    L, H = p["wq"].shape[0], p["wq"].shape[1]
    assert H == num_heads
    dh = D // num_heads
    M = p["f1w"].shape[-1]

    x_idx = lambda b, l: (b, 0, 0)
    l3 = lambda b, l: (l, 0, 0)
    l4 = lambda b, l: (l, 0, 0, 0)
    shared = lambda b, l: (0, 0)

    in_specs = [
        pl.BlockSpec((1, P, D), x_idx),                                     # tokens
        pl.BlockSpec((1, 1, D), l3), pl.BlockSpec((1, 1, D), l3),           # ln1 w,b
        pl.BlockSpec((1, H, D, dh), l4), pl.BlockSpec((1, H, 1, dh), l4),   # wq, bq
        pl.BlockSpec((1, H, D, dh), l4), pl.BlockSpec((1, H, 1, dh), l4),   # wk, bk
        pl.BlockSpec((1, H, D, dh), l4), pl.BlockSpec((1, H, 1, dh), l4),   # wv, bv
        pl.BlockSpec((1, H, dh, D), l4), pl.BlockSpec((1, 1, D), l3),       # wo, bo
        pl.BlockSpec((1, 1, D), l3), pl.BlockSpec((1, 1, D), l3),           # ln2 w,b
        pl.BlockSpec((1, D, M), l3), pl.BlockSpec((1, 1, M), l3),           # fc1 w,b
        pl.BlockSpec((1, M, D), l3), pl.BlockSpec((1, 1, D), l3),           # fc2 w,b
        pl.BlockSpec((1, D), shared), pl.BlockSpec((1, D), shared),         # enc LN
    ]
    kern = functools.partial(_encoder_kernel, num_heads=num_heads, head_dim=dh)
    return pl.pallas_call(
        kern,
        out_shape=jax.ShapeDtypeStruct((B, P, D), jnp.float32),
        grid=(B, L),
        in_specs=in_specs,
        out_specs=pl.BlockSpec((1, P, D), x_idx),
        compiler_params=pltpu.CompilerParams(
            dimension_semantics=("parallel", "arbitrary")),
    )(tokens, p["ln1_w"], p["ln1_b"], p["wq"], p["bq"], p["wk"], p["bk"],
      p["wv"], p["bv"], p["wo"], p["bo"], p["ln2_w"], p["ln2_b"],
      p["f1w"], p["f1b"], p["f2w"], p["f2b"], p["enc_w"], p["enc_b"])


def transformer_forward(x, params, *, num_heads, patch_size):
    tokens = patch_embed(x, params, patch_size[0], patch_size[1])   # Embeddings
    return encode(tokens, params, num_heads)                        # Encoder + final LN


# --------------------------------------------------------------------- params / ref


def init_params(key, *, in_channels, hidden, heads, layers, mlp_dim, n_patches,
                patch_size):
    dh = hidden // heads
    ks = iter(jax.random.split(key, 40))

    def rnd(shape, scale=0.02, dtype=jnp.float32):
        return (scale * jax.random.normal(next(ks), shape, jnp.float32)).astype(dtype)

    # Per-head attention weights are pre-split so the kernel needs no unaligned
    # lane slices:   wq[l, h] == torch_q_weight[l].T[:, h*dh:(h+1)*dh]
    #                wo[l, h] == torch_out_weight[l].T[h*dh:(h+1)*dh, :]
    return {
        # Embeddings: Conv2d(in_channels, hidden, kernel=patch, stride=patch) + pos
        "conv_w": rnd((hidden, in_channels) + patch_size, 0.02, jnp.bfloat16),
        "conv_b": rnd((hidden,), 0.02),
        "pos": rnd((n_patches, hidden), 0.02),
        # Encoder Blocks (stacked over layers)
        "ln1_w": 1.0 + rnd((layers, 1, hidden), 0.05),
        "ln1_b": rnd((layers, 1, hidden), 0.05),
        "wq": rnd((layers, heads, hidden, dh), 0.02, jnp.bfloat16),
        "bq": rnd((layers, heads, 1, dh), 0.02),
        "wk": rnd((layers, heads, hidden, dh), 0.02, jnp.bfloat16),
        "bk": rnd((layers, heads, 1, dh), 0.02),
        "wv": rnd((layers, heads, hidden, dh), 0.02, jnp.bfloat16),
        "bv": rnd((layers, heads, 1, dh), 0.02),
        "wo": rnd((layers, heads, dh, hidden), 0.02, jnp.bfloat16),
        "bo": rnd((layers, 1, hidden), 0.02),
        "ln2_w": 1.0 + rnd((layers, 1, hidden), 0.05),
        "ln2_b": rnd((layers, 1, hidden), 0.05),
        "f1w": rnd((layers, hidden, mlp_dim), 0.02, jnp.bfloat16),
        "f1b": rnd((layers, 1, mlp_dim), 1e-3),
        "f2w": rnd((layers, mlp_dim, hidden), 0.02, jnp.bfloat16),
        "f2b": rnd((layers, 1, hidden), 1e-3),
        # Encoder.encoder_norm
        "enc_w": 1.0 + rnd((1, hidden), 0.05),
        "enc_b": rnd((1, hidden), 0.05),
    }


def reference_forward(x, p, *, num_heads, patch_size):
    """Pure-jnp f32 reference with identical math (dropout = identity)."""
    ph, pw = patch_size
    B, C, H, W = x.shape
    gh, gw = H // ph, W // pw
    D, K = p["conv_w"].shape[0], C * ph * pw
    f32 = lambda a: a.astype(jnp.float32)
    patches = (x.reshape(B, C, gh, ph, gw, pw)
                .transpose(0, 2, 4, 1, 3, 5).reshape(B, gh * gw, K))
    t = patches @ f32(p["conv_w"]).reshape(D, K).T + p["conv_b"] + p["pos"]
    dh = D // num_heads

    def ln(v, w, b, eps=1e-6):
        mu = v.mean(-1, keepdims=True)
        var = ((v - mu) ** 2).mean(-1, keepdims=True)
        return (v - mu) / jnp.sqrt(var + eps) * w + b

    for l in range(p["wq"].shape[0]):
        h = ln(t, p["ln1_w"][l], p["ln1_b"][l])
        attn = jnp.zeros_like(t)
        for hh in range(num_heads):
            q = h @ f32(p["wq"][l, hh]) + p["bq"][l, hh]
            k = h @ f32(p["wk"][l, hh]) + p["bk"][l, hh]
            v = h @ f32(p["wv"][l, hh]) + p["bv"][l, hh]
            s = jnp.einsum("bpd,bqd->bpq", q, k) / math.sqrt(dh)
            probs = jax.nn.softmax(s, axis=-1)
            attn = attn + jnp.einsum("bpq,bqd->bpd", probs, v) @ f32(p["wo"][l, hh])
        t = t + attn + p["bo"][l]
        h2 = ln(t, p["ln2_w"][l], p["ln2_b"][l])
        g = jax.nn.gelu(h2 @ f32(p["f1w"][l]) + p["f1b"][l], approximate=False)
        t = t + g @ f32(p["f2w"][l]) + p["f2b"][l]
    return ln(t, p["enc_w"], p["enc_b"])


# ------------------------------------------------------------------------------ main


if __name__ == "__main__":
    # Module-implied config (Embeddings hard-codes in_channels=1024 and consumes the
    # (B, 1024, img//16, img//16) backbone feature map):
    #   img_size=256, patches.grid=(8,8) -> patch_size=2, n_patches=64
    #   hidden_size=128, num_heads=4, num_layers=2, mlp_dim=256, dropout=0
    B, C_IN, HW, PATCH = 2, 1024, 16, 2
    HIDDEN, HEADS, LAYERS, MLP_DIM = 128, 4, 2, 256
    N_PATCHES = (HW // PATCH) ** 2

    key = jax.random.PRNGKey(0)
    kx, kp = jax.random.split(key)
    x = jax.random.normal(kx, (B, C_IN, HW, HW), dtype=jnp.float32)
    params = init_params(kp, in_channels=C_IN, hidden=HIDDEN, heads=HEADS,
                         layers=LAYERS, mlp_dim=MLP_DIM, n_patches=N_PATCHES,
                         patch_size=(PATCH, PATCH))

    fwd = jax.jit(functools.partial(transformer_forward, num_heads=HEADS,
                                    patch_size=(PATCH, PATCH)))
    encoded = jax.block_until_ready(fwd(x, params))

    assert encoded.shape == (B, N_PATCHES, HIDDEN) and encoded.dtype == jnp.float32
    assert bool(jnp.all(jnp.isfinite(encoded)))

    # self-check against a pure-jnp f32 reference (bf16 MXU + approx reciprocal slack)
    ref = reference_forward(x, params, num_heads=HEADS, patch_size=(PATCH, PATCH))
    err = float(jnp.max(jnp.abs(encoded - ref)))
    assert err < 0.1, f"max abs error vs reference: {err}"

    print("KERNEL_OK")
</pallas_src>

<mosaic_0001>
module attributes {stable_mosaic.version = 11 : i64} {
  func.func @_patch_embed_kernel(%arg0: i32, %arg1: memref<1x64x4096xf32, #tpu.memory_space<vmem>>, %arg2: memref<4096x128xbf16, #tpu.memory_space<vmem>>, %arg3: memref<1x128xf32, #tpu.memory_space<vmem>>, %arg4: memref<64x128xf32, #tpu.memory_space<vmem>>, %arg5: memref<1x64x128xf32, #tpu.memory_space<vmem>>) attributes {dimension_semantics = [#tpu.dimension_semantics<parallel>], iteration_bounds = array<i64: 2>, scalar_prefetch = 0 : i64, scratch_operands = 0 : i64, tpu.core_type = #tpu.core_type<tc>, window_params = [{transform_indices = @transform_0, window_bounds = array<i64: 1, 64, 4096>}, {pipeline_mode = #tpu.pipeline_mode<synchronous>, transform_indices = @transform_1, window_bounds = array<i64: 4096, 128>}, {pipeline_mode = #tpu.pipeline_mode<synchronous>, transform_indices = @transform_2, window_bounds = array<i64: 1, 128>}, {pipeline_mode = #tpu.pipeline_mode<synchronous>, transform_indices = @transform_3, window_bounds = array<i64: 64, 128>}, {transform_indices = @transform_4, window_bounds = array<i64: 1, 64, 128>}]} {
    %c0 = arith.constant 0 : index
    %c0_0 = arith.constant 0 : index
    %c0_1 = arith.constant 0 : index
    %0 = vector.load %arg1[%c0, %c0_0, %c0_1] : memref<1x64x4096xf32, #tpu.memory_space<vmem>>, vector<1x64x4096xf32>
    %1 = vector.shape_cast %0 : vector<1x64x4096xf32> to vector<64x4096xf32>
    %2 = arith.truncf %1 : vector<64x4096xf32> to vector<64x4096xbf16>
    %c0_2 = arith.constant 0 : index
    %c0_3 = arith.constant 0 : index
    %3 = vector.load %arg2[%c0_2, %c0_3] : memref<4096x128xbf16, #tpu.memory_space<vmem>>, vector<4096x128xbf16>
    %cst = arith.constant dense<0.000000e+00> : vector<64x128xf32>
    %4 = tpu.matmul %2, %3, %cst {dimension_numbers = #tpu.dot_dimension_numbers<[1], [0], [0], [1], [0, 0, 1, 1], [], []>} : vector<64x4096xbf16>, vector<4096x128xbf16>, vector<64x128xf32> -> vector<64x128xf32>
    %c0_4 = arith.constant 0 : index
    %c0_5 = arith.constant 0 : index
    %5 = vector.load %arg3[%c0_4, %c0_5] : memref<1x128xf32, #tpu.memory_space<vmem>>, vector<1x128xf32>
    %6 = vector.broadcast %5 : vector<1x128xf32> to vector<64x128xf32>
    %7 = arith.addf %4, %6 : vector<64x128xf32>
    %c0_6 = arith.constant 0 : index
    %c0_7 = arith.constant 0 : index
    %8 = vector.load %arg4[%c0_6, %c0_7] : memref<64x128xf32, #tpu.memory_space<vmem>>, vector<64x128xf32>
    %9 = arith.addf %7, %8 : vector<64x128xf32>
    %c0_8 = arith.constant 0 : index
    %c0_9 = arith.constant 0 : index
    %c0_10 = arith.constant 0 : index
    %10 = vector.load %arg5[%c0_8, %c0_9, %c0_10] : memref<1x64x128xf32, #tpu.memory_space<vmem>>, vector<1x64x128xf32>
    %11 = vector.shape_cast %10 : vector<1x64x128xf32> to vector<64x128xf32>
    %12 = vector.shape_cast %9 : vector<64x128xf32> to vector<1x64x128xf32>
    tpu.vector_store %arg5[%c0_8, %c0_9, %c0_10], %12 {strides = array<i32>} : memref<1x64x128xf32, #tpu.memory_space<vmem>>, vector<1x64x128xf32>,
    return
  }
  func.func @transform_0(%arg0: i32) -> (i32, i32, i32) {
    %c0_i32 = arith.constant 0 : i32
    %c0_i32_0 = arith.constant 0 : i32
    %c0_i32_1 = arith.constant 0 : i32
    return %arg0, %c0_i32, %c0_i32_0 : i32, i32, i32
  }
  func.func @transform_1(%arg0: i32) -> (i32, i32) {
    %c0_i32 = arith.constant 0 : i32
    %c0_i32_0 = arith.constant 0 : i32
    %c0_i32_1 = arith.constant 0 : i32
    return %c0_i32, %c0_i32_0 : i32, i32
  }
  func.func @transform_2(%arg0: i32) -> (i32, i32) {
    %c0_i32 = arith.constant 0 : i32
    %c0_i32_0 = arith.constant 0 : i32
    %c0_i32_1 = arith.constant 0 : i32
    return %c0_i32, %c0_i32_0 : i32, i32
  }
  func.func @transform_3(%arg0: i32) -> (i32, i32) {
    %c0_i32 = arith.constant 0 : i32
    %c0_i32_0 = arith.constant 0 : i32
    %c0_i32_1 = arith.constant 0 : i32
    return %c0_i32, %c0_i32_0 : i32, i32
  }
  func.func @transform_4(%arg0: i32) -> (i32, i32, i32) {
    %c0_i32 = arith.constant 0 : i32
    %c0_i32_0 = arith.constant 0 : i32
    %c0_i32_1 = arith.constant 0 : i32
    return %arg0, %c0_i32, %c0_i32_0 : i32, i32, i32
  }
}

module attributes {stable_mosaic.version = 11 : i64} {
  func.func @_encoder_kernel(%arg0: i32, %arg1: i32, %arg2: memref<1x64x128xf32, #tpu.memory_space<vmem>>, %arg3: memref<1x1x128xf32, #tpu.memory_space<vmem>>, %arg4: memref<1x1x128xf32, #tpu.memory_space<vmem>>, %arg5: memref<1x4x128x32xbf16, #tpu.memory_space<vmem>>, %arg6: memref<1x4x1x32xf32, #tpu.memory_space<vmem>>, %arg7: memref<1x4x128x32xbf16, #tpu.memory_space<vmem>>, %arg8: memref<1x4x1x32xf32, #tpu.memory_space<vmem>>, %arg9: memref<1x4x128x32xbf16, #tpu.memory_space<vmem>>, %arg10: memref<1x4x1x32xf32, #tpu.memory_space<vmem>>, %arg11: memref<1x4x32x128xbf16, #tpu.memory_space<vmem>>, %arg12: memref<1x1x128xf32, #tpu.memory_space<vmem>>, %arg13: memref<1x1x128xf32, #tpu.memory_space<vmem>>, %arg14: memref<1x1x128xf32, #tpu.memory_space<vmem>>, %arg15: memref<1x128x256xbf16, #tpu.memory_space<vmem>>, %arg16: memref<1x1x256xf32, #tpu.memory_space<vmem>>, %arg17: memref<1x256x128xbf16, #tpu.memory_space<vmem>>, %arg18: memref<1x1x128xf32, #tpu.memory_space<vmem>>, %arg19: memref<1x128xf32, #tpu.memory_space<vmem>>, %arg20: memref<1x128xf32, #tpu.memory_space<vmem>>, %arg21: memref<1x64x128xf32, #tpu.memory_space<vmem>>) attributes {dimension_semantics = [#tpu.dimension_semantics<parallel>, #tpu.dimension_semantics<arbitrary>], iteration_bounds = array<i64: 2, 2>, scalar_prefetch = 0 : i64, scratch_operands = 0 : i64, tpu.core_type = #tpu.core_type<tc>, window_params = [{transform_indices = @transform_0, window_bounds = array<i64: 1, 64, 128>}, {transform_indices = @transform_1, window_bounds = array<i64: 1, 1, 128>}, {transform_indices = @transform_2, window_bounds = array<i64: 1, 1, 128>}, {transform_indices = @transform_3, window_bounds = array<i64: 1, 4, 128, 32>}, {transform_indices = @transform_4, window_bounds = array<i64: 1, 4, 1, 32>}, {transform_indices = @transform_5, window_bounds = array<i64: 1, 4, 128, 32>}, {transform_indices = @transform_6, window_bounds = array<i64: 1, 4, 1, 32>}, {transform_indices = @transform_7, window_bounds = array<i64: 1, 4, 128, 32>}, {transform_indices = @transform_8, window_bounds = array<i64: 1, 4, 1, 32>}, {transform_indices = @transform_9, window_bounds = array<i64: 1, 4, 32, 128>}, {transform_indices = @transform_10, window_bounds = array<i64: 1, 1, 128>}, {transform_indices = @transform_11, window_bounds = array<i64: 1, 1, 128>}, {transform_indices = @transform_12, window_bounds = array<i64: 1, 1, 128>}, {transform_indices = @transform_13, window_bounds = array<i64: 1, 128, 256>}, {transform_indices = @transform_14, window_bounds = array<i64: 1, 1, 256>}, {transform_indices = @transform_15, window_bounds = array<i64: 1, 256, 128>}, {transform_indices = @transform_16, window_bounds = array<i64: 1, 1, 128>}, {pipeline_mode = #tpu.pipeline_mode<synchronous>, transform_indices = @transform_17, window_bounds = array<i64: 1, 128>}, {pipeline_mode = #tpu.pipeline_mode<synchronous>, transform_indices = @transform_18, window_bounds = array<i64: 1, 128>}, {transform_indices = @transform_19, window_bounds = array<i64: 1, 64, 128>}]} {
    %c0_i32 = arith.constant 0 : i32
    %0 = arith.cmpi eq, %arg1, %c0_i32 : i32
    %1 = arith.extui %0 : i1 to i32
    %c0_i32_0 = arith.constant 0 : i32
    %2 = arith.cmpi ne, %1, %c0_i32_0 : i32
    scf.if %2 {
      %c0_194 = arith.constant 0 : index
      %c0_195 = arith.constant 0 : index
      %c0_196 = arith.constant 0 : index
      %271 = vector.load %arg2[%c0_194, %c0_195, %c0_196] : memref<1x64x128xf32, #tpu.memory_space<vmem>>, vector<1x64x128xf32>
      %c0_197 = arith.constant 0 : index
      %c0_198 = arith.constant 0 : index
      %c0_199 = arith.constant 0 : index
      %272 = vector.load %arg21[%c0_197, %c0_198, %c0_199] : memref<1x64x128xf32, #tpu.memory_space<vmem>>, vector<1x64x128xf32>
      tpu.vector_store %arg21[%c0_197, %c0_198, %c0_199], %271 {strides = array<i32>} : memref<1x64x128xf32, #tpu.memory_space<vmem>>, vector<1x64x128xf32>,
    } else {
    }
    %c0 = arith.constant 0 : index
    %c0_1 = arith.constant 0 : index
    %c0_2 = arith.constant 0 : index
    %3 = vector.load %arg21[%c0, %c0_1, %c0_2] : memref<1x64x128xf32, #tpu.memory_space<vmem>>, vector<1x64x128xf32>
    %4 = vector.shape_cast %3 : vector<1x64x128xf32> to vector<64x128xf32>
    %c0_3 = arith.constant 0 : index
    %c0_4 = arith.constant 0 : index
    %c0_5 = arith.constant 0 : index
    %5 = vector.load %arg3[%c0_3, %c0_4, %c0_5] : memref<1x1x128xf32, #tpu.memory_space<vmem>>, vector<1x1x128xf32>
    %6 = vector.shape_cast %5 : vector<1x1x128xf32> to vector<1x128xf32>
    %c0_6 = arith.constant 0 : index
    %c0_7 = arith.constant 0 : index
    %c0_8 = arith.constant 0 : index
    %7 = vector.load %arg4[%c0_6, %c0_7, %c0_8] : memref<1x1x128xf32, #tpu.memory_space<vmem>>, vector<1x1x128xf32>
    %8 = vector.shape_cast %7 : vector<1x1x128xf32> to vector<1x128xf32>
    %cst = arith.constant dense<0.000000e+00> : vector<64xf32>
    %9 = vector.multi_reduction <add>, %4, %cst [1] : vector<64x128xf32> to vector<64xf32>
    %10 = vector.shape_cast %9 : vector<64xf32> to vector<64x1xf32>
    %cst_9 = arith.constant 1.280000e+02 : f32
    %11 = vector.broadcast %cst_9 : f32 to vector<64x1xf32>
    %12 = arith.divf %10, %11 : vector<64x1xf32>
    %13 = vector.broadcast %12 : vector<64x1xf32> to vector<64x128xf32>
    %14 = arith.subf %4, %13 : vector<64x128xf32>
    %15 = arith.mulf %14, %14 : vector<64x128xf32>
    %cst_10 = arith.constant dense<0.000000e+00> : vector<64xf32>
    %16 = vector.multi_reduction <add>, %15, %cst_10 [1] : vector<64x128xf32> to vector<64xf32>
    %17 = vector.shape_cast %16 : vector<64xf32> to vector<64x1xf32>
    %cst_11 = arith.constant 1.280000e+02 : f32
    %18 = vector.broadcast %cst_11 : f32 to vector<64x1xf32>
    %19 = arith.divf %17, %18 : vector<64x1xf32>
    %20 = vector.broadcast %12 : vector<64x1xf32> to vector<64x128xf32>
    %21 = arith.subf %4, %20 : vector<64x128xf32>
    %cst_12 = arith.constant 9.99999997E-7 : f32
    %22 = vector.broadcast %cst_12 : f32 to vector<64x1xf32>
    %23 = arith.addf %19, %22 : vector<64x1xf32>
    %24 = math.rsqrt %23 : vector<64x1xf32>
    %25 = vector.broadcast %24 : vector<64x1xf32> to vector<64x128xf32>
    %26 = arith.mulf %21, %25 : vector<64x128xf32>
    %27 = vector.broadcast %6 : vector<1x128xf32> to vector<64x128xf32>
    %28 = arith.mulf %26, %27 : vector<64x128xf32>
    %29 = vector.broadcast %8 : vector<1x128xf32> to vector<64x128xf32>
    %30 = arith.addf %28, %29 : vector<64x128xf32>
    %31 = arith.truncf %30 : vector<64x128xf32> to vector<64x128xbf16>
    %cst_13 = arith.constant 0.000000e+00 : f32
    %32 = vector.broadcast %cst_13 : f32 to vector<64x128xf32>
    %c0_14 = arith.constant 0 : index
    %c0_15 = arith.constant 0 : index
    %c0_16 = arith.constant 0 : index
    %c0_17 = arith.constant 0 : index
    %33 = vector.load %arg5[%c0_14, %c0_15, %c0_16, %c0_17] : memref<1x4x128x32xbf16, #tpu.memory_space<vmem>>, vector<1x1x128x32xbf16>
    %34 = vector.shape_cast %33 : vector<1x1x128x32xbf16> to vector<128x32xbf16>
    %cst_18 = arith.constant dense<0.000000e+00> : vector<64x32xf32>
    %35 = tpu.matmul %31, %34, %cst_18 {dimension_numbers = #tpu.dot_dimension_numbers<[1], [0], [0], [1], [0, 0, 1, 1], [], []>} : vector<64x128xbf16>, vector<128x32xbf16>, vector<64x32xf32> -> vector<64x32xf32>
    %c0_19 = arith.constant 0 : index
    %c0_20 = arith.constant 0 : index
    %c0_21 = arith.constant 0 : index
    %c0_22 = arith.constant 0 : index
    %36 = vector.load %arg6[%c0_19, %c0_20, %c0_21, %c0_22] : memref<1x4x1x32xf32, #tpu.memory_space<vmem>>, vector<1x1x1x32xf32>
    %37 = vector.shape_cast %36 : vector<1x1x1x32xf32> to vector<1x32xf32>
    %38 = vector.broadcast %37 : vector<1x32xf32> to vector<64x32xf32>
    %39 = arith.addf %35, %38 : vector<64x32xf32>
    %c0_23 = arith.constant 0 : index
    %c0_24 = arith.constant 0 : index
    %c0_25 = arith.constant 0 : index
    %c0_26 = arith.constant 0 : index
    %40 = vector.load %arg7[%c0_23, %c0_24, %c0_25, %c0_26] : memref<1x4x128x32xbf16, #tpu.memory_space<vmem>>, vector<1x1x128x32xbf16>
    %41 = vector.shape_cast %40 : vector<1x1x128x32xbf16> to vector<128x32xbf16>
    %cst_27 = arith.constant dense<0.000000e+00> : vector<64x32xf32>
    %42 = tpu.matmul %31, %41, %cst_27 {dimension_numbers = #tpu.dot_dimension_numbers<[1], [0], [0], [1], [0, 0, 1, 1], [], []>} : vector<64x128xbf16>, vector<128x32xbf16>, vector<64x32xf32> -> vector<64x32xf32>
    %c0_28 = arith.constant 0 : index
    %c0_29 = arith.constant 0 : index
    %c0_30 = arith.constant 0 : index
    %c0_31 = arith.constant 0 : index
    %43 = vector.load %arg8[%c0_28, %c0_29, %c0_30, %c0_31] : memref<1x4x1x32xf32, #tpu.memory_space<vmem>>, vector<1x1x1x32xf32>
    %44 = vector.shape_cast %43 : vector<1x1x1x32xf32> to vector<1x32xf32>
    %45 = vector.broadcast %44 : vector<1x32xf32> to vector<64x32xf32>
    %46 = arith.addf %42, %45 : vector<64x32xf32>
    %c0_32 = arith.constant 0 : index
    %c0_33 = arith.constant 0 : index
    %c0_34 = arith.constant 0 : index
    %c0_35 = arith.constant 0 : index
    %47 = vector.load %arg9[%c0_32, %c0_33, %c0_34, %c0_35] : memref<1x4x128x32xbf16, #tpu.memory_space<vmem>>, vector<1x1x128x32xbf16>
    %48 = vector.shape_cast %47 : vector<1x1x128x32xbf16> to vector<128x32xbf16>
    %cst_36 = arith.constant dense<0.000000e+00> : vector<64x32xf32>
    %49 = tpu.matmul %31, %48, %cst_36 {dimension_numbers = #tpu.dot_dimension_numbers<[1], [0], [0], [1], [0, 0, 1, 1], [], []>} : vector<64x128xbf16>, vector<128x32xbf16>, vector<64x32xf32> -> vector<64x32xf32>
    %c0_37 = arith.constant 0 : index
    %c0_38 = arith.constant 0 : index
    %c0_39 = arith.constant 0 : index
    %c0_40 = arith.constant 0 : index
    %50 = vector.load %arg10[%c0_37, %c0_38, %c0_39, %c0_40] : memref<1x4x1x32xf32, #tpu.memory_space<vmem>>, vector<1x1x1x32xf32>
    %51 = vector.shape_cast %50 : vector<1x1x1x32xf32> to vector<1x32xf32>
    %52 = vector.broadcast %51 : vector<1x32xf32> to vector<64x32xf32>
    %53 = arith.addf %49, %52 : vector<64x32xf32>
    %54 = arith.truncf %39 : vector<64x32xf32> to vector<64x32xbf16>
    %55 = arith.truncf %46 : vector<64x32xf32> to vector<64x32xbf16>
    %cst_41 = arith.constant dense<0.000000e+00> : vector<64x64xf32>
    %56 = tpu.matmul %54, %55, %cst_41 {dimension_numbers = #tpu.dot_dimension_numbers<[1], [1], [0], [0], [0, 0, 1, 0], [], []>} : vector<64x32xbf16>, vector<64x32xbf16>, vector<64x64xf32> -> vector<64x64xf32>
    %cst_42 = arith.constant 0.176776692 : f32
    %57 = vector.broadcast %cst_42 : f32 to vector<64x64xf32>
    %58 = arith.mulf %56, %57 : vector<64x64xf32>
    %cst_43 = arith.constant dense<0xFF800000> : vector<64xf32>
    %59 = vector.multi_reduction <maximumf>, %58, %cst_43 [1] : vector<64x64xf32> to vector<64xf32>
    %60 = vector.shape_cast %59 : vector<64xf32> to vector<64x1xf32>
    %61 = vector.broadcast %60 : vector<64x1xf32> to vector<64x64xf32>
    %62 = arith.subf %58, %61 : vector<64x64xf32>
    %63 = math.exp %62 : vector<64x64xf32>
    %cst_44 = arith.constant dense<0.000000e+00> : vector<64xf32>
    %64 = vector.multi_reduction <add>, %63, %cst_44 [1] : vector<64x64xf32> to vector<64xf32>
    %65 = vector.shape_cast %64 : vector<64xf32> to vector<64x1xf32>
    %66 = tpu.reciprocal %65 {approx = true} : vector<64x1xf32> -> vector<64x1xf32>
    %67 = vector.broadcast %66 : vector<64x1xf32> to vector<64x64xf32>
    %68 = arith.mulf %63, %67 : vector<64x64xf32>
    %69 = arith.truncf %68 : vector<64x64xf32> to vector<64x64xbf16>
    %70 = arith.truncf %53 : vector<64x32xf32> to vector<64x32xbf16>
    %cst_45 = arith.constant dense<0.000000e+00> : vector<64x32xf32>
    %71 = tpu.matmul %69, %70, %cst_45 {dimension_numbers = #tpu.dot_dimension_numbers<[1], [0], [0], [1], [0, 0, 1, 1], [], []>} : vector<64x64xbf16>, vector<64x32xbf16>, vector<64x32xf32> -> vector<64x32xf32>
    %c0_46 = arith.constant 0 : index
    %c0_47 = arith.constant 0 : index
    %c0_48 = arith.constant 0 : index
    %c0_49 = arith.constant 0 : index
    %72 = vector.load %arg11[%c0_46, %c0_47, %c0_48, %c0_49] : memref<1x4x32x128xbf16, #tpu.memory_space<vmem>>, vector<1x1x32x128xbf16>
    %73 = vector.shape_cast %72 : vector<1x1x32x128xbf16> to vector<32x128xbf16>
    %74 = arith.truncf %71 : vector<64x32xf32> to vector<64x32xbf16>
    %cst_50 = arith.constant dense<0.000000e+00> : vector<64x128xf32>
    %75 = tpu.matmul %74, %73, %cst_50 {dimension_numbers = #tpu.dot_dimension_numbers<[1], [0], [0], [1], [0, 0, 1, 1], [], []>} : vector<64x32xbf16>, vector<32x128xbf16>, vector<64x128xf32> -> vector<64x128xf32>
    %76 = arith.addf %32, %75 : vector<64x128xf32>
    %c0_51 = arith.constant 0 : index
    %c1 = arith.constant 1 : index
    %c0_52 = arith.constant 0 : index
    %c0_53 = arith.constant 0 : index
    %77 = vector.load %arg5[%c0_51, %c1, %c0_52, %c0_53] : memref<1x4x128x32xbf16, #tpu.memory_space<vmem>>, vector<1x1x128x32xbf16>
    %78 = vector.shape_cast %77 : vector<1x1x128x32xbf16> to vector<128x32xbf16>
    %cst_54 = arith.constant dense<0.000000e+00> : vector<64x32xf32>
    %79 = tpu.matmul %31, %78, %cst_54 {dimension_numbers = #tpu.dot_dimension_numbers<[1], [0], [0], [1], [0, 0, 1, 1], [], []>} : vector<64x128xbf16>, vector<128x32xbf16>, vector<64x32xf32> -> vector<64x32xf32>
    %c0_55 = arith.constant 0 : index
    %c1_56 = arith.constant 1 : index
    %c0_57 = arith.constant 0 : index
    %c0_58 = arith.constant 0 : index
    %80 = vector.load %arg6[%c0_55, %c1_56, %c0_57, %c0_58] : memref<1x4x1x32xf32, #tpu.memory_space<vmem>>, vector<1x1x1x32xf32>
    %81 = vector.shape_cast %80 : vector<1x1x1x32xf32> to vector<1x32xf32>
    %82 = vector.broadcast %81 : vector<1x32xf32> to vector<64x32xf32>
    %83 = arith.addf %79, %82 : vector<64x32xf32>
    %c0_59 = arith.constant 0 : index
    %c1_60 = arith.constant 1 : index
    %c0_61 = arith.constant 0 : index
    %c0_62 = arith.constant 0 : index
    %84 = vector.load %arg7[%c0_59, %c1_60, %c0_61, %c0_62] : memref<1x4x128x32xbf16, #tpu.memory_space<vmem>>, vector<1x1x128x32xbf16>
    %85 = vector.shape_cast %84 : vector<1x1x128x32xbf16> to vector<128x32xbf16>
    %cst_63 = arith.constant dense<0.000000e+00> : vector<64x32xf32>
    %86 = tpu.matmul %31, %85, %cst_63 {dimension_numbers = #tpu.dot_dimension_numbers<[1], [0], [0], [1], [0, 0, 1, 1], [], []>} : vector<64x128xbf16>, vector<128x32xbf16>, vector<64x32xf32> -> vector<64x32xf32>
    %c0_64 = arith.constant 0 : index
    %c1_65 = arith.constant 1 : index
    %c0_66 = arith.constant 0 : index
    %c0_67 = arith.constant 0 : index
    %87 = vector.load %arg8[%c0_64, %c1_65, %c0_66, %c0_67] : memref<1x4x1x32xf32, #tpu.memory_space<vmem>>, vector<1x1x1x32xf32>
    %88 = vector.shape_cast %87 : vector<1x1x1x32xf32> to vector<1x32xf32>
    %89 = vector.broadcast %88 : vector<1x32xf32> to vector<64x32xf32>
    %90 = arith.addf %86, %89 : vector<64x32xf32>
    %c0_68 = arith.constant 0 : index
    %c1_69 = arith.constant 1 : index
    %c0_70 = arith.constant 0 : index
    %c0_71 = arith.constant 0 : index
    %91 = vector.load %arg9[%c0_68, %c1_69, %c0_70, %c0_71] : memref<1x4x128x32xbf16, #tpu.memory_space<vmem>>, vector<1x1x128x32xbf16>
    %92 = vector.shape_cast %91 : vector<1x1x128x32xbf16> to vector<128x32xbf16>
    %cst_72 = arith.constant dense<0.000000e+00> : vector<64x32xf32>
    %93 = tpu.matmul %31, %92, %cst_72 {dimension_numbers = #tpu.dot_dimension_numbers<[1], [0], [0], [1], [0, 0, 1, 1], [], []>} : vector<64x128xbf16>, vector<128x32xbf16>, vector<64x32xf32> -> vector<64x32xf32>
    %c0_73 = arith.constant 0 : index
    %c1_74 = arith.constant 1 : index
    %c0_75 = arith.constant 0 : index
    %c0_76 = arith.constant 0 : index
    %94 = vector.load %arg10[%c0_73, %c1_74, %c0_75, %c0_76] : memref<1x4x1x32xf32, #tpu.memory_space<vmem>>, vector<1x1x1x32xf32>
    %95 = vector.shape_cast %94 : vector<1x1x1x32xf32> to vector<1x32xf32>
    %96 = vector.broadcast %95 : vector<1x32xf32> to vector<64x32xf32>
    %97 = arith.addf %93, %96 : vector<64x32xf32>
    %98 = arith.truncf %83 : vector<64x32xf32> to vector<64x32xbf16>
    %99 = arith.truncf %90 : vector<64x32xf32> to vector<64x32xbf16>
    %cst_77 = arith.constant dense<0.000000e+00> : vector<64x64xf32>
    %100 = tpu.matmul %98, %99, %cst_77 {dimension_numbers = #tpu.dot_dimension_numbers<[1], [1], [0], [0], [0, 0, 1, 0], [], []>} : vector<64x32xbf16>, vector<64x32xbf16>, vector<64x64xf32> -> vector<64x64xf32>
    %cst_78 = arith.constant 0.176776692 : f32
    %101 = vector.broadcast %cst_78 : f32 to vector<64x64xf32>
    %102 = arith.mulf %100, %101 : vector<64x64xf32>
    %cst_79 = arith.constant dense<0xFF800000> : vector<64xf32>
    %103 = vector.multi_reduction <maximumf>, %102, %cst_79 [1] : vector<64x64xf32> to vector<64xf32>
    %104 = vector.shape_cast %103 : vector<64xf32> to vector<64x1xf32>
    %105 = vector.broadcast %104 : vector<64x1xf32> to vector<64x64xf32>
    %106 = arith.subf %102, %105 : vector<64x64xf32>
    %107 = math.exp %106 : vector<64x64xf32>
    %cst_80 = arith.constant dense<0.000000e+00> : vector<64xf32>
    %108 = vector.multi_reduction <add>, %107, %cst_80 [1] : vector<64x64xf32> to vector<64xf32>
    %109 = vector.shape_cast %108 : vector<64xf32> to vector<64x1xf32>
    %110 = tpu.reciprocal %109 {approx = true} : vector<64x1xf32> -> vector<64x1xf32>
    %111 = vector.broadcast %110 : vector<64x1xf32> to vector<64x64xf32>
    %112 = arith.mulf %107, %111 : vector<64x64xf32>
    %113 = arith.truncf %112 : vector<64x64xf32> to vector<64x64xbf16>
    %114 = arith.truncf %97 : vector<64x32xf32> to vector<64x32xbf16>
    %cst_81 = arith.constant dense<0.000000e+00> : vector<64x32xf32>
    %115 = tpu.matmul %113, %114, %cst_81 {dimension_numbers = #tpu.dot_dimension_numbers<[1], [0], [0], [1], [0, 0, 1, 1], [], []>} : vector<64x64xbf16>, vector<64x32xbf16>, vector<64x32xf32> -> vector<64x32xf32>
    %c0_82 = arith.constant 0 : index
    %c1_83 = arith.constant 1 : index
    %c0_84 = arith.constant 0 : index
    %c0_85 = arith.constant 0 : index
    %116 = vector.load %arg11[%c0_82, %c1_83, %c0_84, %c0_85] : memref<1x4x32x128xbf16, #tpu.memory_space<vmem>>, vector<1x1x32x128xbf16>
    %117 = vector.shape_cast %116 : vector<1x1x32x128xbf16> to vector<32x128xbf16>
    %118 = arith.truncf %115 : vector<64x32xf32> to vector<64x32xbf16>
    %cst_86 = arith.constant dense<0.000000e+00> : vector<64x128xf32>
    %119 = tpu.matmul %118, %117, %cst_86 {dimension_numbers = #tpu.dot_dimension_numbers<[1], [0], [0], [1], [0, 0, 1, 1], [], []>} : vector<64x32xbf16>, vector<32x128xbf16>, vector<64x128xf32> -> vector<64x128xf32>
    %120 = arith.addf %76, %119 : vector<64x128xf32>
    %c0_87 = arith.constant 0 : index
    %c2 = arith.constant 2 : index
    %c0_88 = arith.constant 0 : index
    %c0_89 = arith.constant 0 : index
    %121 = vector.load %arg5[%c0_87, %c2, %c0_88, %c0_89] : memref<1x4x128x32xbf16, #tpu.memory_space<vmem>>, vector<1x1x128x32xbf16>
    %122 = vector.shape_cast %121 : vector<1x1x128x32xbf16> to vector<128x32xbf16>
    %cst_90 = arith.constant dense<0.000000e+00> : vector<64x32xf32>
    %123 = tpu.matmul %31, %122, %cst_90 {dimension_numbers = #tpu.dot_dimension_numbers<[1], [0], [0], [1], [0, 0, 1, 1], [], []>} : vector<64x128xbf16>, vector<128x32xbf16>, vector<64x32xf32> -> vector<64x32xf32>
    %c0_91 = arith.constant 0 : index
    %c2_92 = arith.constant 2 : index
    %c0_93 = arith.constant 0 : index
    %c0_94 = arith.constant 0 : index
    %124 = vector.load %arg6[%c0_91, %c2_92, %c0_93, %c0_94] : memref<1x4x1x32xf32, #tpu.memory_space<vmem>>, vector<1x1x1x32xf32>
    %125 = vector.shape_cast %124 : vector<1x1x1x32xf32> to vector<1x32xf32>
    %126 = vector.broadcast %125 : vector<1x32xf32> to vector<64x32xf32>
    %127 = arith.addf %123, %126 : vector<64x32xf32>
    %c0_95 = arith.constant 0 : index
    %c2_96 = arith.constant 2 : index
    %c0_97 = arith.constant 0 : index
    %c0_98 = arith.constant 0 : index
    %128 = vector.load %arg7[%c0_95, %c2_96, %c0_97, %c0_98] : memref<1x4x128x32xbf16, #tpu.memory_space<vmem>>, vector<1x1x128x32xbf16>
    %129 = vector.shape_cast %128 : vector<1x1x128x32xbf16> to vector<128x32xbf16>
    %cst_99 = arith.constant dense<0.000000e+00> : vector<64x32xf32>
    %130 = tpu.matmul %31, %129, %cst_99 {dimension_numbers = #tpu.dot_dimension_numbers<[1], [0], [0], [1], [0, 0, 1, 1], [], []>} : vector<64x128xbf16>, vector<128x32xbf16>, vector<64x32xf32> -> vector<64x32xf32>
    %c0_100 = arith.constant 0 : index
    %c2_101 = arith.constant 2 : index
    %c0_102 = arith.constant 0 : index
    %c0_103 = arith.constant 0 : index
    %131 = vector.load %arg8[%c0_100, %c2_101, %c0_102, %c0_103] : memref<1x4x1x32xf32, #tpu.memory_space<vmem>>, vector<1x1x1x32xf32>
    %132 = vector.shape_cast %131 : vector<1x1x1x32xf32> to vector<1x32xf32>
    %133 = vector.broadcast %132 : vector<1x32xf32> to vector<64x32xf32>
    %134 = arith.addf %130, %133 : vector<64x32xf32>
    %c0_104 = arith.constant 0 : index
    %c2_105 = arith.constant 2 : index
    %c0_106 = arith.constant 0 : index
    %c0_107 = arith.constant 0 : index
    %135 = vector.load %arg9[%c0_104, %c2_105, %c0_106, %c0_107] : memref<1x4x128x32xbf16, #tpu.memory_space<vmem>>, vector<1x1x128x32xbf16>
    %136 = vector.shape_cast %135 : vector<1x1x128x32xbf16> to vector<128x32xbf16>
    %cst_108 = arith.constant dense<0.000000e+00> : vector<64x32xf32>
    %137 = tpu.matmul %31, %136, %cst_108 {dimension_numbers = #tpu.dot_dimension_numbers<[1], [0], [0], [1], [0, 0, 1, 1], [], []>} : vector<64x128xbf16>, vector<128x32xbf16>, vector<64x32xf32> -> vector<64x32xf32>
    %c0_109 = arith.constant 0 : index
    %c2_110 = arith.constant 2 : index
    %c0_111 = arith.constant 0 : index
    %c0_112 = arith.constant 0 : index
    %138 = vector.load %arg10[%c0_109, %c2_110, %c0_111, %c0_112] : memref<1x4x1x32xf32, #tpu.memory_space<vmem>>, vector<1x1x1x32xf32>
    %139 = vector.shape_cast %138 : vector<1x1x1x32xf32> to vector<1x32xf32>
    %140 = vector.broadcast %139 : vector<1x32xf32> to vector<64x32xf32>
    %141 = arith.addf %137, %140 : vector<64x32xf32>
    %142 = arith.truncf %127 : vector<64x32xf32> to vector<64x32xbf16>
    %143 = arith.truncf %134 : vector<64x32xf32> to vector<64x32xbf16>
    %cst_113 = arith.constant dense<0.000000e+00> : vector<64x64xf32>
    %144 = tpu.matmul %142, %143, %cst_113 {dimension_numbers = #tpu.dot_dimension_numbers<[1], [1], [0], [0], [0, 0, 1, 0], [], []>} : vector<64x32xbf16>, vector<64x32xbf16>, vector<64x64xf32> -> vector<64x64xf32>
    %cst_114 = arith.constant 0.176776692 : f32
    %145 = vector.broadcast %cst_114 : f32 to vector<64x64xf32>
    %146 = arith.mulf %144, %145 : vector<64x64xf32>
    %cst_115 = arith.constant dense<0xFF800000> : vector<64xf32>
    %147 = vector.multi_reduction <maximumf>, %146, %cst_115 [1] : vector<64x64xf32> to vector<64xf32>
    %148 = vector.shape_cast %147 : vector<64xf32> to vector<64x1xf32>
    %149 = vector.broadcast %148 : vector<64x1xf32> to vector<64x64xf32>
    %150 = arith.subf %146, %149 : vector<64x64xf32>
    %151 = math.exp %150 : vector<64x64xf32>
    %cst_116 = arith.constant dense<0.000000e+00> : vector<64xf32>
    %152 = vector.multi_reduction <add>, %151, %cst_116 [1] : vector<64x64xf32> to vector<64xf32>
    %153 = vector.shape_cast %152 : vector<64xf32> to vector<64x1xf32>
    %154 = tpu.reciprocal %153 {approx = true} : vector<64x1xf32> -> vector<64x1xf32>
    %155 = vector.broadcast %154 : vector<64x1xf32> to vector<64x64xf32>
    %156 = arith.mulf %151, %155 : vector<64x64xf32>
    %157 = arith.truncf %156 : vector<64x64xf32> to vector<64x64xbf16>
    %158 = arith.truncf %141 : vector<64x32xf32> to vector<64x32xbf16>
    %cst_117 = arith.constant dense<0.000000e+00> : vector<64x32xf32>
    %159 = tpu.matmul %157, %158, %cst_117 {dimension_numbers = #tpu.dot_dimension_numbers<[1], [0], [0], [1], [0, 0, 1, 1], [], []>} : vector<64x64xbf16>, vector<64x32xbf16>, vector<64x32xf32> -> vector<64x32xf32>
    %c0_118 = arith.constant 0 : index
    %c2_119 = arith.constant 2 : index
    %c0_120 = arith.constant 0 : index
    %c0_121 = arith.constant 0 : index
    %160 = vector.load %arg11[%c0_118, %c2_119, %c0_120, %c0_121] : memref<1x4x32x128xbf16, #tpu.memory_space<vmem>>, vector<1x1x32x128xbf16>
    %161 = vector.shape_cast %160 : vector<1x1x32x128xbf16> to vector<32x128xbf16>
    %162 = arith.truncf %159 : vector<64x32xf32> to vector<64x32xbf16>
    %cst_122 = arith.constant dense<0.000000e+00> : vector<64x128xf32>
    %163 = tpu.matmul %162, %161, %cst_122 {dimension_numbers = #tpu.dot_dimension_numbers<[1], [0], [0], [1], [0, 0, 1, 1], [], []>} : vector<64x32xbf16>, vector<32x128xbf16>, vector<64x128xf32> -> vector<64x128xf32>
    %164 = arith.addf %120, %163 : vector<64x128xf32>
    %c0_123 = arith.constant 0 : index
    %c3 = arith.constant 3 : index
    %c0_124 = arith.constant 0 : index
    %c0_125 = arith.constant 0 : index
    %165 = vector.load %arg5[%c0_123, %c3, %c0_124, %c0_125] : memref<1x4x128x32xbf16, #tpu.memory_space<vmem>>, vector<1x1x128x32xbf16>
    %166 = vector.shape_cast %165 : vector<1x1x128x32xbf16> to vector<128x32xbf16>
    %cst_126 = arith.constant dense<0.000000e+00> : vector<64x32xf32>
    %167 = tpu.matmul %31, %166, %cst_126 {dimension_numbers = #tpu.dot_dimension_numbers<[1], [0], [0], [1], [0, 0, 1, 1], [], []>} : vector<64x128xbf16>, vector<128x32xbf16>, vector<64x32xf32> -> vector<64x32xf32>
    %c0_127 = arith.constant 0 : index
    %c3_128 = arith.constant 3 : index
    %c0_129 = arith.constant 0 : index
    %c0_130 = arith.constant 0 : index
    %168 = vector.load %arg6[%c0_127, %c3_128, %c0_129, %c0_130] : memref<1x4x1x32xf32, #tpu.memory_space<vmem>>, vector<1x1x1x32xf32>
    %169 = vector.shape_cast %168 : vector<1x1x1x32xf32> to vector<1x32xf32>
    %170 = vector.broadcast %169 : vector<1x32xf32> to vector<64x32xf32>
    %171 = arith.addf %167, %170 : vector<64x32xf32>
    %c0_131 = arith.constant 0 : index
    %c3_132 = arith.constant 3 : index
    %c0_133 = arith.constant 0 : index
    %c0_134 = arith.constant 0 : index
    %172 = vector.load %arg7[%c0_131, %c3_132, %c0_133, %c0_134] : memref<1x4x128x32xbf16, #tpu.memory_space<vmem>>, vector<1x1x128x32xbf16>
    %173 = vector.shape_cast %172 : vector<1x1x128x32xbf16> to vector<128x32xbf16>
    %cst_135 = arith.constant dense<0.000000e+00> : vector<64x32xf32>
    %174 = tpu.matmul %31, %173, %cst_135 {dimension_numbers = #tpu.dot_dimension_numbers<[1], [0], [0], [1], [0, 0, 1, 1], [], []>} : vector<64x128xbf16>, vector<128x32xbf16>, vector<64x32xf32> -> vector<64x32xf32>
    %c0_136 = arith.constant 0 : index
    %c3_137 = arith.constant 3 : index
    %c0_138 = arith.constant 0 : index
    %c0_139 = arith.constant 0 : index
    %175 = vector.load %arg8[%c0_136, %c3_137, %c0_138, %c0_139] : memref<1x4x1x32xf32, #tpu.memory_space<vmem>>, vector<1x1x1x32xf32>
    %176 = vector.shape_cast %175 : vector<1x1x1x32xf32> to vector<1x32xf32>
    %177 = vector.broadcast %176 : vector<1x32xf32> to vector<64x32xf32>
    %178 = arith.addf %174, %177 : vector<64x32xf32>
    %c0_140 = arith.constant 0 : index
    %c3_141 = arith.constant 3 : index
    %c0_142 = arith.constant 0 : index
    %c0_143 = arith.constant 0 : index
    %179 = vector.load %arg9[%c0_140, %c3_141, %c0_142, %c0_143] : memref<1x4x128x32xbf16, #tpu.memory_space<vmem>>, vector<1x1x128x32xbf16>
    %180 = vector.shape_cast %179 : vector<1x1x128x32xbf16> to vector<128x32xbf16>
    %cst_144 = arith.constant dense<0.000000e+00> : vector<64x32xf32>
    %181 = tpu.matmul %31, %180, %cst_144 {dimension_numbers = #tpu.dot_dimension_numbers<[1], [0], [0], [1], [0, 0, 1, 1], [], []>} : vector<64x128xbf16>, vector<128x32xbf16>, vector<64x32xf32> -> vector<64x32xf32>
    %c0_145 = arith.constant 0 : index
    %c3_146 = arith.constant 3 : index
    %c0_147 = arith.constant 0 : index
    %c0_148 = arith.constant 0 : index
    %182 = vector.load %arg10[%c0_145, %c3_146, %c0_147, %c0_148] : memref<1x4x1x32xf32, #tpu.memory_space<vmem>>, vector<1x1x1x32xf32>
    %183 = vector.shape_cast %182 : vector<1x1x1x32xf32> to vector<1x32xf32>
    %184 = vector.broadcast %183 : vector<1x32xf32> to vector<64x32xf32>
    %185 = arith.addf %181, %184 : vector<64x32xf32>
    %186 = arith.truncf %171 : vector<64x32xf32> to vector<64x32xbf16>
    %187 = arith.truncf %178 : vector<64x32xf32> to vector<64x32xbf16>
    %cst_149 = arith.constant dense<0.000000e+00> : vector<64x64xf32>
    %188 = tpu.matmul %186, %187, %cst_149 {dimension_numbers = #tpu.dot_dimension_numbers<[1], [1], [0], [0], [0, 0, 1, 0], [], []>} : vector<64x32xbf16>, vector<64x32xbf16>, vector<64x64xf32> -> vector<64x64xf32>
    %cst_150 = arith.constant 0.176776692 : f32
    %189 = vector.broadcast %cst_150 : f32 to vector<64x64xf32>
    %190 = arith.mulf %188, %189 : vector<64x64xf32>
    %cst_151 = arith.constant dense<0xFF800000> : vector<64xf32>
    %191 = vector.multi_reduction <maximumf>, %190, %cst_151 [1] : vector<64x64xf32> to vector<64xf32>
    %192 = vector.shape_cast %191 : vector<64xf32> to vector<64x1xf32>
    %193 = vector.broadcast %192 : vector<64x1xf32> to vector<64x64xf32>
    %194 = arith.subf %190, %193 : vector<64x64xf32>
    %195 = math.exp %194 : vector<64x64xf32>
    %cst_152 = arith.constant dense<0.000000e+00> : vector<64xf32>
    %196 = vector.multi_reduction <add>, %195, %cst_152 [1] : vector<64x64xf32> to vector<64xf32>
    %197 = vector.shape_cast %196 : vector<64xf32> to vector<64x1xf32>
    %198 = tpu.reciprocal %197 {approx = true} : vector<64x1xf32> -> vector<64x1xf32>
    %199 = vector.broadcast %198 : vector<64x1xf32> to vector<64x64xf32>
    %200 = arith.mulf %195, %199 : vector<64x64xf32>
    %201 = arith.truncf %200 : vector<64x64xf32> to vector<64x64xbf16>
    %202 = arith.truncf %185 : vector<64x32xf32> to vector<64x32xbf16>
    %cst_153 = arith.constant dense<0.000000e+00> : vector<64x32xf32>
    %203 = tpu.matmul %201, %202, %cst_153 {dimension_numbers = #tpu.dot_dimension_numbers<[1], [0], [0], [1], [0, 0, 1, 1], [], []>} : vector<64x64xbf16>, vector<64x32xbf16>, vector<64x32xf32> -> vector<64x32xf32>
    %c0_154 = arith.constant 0 : index
    %c3_155 = arith.constant 3 : index
    %c0_156 = arith.constant 0 : index
    %c0_157 = arith.constant 0 : index
    %204 = vector.load %arg11[%c0_154, %c3_155, %c0_156, %c0_157] : memref<1x4x32x128xbf16, #tpu.memory_space<vmem>>, vector<1x1x32x128xbf16>
    %205 = vector.shape_cast %204 : vector<1x1x32x128xbf16> to vector<32x128xbf16>
    %206 = arith.truncf %203 : vector<64x32xf32> to vector<64x32xbf16>
    %cst_158 = arith.constant dense<0.000000e+00> : vector<64x128xf32>
    %207 = tpu.matmul %206, %205, %cst_158 {dimension_numbers = #tpu.dot_dimension_numbers<[1], [0], [0], [1], [0, 0, 1, 1], [], []>} : vector<64x32xbf16>, vector<32x128xbf16>, vector<64x128xf32> -> vector<64x128xf32>
    %208 = arith.addf %164, %207 : vector<64x128xf32>
    %209 = arith.addf %4, %208 : vector<64x128xf32>
    %c0_159 = arith.constant 0 : index
    %c0_160 = arith.constant 0 : index
    %c0_161 = arith.constant 0 : index
    %210 = vector.load %arg12[%c0_159, %c0_160, %c0_161] : memref<1x1x128xf32, #tpu.memory_space<vmem>>, vector<1x1x128xf32>
    %211 = vector.shape_cast %210 : vector<1x1x128xf32> to vector<1x128xf32>
    %212 = vector.broadcast %211 : vector<1x128xf32> to vector<64x128xf32>
    %213 = arith.addf %209, %212 : vector<64x128xf32>
    %c0_162 = arith.constant 0 : index
    %c0_163 = arith.constant 0 : index
    %c0_164 = arith.constant 0 : index
    %214 = vector.load %arg13[%c0_162, %c0_163, %c0_164] : memref<1x1x128xf32, #tpu.memory_space<vmem>>, vector<1x1x128xf32>
    %215 = vector.shape_cast %214 : vector<1x1x128xf32> to vector<1x128xf32>
    %c0_165 = arith.constant 0 : index
    %c0_166 = arith.constant 0 : index
    %c0_167 = arith.constant 0 : index
    %216 = vector.load %arg14[%c0_165, %c0_166, %c0_167] : memref<1x1x128xf32, #tpu.memory_space<vmem>>, vector<1x1x128xf32>
    %217 = vector.shape_cast %216 : vector<1x1x128xf32> to vector<1x128xf32>
    %cst_168 = arith.constant dense<0.000000e+00> : vector<64xf32>
    %218 = vector.multi_reduction <add>, %213, %cst_168 [1] : vector<64x128xf32> to vector<64xf32>
    %219 = vector.shape_cast %218 : vector<64xf32> to vector<64x1xf32>
    %cst_169 = arith.constant 1.280000e+02 : f32
    %220 = vector.broadcast %cst_169 : f32 to vector<64x1xf32>
    %221 = arith.divf %219, %220 : vector<64x1xf32>
    %222 = vector.broadcast %221 : vector<64x1xf32> to vector<64x128xf32>
    %223 = arith.subf %213, %222 : vector<64x128xf32>
    %224 = arith.mulf %223, %223 : vector<64x128xf32>
    %cst_170 = arith.constant dense<0.000000e+00> : vector<64xf32>
    %225 = vector.multi_reduction <add>, %224, %cst_170 [1] : vector<64x128xf32> to vector<64xf32>
    %226 = vector.shape_cast %225 : vector<64xf32> to vector<64x1xf32>
    %cst_171 = arith.constant 1.280000e+02 : f32
    %227 = vector.broadcast %cst_171 : f32 to vector<64x1xf32>
    %228 = arith.divf %226, %227 : vector<64x1xf32>
    %229 = vector.broadcast %221 : vector<64x1xf32> to vector<64x128xf32>
    %230 = arith.subf %213, %229 : vector<64x128xf32>
    %cst_172 = arith.constant 9.99999997E-7 : f32
    %231 = vector.broadcast %cst_172 : f32 to vector<64x1xf32>
    %232 = arith.addf %228, %231 : vector<64x1xf32>
    %233 = math.rsqrt %232 : vector<64x1xf32>
    %234 = vector.broadcast %233 : vector<64x1xf32> to vector<64x128xf32>
    %235 = arith.mulf %230, %234 : vector<64x128xf32>
    %236 = vector.broadcast %215 : vector<1x128xf32> to vector<64x128xf32>
    %237 = arith.mulf %235, %236 : vector<64x128xf32>
    %238 = vector.broadcast %217 : vector<1x128xf32> to vector<64x128xf32>
    %239 = arith.addf %237, %238 : vector<64x128xf32>
    %c0_173 = arith.constant 0 : index
    %c0_174 = arith.constant 0 : index
    %c0_175 = arith.constant 0 : index
    %240 = vector.load %arg15[%c0_173, %c0_174, %c0_175] : memref<1x128x256xbf16, #tpu.memory_space<vmem>>, vector<1x128x256xbf16>
    %241 = vector.shape_cast %240 : vector<1x128x256xbf16> to vector<128x256xbf16>
    %242 = arith.truncf %239 : vector<64x128xf32> to vector<64x128xbf16>
    %cst_176 = arith.constant dense<0.000000e+00> : vector<64x256xf32>
    %243 = tpu.matmul %242, %241, %cst_176 {dimension_numbers = #tpu.dot_dimension_numbers<[1], [0], [0], [1], [0, 0, 1, 1], [], []>} : vector<64x128xbf16>, vector<128x256xbf16>, vector<64x256xf32> -> vector<64x256xf32>
    %c0_177 = arith.constant 0 : index
    %c0_178 = arith.constant 0 : index
    %c0_179 = arith.constant 0 : index
    %244 = vector.load %arg16[%c0_177, %c0_178, %c0_179] : memref<1x1x256xf32, #tpu.memory_space<vmem>>, vector<1x1x256xf32>
    %245 = vector.shape_cast %244 : vector<1x1x256xf32> to vector<1x256xf32>
    %246 = vector.broadcast %245 : vector<1x256xf32> to vector<64x256xf32>
    %247 = arith.addf %243, %246 : vector<64x256xf32>
    %cst_180 = arith.constant 5.000000e-01 : f32
    %248 = vector.broadcast %cst_180 : f32 to vector<64x256xf32>
    %249 = arith.mulf %248, %247 : vector<64x256xf32>
    %cst_181 = arith.constant 0.707106769 : f32
    %250 = vector.broadcast %cst_181 : f32 to vector<64x256xf32>
    %251 = arith.mulf %247, %250 : vector<64x256xf32>
    %252 = math.erf %251 : vector<64x256xf32>
    %cst_182 = arith.constant 1.000000e+00 : f32
    %253 = vector.broadcast %cst_182 : f32 to vector<64x256xf32>
    %254 = arith.addf %253, %252 : vector<64x256xf32>
    %255 = arith.mulf %249, %254 : vector<64x256xf32>
    %c0_183 = arith.constant 0 : index
    %c0_184 = arith.constant 0 : index
    %c0_185 = arith.constant 0 : index
    %256 = vector.load %arg17[%c0_183, %c0_184, %c0_185] : memref<1x256x128xbf16, #tpu.memory_space<vmem>>, vector<1x256x128xbf16>
    %257 = vector.shape_cast %256 : vector<1x256x128xbf16> to vector<256x128xbf16>
    %258 = arith.truncf %255 : vector<64x256xf32> to vector<64x256xbf16>
    %cst_186 = arith.constant dense<0.000000e+00> : vector<64x128xf32>
    %259 = tpu.matmul %258, %257, %cst_186 {dimension_numbers = #tpu.dot_dimension_numbers<[1], [0], [0], [1], [0, 0, 1, 1], [], []>} : vector<64x256xbf16>, vector<256x128xbf16>, vector<64x128xf32> -> vector<64x128xf32>
    %260 = arith.addf %213, %259 : vector<64x128xf32>
    %c0_187 = arith.constant 0 : index
    %c0_188 = arith.constant 0 : index
    %c0_189 = arith.constant 0 : index
    %261 = vector.load %arg18[%c0_187, %c0_188, %c0_189] : memref<1x1x128xf32, #tpu.memory_space<vmem>>, vector<1x1x128xf32>
    %262 = vector.shape_cast %261 : vector<1x1x128xf32> to vector<1x128xf32>
    %263 = vector.broadcast %262 : vector<1x128xf32> to vector<64x128xf32>
    %264 = arith.addf %260, %263 : vector<64x128xf32>
    %c0_190 = arith.constant 0 : index
    %c0_191 = arith.constant 0 : index
    %c0_192 = arith.constant 0 : index
    %265 = vector.load %arg21[%c0_190, %c0_191, %c0_192] : memref<1x64x128xf32, #tpu.memory_space<vmem>>, vector<1x64x128xf32>
    %266 = vector.shape_cast %265 : vector<1x64x128xf32> to vector<64x128xf32>
    %267 = vector.shape_cast %264 : vector<64x128xf32> to vector<1x64x128xf32>
    tpu.vector_store %arg21[%c0_190, %c0_191, %c0_192], %267 {strides = array<i32>} : memref<1x64x128xf32, #tpu.memory_space<vmem>>, vector<1x64x128xf32>,
    %c1_i32 = arith.constant 1 : i32
    %268 = arith.cmpi eq, %arg1, %c1_i32 : i32
    %269 = arith.extui %268 : i1 to i32
    %c0_i32_193 = arith.constant 0 : i32
    %270 = arith.cmpi ne, %269, %c0_i32_193 : i32
    scf.if %270 {
      %c0_194 = arith.constant 0 : index
      %c0_195 = arith.constant 0 : index
      %271 = vector.load %arg19[%c0_194, %c0_195] : memref<1x128xf32, #tpu.memory_space<vmem>>, vector<1x128xf32>
      %c0_196 = arith.constant 0 : index
      %c0_197 = arith.constant 0 : index
      %272 = vector.load %arg20[%c0_196, %c0_197] : memref<1x128xf32, #tpu.memory_space<vmem>>, vector<1x128xf32>
      %cst_198 = arith.constant dense<0.000000e+00> : vector<64xf32>
      %273 = vector.multi_reduction <add>, %264, %cst_198 [1] : vector<64x128xf32> to vector<64xf32>
      %274 = vector.shape_cast %273 : vector<64xf32> to vector<64x1xf32>
      %cst_199 = arith.constant 1.280000e+02 : f32
      %275 = vector.broadcast %cst_199 : f32 to vector<64x1xf32>
      %276 = arith.divf %274, %275 : vector<64x1xf32>
      %277 = vector.broadcast %276 : vector<64x1xf32> to vector<64x128xf32>
      %278 = arith.subf %264, %277 : vector<64x128xf32>
      %279 = arith.mulf %278, %278 : vector<64x128xf32>
      %cst_200 = arith.constant dense<0.000000e+00> : vector<64xf32>
      %280 = vector.multi_reduction <add>, %279, %cst_200 [1] : vector<64x128xf32> to vector<64xf32>
      %281 = vector.shape_cast %280 : vector<64xf32> to vector<64x1xf32>
      %cst_201 = arith.constant 1.280000e+02 : f32
      %282 = vector.broadcast %cst_201 : f32 to vector<64x1xf32>
      %283 = arith.divf %281, %282 : vector<64x1xf32>
      %284 = vector.broadcast %276 : vector<64x1xf32> to vector<64x128xf32>
      %285 = arith.subf %264, %284 : vector<64x128xf32>
      %cst_202 = arith.constant 9.99999997E-7 : f32
      %286 = vector.broadcast %cst_202 : f32 to vector<64x1xf32>
      %287 = arith.addf %283, %286 : vector<64x1xf32>
      %288 = math.rsqrt %287 : vector<64x1xf32>
      %289 = vector.broadcast %288 : vector<64x1xf32> to vector<64x128xf32>
      %290 = arith.mulf %285, %289 : vector<64x128xf32>
      %291 = vector.broadcast %271 : vector<1x128xf32> to vector<64x128xf32>
      %292 = arith.mulf %290, %291 : vector<64x128xf32>
      %293 = vector.broadcast %272 : vector<1x128xf32> to vector<64x128xf32>
      %294 = arith.addf %292, %293 : vector<64x128xf32>
      %c0_203 = arith.constant 0 : index
      %c0_204 = arith.constant 0 : index
      %c0_205 = arith.constant 0 : index
      %295 = vector.load %arg21[%c0_203, %c0_204, %c0_205] : memref<1x64x128xf32, #tpu.memory_space<vmem>>, vector<1x64x128xf32>
      %296 = vector.shape_cast %295 : vector<1x64x128xf32> to vector<64x128xf32>
      %297 = vector.shape_cast %294 : vector<64x128xf32> to vector<1x64x128xf32>
      tpu.vector_store %arg21[%c0_203, %c0_204, %c0_205], %297 {strides = array<i32>} : memref<1x64x128xf32, #tpu.memory_space<vmem>>, vector<1x64x128xf32>,
    } else {
    }
    return
  }
  func.func @transform_0(%arg0: i32, %arg1: i32) -> (i32, i32, i32) {
    %c0_i32 = arith.constant 0 : i32
    %c0_i32_0 = arith.constant 0 : i32
    %c0_i32_1 = arith.constant 0 : i32
    return %arg0, %c0_i32, %c0_i32_0 : i32, i32, i32
  }
  func.func @transform_1(%arg0: i32, %arg1: i32) -> (i32, i32, i32) {
    %c0_i32 = arith.constant 0 : i32
    %c0_i32_0 = arith.constant 0 : i32
    %c0_i32_1 = arith.constant 0 : i32
    return %arg1, %c0_i32, %c0_i32_0 : i32, i32, i32
  }
  func.func @transform_2(%arg0: i32, %arg1: i32) -> (i32, i32, i32) {
    %c0_i32 = arith.constant 0 : i32
    %c0_i32_0 = arith.constant 0 : i32
    %c0_i32_1 = arith.constant 0 : i32
    return %arg1, %c0_i32, %c0_i32_0 : i32, i32, i32
  }
  func.func @transform_3(%arg0: i32, %arg1: i32) -> (i32, i32, i32, i32) {
    %c0_i32 = arith.constant 0 : i32
    %c0_i32_0 = arith.constant 0 : i32
    %c0_i32_1 = arith.constant 0 : i32
    %c0_i32_2 = arith.constant 0 : i32
    return %arg1, %c0_i32, %c0_i32_0, %c0_i32_1 : i32, i32, i32, i32
  }
  func.func @transform_4(%arg0: i32, %arg1: i32) -> (i32, i32, i32, i32) {
    %c0_i32 = arith.constant 0 : i32
    %c0_i32_0 = arith.constant 0 : i32
    %c0_i32_1 = arith.constant 0 : i32
    %c0_i32_2 = arith.constant 0 : i32
    return %arg1, %c0_i32, %c0_i32_0, %c0_i32_1 : i32, i32, i32, i32
  }
  func.func @transform_5(%arg0: i32, %arg1: i32) -> (i32, i32, i32, i32) {
    %c0_i32 = arith.constant 0 : i32
    %c0_i32_0 = arith.constant 0 : i32
    %c0_i32_1 = arith.constant 0 : i32
    %c0_i32_2 = arith.constant 0 : i32
    return %arg1, %c0_i32, %c0_i32_0, %c0_i32_1 : i32, i32, i32, i32
  }
  func.func @transform_6(%arg0: i32, %arg1: i32) -> (i32, i32, i32, i32) {
    %c0_i32 = arith.constant 0 : i32
    %c0_i32_0 = arith.constant 0 : i32
    %c0_i32_1 = arith.constant 0 : i32
    %c0_i32_2 = arith.constant 0 : i32
    return %arg1, %c0_i32, %c0_i32_0, %c0_i32_1 : i32, i32, i32, i32
  }
  func.func @transform_7(%arg0: i32, %arg1: i32) -> (i32, i32, i32, i32) {
    %c0_i32 = arith.constant 0 : i32
    %c0_i32_0 = arith.constant 0 : i32
    %c0_i32_1 = arith.constant 0 : i32
    %c0_i32_2 = arith.constant 0 : i32
    return %arg1, %c0_i32, %c0_i32_0, %c0_i32_1 : i32, i32, i32, i32
  }
  func.func @transform_8(%arg0: i32, %arg1: i32) -> (i32, i32, i32, i32) {
    %c0_i32 = arith.constant 0 : i32
    %c0_i32_0 = arith.constant 0 : i32
    %c0_i32_1 = arith.constant 0 : i32
    %c0_i32_2 = arith.constant 0 : i32
    return %arg1, %c0_i32, %c0_i32_0, %c0_i32_1 : i32, i32, i32, i32
  }
  func.func @transform_9(%arg0: i32, %arg1: i32) -> (i32, i32, i32, i32) {
    %c0_i32 = arith.constant 0 : i32
    %c0_i32_0 = arith.constant 0 : i32
    %c0_i32_1 = arith.constant 0 : i32
    %c0_i32_2 = arith.constant 0 : i32
    return %arg1, %c0_i32, %c0_i32_0, %c0_i32_1 : i32, i32, i32, i32
  }
  func.func @transform_10(%arg0: i32, %arg1: i32) -> (i32, i32, i32) {
    %c0_i32 = arith.constant 0 : i32
    %c0_i32_0 = arith.constant 0 : i32
    %c0_i32_1 = arith.constant 0 : i32
    return %arg1, %c0_i32, %c0_i32_0 : i32, i32, i32
  }
  func.func @transform_11(%arg0: i32, %arg1: i32) -> (i32, i32, i32) {
    %c0_i32 = arith.constant 0 : i32
    %c0_i32_0 = arith.constant 0 : i32
    %c0_i32_1 = arith.constant 0 : i32
    return %arg1, %c0_i32, %c0_i32_0 : i32, i32, i32
  }
  func.func @transform_12(%arg0: i32, %arg1: i32) -> (i32, i32, i32) {
    %c0_i32 = arith.constant 0 : i32
    %c0_i32_0 = arith.constant 0 : i32
    %c0_i32_1 = arith.constant 0 : i32
    return %arg1, %c0_i32, %c0_i32_0 : i32, i32, i32
  }
  func.func @transform_13(%arg0: i32, %arg1: i32) -> (i32, i32, i32) {
    %c0_i32 = arith.constant 0 : i32
    %c0_i32_0 = arith.constant 0 : i32
    %c0_i32_1 = arith.constant 0 : i32
    return %arg1, %c0_i32, %c0_i32_0 : i32, i32, i32
  }
  func.func @transform_14(%arg0: i32, %arg1: i32) -> (i32, i32, i32) {
    %c0_i32 = arith.constant 0 : i32
    %c0_i32_0 = arith.constant 0 : i32
    %c0_i32_1 = arith.constant 0 : i32
    return %arg1, %c0_i32, %c0_i32_0 : i32, i32, i32
  }
  func.func @transform_15(%arg0: i32, %arg1: i32) -> (i32, i32, i32) {
    %c0_i32 = arith.constant 0 : i32
    %c0_i32_0 = arith.constant 0 : i32
    %c0_i32_1 = arith.constant 0 : i32
    return %arg1, %c0_i32, %c0_i32_0 : i32, i32, i32
  }
  func.func @transform_16(%arg0: i32, %arg1: i32) -> (i32, i32, i32) {
    %c0_i32 = arith.constant 0 : i32
    %c0_i32_0 = arith.constant 0 : i32
    %c0_i32_1 = arith.constant 0 : i32
    return %arg1, %c0_i32, %c0_i32_0 : i32, i32, i32
  }
  func.func @transform_17(%arg0: i32, %arg1: i32) -> (i32, i32) {
    %c0_i32 = arith.constant 0 : i32
    %c0_i32_0 = arith.constant 0 : i32
    %c0_i32_1 = arith.constant 0 : i32
    return %c0_i32, %c0_i32_0 : i32, i32
  }
  func.func @transform_18(%arg0: i32, %arg1: i32) -> (i32, i32) {
    %c0_i32 = arith.constant 0 : i32
    %c0_i32_0 = arith.constant 0 : i32
    %c0_i32_1 = arith.constant 0 : i32
    return %c0_i32, %c0_i32_0 : i32, i32
  }
  func.func @transform_19(%arg0: i32, %arg1: i32) -> (i32, i32, i32) {
    %c0_i32 = arith.constant 0 : i32
    %c0_i32_0 = arith.constant 0 : i32
    %c0_i32_1 = arith.constant 0 : i32
    return %arg0, %c0_i32, %c0_i32_0 : i32, i32, i32
  }
}

</mosaic_0001>

<bundles_post_ra>
// kernel: transformer_forward.2
= control target key start
LH: loop header
LB: loop body
LE: loop exit
PB: predicated region body
PF: predicated region fallthrough
CT: control target
= control target key end

     0   :  { %s4964_s15 = smov 0   ;;  %s6367_s0 = inlined_call_operand.vmem [shape: f32[2,64,4096], index: 0, kind: input, shape index: {}]   ;;  %s6368_s1 = inlined_call_operand.vmem [shape: bf16[4096,128], index: 1, kind: input, shape index: {}]   ;;  %s6369_s2 = inlined_call_operand.vmem [shape: f32[1,128], index: 2, kind: input, shape index: {}]   ;;  %s6370_s3 = inlined_call_operand.vmem [shape: f32[64,128], index: 3, kind: input, shape index: {}]   ;;  %s6371_s4 = inlined_call_operand.vmem [shape: f32[2,64,128], index: 4, kind: output, shape index: {}]  }
   0x1 LB: > { %s3757_s16 = sadd.s32 4294967295, %s4937_s15   ;;  %p3761_p0 = scmp.ge.s32.totalorder %s4937_s15, 1  ;;  %s4937_s15 = sphi %s4964_s15, %s14_s15  }
   0x2   : > { %p162_p1 = scmp.lt.s32.totalorder %s4937_s15, 3 }
   0x4   : > { %p163_p2 = pnand %p3761_p0, %p162_p1 }
   0x6   : > { %166 = sbr.rel (%p163_p2) target bundleno = 550 (0x226), region = 36 }
   0xb   : > { %v4675_v0 = vld [vmem:[%s6368_s1 + $0x78] sm:$0xff]   ;;  %v4679_v4 = vld [vmem:[%s6368_s1 + $0x70] sm:$0xff]   ;;  %v4683_v8 = vld [vmem:[%s6368_s1 + $0x68] sm:$0xff]   ;;  %p188_p3 = scmp.lt.s32.totalorder %s3757_s16, 1 }
   0xc   : > { %v4676_v1 = vld [vmem:[%s6368_s1 + $0xf8] sm:$0xff]   ;;  %4027 = vmatprep.subr.bf16.mxu0 %v4675_v0  ;;  %v4680_v5 = vld [vmem:[%s6368_s1 + $0xf0] sm:$0xff]   ;;  %v4684_v9 = vld [vmem:[%s6368_s1 + $0xe8] sm:$0xff]  }
   0xd   : > { %v4677_v2 = vld [vmem:[%s6368_s1 + $0x38] sm:$0xff]   ;;  %4067 = vmatprep.subr.bf16.mxu1 %v4676_v1  ;;  %v4681_v6 = vld [vmem:[%s6368_s1 + $0x30] sm:$0xff]   ;;  %v4685_v10 = vld [vmem:[%s6368_s1 + $0x28] sm:$0xff]   ;;  %s6405_s16 = smov (!%p188_p3, %s3757_s16), 1 }
   0xe   : > { %v4678_v3 = vld [vmem:[%s6368_s1 + $0xb8] sm:$0xff]   ;;  %4028 = vmatpush3.bf16.msra.mxu0 %v4677_v2  ;;  %v4682_v7 = vld [vmem:[%s6368_s1 + $0xb0] sm:$0xff]   ;;  %v4686_v11 = vld [vmem:[%s6368_s1 + $0xa8] sm:$0xff]   ;;  %s4025_s23 = sshll.u32 %s6405_s16, 11 }
   0xf   : > { %4068 = vmatpush3.bf16.msra.mxu1 %v4678_v3  ;;  %4029 = vmatprep.subr.bf16.mxu0 %v4679_v4  ;;  %v4687_v12 = vld [vmem:[%s6368_s1 + $0x60] sm:$0xff]   ;;  %v4691_v16 = vld [vmem:[%s6368_s1 + $0x58] sm:$0xff]   ;;  %v4695_v20 = vld [vmem:[%s6368_s1 + $0x50] sm:$0xff]   ;;  %s5072_s6 = scalar_lea.vmem %s6367_s0, %s4025_s23 }
  0x10   : > { %4069 = vmatprep.subr.bf16.mxu1 %v4680_v5  ;;  %v4688_v13 = vld [vmem:[%s6368_s1 + $0xe0] sm:$0xff]   ;;  %v4692_v17 = vld [vmem:[%s6368_s1 + $0xd8] sm:$0xff]   ;;  %v4696_v21 = vld [vmem:[%s6368_s1 + $0xd0] sm:$0xff]  }
  0x11   : > { %v4689_v14 = vld [vmem:[%s6368_s1 + $0x20] sm:$0xff]   ;;  %v4693_v18 = vld [vmem:[%s6368_s1 + $0x18] sm:$0xff]   ;;  %v4697_v22 = vld [vmem:[%s6368_s1 + $0x10] sm:$0xff]  }
  0x12   : > { %4030 = vmatpush3.bf16.msra.mxu0 %v4681_v6  ;;  %v4690_v15 = vld [vmem:[%s6368_s1 + $0xa0] sm:$0xff]   ;;  %v4694_v19 = vld [vmem:[%s6368_s1 + $0x98] sm:$0xff]   ;;  %v4698_v23 = vld [vmem:[%s6368_s1 + $0x90] sm:$0xff]  }
  0x13   : > { %4070 = vmatpush3.bf16.msra.mxu1 %v4682_v7  ;;  %4031 = vmatprep.subr.bf16.mxu0 %v4683_v8  ;;  %v4699_v24 = vld [vmem:[%s6368_s1 + $0x48] sm:$0xff]   ;;  %v4703_v28 = vld [vmem:[%s6368_s1 + $0x40] sm:$0xff]   ;;  %v202_v34 = vld [vmem:[%s5072_s6 + $0x18] sm:$0xff] }
  0x14   : > { %4071 = vmatprep.subr.bf16.mxu1 %v4684_v9  ;;  %v4700_v25 = vld [vmem:[%s6368_s1 + $0xc8] sm:$0xff]   ;;  %v4704_v29 = vld [vmem:[%s6368_s1 + $0xc0] sm:$0xff]   ;;  %v234_v36 = vld [vmem:[%s5072_s6 + $0x118] sm:$0xff] }
  0x15   : > { %v4701_v26 = vld [vmem:[%s6368_s1 + $0x8] sm:$0xff]   ;;  %v4705_v30 = vld [vmem:[%s6368_s1] sm:$0xff]   ;;  %v458_v39 = vpack.c.bf16 %v234_v36, %v202_v34  ;;  %v201_v41 = vld [vmem:[%s5072_s6 + $0x10] sm:$0xff] }
  0x16   : > { %4032 = vmatpush3.bf16.msra.mxu0 %v4685_v10  ;;  %v4702_v27 = vld [vmem:[%s6368_s1 + $0x88] sm:$0xff]   ;;  %v4706_v31 = vld [vmem:[%s6368_s1 + $0x80] sm:$0xff]   ;;  %v233_v42 = vld [vmem:[%s5072_s6 + $0x110] sm:$0xff] }
  0x17   : > { %4072 = vmatpush3.bf16.msra.mxu1 %v4686_v11  ;;  %4033 = vmatprep.subr.bf16.mxu0 %v4687_v12  ;;  %v200_v32 = vld [vmem:[%s5072_s6 + $0x8] sm:$0xff]  ;;  %v199_v37 = vld [vmem:[%s5072_s6] sm:$0xff]  ;;  %v457_v43 = vpack.c.bf16 %v233_v42, %v201_v41  ;;  %v4707_v44 = vld [vmem:[%s6368_s1 + $0x178] sm:$0xff]  }
  0x18   : > { %4073 = vmatprep.subr.bf16.mxu1 %v4688_v13  ;;  %v232_v33 = vld [vmem:[%s5072_s6 + $0x108] sm:$0xff]  ;;  %v231_v38 = vld [vmem:[%s5072_s6 + $0x100] sm:$0xff]  ;;  %2735 = vmatprep.mubr.bf16.mxu1 %v458_v39  ;;  %v4708_v45 = vld [vmem:[%s6368_s1 + $0x1f8] sm:$0xff]  }
  0x19   : > { %v456_v35 = vpack.c.bf16 %v232_v33, %v200_v32  ;;  %v455_v40 = vpack.c.bf16 %v231_v38, %v199_v37  ;;  %v4709_v46 = vld [vmem:[%s6368_s1 + $0x138] sm:$0xff]   ;;  %v4711_v48 = vld [vmem:[%s6368_s1 + $0x170] sm:$0xff]   ;;  %v264_v52 = vld [vmem:[%s5072_s6 + $0x208] sm:$0xff] }
  0x1a   : > { %4034 = vmatpush3.bf16.msra.mxu0 %v4689_v14  ;;  %v4710_v47 = vld [vmem:[%s6368_s1 + $0x1b8] sm:$0xff]   ;;  %v4712_v49 = vld [vmem:[%s6368_s1 + $0x1f0] sm:$0xff]   ;;  %v296_v53 = vld [vmem:[%s5072_s6 + $0x308] sm:$0xff] }
  0x1b   : > { %4074 = vmatpush3.bf16.msra.mxu1 %v4690_v15  ;;  %4035 = vmatprep.subr.bf16.mxu0 %v4691_v16  ;;  %v4713_v50 = vld [vmem:[%s6368_s1 + $0x130] sm:$0xff]   ;;  %v266_v54 = vld [vmem:[%s5072_s6 + $0x218] sm:$0xff]  ;;  %v488_v56 = vpack.c.bf16 %v296_v53, %v264_v52  ;;  %v263_v58 = vld [vmem:[%s5072_s6 + $0x200] sm:$0xff] }
  0x1c   : > { %4075 = vmatprep.subr.bf16.mxu1 %v4692_v17  ;;  %2670 = vmatprep.mubr.bf16.mxu0 %v456_v35  ;;  %v4714_v51 = vld [vmem:[%s6368_s1 + $0x1b0] sm:$0xff]   ;;  %v298_v55 = vld [vmem:[%s5072_s6 + $0x318] sm:$0xff]  ;;  %v295_v59 = vld [vmem:[%s5072_s6 + $0x300] sm:$0xff] }
  0x1d   : > { %v490_v57 = vpack.c.bf16 %v298_v55, %v266_v54  ;;  %v265_v60 = vld [vmem:[%s5072_s6 + $0x210] sm:$0xff]  ;;  %v487_v61 = vpack.c.bf16 %v295_v59, %v263_v58  ;;  %v4715_v0 = vld [vmem:[%s6368_s1 + $0x168] sm:$0xff]   ;;  %v4719_v4 = vld [vmem:[%s6368_s1 + $0x160] sm:$0xff]  }
  0x1e   : > { %4036 = vmatpush3.bf16.msra.mxu0 %v4693_v18  ;;  %v297_v62 = vld [vmem:[%s5072_s6 + $0x310] sm:$0xff]  ;;  %v4716_v1 = vld [vmem:[%s6368_s1 + $0x1e8] sm:$0xff]   ;;  %v4720_v5 = vld [vmem:[%s6368_s1 + $0x1e0] sm:$0xff]  }
  0x1f   : > { %4076 = vmatpush3.bf16.msra.mxu1 %v4694_v19  ;;  %4037 = vmatprep.subr.bf16.mxu0 %v4695_v20  ;;  %v489_v63 = vpack.c.bf16 %v297_v62, %v265_v60  ;;  %v4717_v2 = vld [vmem:[%s6368_s1 + $0x128] sm:$0xff]   ;;  %v4721_v6 = vld [vmem:[%s6368_s1 + $0x120] sm:$0xff]   ;;  %v330_v11 = vld [vmem:[%s5072_s6 + $0x418] sm:$0xff] }
  0x20   : > { %4077 = vmatprep.subr.bf16.mxu1 %v4696_v21  ;;  %v4718_v3 = vld [vmem:[%s6368_s1 + $0x1a8] sm:$0xff]   ;;  %v4722_v7 = vld [vmem:[%s6368_s1 + $0x1a0] sm:$0xff]   ;;  %v362_v12 = vld [vmem:[%s5072_s6 + $0x518] sm:$0xff] }
  0x21   : > { %v328_v8 = vld [vmem:[%s5072_s6 + $0x408] sm:$0xff]  ;;  %v327_v13 = vld [vmem:[%s5072_s6 + $0x400] sm:$0xff]  ;;  %v522_v14 = vpack.c.bf16 %v362_v12, %v330_v11  ;;  %v329_v16 = vld [vmem:[%s5072_s6 + $0x410] sm:$0xff] }
  0x22   : > { %4038 = vmatpush3.bf16.msra.mxu0 %v4697_v22  ;;  %v360_v9 = vld [vmem:[%s5072_s6 + $0x508] sm:$0xff]  ;;  %v359_v15 = vld [vmem:[%s5072_s6 + $0x500] sm:$0xff]  ;;  %v361_v17 = vld [vmem:[%s5072_s6 + $0x510] sm:$0xff] }
  0x23   : > { %4078 = vmatpush3.bf16.msra.mxu1 %v4698_v23  ;;  %4039 = vmatprep.subr.bf16.mxu0 %v4699_v24  ;;  %v520_v10 = vpack.c.bf16 %v360_v9, %v328_v8  ;;  %v519_v18 = vpack.c.bf16 %v359_v15, %v327_v13  ;;  %v521_v19 = vpack.c.bf16 %v361_v17, %v329_v16  ;;  %v4723_v20 = vld [vmem:[%s6368_s1 + $0x158] sm:$0xff]   ;;  %v4727_v24 = vld [vmem:[%s6368_s1 + $0x150] sm:$0xff]   ;;  %v391_v33 = vld [vmem:[%s5072_s6 + $0x600] sm:$0xff] }
  0x24   : > { %4079 = vmatprep.subr.bf16.mxu1 %v4700_v25  ;;  %v4724_v21 = vld [vmem:[%s6368_s1 + $0x1d8] sm:$0xff]   ;;  %v4728_v25 = vld [vmem:[%s6368_s1 + $0x1d0] sm:$0xff]   ;;  %v423_v34 = vld [vmem:[%s5072_s6 + $0x700] sm:$0xff] }
  0x25   : > { %v4725_v22 = vld [vmem:[%s6368_s1 + $0x118] sm:$0xff]   ;;  %v551_v36 = vpack.c.bf16 %v423_v34, %v391_v33  ;;  %v393_v37 = vld [vmem:[%s5072_s6 + $0x610] sm:$0xff]  ;;  %v4732_v41 = vld [vmem:[%s6368_s1 + $0x1c8] sm:$0xff]  }
  0x26   : > { %4040 = vmatpush3.bf16.msra.mxu0 %v4701_v26  ;;  %v4726_v23 = vld [vmem:[%s6368_s1 + $0x198] sm:$0xff]   ;;  %v4729_v26 = vld [vmem:[%s6368_s1 + $0x110] sm:$0xff]   ;;  %v4733_v42 = vld [vmem:[%s6368_s1 + $0x108] sm:$0xff]  }
  0x27   : > { %4080 = vmatpush3.bf16.msra.mxu1 %v4702_v27  ;;  %4041 = vmatprep.subr.bf16.mxu0 %v4703_v28  ;;  %v4730_v27 = vld [vmem:[%s6368_s1 + $0x190] sm:$0xff]   ;;  %v392_v28 = vld [vmem:[%s5072_s6 + $0x608] sm:$0xff]  ;;  %v426_v32 = vld [vmem:[%s5072_s6 + $0x718] sm:$0xff] }
  0x28   : > { %4081 = vmatprep.subr.bf16.mxu1 %v4704_v29  ;;  %v424_v29 = vld [vmem:[%s5072_s6 + $0x708] sm:$0xff]  ;;  %v425_v38 = vld [vmem:[%s5072_s6 + $0x710] sm:$0xff]  ;;  %v203_v54 = vld [vmem:[%s5072_s6 + $0x20] sm:$0xff] }
  0x29   : > { %v553_v39 = vpack.c.bf16 %v425_v38, %v393_v37  ;;  %v235_v55 = vld [vmem:[%s5072_s6 + $0x120] sm:$0xff]  ;;  %v237_v58 = vld [vmem:[%s5072_s6 + $0x130] sm:$0xff]  ;;  %v4739_v60 = vld [vmem:[%s6368_s1 + $0x278] sm:$0xff]  }
  0x2a   : > { %4042 = vmatpush3.bf16.msra.mxu0 %v4705_v30  ;;  %v394_v30 = vld [vmem:[%s5072_s6 + $0x618] sm:$0xff]  ;;  %v267_v9 = vld [vmem:[%s5072_s6 + $0x220] sm:$0xff]  ;;  %v269_v12 = vld [vmem:[%s5072_s6 + $0x230] sm:$0xff] }
  0x2b   : > { %4082 = vmatpush3.bf16.msra.mxu1 %v4706_v31  ;;  %4107 = vmatprep.subr.bf16.mxu0 %v4707_v44  ;;  %v552_v31 = vpack.c.bf16 %v424_v29, %v392_v28  ;;  %v554_v35 = vpack.c.bf16 %v426_v32, %v394_v30  ;;  %v4735_v44 = vld [vmem:[%s6368_s1 + $0x140] sm:$0xff]   ;;  %v4741_v62 = vld [vmem:[%s6368_s1 + $0x238] sm:$0xff]   ;;  %v301_v13 = vld [vmem:[%s5072_s6 + $0x330] sm:$0xff] }
  0x2c   : > { %4147 = vmatprep.subr.bf16.mxu1 %v4708_v45  ;;  %v4736_v45 = vld [vmem:[%s6368_s1 + $0x1c0] sm:$0xff]   ;;  %v302_v8 = vld [vmem:[%s5072_s6 + $0x338] sm:$0xff]  ;;  %v493_v15 = vpack.c.bf16 %v301_v13, %v269_v12  ;;  %v4747_v16 = vld [vmem:[%s6368_s1 + $0x268] sm:$0xff]  }
  0x2d   : > { %2671 = vmatmul.mubr.bf16.vlgmr.msra.gmra.mxu0 %v455_v40  ;;  %v4731_v40 = vld [vmem:[%s6368_s1 + $0x148] sm:$0xff]   ;;  %v299_v11 = vld [vmem:[%s5072_s6 + $0x320] sm:$0xff]  ;;  %v366_v28 = vld [vmem:[%s5072_s6 + $0x538] sm:$0xff] }
  0x2e   : > { %2736 = vmatmul.mubr.bf16.vlgmr.msra.gmra.mxu1 %v457_v43  ;;  %4108 = vmatpush3.bf16.msra.mxu0 %v4709_v46  ;;  %v4734_v43 = vld [vmem:[%s6368_s1 + $0x188] sm:$0xff]   ;;  %v4737_v46 = vld [vmem:[%s6368_s1 + $0x100] sm:$0xff]   ;;  %v333_v33 = vld [vmem:[%s5072_s6 + $0x430] sm:$0xff] }
  0x2f   : > { %4148 = vmatpush3.bf16.msra.mxu1 %v4710_v47  ;;  %4109 = vmatprep.subr.bf16.mxu0 %v4711_v48  ;;  %v4738_v47 = vld [vmem:[%s6368_s1 + $0x180] sm:$0xff]   ;;  %v204_v48 = vld [vmem:[%s5072_s6 + $0x28] sm:$0xff]  ;;  %v365_v34 = vld [vmem:[%s5072_s6 + $0x530] sm:$0xff] }
  0x30   : > { %4149 = vmatprep.subr.bf16.mxu1 %v4712_v49  ;;  %2678 = vmatprep.mubr.bf16.mxu0 %v488_v56  ;;  %v236_v49 = vld [vmem:[%s5072_s6 + $0x128] sm:$0xff]  ;;  %v205_v56 = vld [vmem:[%s5072_s6 + $0x30] sm:$0xff]  ;;  %v331_v29 = vld [vmem:[%s5072_s6 + $0x420] sm:$0xff] }
  0x31   : > { %2743 = vmatprep.mubr.bf16.mxu1 %v490_v57  ;;  %v460_v52 = vpack.c.bf16 %v236_v49, %v204_v48  ;;  %v459_v57 = vpack.c.bf16 %v235_v55, %v203_v54  ;;  %v461_v59 = vpack.c.bf16 %v237_v58, %v205_v56  ;;  %v4748_v17 = vld [vmem:[%s6368_s1 + $0x2e8] sm:$0xff]   ;;  %v363_v30 = vld [vmem:[%s5072_s6 + $0x520] sm:$0xff]  ;;  %v4756_v37 = vld [vmem:[%s6368_s1 + $0x2d8] sm:$0xff]  }
  0x32   : > { %4110 = vmatpush3.bf16.msra.mxu0 %v4713_v50  ;;  %v206_v50 = vld [vmem:[%s5072_s6 + $0x38] sm:$0xff]  ;;  %v523_v32 = vpack.c.bf16 %v363_v30, %v331_v29  ;;  %v429_v54 = vld [vmem:[%s5072_s6 + $0x730] sm:$0xff]  ;;  %v4763_v56 = vld [vmem:[%s6368_s1 + $0x248] sm:$0xff]  }
  0x33   : > { %4150 = vmatpush3.bf16.msra.mxu1 %v4714_v51  ;;  %4111 = vmatprep.subr.bf16.mxu0 %v4715_v0  ;;  %v238_v51 = vld [vmem:[%s5072_s6 + $0x138] sm:$0xff]  ;;  %v4743_v0 = vld [vmem:[%s6368_s1 + $0x270] sm:$0xff]   ;;  %v4765_v58 = vld [vmem:[%s6368_s1 + $0x208] sm:$0xff]  }
  0x34   : > { %4151 = vmatprep.subr.bf16.mxu1 %v4716_v1  ;;  %v462_v53 = vpack.c.bf16 %v238_v51, %v206_v50  ;;  %v4744_v1 = vld [vmem:[%s6368_s1 + $0x2f0] sm:$0xff]   ;;  %v4757_v38 = vld [vmem:[%s6368_s1 + $0x218] sm:$0xff]   ;;  %v395_v50 = vld [vmem:[%s5072_s6 + $0x620] sm:$0xff] }
  0x35   : > { %2679 = vmatmul.mubr.bf16.gmra.mxu0 %v487_v61  ;;  %v4740_v61 = vld [vmem:[%s6368_s1 + $0x2f8] sm:$0xff]   ;;  %v427_v51 = vld [vmem:[%s5072_s6 + $0x720] sm:$0xff]  ;;  %v273_v29 = vld [vmem:[%s5072_s6 + $0x250] sm:$0xff] }
  0x36   : > { %2744 = vmatmul.mubr.bf16.gmra.mxu1 %v489_v63  ;;  %4112 = vmatpush3.bf16.msra.mxu0 %v4717_v2  ;;  %v4742_v63 = vld [vmem:[%s6368_s1 + $0x2b8] sm:$0xff]   ;;  %v4745_v2 = vld [vmem:[%s6368_s1 + $0x230] sm:$0xff]  }
  0x37   : > { %4152 = vmatpush3.bf16.msra.mxu1 %v4718_v3  ;;  %4113 = vmatprep.subr.bf16.mxu0 %v4719_v4  ;;  %v4746_v3 = vld [vmem:[%s6368_s1 + $0x2b0] sm:$0xff]   ;;  %v268_v4 = vld [vmem:[%s5072_s6 + $0x228] sm:$0xff]  ;;  %v4771_v12 = vld [vmem:[%s6368_s1 + $0x378] sm:$0xff]  }
  0x38   : > { %4153 = vmatprep.subr.bf16.mxu1 %v4720_v5  ;;  %2686 = vmatprep.mubr.bf16.mxu0 %v520_v10  ;;  %v300_v5 = vld [vmem:[%s5072_s6 + $0x328] sm:$0xff]  ;;  %v4772_v13 = vld [vmem:[%s6368_s1 + $0x3f8] sm:$0xff]   ;;  %v305_v30 = vld [vmem:[%s5072_s6 + $0x350] sm:$0xff] }
  0x39   : > { %2751 = vmatprep.mubr.bf16.mxu1 %v522_v14  ;;  %v491_v14 = vpack.c.bf16 %v299_v11, %v267_v9  ;;  %v241_v9 = vld [vmem:[%s5072_s6 + $0x150] sm:$0xff] }
  0x3a   : > { %4114 = vmatpush3.bf16.msra.mxu0 %v4721_v6  ;;  %v492_v6 = vpack.c.bf16 %v300_v5, %v268_v4  ;;  %v242_v4 = vld [vmem:[%s5072_s6 + $0x158] sm:$0xff]  ;;  %v207_v5 = vld [vmem:[%s5072_s6 + $0x40] sm:$0xff] }
  0x3b   : > { %4154 = vmatpush3.bf16.msra.mxu1 %v4722_v7  ;;  %4115 = vmatprep.subr.bf16.mxu0 %v4723_v20  ;;  %v270_v7 = vld [vmem:[%s5072_s6 + $0x238] sm:$0xff]  ;;  %v4751_v20 = vld [vmem:[%s6368_s1 + $0x260] sm:$0xff]  }
  0x3c   : > { %4155 = vmatprep.subr.bf16.mxu1 %v4724_v21  ;;  %v494_v10 = vpack.c.bf16 %v302_v8, %v270_v7  ;;  %v4752_v21 = vld [vmem:[%s6368_s1 + $0x2e0] sm:$0xff]   ;;  %v209_v8 = vld [vmem:[%s5072_s6 + $0x50] sm:$0xff] }
  0x3d   : > { %2687 = vmatmul.mubr.bf16.gmra.mxu0 %v519_v18  ;;  %v4749_v18 = vld [vmem:[%s6368_s1 + $0x228] sm:$0xff]   ;;  %v239_v7 = vld [vmem:[%s5072_s6 + $0x140] sm:$0xff]  ;;  %v465_v11 = vpack.c.bf16 %v241_v9, %v209_v8 }
  0x3e   : > { %2752 = vmatmul.mubr.bf16.gmra.mxu1 %v521_v19  ;;  %4116 = vmatpush3.bf16.msra.mxu0 %v4725_v22  ;;  %v4750_v19 = vld [vmem:[%s6368_s1 + $0x2a8] sm:$0xff]   ;;  %v4753_v22 = vld [vmem:[%s6368_s1 + $0x220] sm:$0xff]  }
  0x3f   : > { %4156 = vmatpush3.bf16.msra.mxu1 %v4726_v23  ;;  %4117 = vmatprep.subr.bf16.mxu0 %v4727_v24  ;;  %v4754_v23 = vld [vmem:[%s6368_s1 + $0x2a0] sm:$0xff]   ;;  %v332_v24 = vld [vmem:[%s5072_s6 + $0x428] sm:$0xff] }
  0x40   : > { %4157 = vmatprep.subr.bf16.mxu1 %v4728_v25  ;;  %2694 = vmatprep.mubr.bf16.mxu0 %v552_v31  ;;  %v364_v25 = vld [vmem:[%s5072_s6 + $0x528] sm:$0xff] }
  0x41   : > { %2759 = vmatprep.mubr.bf16.mxu1 %v554_v35  ;;  %v525_v35 = vpack.c.bf16 %v365_v34, %v333_v33  ;;  %v4780_v33 = vld [vmem:[%s6368_s1 + $0x3e8] sm:$0xff]  }
  0x42   : > { %4118 = vmatpush3.bf16.msra.mxu0 %v4729_v26  ;;  %v334_v26 = vld [vmem:[%s5072_s6 + $0x438] sm:$0xff]  ;;  %v4781_v34 = vld [vmem:[%s6368_s1 + $0x328] sm:$0xff]  }
  0x43   : > { %4158 = vmatpush3.bf16.msra.mxu1 %v4730_v27  ;;  %4119 = vmatprep.subr.bf16.mxu0 %v4731_v40  ;;  %v524_v27 = vpack.c.bf16 %v364_v25, %v332_v24  ;;  %v526_v31 = vpack.c.bf16 %v366_v28, %v334_v26  ;;  %v4759_v40 = vld [vmem:[%s6368_s1 + $0x250] sm:$0xff]   ;;  %v306_v24 = vld [vmem:[%s5072_s6 + $0x358] sm:$0xff]  ;;  %v271_v25 = vld [vmem:[%s5072_s6 + $0x240] sm:$0xff] }
  0x44   : > { %4159 = vmatprep.subr.bf16.mxu1 %v4732_v41  ;;  %v4760_v41 = vld [vmem:[%s6368_s1 + $0x2d0] sm:$0xff]   ;;  %v303_v26 = vld [vmem:[%s5072_s6 + $0x340] sm:$0xff]  ;;  %v4795_v8 = vld [vmem:[%s6368_s1 + $0x348] sm:$0xff]  }
  0x45   : > { %2695 = vmatmul.mubr.bf16.gmra.mxu0 %v551_v36  ;;  %v4755_v36 = vld [vmem:[%s6368_s1 + $0x258] sm:$0xff]   ;;  %v495_v28 = vpack.c.bf16 %v303_v26, %v271_v25  ;;  %v4796_v9 = vld [vmem:[%s6368_s1 + $0x3c8] sm:$0xff]   ;;  %v213_v25 = vld [vmem:[%s5072_s6 + $0x70] sm:$0xff] }
  0x46   : > { %2760 = vmatmul.mubr.bf16.gmra.mxu1 %v553_v39  ;;  %4120 = vmatpush3.bf16.msra.mxu0 %v4733_v42  ;;  %v4758_v39 = vld [vmem:[%s6368_s1 + $0x298] sm:$0xff]   ;;  %v4761_v42 = vld [vmem:[%s6368_s1 + $0x210] sm:$0xff]  }
  0x47   : > { %4160 = vmatpush3.bf16.msra.mxu1 %v4734_v43  ;;  %4121 = vmatprep.subr.bf16.mxu0 %v4735_v44  ;;  %v4762_v43 = vld [vmem:[%s6368_s1 + $0x290] sm:$0xff]   ;;  %v396_v44 = vld [vmem:[%s5072_s6 + $0x628] sm:$0xff] }
  0x48   : > { %4161 = vmatprep.subr.bf16.mxu1 %v4736_v45  ;;  %2800 = vmatprep.mubr.bf16.mxu0 %v460_v52  ;;  %v428_v45 = vld [vmem:[%s5072_s6 + $0x728] sm:$0xff]  ;;  %v397_v52 = vld [vmem:[%s5072_s6 + $0x630] sm:$0xff] }
  0x49   : > { %2865 = vmatprep.mubr.bf16.mxu1 %v462_v53  ;;  %v556_v48 = vpack.c.bf16 %v428_v45, %v396_v44  ;;  %v555_v53 = vpack.c.bf16 %v427_v51, %v395_v50  ;;  %v557_v55 = vpack.c.bf16 %v429_v54, %v397_v52  ;;  %v369_v50 = vld [vmem:[%s5072_s6 + $0x550] sm:$0xff]  ;;  %v4787_v52 = vld [vmem:[%s6368_s1 + $0x358] sm:$0xff]  }
  0x4a   : > { %4122 = vmatpush3.bf16.msra.mxu0 %v4737_v46  ;;  %v398_v46 = vld [vmem:[%s5072_s6 + $0x638] sm:$0xff]  ;;  %v245_v26 = vld [vmem:[%s5072_s6 + $0x170] sm:$0xff] }
  0x4b   : > { %4162 = vmatpush3.bf16.msra.mxu1 %v4738_v47  ;;  %4187 = vmatprep.subr.bf16.mxu0 %v4739_v60  ;;  %v430_v47 = vld [vmem:[%s5072_s6 + $0x738] sm:$0xff]  ;;  %v4767_v60 = vld [vmem:[%s6368_s1 + $0x240] sm:$0xff]  }
  0x4c   : > { %4227 = vmatprep.subr.bf16.mxu1 %v4740_v61  ;;  %v558_v49 = vpack.c.bf16 %v430_v47, %v398_v46  ;;  %v4768_v61 = vld [vmem:[%s6368_s1 + $0x2c0] sm:$0xff]   ;;  %v4789_v54 = vld [vmem:[%s6368_s1 + $0x318] sm:$0xff]  }
  0x4d   : > { %2801 = vmatmul.mubr.bf16.vlgmr.msra.gmra.mxu0 %v459_v57  ;;  %v4764_v57 = vld [vmem:[%s6368_s1 + $0x2c8] sm:$0xff]   ;;  %v335_v46 = vld [vmem:[%s5072_s6 + $0x440] sm:$0xff] }
  0x4e   : > { %2866 = vmatmul.mubr.bf16.vlgmr.msra.gmra.mxu1 %v461_v59  ;;  %4188 = vmatpush3.bf16.msra.mxu0 %v4741_v62  ;;  %v4766_v59 = vld [vmem:[%s6368_s1 + $0x288] sm:$0xff]   ;;  %v4769_v62 = vld [vmem:[%s6368_s1 + $0x200] sm:$0xff]  }
  0x4f   : > { %4228 = vmatpush3.bf16.msra.mxu1 %v4742_v63  ;;  %4189 = vmatprep.subr.bf16.mxu0 %v4743_v0  ;;  %v4770_v63 = vld [vmem:[%s6368_s1 + $0x280] sm:$0xff]   ;;  %v208_v0 = vld [vmem:[%s5072_s6 + $0x48] sm:$0xff] }
  0x50   : > { %4229 = vmatprep.subr.bf16.mxu1 %v4744_v1  ;;  %2808 = vmatprep.mubr.bf16.mxu0 %v492_v6  ;;  %v240_v1 = vld [vmem:[%s5072_s6 + $0x148] sm:$0xff]  ;;  %v367_v47 = vld [vmem:[%s5072_s6 + $0x540] sm:$0xff] }
  0x51   : > { %2873 = vmatprep.mubr.bf16.mxu1 %v494_v10  ;;  %v463_v10 = vpack.c.bf16 %v239_v7, %v207_v5  ;;  %v433_v5 = vld [vmem:[%s5072_s6 + $0x750] sm:$0xff] }
  0x52   : > { %4190 = vmatpush3.bf16.msra.mxu0 %v4745_v2  ;;  %v464_v2 = vpack.c.bf16 %v240_v1, %v208_v0  ;;  %v434_v0 = vld [vmem:[%s5072_s6 + $0x758] sm:$0xff]  ;;  %v399_v1 = vld [vmem:[%s5072_s6 + $0x640] sm:$0xff] }
  0x53   : > { %4230 = vmatpush3.bf16.msra.mxu1 %v4746_v3  ;;  %4191 = vmatprep.subr.bf16.mxu0 %v4747_v16  ;;  %v210_v3 = vld [vmem:[%s5072_s6 + $0x58] sm:$0xff]  ;;  %v4775_v16 = vld [vmem:[%s6368_s1 + $0x370] sm:$0xff]  }
  0x54   : > { %4231 = vmatprep.subr.bf16.mxu1 %v4748_v17  ;;  %v466_v6 = vpack.c.bf16 %v242_v4, %v210_v3  ;;  %v4776_v17 = vld [vmem:[%s6368_s1 + $0x3f0] sm:$0xff]   ;;  %v431_v3 = vld [vmem:[%s5072_s6 + $0x740] sm:$0xff] }
  0x55   : > { %2809 = vmatmul.mubr.bf16.gmra.mxu0 %v491_v14  ;;  %v4773_v14 = vld [vmem:[%s6368_s1 + $0x338] sm:$0xff]   ;;  %v401_v4 = vld [vmem:[%s5072_s6 + $0x650] sm:$0xff] }
  0x56   : > { %2874 = vmatmul.mubr.bf16.gmra.mxu1 %v493_v15  ;;  %4192 = vmatpush3.bf16.msra.mxu0 %v4749_v18  ;;  %v4774_v15 = vld [vmem:[%s6368_s1 + $0x3b8] sm:$0xff]   ;;  %v4777_v18 = vld [vmem:[%s6368_s1 + $0x330] sm:$0xff]   ;;  %v561_v7 = vpack.c.bf16 %v433_v5, %v401_v4 }
  0x57   : > { %4232 = vmatpush3.bf16.msra.mxu1 %v4750_v19  ;;  %4193 = vmatprep.subr.bf16.mxu0 %v4751_v20  ;;  %v4778_v19 = vld [vmem:[%s6368_s1 + $0x3b0] sm:$0xff]   ;;  %v272_v20 = vld [vmem:[%s5072_s6 + $0x248] sm:$0xff]  ;;  %v4819_v4 = vld [vmem:[%s6368_s1 + $0x458] sm:$0xff]  }
  0x58   : > { %4233 = vmatprep.subr.bf16.mxu1 %v4752_v21  ;;  %2816 = vmatprep.mubr.bf16.mxu0 %v524_v27  ;;  %v304_v21 = vld [vmem:[%s5072_s6 + $0x348] sm:$0xff]  ;;  %v4820_v5 = vld [vmem:[%s6368_s1 + $0x4d8] sm:$0xff]  }
  0x59   : > { %2881 = vmatprep.mubr.bf16.mxu1 %v526_v31  ;;  %v497_v31 = vpack.c.bf16 %v305_v30, %v273_v29  ;;  %v4804_v29 = vld [vmem:[%s6368_s1 + $0x4f8] sm:$0xff]  }
  0x5a   : > { %4194 = vmatpush3.bf16.msra.mxu0 %v4753_v22  ;;  %v274_v22 = vld [vmem:[%s5072_s6 + $0x258] sm:$0xff] }
  0x5b   : > { %4234 = vmatpush3.bf16.msra.mxu1 %v4754_v23  ;;  %4195 = vmatprep.subr.bf16.mxu0 %v4755_v36  ;;  %v496_v23 = vpack.c.bf16 %v304_v21, %v272_v20  ;;  %v498_v27 = vpack.c.bf16 %v306_v24, %v274_v22  ;;  %v4783_v36 = vld [vmem:[%s6368_s1 + $0x360] sm:$0xff]   ;;  %v246_v20 = vld [vmem:[%s5072_s6 + $0x178] sm:$0xff] }
  0x5c   : > { %4235 = vmatprep.subr.bf16.mxu1 %v4756_v37  ;;  %v4784_v37 = vld [vmem:[%s6368_s1 + $0x3e0] sm:$0xff]   ;;  %v4805_v30 = vld [vmem:[%s6368_s1 + $0x438] sm:$0xff]  }
  0x5d   : > { %2817 = vmatmul.mubr.bf16.gmra.mxu0 %v523_v32  ;;  %v4779_v32 = vld [vmem:[%s6368_s1 + $0x368] sm:$0xff]   ;;  %v211_v21 = vld [vmem:[%s5072_s6 + $0x60] sm:$0xff] }
  0x5e   : > { %2882 = vmatmul.mubr.bf16.gmra.mxu1 %v525_v35  ;;  %4196 = vmatpush3.bf16.msra.mxu0 %v4757_v38  ;;  %v4782_v35 = vld [vmem:[%s6368_s1 + $0x3a8] sm:$0xff]   ;;  %v4785_v38 = vld [vmem:[%s6368_s1 + $0x320] sm:$0xff]  }
  0x5f   : > { %4236 = vmatpush3.bf16.msra.mxu1 %v4758_v39  ;;  %4197 = vmatprep.subr.bf16.mxu0 %v4759_v40  ;;  %v4786_v39 = vld [vmem:[%s6368_s1 + $0x3a0] sm:$0xff]   ;;  %v336_v40 = vld [vmem:[%s5072_s6 + $0x448] sm:$0xff] }
  0x60   : > { %4237 = vmatprep.subr.bf16.mxu1 %v4760_v41  ;;  %2824 = vmatprep.mubr.bf16.mxu0 %v556_v48  ;;  %v368_v41 = vld [vmem:[%s5072_s6 + $0x548] sm:$0xff]  ;;  %v337_v48 = vld [vmem:[%s5072_s6 + $0x450] sm:$0xff]  ;;  %v243_v22 = vld [vmem:[%s5072_s6 + $0x160] sm:$0xff] }
  0x61   : > { %2889 = vmatprep.mubr.bf16.mxu1 %v558_v49  ;;  %v528_v44 = vpack.c.bf16 %v368_v41, %v336_v40  ;;  %v527_v49 = vpack.c.bf16 %v367_v47, %v335_v46  ;;  %v529_v51 = vpack.c.bf16 %v369_v50, %v337_v48  ;;  %v467_v24 = vpack.c.bf16 %v243_v22, %v211_v21  ;;  %v309_v46 = vld [vmem:[%s5072_s6 + $0x370] sm:$0xff]  ;;  %v4811_v48 = vld [vmem:[%s6368_s1 + $0x468] sm:$0xff]  }
  0x62   : > { %4198 = vmatpush3.bf16.msra.mxu0 %v4761_v42  ;;  %v338_v42 = vld [vmem:[%s5072_s6 + $0x458] sm:$0xff]  ;;  %v4813_v50 = vld [vmem:[%s6368_s1 + $0x428] sm:$0xff]   ;;  %v405_v21 = vld [vmem:[%s5072_s6 + $0x670] sm:$0xff] }
  0x63   : > { %4238 = vmatpush3.bf16.msra.mxu1 %v4762_v43  ;;  %4199 = vmatprep.subr.bf16.mxu0 %v4763_v56  ;;  %v370_v43 = vld [vmem:[%s5072_s6 + $0x558] sm:$0xff]  ;;  %v4791_v56 = vld [vmem:[%s6368_s1 + $0x350] sm:$0xff]  }
  0x64   : > { %4239 = vmatprep.subr.bf16.mxu1 %v4764_v57  ;;  %v530_v45 = vpack.c.bf16 %v370_v43, %v338_v42  ;;  %v4792_v57 = vld [vmem:[%s6368_s1 + $0x3d0] sm:$0xff]   ;;  %v275_v42 = vld [vmem:[%s5072_s6 + $0x260] sm:$0xff] }
  0x65   : > { %2825 = vmatmul.mubr.bf16.gmra.mxu0 %v555_v53  ;;  %v4788_v53 = vld [vmem:[%s6368_s1 + $0x3d8] sm:$0xff]   ;;  %v307_v43 = vld [vmem:[%s5072_s6 + $0x360] sm:$0xff]  ;;  %v437_v22 = vld [vmem:[%s5072_s6 + $0x770] sm:$0xff] }
  0x66   : > { %2890 = vmatmul.mubr.bf16.gmra.mxu1 %v557_v55  ;;  %4200 = vmatpush3.bf16.msra.mxu0 %v4765_v58  ;;  %v4790_v55 = vld [vmem:[%s6368_s1 + $0x398] sm:$0xff]   ;;  %v4793_v58 = vld [vmem:[%s6368_s1 + $0x310] sm:$0xff]  }
  0x67   : > { %4240 = vmatpush3.bf16.msra.mxu1 %v4766_v59  ;;  %4201 = vmatprep.subr.bf16.mxu0 %v4767_v60  ;;  %v4794_v59 = vld [vmem:[%s6368_s1 + $0x390] sm:$0xff]   ;;  %v400_v60 = vld [vmem:[%s5072_s6 + $0x648] sm:$0xff] }
  0x68   : > { %4241 = vmatprep.subr.bf16.mxu1 %v4768_v61  ;;  %2930 = vmatprep.mubr.bf16.mxu0 %v464_v2  ;;  %v432_v61 = vld [vmem:[%s5072_s6 + $0x748] sm:$0xff] }
  0x69   : > { %2995 = vmatprep.mubr.bf16.mxu1 %v466_v6  ;;  %v559_v6 = vpack.c.bf16 %v431_v3, %v399_v1  ;;  %v373_v1 = vld [vmem:[%s5072_s6 + $0x570] sm:$0xff] }
  0x6a   : > { %4202 = vmatpush3.bf16.msra.mxu0 %v4769_v62  ;;  %v560_v62 = vpack.c.bf16 %v432_v61, %v400_v60  ;;  %v374_v60 = vld [vmem:[%s5072_s6 + $0x578] sm:$0xff]  ;;  %v339_v61 = vld [vmem:[%s5072_s6 + $0x460] sm:$0xff] }
  0x6b   : > { %4242 = vmatpush3.bf16.msra.mxu1 %v4770_v63  ;;  %4267 = vmatprep.subr.bf16.mxu0 %v4771_v12  ;;  %v402_v63 = vld [vmem:[%s5072_s6 + $0x658] sm:$0xff]  ;;  %v4799_v12 = vld [vmem:[%s6368_s1 + $0x340] sm:$0xff]  }
  0x6c   : > { %4307 = vmatprep.subr.bf16.mxu1 %v4772_v13  ;;  %v562_v2 = vpack.c.bf16 %v434_v0, %v402_v63  ;;  %v4800_v13 = vld [vmem:[%s6368_s1 + $0x3c0] sm:$0xff]   ;;  %v341_v0 = vld [vmem:[%s5072_s6 + $0x470] sm:$0xff] }
  0x6d   : > { %2931 = vmatmul.mubr.bf16.vlgmr.msra.gmra.mxu0 %v463_v10  ;;  %v4797_v10 = vld [vmem:[%s6368_s1 + $0x308] sm:$0xff]   ;;  %v371_v63 = vld [vmem:[%s5072_s6 + $0x560] sm:$0xff]  ;;  %v533_v3 = vpack.c.bf16 %v373_v1, %v341_v0 }
  0x6e   : > { %2996 = vmatmul.mubr.bf16.vlgmr.msra.gmra.mxu1 %v465_v11  ;;  %4268 = vmatpush3.bf16.msra.mxu0 %v4773_v14  ;;  %v4798_v11 = vld [vmem:[%s6368_s1 + $0x388] sm:$0xff]   ;;  %v4801_v14 = vld [vmem:[%s6368_s1 + $0x300] sm:$0xff]  }
  0x6f   : > { %4308 = vmatpush3.bf16.msra.mxu1 %v4774_v15  ;;  %4269 = vmatprep.subr.bf16.mxu0 %v4775_v16  ;;  %v4802_v15 = vld [vmem:[%s6368_s1 + $0x380] sm:$0xff]   ;;  %v212_v16 = vld [vmem:[%s5072_s6 + $0x68] sm:$0xff] }
  0x70   : > { %4309 = vmatprep.subr.bf16.mxu1 %v4776_v17  ;;  %2938 = vmatprep.mubr.bf16.mxu0 %v496_v23  ;;  %v244_v17 = vld [vmem:[%s5072_s6 + $0x168] sm:$0xff] }
  0x71   : > { %3003 = vmatprep.mubr.bf16.mxu1 %v498_v27  ;;  %v469_v27 = vpack.c.bf16 %v245_v26, %v213_v25  ;;  %v4828_v25 = vld [vmem:[%s6368_s1 + $0x4c8] sm:$0xff]  }
  0x72   : > { %4270 = vmatpush3.bf16.msra.mxu0 %v4777_v18  ;;  %v214_v18 = vld [vmem:[%s5072_s6 + $0x78] sm:$0xff]  ;;  %v4829_v26 = vld [vmem:[%s6368_s1 + $0x408] sm:$0xff]  }
  0x73   : > { %4310 = vmatpush3.bf16.msra.mxu1 %v4778_v19  ;;  %4271 = vmatprep.subr.bf16.mxu0 %v4779_v32  ;;  %v468_v19 = vpack.c.bf16 %v244_v17, %v212_v16  ;;  %v470_v23 = vpack.c.bf16 %v246_v20, %v214_v18  ;;  %v4807_v32 = vld [vmem:[%s6368_s1 + $0x470] sm:$0xff]   ;;  %v438_v16 = vld [vmem:[%s5072_s6 + $0x778] sm:$0xff]  ;;  %v403_v17 = vld [vmem:[%s5072_s6 + $0x660] sm:$0xff] }
  0x74   : > { %4311 = vmatprep.subr.bf16.mxu1 %v4780_v33  ;;  %v4808_v33 = vld [vmem:[%s6368_s1 + $0x4f0] sm:$0xff]   ;;  %v435_v18 = vld [vmem:[%s5072_s6 + $0x760] sm:$0xff]  ;;  %v4843_v0 = vld [vmem:[%s6368_s1 + $0x568] sm:$0xff]  }
  0x75   : > { %2939 = vmatmul.mubr.bf16.gmra.mxu0 %v495_v28  ;;  %v4803_v28 = vld [vmem:[%s6368_s1 + $0x478] sm:$0xff]   ;;  %v563_v20 = vpack.c.bf16 %v435_v18, %v403_v17  ;;  %v4844_v1 = vld [vmem:[%s6368_s1 + $0x5e8] sm:$0xff]   ;;  %v345_v17 = vld [vmem:[%s5072_s6 + $0x490] sm:$0xff] }
  0x76   : > { %3004 = vmatmul.mubr.bf16.gmra.mxu1 %v497_v31  ;;  %4272 = vmatpush3.bf16.msra.mxu0 %v4781_v34  ;;  %v4806_v31 = vld [vmem:[%s6368_s1 + $0x4b8] sm:$0xff]   ;;  %v4809_v34 = vld [vmem:[%s6368_s1 + $0x430] sm:$0xff]  }
  0x77   : > { %4312 = vmatpush3.bf16.msra.mxu1 %v4782_v35  ;;  %4273 = vmatprep.subr.bf16.mxu0 %v4783_v36  ;;  %v4810_v35 = vld [vmem:[%s6368_s1 + $0x4b0] sm:$0xff]   ;;  %v276_v36 = vld [vmem:[%s5072_s6 + $0x268] sm:$0xff] }
  0x78   : > { %4313 = vmatprep.subr.bf16.mxu1 %v4784_v37  ;;  %2946 = vmatprep.mubr.bf16.mxu0 %v528_v44  ;;  %v308_v37 = vld [vmem:[%s5072_s6 + $0x368] sm:$0xff]  ;;  %v277_v44 = vld [vmem:[%s5072_s6 + $0x270] sm:$0xff] }
  0x79   : > { %3011 = vmatprep.mubr.bf16.mxu1 %v530_v45  ;;  %v500_v40 = vpack.c.bf16 %v308_v37, %v276_v36  ;;  %v499_v45 = vpack.c.bf16 %v307_v43, %v275_v42  ;;  %v501_v47 = vpack.c.bf16 %v309_v46, %v277_v44  ;;  %v249_v42 = vld [vmem:[%s5072_s6 + $0x190] sm:$0xff]  ;;  %v4835_v44 = vld [vmem:[%s6368_s1 + $0x578] sm:$0xff]  }
  0x7a   : > { %4274 = vmatpush3.bf16.msra.mxu0 %v4785_v38  ;;  %v278_v38 = vld [vmem:[%s5072_s6 + $0x278] sm:$0xff]  ;;  %v377_v18 = vld [vmem:[%s5072_s6 + $0x590] sm:$0xff] }
  0x7b   : > { %4314 = vmatpush3.bf16.msra.mxu1 %v4786_v39  ;;  %4275 = vmatprep.subr.bf16.mxu0 %v4787_v52  ;;  %v310_v39 = vld [vmem:[%s5072_s6 + $0x378] sm:$0xff]  ;;  %v4815_v52 = vld [vmem:[%s6368_s1 + $0x460] sm:$0xff]  }
  0x7c   : > { %4315 = vmatprep.subr.bf16.mxu1 %v4788_v53  ;;  %v502_v41 = vpack.c.bf16 %v310_v39, %v278_v38  ;;  %v4816_v53 = vld [vmem:[%s6368_s1 + $0x4e0] sm:$0xff]   ;;  %v4837_v46 = vld [vmem:[%s6368_s1 + $0x538] sm:$0xff]  }
  0x7d   : > { %2947 = vmatmul.mubr.bf16.gmra.mxu0 %v527_v49  ;;  %v4812_v49 = vld [vmem:[%s6368_s1 + $0x4e8] sm:$0xff]   ;;  %v215_v38 = vld [vmem:[%s5072_s6 + $0x80] sm:$0xff] }
  0x7e   : > { %3012 = vmatmul.mubr.bf16.gmra.mxu1 %v529_v51  ;;  %4276 = vmatpush3.bf16.msra.mxu0 %v4789_v54  ;;  %v4814_v51 = vld [vmem:[%s6368_s1 + $0x4a8] sm:$0xff]   ;;  %v4817_v54 = vld [vmem:[%s6368_s1 + $0x420] sm:$0xff]  }
  0x7f   : > { %4316 = vmatpush3.bf16.msra.mxu1 %v4790_v55  ;;  %4277 = vmatprep.subr.bf16.mxu0 %v4791_v56  ;;  %v4818_v55 = vld [vmem:[%s6368_s1 + $0x4a0] sm:$0xff]   ;;  %v340_v56 = vld [vmem:[%s5072_s6 + $0x468] sm:$0xff] }
  0x80   : > { %4317 = vmatprep.subr.bf16.mxu1 %v4792_v57  ;;  %2954 = vmatprep.mubr.bf16.mxu0 %v560_v62  ;;  %v372_v57 = vld [vmem:[%s5072_s6 + $0x568] sm:$0xff]  ;;  %v247_v39 = vld [vmem:[%s5072_s6 + $0x180] sm:$0xff] }
  0x81   : > { %3019 = vmatprep.mubr.bf16.mxu1 %v562_v2  ;;  %v531_v2 = vpack.c.bf16 %v371_v63, %v339_v61  ;;  %v313_v61 = vld [vmem:[%s5072_s6 + $0x390] sm:$0xff] }
  0x82   : > { %4278 = vmatpush3.bf16.msra.mxu0 %v4793_v58  ;;  %v532_v58 = vpack.c.bf16 %v372_v57, %v340_v56  ;;  %v314_v56 = vld [vmem:[%s5072_s6 + $0x398] sm:$0xff]  ;;  %v279_v57 = vld [vmem:[%s5072_s6 + $0x280] sm:$0xff] }
  0x83   : > { %4318 = vmatpush3.bf16.msra.mxu1 %v4794_v59  ;;  %4279 = vmatprep.subr.bf16.mxu0 %v4795_v8  ;;  %v342_v59 = vld [vmem:[%s5072_s6 + $0x478] sm:$0xff]  ;;  %v4823_v8 = vld [vmem:[%s6368_s1 + $0x450] sm:$0xff]  }
  0x84   : > { %4319 = vmatprep.subr.bf16.mxu1 %v4796_v9  ;;  %v534_v62 = vpack.c.bf16 %v374_v60, %v342_v59  ;;  %v4824_v9 = vld [vmem:[%s6368_s1 + $0x4d0] sm:$0xff]   ;;  %v311_v59 = vld [vmem:[%s5072_s6 + $0x380] sm:$0xff] }
  0x85   : > { %2955 = vmatmul.mubr.bf16.gmra.mxu0 %v559_v6  ;;  %v4821_v6 = vld [vmem:[%s6368_s1 + $0x418] sm:$0xff]   ;;  %v281_v60 = vld [vmem:[%s5072_s6 + $0x290] sm:$0xff] }
  0x86   : > { %3020 = vmatmul.mubr.bf16.gmra.mxu1 %v561_v7  ;;  %4280 = vmatpush3.bf16.msra.mxu0 %v4797_v10  ;;  %v4822_v7 = vld [vmem:[%s6368_s1 + $0x498] sm:$0xff]   ;;  %v4825_v10 = vld [vmem:[%s6368_s1 + $0x410] sm:$0xff]   ;;  %v505_v63 = vpack.c.bf16 %v313_v61, %v281_v60  ;;  %v4864_v60 = vld [vmem:[%s6368_s1 + $0x5c0] sm:$0xff]  }
  0x87   : > { %4320 = vmatpush3.bf16.msra.mxu1 %v4798_v11  ;;  %4281 = vmatprep.subr.bf16.mxu0 %v4799_v12  ;;  %v4826_v11 = vld [vmem:[%s6368_s1 + $0x490] sm:$0xff]   ;;  %v404_v12 = vld [vmem:[%s5072_s6 + $0x668] sm:$0xff] }
  0x88   : > { %4321 = vmatprep.subr.bf16.mxu1 %v4800_v13  ;;  %3060 = vmatprep.mubr.bf16.mxu0 %v468_v19  ;;  %v436_v13 = vld [vmem:[%s5072_s6 + $0x768] sm:$0xff] }
  0x89   : > { %3125 = vmatprep.mubr.bf16.mxu1 %v470_v23  ;;  %v565_v23 = vpack.c.bf16 %v437_v22, %v405_v21  ;;  %v4852_v21 = vld [vmem:[%s6368_s1 + $0x5d8] sm:$0xff]  }
  0x8a   : > { %4282 = vmatpush3.bf16.msra.mxu0 %v4801_v14  ;;  %v406_v14 = vld [vmem:[%s5072_s6 + $0x678] sm:$0xff] }
  0x8b   : > { %4322 = vmatpush3.bf16.msra.mxu1 %v4802_v15  ;;  %4347 = vmatprep.subr.bf16.mxu0 %v4803_v28  ;;  %v564_v15 = vpack.c.bf16 %v436_v13, %v404_v12  ;;  %v566_v19 = vpack.c.bf16 %v438_v16, %v406_v14  ;;  %v4831_v28 = vld [vmem:[%s6368_s1 + $0x440] sm:$0xff]   ;;  %v378_v12 = vld [vmem:[%s5072_s6 + $0x598] sm:$0xff] }
  0x8c   : > { %4387 = vmatprep.subr.bf16.mxu1 %v4804_v29  ;;  %v4832_v29 = vld [vmem:[%s6368_s1 + $0x4c0] sm:$0xff]  }
  0x8d   : > { %3061 = vmatmul.mubr.bf16.vlgmr.msra.gmra.mxu0 %v467_v24  ;;  %v4827_v24 = vld [vmem:[%s6368_s1 + $0x448] sm:$0xff]   ;;  %v343_v13 = vld [vmem:[%s5072_s6 + $0x480] sm:$0xff] }
  0x8e   : > { %3126 = vmatmul.mubr.bf16.vlgmr.msra.gmra.mxu1 %v469_v27  ;;  %4348 = vmatpush3.bf16.msra.mxu0 %v4805_v30  ;;  %v4830_v27 = vld [vmem:[%s6368_s1 + $0x488] sm:$0xff]   ;;  %v4833_v30 = vld [vmem:[%s6368_s1 + $0x400] sm:$0xff]  }
  0x8f   : > { %4388 = vmatpush3.bf16.msra.mxu1 %v4806_v31  ;;  %4349 = vmatprep.subr.bf16.mxu0 %v4807_v32  ;;  %v4834_v31 = vld [vmem:[%s6368_s1 + $0x480] sm:$0xff]   ;;  %v216_v32 = vld [vmem:[%s5072_s6 + $0x88] sm:$0xff] }
  0x90   : > { %4389 = vmatprep.subr.bf16.mxu1 %v4808_v33  ;;  %3068 = vmatprep.mubr.bf16.mxu0 %v500_v40  ;;  %v248_v33 = vld [vmem:[%s5072_s6 + $0x188] sm:$0xff]  ;;  %v217_v40 = vld [vmem:[%s5072_s6 + $0x90] sm:$0xff]  ;;  %v375_v14 = vld [vmem:[%s5072_s6 + $0x580] sm:$0xff] }
  0x91   : > { %3133 = vmatprep.mubr.bf16.mxu1 %v502_v41  ;;  %v472_v36 = vpack.c.bf16 %v248_v33, %v216_v32  ;;  %v471_v41 = vpack.c.bf16 %v247_v39, %v215_v38  ;;  %v473_v43 = vpack.c.bf16 %v249_v42, %v217_v40  ;;  %v535_v16 = vpack.c.bf16 %v375_v14, %v343_v13  ;;  %v4857_v33 = vld [vmem:[%s6368_s1 + $0x510] sm:$0xff]   ;;  %v410_v38 = vld [vmem:[%s5072_s6 + $0x698] sm:$0xff] }
  0x92   : > { %4350 = vmatpush3.bf16.msra.mxu0 %v4809_v34  ;;  %v218_v34 = vld [vmem:[%s5072_s6 + $0x98] sm:$0xff]  ;;  %v253_v13 = vld [vmem:[%s5072_s6 + $0x1b0] sm:$0xff] }
  0x93   : > { %4390 = vmatpush3.bf16.msra.mxu1 %v4810_v35  ;;  %4351 = vmatprep.subr.bf16.mxu0 %v4811_v48  ;;  %v250_v35 = vld [vmem:[%s5072_s6 + $0x198] sm:$0xff]  ;;  %v4839_v48 = vld [vmem:[%s6368_s1 + $0x570] sm:$0xff]  }
  0x94   : > { %4391 = vmatprep.subr.bf16.mxu1 %v4812_v49  ;;  %v474_v37 = vpack.c.bf16 %v250_v35, %v218_v34  ;;  %v4840_v49 = vld [vmem:[%s6368_s1 + $0x5f0] sm:$0xff]   ;;  %v442_v39 = vld [vmem:[%s5072_s6 + $0x798] sm:$0xff] }
  0x95   : > { %3069 = vmatmul.mubr.bf16.gmra.mxu0 %v499_v45  ;;  %v4836_v45 = vld [vmem:[%s6368_s1 + $0x5f8] sm:$0xff]   ;;  %v4858_v35 = vld [vmem:[%s6368_s1 + $0x590] sm:$0xff]   ;;  %v570_v42 = vpack.c.bf16 %v442_v39, %v410_v38 }
  0x96   : > { %3134 = vmatmul.mubr.bf16.gmra.mxu1 %v501_v47  ;;  %4352 = vmatpush3.bf16.msra.mxu0 %v4813_v50  ;;  %v4838_v47 = vld [vmem:[%s6368_s1 + $0x5b8] sm:$0xff]   ;;  %v4841_v50 = vld [vmem:[%s6368_s1 + $0x530] sm:$0xff]  }
  0x97   : > { %4392 = vmatpush3.bf16.msra.mxu1 %v4814_v51  ;;  %4353 = vmatprep.subr.bf16.mxu0 %v4815_v52  ;;  %v4842_v51 = vld [vmem:[%s6368_s1 + $0x5b0] sm:$0xff]   ;;  %v280_v52 = vld [vmem:[%s5072_s6 + $0x288] sm:$0xff]  ;;  %v286_v38 = vld [vmem:[%s5072_s6 + $0x2b8] sm:$0xff] }
  0x98   : > { %4393 = vmatprep.subr.bf16.mxu1 %v4816_v53  ;;  %3076 = vmatprep.mubr.bf16.mxu0 %v532_v58  ;;  %v312_v53 = vld [vmem:[%s5072_s6 + $0x388] sm:$0xff] }
  0x99   : > { %3141 = vmatprep.mubr.bf16.mxu1 %v534_v62  ;;  %v503_v62 = vpack.c.bf16 %v311_v59, %v279_v57  ;;  %v4863_v57 = vld [vmem:[%s6368_s1 + $0x540] sm:$0xff]  }
  0x9a   : > { %4354 = vmatpush3.bf16.msra.mxu0 %v4817_v54  ;;  %v504_v54 = vpack.c.bf16 %v312_v53, %v280_v52  ;;  %v4861_v53 = vld [vmem:[%s6368_s1 + $0x508] sm:$0xff]  }
  0x9b   : > { %4394 = vmatpush3.bf16.msra.mxu1 %v4818_v55  ;;  %4355 = vmatprep.subr.bf16.mxu0 %v4819_v4  ;;  %v282_v55 = vld [vmem:[%s5072_s6 + $0x298] sm:$0xff]  ;;  %v4847_v4 = vld [vmem:[%s6368_s1 + $0x560] sm:$0xff]  }
  0x9c   : > { %4395 = vmatprep.subr.bf16.mxu1 %v4820_v5  ;;  %v506_v58 = vpack.c.bf16 %v314_v56, %v282_v55  ;;  %v4848_v5 = vld [vmem:[%s6368_s1 + $0x5e0] sm:$0xff]   ;;  %v4862_v55 = vld [vmem:[%s6368_s1 + $0x588] sm:$0xff]  }
  0x9d   : > { %3077 = vmatmul.mubr.bf16.gmra.mxu0 %v531_v2  ;;  %v4845_v2 = vld [vmem:[%s6368_s1 + $0x528] sm:$0xff]  }
  0x9e   : > { %3142 = vmatmul.mubr.bf16.gmra.mxu1 %v533_v3  ;;  %4356 = vmatpush3.bf16.msra.mxu0 %v4821_v6  ;;  %v4846_v3 = vld [vmem:[%s6368_s1 + $0x5a8] sm:$0xff]   ;;  %v4849_v6 = vld [vmem:[%s6368_s1 + $0x520] sm:$0xff]  }
  0x9f   : > { %4396 = vmatpush3.bf16.msra.mxu1 %v4822_v7  ;;  %4357 = vmatprep.subr.bf16.mxu0 %v4823_v8  ;;  %v4850_v7 = vld [vmem:[%s6368_s1 + $0x5a0] sm:$0xff]   ;;  %v344_v8 = vld [vmem:[%s5072_s6 + $0x488] sm:$0xff] }
  0xa0   : > { %4397 = vmatprep.subr.bf16.mxu1 %v4824_v9  ;;  %3084 = vmatprep.mubr.bf16.mxu0 %v564_v15  ;;  %v376_v9 = vld [vmem:[%s5072_s6 + $0x588] sm:$0xff] }
  0xa1   : > { %3149 = vmatprep.mubr.bf16.mxu1 %v566_v19  ;;  %v537_v19 = vpack.c.bf16 %v377_v18, %v345_v17  ;;  %v4868_v17 = vld [vmem:[%s6368_s1 + $0x6f8] sm:$0xff]  }
  0xa2   : > { %4358 = vmatpush3.bf16.msra.mxu0 %v4825_v10  ;;  %v346_v10 = vld [vmem:[%s5072_s6 + $0x498] sm:$0xff] }
  0xa3   : > { %4398 = vmatpush3.bf16.msra.mxu1 %v4826_v11  ;;  %4359 = vmatprep.subr.bf16.mxu0 %v4827_v24  ;;  %v536_v11 = vpack.c.bf16 %v376_v9, %v344_v8  ;;  %v538_v15 = vpack.c.bf16 %v378_v12, %v346_v10  ;;  %v221_v12 = vld [vmem:[%s5072_s6 + $0xb0] sm:$0xff]  ;;  %v4869_v18 = vld [vmem:[%s6368_s1 + $0x638] sm:$0xff]  }
  0xa4   : > { %4399 = vmatprep.subr.bf16.mxu1 %v4828_v25  ;;  %v4854_v25 = vld [vmem:[%s6368_s1 + $0x598] sm:$0xff]  }
  0xa5   : > { %3085 = vmatmul.mubr.bf16.gmra.mxu0 %v563_v20  ;;  %v4851_v20 = vld [vmem:[%s6368_s1 + $0x558] sm:$0xff]  }
  0xa6   : > { %3150 = vmatmul.mubr.bf16.gmra.mxu1 %v565_v23  ;;  %4360 = vmatpush3.bf16.msra.mxu0 %v4829_v26  ;;  %v4853_v23 = vld [vmem:[%s6368_s1 + $0x518] sm:$0xff]  }
  0xa7   : > { %4400 = vmatpush3.bf16.msra.mxu1 %v4830_v27  ;;  %4361 = vmatprep.subr.bf16.mxu0 %v4831_v28  ;;  %v4855_v27 = vld [vmem:[%s6368_s1 + $0x550] sm:$0xff]  }
  0xa8   : > { %4401 = vmatprep.subr.bf16.mxu1 %v4832_v29  ;;  %3190 = vmatprep.mubr.bf16.mxu0 %v472_v36  ;;  %v408_v36 = vld [vmem:[%s5072_s6 + $0x688] sm:$0xff] }
  0xa9   : > { %3255 = vmatprep.mubr.bf16.mxu1 %v474_v37  ;;  %v440_v37 = vld [vmem:[%s5072_s6 + $0x788] sm:$0xff] }
  0xaa   : > { %4362 = vmatpush3.bf16.msra.mxu0 %v4833_v30  ;;  %v4856_v30 = vld [vmem:[%s6368_s1 + $0x5d0] sm:$0xff]  }
  0xab   : > { %4402 = vmatpush3.bf16.msra.mxu1 %v4834_v31  ;;  %4427 = vmatprep.subr.bf16.mxu0 %v4835_v44  ;;  %v439_v44 = vld [vmem:[%s5072_s6 + $0x780] sm:$0xff] }
  0xac   : > { %4467 = vmatprep.subr.bf16.mxu1 %v4836_v45  ;;  %v409_v45 = vld [vmem:[%s5072_s6 + $0x690] sm:$0xff] }
  0xad   : > { %3191 = vmatmul.mubr.bf16.vlgmr.msra.gmra.mxu0 %v471_v41  ;;  %v568_v41 = vpack.c.bf16 %v440_v37, %v408_v36  ;;  %v284_v36 = vld [vmem:[%s5072_s6 + $0x2a8] sm:$0xff] }
  0xae   : > { %3256 = vmatmul.mubr.bf16.vlgmr.msra.gmra.mxu1 %v473_v43  ;;  %4428 = vmatpush3.bf16.msra.mxu0 %v4837_v46  ;;  %v407_v43 = vld [vmem:[%s5072_s6 + $0x680] sm:$0xff]  ;;  %v316_v37 = vld [vmem:[%s5072_s6 + $0x3a8] sm:$0xff] }
  0xaf   : > { %4468 = vmatpush3.bf16.msra.mxu1 %v4838_v47  ;;  %4429 = vmatprep.subr.bf16.mxu0 %v4839_v48  ;;  %v567_v47 = vpack.c.bf16 %v439_v44, %v407_v43  ;;  %v441_v48 = vld [vmem:[%s5072_s6 + $0x790] sm:$0xff]  ;;  %v283_v43 = vld [vmem:[%s5072_s6 + $0x2a0] sm:$0xff] }
  0xb0   : > { %4469 = vmatprep.subr.bf16.mxu1 %v4840_v49  ;;  %3198 = vmatprep.mubr.bf16.mxu0 %v504_v54  ;;  %v569_v49 = vpack.c.bf16 %v441_v48, %v409_v45  ;;  %v315_v44 = vld [vmem:[%s5072_s6 + $0x3a0] sm:$0xff] }
  0xb1   : > { %3263 = vmatprep.mubr.bf16.mxu1 %v506_v58  ;;  %v507_v48 = vpack.c.bf16 %v315_v44, %v283_v43  ;;  %v4888_v44 = vld [vmem:[%s6368_s1 + $0x6d0] sm:$0xff]  }
  0xb2   : > { %4430 = vmatpush3.bf16.msra.mxu0 %v4841_v50  ;;  %v4859_v50 = vld [vmem:[%s6368_s1 + $0x548] sm:$0xff]  }
  0xb3   : > { %4470 = vmatpush3.bf16.msra.mxu1 %v4842_v51  ;;  %4431 = vmatprep.subr.bf16.mxu0 %v4843_v0  ;;  %v4860_v51 = vld [vmem:[%s6368_s1 + $0x5c8] sm:$0xff]  }
  0xb4   : > { %4471 = vmatprep.subr.bf16.mxu1 %v4844_v1  ;;  %v4866_v1 = vld [vmem:[%s6368_s1 + $0x580] sm:$0xff]  }
  0xb5   : > { %3199 = vmatmul.mubr.bf16.gmra.mxu0 %v503_v62 }
  0xb6   : > { %3264 = vmatmul.mubr.bf16.gmra.mxu1 %v505_v63  ;;  %4432 = vmatpush3.bf16.msra.mxu0 %v4845_v2  ;;  %v4865_v63 = vld [vmem:[%s6368_s1 + $0x500] sm:$0xff]   ;;  %v220_v2 = vld [vmem:[%s5072_s6 + $0xa8] sm:$0xff] }
  0xb7   : > { %4472 = vmatpush3.bf16.msra.mxu1 %v4846_v3  ;;  %4433 = vmatprep.subr.bf16.mxu0 %v4847_v4  ;;  %v252_v3 = vld [vmem:[%s5072_s6 + $0x1a8] sm:$0xff] }
  0xb8   : > { %4473 = vmatprep.subr.bf16.mxu1 %v4848_v5  ;;  %3206 = vmatprep.mubr.bf16.mxu0 %v536_v11  ;;  %v476_v4 = vpack.c.bf16 %v252_v3, %v220_v2  ;;  %v222_v5 = vld [vmem:[%s5072_s6 + $0xb8] sm:$0xff]  ;;  %v251_v11 = vld [vmem:[%s5072_s6 + $0x1a0] sm:$0xff] }
  0xb9   : > { %3271 = vmatprep.mubr.bf16.mxu1 %v538_v15  ;;  %v477_v15 = vpack.c.bf16 %v253_v13, %v221_v12  ;;  %v4880_v2 = vld [vmem:[%s6368_s1 + $0x6e0] sm:$0xff]   ;;  %v350_v12 = vld [vmem:[%s5072_s6 + $0x4b8] sm:$0xff] }
  0xba   : > { %4434 = vmatpush3.bf16.msra.mxu0 %v4849_v6  ;;  %v254_v6 = vld [vmem:[%s5072_s6 + $0x1b8] sm:$0xff] }
  0xbb   : > { %4474 = vmatpush3.bf16.msra.mxu1 %v4850_v7  ;;  %4435 = vmatprep.subr.bf16.mxu0 %v4851_v20  ;;  %v219_v7 = vld [vmem:[%s5072_s6 + $0xa0] sm:$0xff]  ;;  %v478_v10 = vpack.c.bf16 %v254_v6, %v222_v5  ;;  %v382_v13 = vld [vmem:[%s5072_s6 + $0x5b8] sm:$0xff] }
  0xbc   : > { %4475 = vmatprep.subr.bf16.mxu1 %v4852_v21  ;;  %v475_v14 = vpack.c.bf16 %v251_v11, %v219_v7  ;;  %v4870_v21 = vld [vmem:[%s6368_s1 + $0x6b8] sm:$0xff]   ;;  %v4881_v5 = vld [vmem:[%s6368_s1 + $0x620] sm:$0xff]   ;;  %v380_v11 = vld [vmem:[%s5072_s6 + $0x5a8] sm:$0xff] }
  0xbd   : > { %3207 = vmatmul.mubr.bf16.gmra.mxu0 %v535_v16  ;;  %v4867_v16 = vld [vmem:[%s6368_s1 + $0x678] sm:$0xff]   ;;  %v4882_v7 = vld [vmem:[%s6368_s1 + $0x6a0] sm:$0xff]  }
  0xbe   : > { %3272 = vmatmul.mubr.bf16.gmra.mxu1 %v537_v19  ;;  %4436 = vmatpush3.bf16.msra.mxu0 %v4853_v23 }
  0xbf   : > { %4476 = vmatpush3.bf16.msra.mxu1 %v4854_v25  ;;  %4437 = vmatprep.subr.bf16.mxu0 %v4855_v27  ;;  %v4872_v25 = vld [vmem:[%s6368_s1 + $0x6f0] sm:$0xff]  }
  0xc0   : > { %4477 = vmatprep.subr.bf16.mxu1 %v4856_v30  ;;  %3214 = vmatprep.mubr.bf16.mxu0 %v568_v41  ;;  %v508_v41 = vpack.c.bf16 %v316_v37, %v284_v36  ;;  %v4886_v37 = vld [vmem:[%s6368_s1 + $0x698] sm:$0xff]  }
  0xc1   : > { %3279 = vmatprep.mubr.bf16.mxu1 %v570_v42  ;;  %v318_v42 = vld [vmem:[%s5072_s6 + $0x3b8] sm:$0xff] }
  0xc2   : > { %4438 = vmatpush3.bf16.msra.mxu0 %v4857_v33 }
  0xc3   : > { %4478 = vmatpush3.bf16.msra.mxu1 %v4858_v35  ;;  %4439 = vmatprep.subr.bf16.mxu0 %v4859_v50  ;;  %v4874_v35 = vld [vmem:[%s6368_s1 + $0x6b0] sm:$0xff]  }
  0xc4   : > { %4479 = vmatprep.subr.bf16.mxu1 %v4860_v51  ;;  %v317_v50 = vld [vmem:[%s5072_s6 + $0x3b0] sm:$0xff] }
  0xc5   : > { %3215 = vmatmul.mubr.bf16.gmra.mxu0 %v567_v47  ;;  %v510_v47 = vpack.c.bf16 %v318_v42, %v286_v38 }
  0xc6   : > { %3280 = vmatmul.mubr.bf16.gmra.mxu1 %v569_v49  ;;  %4440 = vmatpush3.bf16.msra.mxu0 %v4861_v53  ;;  %v285_v49 = vld [vmem:[%s5072_s6 + $0x2b0] sm:$0xff]  ;;  %v4876_v53 = vld [vmem:[%s6368_s1 + $0x6e8] sm:$0xff]  }
  0xc7   : > { %4480 = vmatpush3.bf16.msra.mxu1 %v4862_v55  ;;  %4441 = vmatprep.subr.bf16.mxu0 %v4863_v57  ;;  %v509_v51 = vpack.c.bf16 %v317_v50, %v285_v49  ;;  %v4877_v55 = vld [vmem:[%s6368_s1 + $0x628] sm:$0xff]   ;;  %v4889_v49 = vld [vmem:[%s6368_s1 + $0x610] sm:$0xff]  }
  0xc8   : > { %4481 = vmatprep.subr.bf16.mxu1 %v4864_v60  ;;  %3320 = vmatprep.mubr.bf16.mxu0 %v476_v4  ;;  %v4878_v57 = vld [vmem:[%s6368_s1 + $0x6a8] sm:$0xff]   ;;  %v4879_v60 = vld [vmem:[%s6368_s1 + $0x660] sm:$0xff]  }
  0xc9   : > { %3385 = vmatprep.mubr.bf16.mxu1 %v478_v10  ;;  %v348_v10 = vld [vmem:[%s5072_s6 + $0x4a8] sm:$0xff] }
  0xca   : > { %4442 = vmatpush3.bf16.msra.mxu0 %v4865_v63 }
  0xcb   : > { %4482 = vmatpush3.bf16.msra.mxu1 %v4866_v1  ;;  %4507 = vmatprep.subr.bf16.mxu0 %v4867_v16  ;;  %v542_v16 = vpack.c.bf16 %v382_v13, %v350_v12 }
  0xcc   : > { %4547 = vmatprep.subr.bf16.mxu1 %v4868_v17  ;;  %v347_v17 = vld [vmem:[%s5072_s6 + $0x4a0] sm:$0xff] }
  0xcd   : > { %3321 = vmatmul.mubr.bf16.vlgmr.msra.gmra.mxu0 %v475_v14 }
  0xce   : > { %3386 = vmatmul.mubr.bf16.vlgmr.msra.gmra.mxu1 %v477_v15  ;;  %4508 = vmatpush3.bf16.msra.mxu0 %v4869_v18  ;;  %v540_v15 = vpack.c.bf16 %v380_v11, %v348_v10  ;;  %v379_v18 = vld [vmem:[%s5072_s6 + $0x5a0] sm:$0xff]  ;;  %v445_v10 = vld [vmem:[%s5072_s6 + $0x7b0] sm:$0xff] }
  0xcf   : > { %4548 = vmatpush3.bf16.msra.mxu1 %v4870_v21  ;;  %3328 = vmatprep.mubr.bf16.mxu0 %v508_v41  ;;  %v539_v21 = vpack.c.bf16 %v379_v18, %v347_v17  ;;  %v4887_v41 = vld [vmem:[%s6368_s1 + $0x650] sm:$0xff]   ;;  %v4893_v17 = vld [vmem:[%s6368_s1 + $0x608] sm:$0xff]  }
  0xd0   : > { %4549 = vmatprep.subr.bf16.mxu1 %v4872_v25  ;;  %3393 = vmatprep.mubr.bf16.mxu1 %v510_v47  ;;  %v4884_v25 = vld [vmem:[%s6368_s1 + $0x6d8] sm:$0xff]  }
  0xd3   : > { %4550 = vmatpush3.bf16.msra.mxu1 %v4874_v35  ;;  %v4885_v35 = vld [vmem:[%s6368_s1 + $0x618] sm:$0xff]  }
  0xd4   : > { %4551 = vmatprep.subr.bf16.mxu1 %v4876_v53  ;;  %v444_v53 = vld [vmem:[%s5072_s6 + $0x7a8] sm:$0xff] }
  0xd5   : > { %3329 = vmatmul.mubr.bf16.gmra.mxu0 %v507_v48 }
  0xd6   : > { %3394 = vmatmul.mubr.bf16.gmra.mxu1 %v509_v51  ;;  %3336 = vmatprep.mubr.bf16.mxu0 %v540_v15  ;;  %v4890_v51 = vld [vmem:[%s6368_s1 + $0x690] sm:$0xff]   ;;  %v4891_v15 = vld [vmem:[%s6368_s1 + $0x648] sm:$0xff]  }
  0xd7   : > { %4552 = vmatpush3.bf16.msra.mxu1 %v4878_v57  ;;  %3401 = vmatprep.mubr.bf16.mxu1 %v542_v16  ;;  %v446_v57 = vld [vmem:[%s5072_s6 + $0x7b8] sm:$0xff]  ;;  %v4892_v16 = vld [vmem:[%s6368_s1 + $0x6c8] sm:$0xff]  }
  0xd8   : > { %4553 = vmatprep.subr.bf16.mxu1 %v4880_v2 }
  0xdb   : > { %4554 = vmatpush3.bf16.msra.mxu1 %v4882_v7  ;;  %v413_v7 = vld [vmem:[%s5072_s6 + $0x6b0] sm:$0xff] }
  0xdc   : > { %4555 = vmatprep.subr.bf16.mxu1 %v4884_v25  ;;  %v573_v13 = vpack.c.bf16 %v445_v10, %v413_v7  ;;  %v4896_v25 = vld [vmem:[%s6368_s1 + $0x6c0] sm:$0xff]   ;;  %v4899_v7 = vld [vmem:[%s6368_s1 + $0x778] sm:$0xff]  }
  0xdd   : > { %3337 = vmatmul.mubr.bf16.gmra.mxu0 %v539_v21  ;;  %v4894_v21 = vld [vmem:[%s6368_s1 + $0x688] sm:$0xff]  }
  0xdf   : > { %4556 = vmatpush3.bf16.msra.mxu1 %v4886_v37 }
  0xe0   : > { %4557 = vmatprep.subr.bf16.mxu1 %v4888_v44  ;;  %v256_v44 = vld [vmem:[%s5072_s6 + $0x1c8] sm:$0xff] }
  0xe3   : > { %4558 = vmatpush3.bf16.msra.mxu1 %v4890_v51 }
  0xe4   : > { %4559 = vmatprep.subr.bf16.mxu1 %v4892_v16 }
  0xe7   : > { %4560 = vmatpush3.bf16.msra.mxu1 %v4894_v21  ;;  %v4903_v21 = vld [vmem:[%s6368_s1 + $0x770] sm:$0xff]  }
  0xe8   : > { %4561 = vmatprep.subr.bf16.mxu1 %v4896_v25 }
  0xed   : > { %v4043_v22 = vpop.f32.mrf.mxu0 }
  0xee   : > { %v4083_v24 = vpop.f32.mrf.mxu1 }
  0xef   : > { %v4044_v26 = vpop.f32.mrf.mxu0 }
  0xf0   : > { %v5679_v28 = vadd.f32 %v4044_v26, %v4043_v22  ;;  %v4084_v29 = vpop.f32.mrf.mxu1  ;;  %v4871_v22 = vld [vmem:[%s6368_s1 + $0x670] sm:$0xff]  }
  0xf1   : > { %v5684_v31 = vadd.f32 %v4084_v29, %v4083_v24  ;;  %v5686_v32 = vpop.f32.mrf.mxu0  ;;  %4509 = vmatprep.subr.bf16.mxu0 %v4871_v22  ;;  %v4873_v29 = vld [vmem:[%s6368_s1 + $0x630] sm:$0xff]  }
  0xf2   : > { %v5691_v34 = vpop.f32.mrf.mxu1  ;;  %4510 = vmatpush3.bf16.msra.mxu0 %v4873_v29  ;;  %v381_v22 = vld [vmem:[%s5072_s6 + $0x5b0] sm:$0xff] }
  0xf3   : > { %v5700_v40 = vpop.f32.mrf.mxu0 }
  0xf4   : > { %v5705_v46 = vpop.f32.mrf.mxu1  ;;  %v4048_v10 = vadd.f32 %v5700_v40, %v5686_v32  ;;  %v4901_v32 = vld [vmem:[%s6368_s1 + $0x738] sm:$0xff]  }
  0xf5   : > { %v4049_v52 = vpop.f32.mrf.mxu0 }
  0xf6   : > { %v4089_v54 = vpop.f32.mrf.mxu1 }
  0xf7   : > { %v4050_v56 = vpop.f32.mrf.mxu0 }
  0xf8   : > { %v5723_v58 = vadd.f32 %v4050_v56, %v4049_v52  ;;  %v4090_v59 = vpop.f32.mrf.mxu1  ;;  %v4875_v52 = vld [vmem:[%s6368_s1 + $0x668] sm:$0xff]  }
  0xf9   : > { %v5728_v61 = vadd.f32 %v4090_v59, %v4089_v54  ;;  %v5730_v62 = vpop.f32.mrf.mxu0  ;;  %4511 = vmatprep.subr.bf16.mxu0 %v4875_v52  ;;  %v412_v52 = vld [vmem:[%s5072_s6 + $0x6a8] sm:$0xff] }
  0xfa   : > { %v5735_v0 = vpop.f32.mrf.mxu1  ;;  %4512 = vmatpush3.bf16.msra.mxu0 %v4877_v55  ;;  %v572_v55 = vpack.c.bf16 %v444_v53, %v412_v52  ;;  %v258_v52 = vld [vmem:[%s5072_s6 + $0x1d8] sm:$0xff]  ;;  %v223_v53 = vld [vmem:[%s5072_s6 + $0xc0] sm:$0xff] }
  0xfb   : > { %v5745_v8 = vpop.f32.mrf.mxu0  ;;  %4513 = vmatprep.subr.bf16.mxu0 %v4879_v60 }
  0xfc   : > { %v5747_v9 = vpop.f32.mrf.mxu1  ;;  %3344 = vmatprep.mubr.bf16.mxu0 %v572_v55 }
  0xfd   : > { %v4055_v19 = vpop.f32.mrf.mxu0 }
  0xfe   : > { %v4095_v20 = vpop.f32.mrf.mxu1  ;;  %4514 = vmatpush3.bf16.msra.mxu0 %v4881_v5  ;;  %v443_v5 = vld [vmem:[%s5072_s6 + $0x7a0] sm:$0xff] }
  0xff   : > { %v4056_v23 = vpop.f32.mrf.mxu0 }
 0x100   : > { %v4096_v24 = vpop.f32.mrf.mxu1  ;;  %v5770_v26 = vadd.f32 %v4056_v23, %v4055_v19  ;;  %v349_v19 = vld [vmem:[%s5072_s6 + $0x4b0] sm:$0xff] }
 0x101   : > { %v5772_v27 = vadd.f32 %v4096_v24, %v4095_v20  ;;  %v5777_v30 = vpop.f32.mrf.mxu0  ;;  %v541_v23 = vpack.c.bf16 %v381_v22, %v349_v19  ;;  %v4883_v24 = vld [vmem:[%s6368_s1 + $0x658] sm:$0xff]   ;;  %v4895_v22 = vld [vmem:[%s6368_s1 + $0x640] sm:$0xff]  }
 0x102   : > { %v5779_v33 = vpop.f32.mrf.mxu1  ;;  %4515 = vmatprep.subr.bf16.mxu0 %v4883_v24 }
 0x103   : > { %v5787_v39 = vpop.f32.mrf.mxu0  ;;  %3402 = vmatmul.mubr.bf16.gmra.mxu1 %v541_v23  ;;  %4516 = vmatpush3.bf16.msra.mxu0 %v4885_v35 }
 0x104   : > { %v5792_v45 = vpop.f32.mrf.mxu1  ;;  %4517 = vmatprep.subr.bf16.mxu0 %v4887_v41  ;;  %v4898_v41 = vld [vmem:[%s6368_s1 + $0x680] sm:$0xff]  }
 0x105   : > { %v4061_v54 = vpop.f32.mrf.mxu0  ;;  %4562 = vmatpush3.bf16.msra.mxu1 %v4898_v41 }
 0x106   : > { %v4101_v56 = vpop.f32.mrf.mxu1 }
 0x107   : > { %v4062_v59 = vpop.f32.mrf.mxu0  ;;  %4518 = vmatpush3.bf16.msra.mxu0 %v4889_v49 }
 0x108   : > { %v5811_v63 = vadd.f32 %v4062_v59, %v4061_v54  ;;  %v4102_v1 = vpop.f32.mrf.mxu1  ;;  %v411_v59 = vld [vmem:[%s5072_s6 + $0x6a0] sm:$0xff]  ;;  %4519 = vmatprep.subr.bf16.mxu0 %v4891_v15  ;;  %v4060_v15 = vadd.f32 %v5787_v39, %v5777_v30  ;;  %v4088_v30 = vadd.f32 %v5705_v46, %v5691_v34  ;;  %v4094_v39 = vadd.f32 %v5747_v9, %v5735_v0  ;;  %v4904_v0 = vld [vmem:[%s6368_s1 + $0x7f0] sm:$0xff]  }
 0x109   : > { %v5816_v3 = vadd.f32 %v4102_v1, %v4101_v56  ;;  %v5818_v4 = vpop.f32.mrf.mxu0  ;;  %v414_v56 = vld [vmem:[%s5072_s6 + $0x6b8] sm:$0xff]  ;;  %v571_v12 = vpack.c.bf16 %v443_v5, %v411_v59 }
 0x10a   : > { %v5823_v6 = vpop.f32.mrf.mxu1  ;;  %v574_v2 = vpack.c.bf16 %v446_v57, %v414_v56 }
 0x10b   : > { %v5832_v14 = vpop.f32.mrf.mxu0  ;;  %3345 = vmatmul.mubr.bf16.gmra.mxu0 %v571_v12  ;;  %v4054_v12 = vadd.f32 %v5745_v8, %v5730_v62  ;;  %v4902_v62 = vld [vmem:[%s6368_s1 + $0x7b8] sm:$0xff]   ;;  %v3766_v8 = vld [vmem:[%s6369_s2] ss:$0 sm:$0xff] }
 0x10c   : > { %v5837_v20 = vpop.f32.mrf.mxu1  ;;  %3409 = vmatprep.mubr.bf16.mxu1 %v574_v2  ;;  %4520 = vmatpush3.bf16.msra.mxu0 %v4893_v17  ;;  %v257_v2 = vld [vmem:[%s5072_s6 + $0x1d0] sm:$0xff]  ;;  %v4066_v16 = vadd.f32 %v5832_v14, %v5818_v4  ;;  %v4100_v4 = vadd.f32 %v5792_v45, %v5779_v33  ;;  %v2681_v34 = vadd.f32 %v5723_v58, %v3766_v8 }
 0x10d   : > { %v4123_v29 = vpop.f32.mrf.mxu0  ;;  %3410 = vmatmul.mubr.bf16.gmra.mxu1 %v573_v13  ;;  %4521 = vmatprep.subr.bf16.mxu0 %v4895_v22  ;;  %v4900_v13 = vld [vmem:[%s6368_s1 + $0x7f8] sm:$0xff]   ;;  %v4106_v14 = vadd.f32 %v5837_v20, %v5823_v6  ;;  %v2676_v22 = vadd.f32 %v4048_v10, %v3766_v8  ;;  %v2684_v46 = vadd.f32 %v4054_v12, %v3766_v8  ;;  %v4905_v58 = vld [vmem:[%s6368_s1 + $0x730] sm:$0xff]  }
 0x10e   : > { %v4163_v36 = vpop.f32.mrf.mxu1  ;;  %4627 = vmatprep.subr.bf16.mxu1 %v4900_v13  ;;  %v2689_v9 = vadd.f32 %v5770_v26, %v3766_v8  ;;  %v2692_v33 = vadd.f32 %v4060_v15, %v3766_v8  ;;  %v2697_v45 = vadd.f32 %v5811_v63, %v3766_v8  ;;  %v2746_v25 = vadd.f32 %v5728_v61, %v2681_v34  ;;  %v4906_v63 = vld [vmem:[%s6368_s1 + $0x7b0] sm:$0xff]   ;;  %v288_v61 = vld [vmem:[%s5072_s6 + $0x2c8] sm:$0xff] }
 0x10f   : > { %v4124_v38 = vpop.f32.mrf.mxu0  ;;  %v289_v10 = vld [vmem:[%s5072_s6 + $0x2d0] sm:$0xff] }
 0x110   : > { %v5855_v42 = vadd.f32 %v4124_v38, %v4123_v29  ;;  %v4164_v43 = vpop.f32.mrf.mxu1 }
 0x111   : > { %v5860_v47 = vadd.f32 %v4164_v43, %v4163_v36  ;;  %v4126_v48 = vpop.f32.mrf.mxu0  ;;  %v4897_v36 = vld [vmem:[%s6368_s1 + $0x600] sm:$0xff]   ;;  %v224_v43 = vld [vmem:[%s5072_s6 + $0xc8] sm:$0xff] }
 0x112   : > { %v4166_v50 = vpop.f32.mrf.mxu1  ;;  %4522 = vmatpush3.bf16.msra.mxu0 %v4897_v36  ;;  %v480_v51 = vpack.c.bf16 %v256_v44, %v224_v43  ;;  %v2749_v36 = vadd.f32 %v4094_v39, %v2684_v46  ;;  %v320_v44 = vld [vmem:[%s5072_s6 + $0x3c8] sm:$0xff]  ;;  %v4911_v39 = vld [vmem:[%s6368_s1 + $0x760] sm:$0xff]  }
 0x113   : > { %v4127_v54 = vpop.f32.mrf.mxu0  ;;  %4587 = vmatprep.subr.bf16.mxu0 %v4899_v7 }
 0x114   : > { %v5873_v60 = vadd.f32 %v4127_v54, %v4126_v48  ;;  %v4167_v1 = vpop.f32.mrf.mxu1  ;;  %v226_v48 = vld [vmem:[%s5072_s6 + $0xd8] sm:$0xff]  ;;  %v255_v54 = vld [vmem:[%s5072_s6 + $0x1c0] sm:$0xff]  ;;  %3450 = vmatprep.mubr.bf16.mxu0 %v480_v51 }
 0x115   : > { %v5878_v11 = vadd.f32 %v4167_v1, %v4166_v50  ;;  %v4129_v18 = vpop.f32.mrf.mxu0  ;;  %v482_v57 = vpack.c.bf16 %v258_v52, %v226_v48  ;;  %v479_v59 = vpack.c.bf16 %v255_v54, %v223_v53  ;;  %v225_v1 = vld [vmem:[%s5072_s6 + $0xd0] sm:$0xff]  ;;  %v290_v48 = vld [vmem:[%s5072_s6 + $0x2d8] sm:$0xff]  ;;  %v512_v52 = vpack.c.bf16 %v320_v44, %v288_v61  ;;  %v287_v53 = vld [vmem:[%s5072_s6 + $0x2c0] sm:$0xff] }
 0x116   : > { %v4169_v19 = vpop.f32.mrf.mxu1  ;;  %v481_v5 = vpack.c.bf16 %v257_v2, %v225_v1  ;;  %v319_v54 = vld [vmem:[%s5072_s6 + $0x3c0] sm:$0xff]  ;;  %v4915_v44 = vld [vmem:[%s6368_s1 + $0x758] sm:$0xff]  }
 0x117   : > { %v4130_v23 = vpop.f32.mrf.mxu0  ;;  %3515 = vmatprep.mubr.bf16.mxu1 %v482_v57  ;;  %3451 = vmatmul.mubr.bf16.vlgmr.msra.gmra.mxu0 %v479_v59  ;;  %v511_v7 = vpack.c.bf16 %v319_v54, %v287_v53  ;;  %v4919_v53 = vld [vmem:[%s6368_s1 + $0x750] sm:$0xff]  }
 0x118   : > { %v4170_v24 = vpop.f32.mrf.mxu1  ;;  %v5898_v29 = vadd.f32 %v4130_v23, %v4129_v18  ;;  %3516 = vmatmul.mubr.bf16.vlgmr.msra.gmra.mxu1 %v481_v5  ;;  %4588 = vmatpush3.bf16.msra.mxu0 %v4901_v32 }
 0x119   : > { %v5900_v35 = vadd.f32 %v4170_v24, %v4169_v19  ;;  %v4132_v37 = vpop.f32.mrf.mxu0  ;;  %v2673_v19 = vadd.f32 %v5679_v28, %v3766_v8  ;;  %4628 = vmatpush3.bf16.msra.mxu1 %v4902_v62  ;;  %v2700_v28 = vadd.f32 %v4066_v16, %v3766_v8  ;;  %4589 = vmatprep.subr.bf16.mxu0 %v4903_v21  ;;  %v4910_v62 = vld [vmem:[%s6368_s1 + $0x7a8] sm:$0xff]  }
 0x11a   : > { %v4172_v38 = vpop.f32.mrf.mxu1  ;;  %v2741_v24 = vadd.f32 %v4088_v30, %v2676_v22  ;;  %4629 = vmatprep.subr.bf16.mxu1 %v4904_v0  ;;  %3458 = vmatprep.mubr.bf16.mxu0 %v512_v52  ;;  %v4913_v22 = vld [vmem:[%s6368_s1 + $0x720] sm:$0xff]   ;;  %v352_v0 = vld [vmem:[%s5072_s6 + $0x4c8] sm:$0xff] }
 0x11b   : > { %v4133_v49 = vpop.f32.mrf.mxu0  ;;  %v2738_v20 = vadd.f32 %v5684_v31, %v2673_v19  ;;  %v2754_v31 = vadd.f32 %v5772_v27, %v2689_v9  ;;  %v5971_v41 = vadd.f32 %v4106_v14, %v2700_v28  ;;  %v2811_v27 = vadd.f32 %v5898_v29, %v2746_v25  ;;  %v386_v28 = vld [vmem:[%s5072_s6 + $0x5d8] sm:$0xff] }
 0x11c   : > { %v4173_v50 = vpop.f32.mrf.mxu1  ;;  %v5914_v55 = vadd.f32 %v4133_v49, %v4132_v37  ;;  %v2757_v37 = vadd.f32 %v4100_v4, %v2692_v33  ;;  %4590 = vmatpush3.bf16.msra.mxu0 %v4905_v58  ;;  %v384_v33 = vld [vmem:[%s5072_s6 + $0x5c8] sm:$0xff] }
 0x11d   : > { %v5916_v56 = vadd.f32 %v4173_v50, %v4172_v38  ;;  %v4135_v17 = vpop.f32.mrf.mxu0  ;;  %v2762_v38 = vadd.f32 %v5816_v3, %v2697_v45  ;;  %v2803_v49 = vadd.f32 %v5855_v42, %v2738_v20  ;;  %v2806_v50 = vadd.f32 %v5873_v60, %v2741_v24  ;;  %4630 = vmatpush3.bf16.msra.mxu1 %v4906_v63  ;;  %v322_v3 = vld [vmem:[%s5072_s6 + $0x3d8] sm:$0xff]  ;;  %v321_v42 = vld [vmem:[%s5072_s6 + $0x3d0] sm:$0xff] }
 0x11e   : > { %v4175_v40 = vpop.f32.mrf.mxu1  ;;  %v2814_v51 = vadd.f32 %v5914_v55, %v2749_v36  ;;  %v514_v5 = vpack.c.bf16 %v322_v3, %v290_v48  ;;  %v513_v29 = vpack.c.bf16 %v321_v42, %v289_v10  ;;  %v4907_v55 = vld [vmem:[%s6368_s1 + $0x768] sm:$0xff]   ;;  %v5995_v13 = vadd.f32 %v5900_v35, %v2811_v27  ;;  %v354_v45 = vld [vmem:[%s5072_s6 + $0x4d8] sm:$0xff]  ;;  %v351_v36 = vld [vmem:[%s5072_s6 + $0x4c0] sm:$0xff] }
 0x11f   : > { %v4136_v18 = vpop.f32.mrf.mxu0  ;;  %v5986_v12 = vadd.f32 %v5860_v47, %v2803_v49  ;;  %v5989_v60 = vadd.f32 %v5878_v11, %v2806_v50  ;;  %3459 = vmatmul.mubr.bf16.gmra.mxu0 %v511_v7  ;;  %v4908_v47 = vld [vmem:[%s6368_s1 + $0x7e8] sm:$0xff]   ;;  %4591 = vmatprep.subr.bf16.mxu0 %v4907_v55  ;;  %v544_v24 = vpack.c.bf16 %v384_v33, %v352_v0  ;;  %v353_v63 = vld [vmem:[%s5072_s6 + $0x4d0] sm:$0xff]  ;;  %v4916_v48 = vld [vmem:[%s6368_s1 + $0x7d8] sm:$0xff]  }
 0x120   : > { %v4176_v23 = vpop.f32.mrf.mxu1  ;;  %v4137_v57 = vadd.f32 %v4136_v18, %v4135_v17  ;;  %v5998_v15 = vadd.f32 %v5916_v56, %v2814_v51  ;;  %3523 = vmatprep.mubr.bf16.mxu1 %v514_v5  ;;  %v4909_v35 = vld [vmem:[%s6368_s1 + $0x728] sm:$0xff]   ;;  %4631 = vmatprep.subr.bf16.mxu1 %v4908_v47  ;;  %v4912_v18 = vld [vmem:[%s6368_s1 + $0x7e0] sm:$0xff]   ;;  %v546_v25 = vpack.c.bf16 %v386_v28, %v354_v45  ;;  %v4918_v51 = vld [vmem:[%s6368_s1 + $0x798] sm:$0xff]  }
 0x121   : > { %v4138_v6 = vpop.f32.mrf.mxu0  ;;  %v4177_v59 = vadd.f32 %v4176_v23, %v4175_v40  ;;  %3524 = vmatmul.mubr.bf16.gmra.mxu1 %v513_v29  ;;  %4592 = vmatpush3.bf16.msra.mxu0 %v4909_v35  ;;  %v4914_v23 = vld [vmem:[%s6368_s1 + $0x7a0] sm:$0xff]   ;;  %v4921_v5 = vld [vmem:[%s6368_s1 + $0x710] sm:$0xff]   ;;  %v416_v42 = vld [vmem:[%s5072_s6 + $0x6c8] sm:$0xff] }
 0x122   : > { %v4178_v26 = vpop.f32.mrf.mxu1  ;;  %v2819_v16 = vadd.f32 %v4137_v57, %v2754_v31  ;;  %4632 = vmatpush3.bf16.msra.mxu1 %v4910_v62  ;;  %4593 = vmatprep.subr.bf16.mxu0 %v4911_v39  ;;  %v4922_v10 = vld [vmem:[%s6368_s1 + $0x790] sm:$0xff]   ;;  %v448_v29 = vld [vmem:[%s5072_s6 + $0x7c8] sm:$0xff]  ;;  %v4927_v33 = vld [vmem:[%s6368_s1 + $0x740] sm:$0xff]  }
 0x123   : > { %v4139_v43 = vpop.f32.mrf.mxu0  ;;  %4633 = vmatprep.subr.bf16.mxu1 %v4912_v18  ;;  %3466 = vmatprep.mubr.bf16.mxu0 %v544_v24  ;;  %v576_v47 = vpack.c.bf16 %v448_v29, %v416_v42  ;;  %v417_v39 = vld [vmem:[%s5072_s6 + $0x6d0] sm:$0xff] }
 0x124   : > { %v4140_v1 = vadd.f32 %v4139_v43, %v4138_v6  ;;  %v4179_v2 = vpop.f32.mrf.mxu1  ;;  %v6006_v40 = vadd.f32 %v4177_v59, %v2819_v16  ;;  %3531 = vmatprep.mubr.bf16.mxu1 %v546_v25  ;;  %v4920_v59 = vld [vmem:[%s6368_s1 + $0x7d0] sm:$0xff]   ;;  %v4929_v25 = vld [vmem:[%s6368_s1 + $0x700] sm:$0xff]  }
 0x125   : > { %v4180_v17 = vadd.f32 %v4179_v2, %v4178_v26  ;;  %v4141_v32 = vpop.f32.mrf.mxu0  ;;  %4594 = vmatpush3.bf16.msra.mxu0 %v4913_v22  ;;  %v383_v26 = vld [vmem:[%s5072_s6 + $0x5c0] sm:$0xff]  ;;  %v4924_v22 = vld [vmem:[%s6368_s1 + $0x7c8] sm:$0xff]  }
 0x126   : > { %v2822_v11 = vadd.f32 %v4140_v1, %v2757_v37  ;;  %v4181_v56 = vpop.f32.mrf.mxu1  ;;  %4634 = vmatpush3.bf16.msra.mxu1 %v4914_v23  ;;  %v543_v37 = vpack.c.bf16 %v383_v26, %v351_v36  ;;  %4595 = vmatprep.subr.bf16.mxu0 %v4915_v44 }
 0x127   : > { %v4142_v30 = vpop.f32.mrf.mxu0  ;;  %4635 = vmatprep.subr.bf16.mxu1 %v4916_v48 }
 0x128   : > { %v6011_v8 = vadd.f32 %v4180_v17, %v2822_v11  ;;  %v4143_v4 = vadd.f32 %v4142_v30, %v4141_v32  ;;  %v4182_v14 = vpop.f32.mrf.mxu1  ;;  %3467 = vmatmul.mubr.bf16.gmra.mxu0 %v543_v37  ;;  %v418_v11 = vld [vmem:[%s5072_s6 + $0x6d8] sm:$0xff]  ;;  %v415_v32 = vld [vmem:[%s5072_s6 + $0x6c0] sm:$0xff]  ;;  %v228_v37 = vld [vmem:[%s5072_s6 + $0xe8] sm:$0xff] }
 0x129   : > { %v4183_v19 = vadd.f32 %v4182_v14, %v4181_v56  ;;  %v4144_v21 = vpop.f32.mrf.mxu0  ;;  %v450_v17 = vld [vmem:[%s5072_s6 + $0x7d8] sm:$0xff]  ;;  %v447_v30 = vld [vmem:[%s5072_s6 + $0x7c0] sm:$0xff]  ;;  %3474 = vmatprep.mubr.bf16.mxu0 %v576_v47  ;;  %v293_v47 = vld [vmem:[%s5072_s6 + $0x2f0] sm:$0xff] }
 0x12a   : > { %v2827_v34 = vadd.f32 %v4143_v4, %v2762_v38  ;;  %v4184_v46 = vpop.f32.mrf.mxu1  ;;  %v385_v38 = vld [vmem:[%s5072_s6 + $0x5d0] sm:$0xff]  ;;  %4636 = vmatpush3.bf16.msra.mxu1 %v4918_v51  ;;  %v578_v62 = vpack.c.bf16 %v450_v17, %v418_v11  ;;  %v575_v14 = vpack.c.bf16 %v447_v30, %v415_v32  ;;  %v356_v32 = vld [vmem:[%s5072_s6 + $0x4e8] sm:$0xff]  ;;  %v390_v30 = vld [vmem:[%s5072_s6 + $0x5f8] sm:$0xff] }
 0x12b   : > { %v4145_v9 = vpop.f32.mrf.mxu0  ;;  %v545_v61 = vpack.c.bf16 %v385_v38, %v353_v63  ;;  %4637 = vmatprep.subr.bf16.mxu1 %v4920_v59  ;;  %v449_v4 = vld [vmem:[%s5072_s6 + $0x7d0] sm:$0xff]  ;;  %v4930_v63 = vld [vmem:[%s6368_s1 + $0x780] sm:$0xff]   ;;  %v260_v38 = vld [vmem:[%s5072_s6 + $0x1e8] sm:$0xff] }
 0x12c   : > { %v6029_v6 = vadd.f32 %v4183_v19, %v2827_v34  ;;  %v4146_v20 = vadd.f32 %v4145_v9, %v4144_v21  ;;  %v4185_v58 = vpop.f32.mrf.mxu1  ;;  %v577_v18 = vpack.c.bf16 %v449_v4, %v417_v39  ;;  %v4923_v19 = vld [vmem:[%s6368_s1 + $0x748] sm:$0xff]   ;;  %v484_v48 = vpack.c.bf16 %v260_v38, %v228_v37  ;;  %v325_v17 = vld [vmem:[%s5072_s6 + $0x3f0] sm:$0xff] }
 0x12d   : > { %v4186_v31 = vadd.f32 %v4185_v58, %v4184_v46  ;;  %v4203_v50 = vpop.f32.mrf.mxu0  ;;  %3532 = vmatmul.mubr.bf16.gmra.mxu1 %v545_v61  ;;  %v4925_v46 = vld [vmem:[%s6368_s1 + $0x708] sm:$0xff]  }
 0x12e   : > { %v2830_v43 = vadd.f32 %v4146_v20, %v5971_v41  ;;  %v4243_v27 = vpop.f32.mrf.mxu1  ;;  %v4917_v41 = vld [vmem:[%s6368_s1 + $0x718] sm:$0xff]   ;;  %4638 = vmatpush3.bf16.msra.mxu1 %v4922_v10  ;;  %3539 = vmatprep.mubr.bf16.mxu1 %v578_v62  ;;  %v4928_v20 = vld [vmem:[%s6368_s1 + $0x7c0] sm:$0xff]  }
 0x12f   : > { %v4204_v52 = vpop.f32.mrf.mxu0  ;;  %4596 = vmatpush3.bf16.msra.mxu0 %v4917_v41  ;;  %4639 = vmatprep.subr.bf16.mxu1 %v4924_v22  ;;  %v259_v41 = vld [vmem:[%s5072_s6 + $0x1e0] sm:$0xff]  ;;  %v358_v62 = vld [vmem:[%s5072_s6 + $0x4f8] sm:$0xff] }
 0x130   : > { %v6042_v49 = vadd.f32 %v4186_v31, %v2830_v43  ;;  %v4244_v3 = vpop.f32.mrf.mxu1  ;;  %v4205_v54 = vadd.f32 %v4204_v52, %v4203_v50  ;;  %4597 = vmatprep.subr.bf16.mxu0 %v4919_v53  ;;  %3475 = vmatmul.mubr.bf16.gmra.mxu0 %v575_v14  ;;  %v230_v43 = vld [vmem:[%s5072_s6 + $0xf8] sm:$0xff]  ;;  %v229_v53 = vld [vmem:[%s5072_s6 + $0xf0] sm:$0xff] }
 0x131   : > { %v4245_v57 = vadd.f32 %v4244_v3, %v4243_v27  ;;  %v4206_v1 = vpop.f32.mrf.mxu0  ;;  %v262_v50 = vld [vmem:[%s5072_s6 + $0x1f8] sm:$0xff]  ;;  %v227_v27 = vld [vmem:[%s5072_s6 + $0xe0] sm:$0xff]  ;;  %3580 = vmatprep.mubr.bf16.mxu0 %v484_v48 }
 0x132   : > { %v4246_v2 = vpop.f32.mrf.mxu1  ;;  %v2933_v7 = vadd.f32 %v4205_v54, %v5986_v12  ;;  %v486_v52 = vpack.c.bf16 %v262_v50, %v230_v43  ;;  %v483_v3 = vpack.c.bf16 %v259_v41, %v227_v27  ;;  %v261_v54 = vld [vmem:[%s5072_s6 + $0x1f0] sm:$0xff] }
 0x133   : > { %v4207_v55 = vpop.f32.mrf.mxu0  ;;  %4598 = vmatpush3.bf16.msra.mxu0 %v4921_v5  ;;  %v294_v5 = vld [vmem:[%s5072_s6 + $0x2f8] sm:$0xff] }
 0x134   : > { %v4247_v16 = vpop.f32.mrf.mxu1  ;;  %v6068_v35 = vadd.f32 %v4245_v57, %v2933_v7  ;;  %v4208_v12 = vadd.f32 %v4207_v55, %v4206_v1  ;;  %4599 = vmatprep.subr.bf16.mxu0 %v4923_v19  ;;  %v292_v57 = vld [vmem:[%s5072_s6 + $0x2e8] sm:$0xff]  ;;  %v485_v1 = vpack.c.bf16 %v261_v54, %v229_v53  ;;  %v326_v7 = vld [vmem:[%s5072_s6 + $0x3f8] sm:$0xff]  ;;  %v419_v54 = vld [vmem:[%s5072_s6 + $0x6e0] sm:$0xff] }
 0x135   : > { %v4248_v56 = vadd.f32 %v4247_v16, %v4246_v2  ;;  %v4209_v34 = vpop.f32.mrf.mxu0  ;;  %3540 = vmatmul.mubr.bf16.gmra.mxu1 %v577_v18  ;;  %v324_v2 = vld [vmem:[%s5072_s6 + $0x3e8] sm:$0xff]  ;;  %v518_v42 = vpack.c.bf16 %v326_v7, %v294_v5  ;;  %v291_v16 = vld [vmem:[%s5072_s6 + $0x2e0] sm:$0xff]  ;;  %v453_v5 = vld [vmem:[%s5072_s6 + $0x7f0] sm:$0xff] }
 0x136   : > { %v2936_v21 = vadd.f32 %v4208_v12, %v5989_v60  ;;  %v4249_v0 = vpop.f32.mrf.mxu1  ;;  %v4926_v60 = vld [vmem:[%s6368_s1 + $0x788] sm:$0xff]   ;;  %3645 = vmatprep.mubr.bf16.mxu1 %v486_v52  ;;  %v516_v10 = vpack.c.bf16 %v324_v2, %v292_v57  ;;  %v451_v57 = vld [vmem:[%s5072_s6 + $0x7e0] sm:$0xff]  ;;  %v421_v2 = vld [vmem:[%s5072_s6 + $0x6f0] sm:$0xff] }
 0x137   : > { %v4210_v9 = vpop.f32.mrf.mxu0  ;;  %4600 = vmatpush3.bf16.msra.mxu0 %v4925_v46  ;;  %4640 = vmatpush3.bf16.msra.mxu1 %v4926_v60  ;;  %v388_v12 = vld [vmem:[%s5072_s6 + $0x5e8] sm:$0xff] }
 0x138   : > { %v6083_v23 = vadd.f32 %v4248_v56, %v2936_v21  ;;  %v4211_v45 = vadd.f32 %v4210_v9, %v4209_v34  ;;  %v4250_v28 = vpop.f32.mrf.mxu1  ;;  %4601 = vmatprep.subr.bf16.mxu0 %v4927_v33  ;;  %4641 = vmatprep.subr.bf16.mxu1 %v4928_v20  ;;  %v517_v21 = vpack.c.bf16 %v325_v17, %v293_v47  ;;  %v355_v20 = vld [vmem:[%s5072_s6 + $0x4e0] sm:$0xff] }
 0x139   : > { %v4251_v58 = vadd.f32 %v4250_v28, %v4249_v0  ;;  %v4212_v24 = vpop.f32.mrf.mxu0  ;;  %v548_v22 = vpack.c.bf16 %v388_v12, %v356_v32  ;;  %v550_v0 = vpack.c.bf16 %v390_v30, %v358_v62 }
 0x13a   : > { %v2941_v36 = vadd.f32 %v4211_v45, %v5995_v13  ;;  %v4252_v26 = vpop.f32.mrf.mxu1 }
 0x13b   : > { %v4213_v31 = vpop.f32.mrf.mxu0  ;;  %4602 = vmatpush3.bf16.msra.mxu0 %v4929_v25  ;;  %4642 = vmatpush3.bf16.msra.mxu1 %v4930_v63  ;;  %v389_v25 = vld [vmem:[%s5072_s6 + $0x5f0] sm:$0xff]  ;;  %v422_v63 = vld [vmem:[%s5072_s6 + $0x6f8] sm:$0xff] }
 0x13c   : > { %v6104_v61 = vadd.f32 %v4251_v58, %v2941_v36  ;;  %v4214_v44 = vadd.f32 %v4213_v31, %v4212_v24  ;;  %v4253_v13 = vpop.f32.mrf.mxu1  ;;  %v387_v58 = vld [vmem:[%s5072_s6 + $0x5e0] sm:$0xff]  ;;  %v357_v24 = vld [vmem:[%s5072_s6 + $0x4f0] sm:$0xff]  ;;  %v420_v36 = vld [vmem:[%s5072_s6 + $0x6e8] sm:$0xff] }
 0x13d   : > { %v4254_v51 = vadd.f32 %v4253_v13, %v4252_v26  ;;  %v4215_v55 = vpop.f32.mrf.mxu0  ;;  %v452_v26 = vld [vmem:[%s5072_s6 + $0x7e8] sm:$0xff]  ;;  %v454_v31 = vld [vmem:[%s5072_s6 + $0x7f8] sm:$0xff]  ;;  %v549_v13 = vpack.c.bf16 %v389_v25, %v357_v24 }
 0x13e   : > { %v2944_v59 = vadd.f32 %v4214_v44, %v5998_v15  ;;  %3581 = vmatmul.mubr.bf16.vlgmr.msra.gmra.mxu0 %v483_v3  ;;  %3646 = vmatmul.mubr.bf16.vlgmr.msra.gmra.mxu1 %v485_v1  ;;  %v323_v15 = vld [vmem:[%s5072_s6 + $0x3e0] sm:$0xff]  ;;  %v4255_v11 = vpop.f32.mrf.mxu1  ;;  %v547_v44 = vpack.c.bf16 %v387_v58, %v355_v20  ;;  %v580_v48 = vpack.c.bf16 %v452_v26, %v420_v36  ;;  %s4026_s6 = sshll.u32 %s6405_s16, 6 }
 0x13f   : > { %3588 = vmatprep.mubr.bf16.mxu0 %v516_v10  ;;  %3653 = vmatprep.mubr.bf16.mxu1 %v518_v42  ;;  %v4216_v56 = vpop.f32.mrf.mxu0  ;;  %v515_v14 = vpack.c.bf16 %v323_v15, %v291_v16  ;;  %v581_v15 = vpack.c.bf16 %v453_v5, %v421_v2  ;;  %s6300_s29 = scalar_lea.vmem %s6371_s4, %s4026_s6 }
 0x140   : > { %v6116_v29 = vadd.f32 %v4254_v51, %v2944_v59  ;;  %v4217_v39 = vadd.f32 %v4216_v56, %v4215_v55  ;;  %v4256_v4 = vpop.f32.mrf.mxu1  ;;  %v579_v55 = vpack.c.bf16 %v451_v57, %v419_v54 }
 0x141   : > { %v4257_v18 = vadd.f32 %v4256_v4, %v4255_v11  ;;  %v4218_v19 = vpop.f32.mrf.mxu0 }
 0x142   : > { %v2949_v34 = vadd.f32 %v4217_v39, %v6006_v40  ;;  %v4258_v46 = vpop.f32.mrf.mxu1 }
 0x143   : > { %v4219_v60 = vpop.f32.mrf.mxu0 }
 0x144   : > { %v6127_v9 = vadd.f32 %v4257_v18, %v2949_v34  ;;  %v4220_v33 = vadd.f32 %v4219_v60, %v4218_v19  ;;  %v4259_v45 = vpop.f32.mrf.mxu1 }
 0x145   : > { %v4260_v28 = vadd.f32 %v4259_v45, %v4258_v46  ;;  %v4221_v38 = vpop.f32.mrf.mxu0 }
 0x146   : > { %3589 = vmatmul.mubr.bf16.gmra.mxu0 %v515_v14  ;;  %3654 = vmatmul.mubr.bf16.gmra.mxu1 %v517_v21  ;;  %v2952_v40 = vadd.f32 %v4220_v33, %v6011_v8  ;;  %v4261_v43 = vpop.f32.mrf.mxu1  ;;  %v582_v8 = vpack.c.bf16 %v454_v31, %v422_v63 }
 0x147   : > { %3596 = vmatprep.mubr.bf16.mxu0 %v548_v22  ;;  %3661 = vmatprep.mubr.bf16.mxu1 %v550_v0  ;;  %v4222_v50 = vpop.f32.mrf.mxu0 }
 0x148   : > { %v6138_v37 = vadd.f32 %v4260_v28, %v2952_v40  ;;  %v4262_v27 = vpop.f32.mrf.mxu1  ;;  %v4223_v41 = vadd.f32 %v4222_v50, %v4221_v38 }
 0x149   : > { %v4263_v51 = vadd.f32 %v4262_v27, %v4261_v43  ;;  %v4224_v52 = vpop.f32.mrf.mxu0 }
 0x14a   : > { %v4264_v3 = vpop.f32.mrf.mxu1  ;;  %v2957_v53 = vadd.f32 %v4223_v41, %v6029_v6 }
 0x14b   : > { %v4225_v59 = vpop.f32.mrf.mxu0 }
 0x14c   : > { %v4265_v1 = vpop.f32.mrf.mxu1  ;;  %v6145_v7 = vadd.f32 %v4263_v51, %v2957_v53  ;;  %v4226_v10 = vadd.f32 %v4225_v59, %v4224_v52 }
 0x14d   : > { %v4266_v42 = vadd.f32 %v4265_v1, %v4264_v3  ;;  %v4283_v47 = vpop.f32.mrf.mxu0 }
 0x14e   : > { %3597 = vmatmul.mubr.bf16.gmra.mxu0 %v547_v44  ;;  %3662 = vmatmul.mubr.bf16.gmra.mxu1 %v549_v13  ;;  %v2960_v16 = vadd.f32 %v4226_v10, %v6042_v49  ;;  %v4323_v6 = vpop.f32.mrf.mxu1 }
 0x14f   : > { %3604 = vmatprep.mubr.bf16.mxu0 %v580_v48  ;;  %3669 = vmatprep.mubr.bf16.mxu1 %v582_v8  ;;  %v4284_v17 = vpop.f32.mrf.mxu0 }
 0x150   : > { %v6148_v11 = vadd.f32 %v4266_v42, %v2960_v16  ;;  %v4285_v32 = vadd.f32 %v4284_v17, %v4283_v47  ;;  %v4324_v12 = vpop.f32.mrf.mxu1 }
 0x151   : > { %v4325_v56 = vadd.f32 %v4324_v12, %v4323_v6  ;;  %v4286_v62 = vpop.f32.mrf.mxu0 }
 0x152   : > { %v3063_v30 = vadd.f32 %v4285_v32, %v6068_v35  ;;  %v4326_v39 = vpop.f32.mrf.mxu1 }
 0x153   : > { %v4287_v4 = vpop.f32.mrf.mxu0 }
 0x154   : > { %v3128_v14 = vadd.f32 %v4325_v56, %v3063_v30  ;;  %v4288_v18 = vadd.f32 %v4287_v4, %v4286_v62  ;;  %v4327_v19 = vpop.f32.mrf.mxu1 }
 0x155   : > { %v4328_v49 = vadd.f32 %v4327_v19, %v4326_v39  ;;  %v4289_v34 = vpop.f32.mrf.mxu0 }
 0x156   : > { %3605 = vmatmul.mubr.bf16.gmra.mxu0 %v579_v55  ;;  %3670 = vmatmul.mubr.bf16.gmra.mxu1 %v581_v15  ;;  %v3066_v21 = vadd.f32 %v4288_v18, %v6083_v23  ;;  %v4329_v46 = vpop.f32.mrf.mxu1 }
 0x157   : > { %v4290_v0 = vpop.f32.mrf.mxu0 }
 0x158   : > { %v6152_v22 = vadd.f32 %v4328_v49, %v3066_v21  ;;  %v4291_v60 = vadd.f32 %v4290_v0, %v4289_v34  ;;  %v4330_v33 = vpop.f32.mrf.mxu1 }
 0x159   : > { %v4331_v45 = vadd.f32 %v4330_v33, %v4329_v46  ;;  %v4292_v28 = vpop.f32.mrf.mxu0 }
 0x15a   : > { %v3071_v20 = vadd.f32 %v4291_v60, %v6104_v61  ;;  %v4332_v35 = vpop.f32.mrf.mxu1 }
 0x15b   : > { %v4293_v58 = vpop.f32.mrf.mxu0 }
 0x15c   : > { %v3136_v24 = vadd.f32 %v4331_v45, %v3071_v20  ;;  %v4294_v40 = vadd.f32 %v4293_v58, %v4292_v28  ;;  %v4333_v25 = vpop.f32.mrf.mxu1 }
 0x15d   : > { %v4334_v36 = vadd.f32 %v4333_v25, %v4332_v35  ;;  %v4295_v63 = vpop.f32.mrf.mxu0 }
 0x15e   : > { %v3074_v26 = vadd.f32 %v4294_v40, %v6116_v29  ;;  %v4335_v31 = vpop.f32.mrf.mxu1 }
 0x15f   : > { %v4296_v38 = vpop.f32.mrf.mxu0 }
 0x160   : > { %v6156_v23 = vadd.f32 %v4334_v36, %v3074_v26  ;;  %v4336_v43 = vpop.f32.mrf.mxu1  ;;  %v4297_v44 = vadd.f32 %v4296_v38, %v4295_v63 }
 0x161   : > { %v4337_v13 = vadd.f32 %v4336_v43, %v4335_v31  ;;  %v4298_v48 = vpop.f32.mrf.mxu0 }
 0x162   : > { %v4338_v50 = vpop.f32.mrf.mxu1  ;;  %v3079_v61 = vadd.f32 %v4297_v44, %v6127_v9 }
 0x163   : > { %v4299_v27 = vpop.f32.mrf.mxu0 }
 0x164   : > { %v4339_v8 = vpop.f32.mrf.mxu1  ;;  %v3144_v41 = vadd.f32 %v4337_v13, %v3079_v61  ;;  %v4300_v51 = vadd.f32 %v4299_v27, %v4298_v48 }
 0x165   : > { %v4340_v52 = vadd.f32 %v4339_v8, %v4338_v50  ;;  %v4301_v29 = vpop.f32.mrf.mxu0 }
 0x166   : > { %v3082_v3 = vadd.f32 %v4300_v51, %v6138_v37  ;;  %v4341_v54 = vpop.f32.mrf.mxu1 }
 0x167   : > { %v4302_v57 = vpop.f32.mrf.mxu0 }
 0x168   : > { %v3147_v53 = vadd.f32 %v4340_v52, %v3082_v3  ;;  %v4303_v59 = vadd.f32 %v4302_v57, %v4301_v29  ;;  %v4342_v1 = vpop.f32.mrf.mxu1 }
 0x169   : > { %v4343_v2 = vadd.f32 %v4342_v1, %v4341_v54  ;;  %v4304_v5 = vpop.f32.mrf.mxu0 }
 0x16a   : > { %v3087_v10 = vadd.f32 %v4303_v59, %v6145_v7  ;;  %v4344_v42 = vpop.f32.mrf.mxu1 }
 0x16b   : > { %v4305_v55 = vpop.f32.mrf.mxu0 }
 0x16c   : > { %v3152_v9 = vadd.f32 %v4343_v2, %v3087_v10  ;;  %v4306_v16 = vadd.f32 %v4305_v55, %v4304_v5  ;;  %v4345_v15 = vpop.f32.mrf.mxu1 }
 0x16d   : > { %v4346_v47 = vadd.f32 %v4345_v15, %v4344_v42  ;;  %v4363_v37 = vpop.f32.mrf.mxu0 }
 0x16e   : > { %v3090_v6 = vadd.f32 %v4306_v16, %v6148_v11  ;;  %v4403_v32 = vpop.f32.mrf.mxu1 }
 0x16f   : > { %v4364_v12 = vpop.f32.mrf.mxu0 }
 0x170   : > { %v6162_v17 = vadd.f32 %v4346_v47, %v3090_v6  ;;  %v4365_v56 = vadd.f32 %v4364_v12, %v4363_v37  ;;  %v4404_v62 = vpop.f32.mrf.mxu1 }
 0x171   : > { %v4405_v30 = vadd.f32 %v4404_v62, %v4403_v32  ;;  %v4366_v39 = vpop.f32.mrf.mxu0 }
 0x172   : > { %v3193_v4 = vadd.f32 %v4365_v56, %v3128_v14  ;;  %v4406_v18 = vpop.f32.mrf.mxu1 }
 0x173   : > { %v4367_v7 = vpop.f32.mrf.mxu0 }
 0x174   : > { %v6164_v19 = vadd.f32 %v4405_v30, %v3193_v4  ;;  %v4368_v49 = vadd.f32 %v4367_v7, %v4366_v39  ;;  %v4407_v21 = vpop.f32.mrf.mxu1 }
 0x175   : > { %v4408_v34 = vadd.f32 %v4407_v21, %v4406_v18  ;;  %v4369_v0 = vpop.f32.mrf.mxu0 }
 0x176   : > { %v3196_v46 = vadd.f32 %v4368_v49, %v6152_v22  ;;  %v4409_v60 = vpop.f32.mrf.mxu1 }
 0x177   : > { %v4370_v33 = vpop.f32.mrf.mxu0 }
 0x178   : > { %v6167_v11 = vadd.f32 %v4408_v34, %v3196_v46  ;;  %v4410_v45 = vpop.f32.mrf.mxu1  ;;  %v4371_v28 = vadd.f32 %v4370_v33, %v4369_v0 }
 0x179   : > { %v4411_v20 = vadd.f32 %v4410_v45, %v4409_v60  ;;  %v4372_v35 = vpop.f32.mrf.mxu0 }
 0x17a   : > { %v4412_v58 = vpop.f32.mrf.mxu1  ;;  %v3201_v14 = vadd.f32 %v4371_v28, %v3136_v24 }
 0x17b   : > { %v4373_v40 = vpop.f32.mrf.mxu0 }
 0x17c   : > { %v4413_v25 = vpop.f32.mrf.mxu1  ;;  %v6169_v36 = vadd.f32 %v4411_v20, %v3201_v14  ;;  %v4374_v26 = vadd.f32 %v4373_v40, %v4372_v35 }
 0x17d   : > { %v4414_v63 = vadd.f32 %v4413_v25, %v4412_v58  ;;  %v4375_v22 = vpop.f32.mrf.mxu0 }
 0x17e   : > { %v3204_v31 = vadd.f32 %v4374_v26, %v6156_v23  ;;  %v4415_v43 = vpop.f32.mrf.mxu1 }
 0x17f   : > { %v4376_v44 = vpop.f32.mrf.mxu0 }
 0x180   : > { %v6172_v38 = vadd.f32 %v4414_v63, %v3204_v31  ;;  %v4377_v13 = vadd.f32 %v4376_v44, %v4375_v22  ;;  %v4416_v48 = vpop.f32.mrf.mxu1 }
 0x181   : > { %v4417_v50 = vadd.f32 %v4416_v48, %v4415_v43  ;;  %v4378_v61 = vpop.f32.mrf.mxu0 }
 0x182   : > { %v3209_v27 = vadd.f32 %v4377_v13, %v3144_v41  ;;  %v4418_v8 = vpop.f32.mrf.mxu1 }
 0x183   : > { %v4379_v24 = vpop.f32.mrf.mxu0 }
 0x184   : > { %v6174_v51 = vadd.f32 %v4417_v50, %v3209_v27  ;;  %v4380_v52 = vadd.f32 %v4379_v24, %v4378_v61  ;;  %v4419_v3 = vpop.f32.mrf.mxu1 }
 0x185   : > { %v4420_v29 = vadd.f32 %v4419_v3, %v4418_v8  ;;  %v4381_v23 = vpop.f32.mrf.mxu0 }
 0x186   : > { %v3212_v54 = vadd.f32 %v4380_v52, %v3147_v53  ;;  %v4421_v59 = vpop.f32.mrf.mxu1 }
 0x187   : > { %v4382_v1 = vpop.f32.mrf.mxu0 }
 0x188   : > { %v6176_v57 = vadd.f32 %v4420_v29, %v3212_v54  ;;  %v4383_v2 = vadd.f32 %v4382_v1, %v4381_v23  ;;  %v4422_v5 = vpop.f32.mrf.mxu1 }
 0x189   : > { %v4423_v10 = vadd.f32 %v4422_v5, %v4421_v59  ;;  %v4384_v42 = vpop.f32.mrf.mxu0 }
 0x18a   : > { %v3217_v55 = vadd.f32 %v4383_v2, %v3152_v9  ;;  %v4424_v16 = vpop.f32.mrf.mxu1 }
 0x18b   : > { %v4385_v41 = vpop.f32.mrf.mxu0 }
 0x18c   : > { %v6178_v15 = vadd.f32 %v4423_v10, %v3217_v55  ;;  %v4386_v47 = vadd.f32 %v4385_v41, %v4384_v42  ;;  %v4425_v6 = vpop.f32.mrf.mxu1 }
 0x18d   : > { %v4426_v37 = vadd.f32 %v4425_v6, %v4424_v16  ;;  %v4443_v12 = vpop.f32.mrf.mxu0 }
 0x18e   : > { %6372 = vst [vmem:[#allocation2_spill] sm:$0xff] %v6178_v15  ;;  %v3220_v32 = vadd.f32 %v4386_v47, %v6162_v17  ;;  %v6183_v56 = vpop.f32.mrf.mxu1 }
 0x18f   : > { %v4444_v62 = vpop.f32.mrf.mxu0 }
 0x190   : > { %v6181_v53 = vadd.f32 %v4426_v37, %v3220_v32  ;;  %v4484_v30 = vpop.f32.mrf.mxu1 }
 0x191   : > { %v4446_v39 = vpop.f32.mrf.mxu0 }
 0x192   : > { %6373 = vst [vmem:[#allocation3_spill] sm:$0xff] %v6181_v53  ;;  %v6185_v4 = vpop.f32.mrf.mxu1 }
 0x193   : > { %v4447_v9 = vpop.f32.mrf.mxu0 }
 0x194   : > { %v6187_v18 = vpop.f32.mrf.mxu1 }
 0x195   : > { %v4449_v7 = vpop.f32.mrf.mxu0 }
 0x196   : > { %v6189_v49 = vpop.f32.mrf.mxu1 }
 0x197   : > { %v4450_v21 = vpop.f32.mrf.mxu0 }
 0x198   : > { %v6191_v34 = vpop.f32.mrf.mxu1 }
 0x199   : > { %v6193_v17 = vpop.f32.mrf.mxu0 }
 0x19a   : > { %v6195_v46 = vpop.f32.mrf.mxu1 }
 0x19b   : > { %v6197_v0 = vpop.f32.mrf.mxu0 }
 0x19c   : > { %v6199_v60 = vpop.f32.mrf.mxu1 }
 0x19d   : > { %v6201_v33 = vpop.f32.mrf.mxu0 }
 0x19f   : > { %v6205_v28 = vpop.f32.mrf.mxu0 }
 0x1a1   : > { %v6209_v35 = vpop.f32.mrf.mxu0 }
 0x1a3   : > { %v6213_v14 = vpop.f32.mrf.mxu0 }
 0x1c3   : > { %v6203_v45 = vpop.f32.mrf.mxu1 }
 0x1c5   : > { %v6207_v20 = vpop.f32.mrf.mxu1 }
 0x1c7   : > { %v6211_v58 = vpop.f32.mrf.mxu1 }
 0x1c9   : > { %v6215_v40 = vpop.f32.mrf.mxu1 }
 0x1cb   : > { %v6217_v25 = vpop.f32.mrf.mxu0 }
 0x1cd   : > { %v6219_v26 = vpop.f32.mrf.mxu1  ;;  %v6221_v63 = vpop.f32.mrf.mxu0 }
 0x1ce   : > { %6374 = vst [vmem:[#allocation4_spill] sm:$0xff] %v6219_v26 }
 0x1cf   : > { %v6223_v31 = vpop.f32.mrf.mxu1  ;;  %v6225_v22 = vpop.f32.mrf.mxu0 }
 0x1d0   : > { %6375 = vst [vmem:[#allocation5_spill] sm:$0xff] %v6223_v31  ;;  %6376 = vst [vmem:[#allocation6_spill] sm:$0xff] %v6225_v22 }
 0x1d1   : > { %v6227_v43 = vpop.f32.mrf.mxu1  ;;  %v6229_v44 = vpop.f32.mrf.mxu0 }
 0x1d2   : > { %6377 = vst [vmem:[#allocation7_spill] sm:$0xff] %v6227_v43  ;;  %6378 = vst [vmem:[#allocation8_spill] sm:$0xff] %v6229_v44 }
 0x1d3   : > { %v6231_v13 = vpop.f32.mrf.mxu1 }
 0x1d4   : > { %6379 = vst [vmem:[#allocation9_spill] sm:$0xff] %v6231_v13  ;;  %v4445_v13 = vadd.f32 %v4444_v62, %v4443_v12 }
 0x1d7   : > { %v4523_v48 = vpop.f32.mrf.mxu0 }
 0x1d8   : > { %v4563_v50 = vpop.f32.mrf.mxu1 }
 0x1d9   : > { %v4524_v61 = vpop.f32.mrf.mxu0 }
 0x1da   : > { %v4564_v27 = vpop.f32.mrf.mxu1  ;;  %v4525_v15 = vadd.f32 %v4524_v61, %v4523_v48 }
 0x1db   : > { %v4526_v8 = vpop.f32.mrf.mxu0 }
 0x1dc   : > { %v4566_v24 = vpop.f32.mrf.mxu1 }
 0x1dd   : > { %v4527_v52 = vpop.f32.mrf.mxu0 }
 0x1de   : > { %v4567_v3 = vpop.f32.mrf.mxu1 }
 0x1df   : > { %v4529_v29 = vpop.f32.mrf.mxu0 }
 0x1e1   : > { %v6233_v54 = vpop.f32.mrf.mxu1  ;;  %v4530_v23 = vpop.f32.mrf.mxu0 }
 0x1e3   : > { %v6235_v59 = vpop.f32.mrf.mxu1  ;;  %v4532_v1 = vpop.f32.mrf.mxu0 }
 0x1e5   : > { %v6237_v2 = vpop.f32.mrf.mxu1  ;;  %v4533_v5 = vpop.f32.mrf.mxu0 }
 0x1e7   : > { %v6239_v10 = vpop.f32.mrf.mxu1 }
 0x1e8   : > { %v6241_v42 = vpop.f32.mrf.mxu0 }
 0x1ea   : > { %v6245_v16 = vpop.f32.mrf.mxu0 }
 0x1ec   : > { %v6249_v47 = vpop.f32.mrf.mxu0 }
 0x1ed   : > { %v6243_v55 = vpop.f32.mrf.mxu1 }
 0x1ee   : > { %6380 = vst [vmem:[#allocation10_spill] sm:$0xff] %v6243_v55  ;;  %v6253_v37 = vpop.f32.mrf.mxu0  ;;  %v3323_v55 = vadd.f32 %v4445_v13, %v6164_v19 }
 0x1ef   : > { %v6247_v41 = vpop.f32.mrf.mxu1 }
 0x1f0   : > { %6381 = vst [vmem:[#allocation11_spill] sm:$0xff] %v6247_v41  ;;  %v6257_v43 = vpop.f32.mrf.mxu0  ;;  %v4448_v41 = vadd.f32 %v4447_v9, %v4446_v39  ;;  %v4528_v39 = vadd.f32 %v4527_v52, %v4526_v8 }
 0x1f1   : > { %v6251_v6 = vpop.f32.mrf.mxu1  ;;  %6384 = vst [vmem:[#allocation14_spill] sm:$0xff] %v6257_v43 }
 0x1f2   : > { %6382 = vst [vmem:[#allocation12_spill] sm:$0xff] %v6251_v6  ;;  %v6261_v31 = vpop.f32.mrf.mxu0  ;;  %v4485_v6 = vadd.f32 %v4484_v30, %v6183_v56  ;;  %v4454_v56 = vadd.f32 %v6197_v0, %v6193_v17  ;;  %v4565_v30 = vadd.f32 %v4564_v27, %v4563_v50  ;;  %v4568_v17 = vadd.f32 %v4567_v3, %v4566_v24 }
 0x1f3   : > { %v6255_v32 = vpop.f32.mrf.mxu1  ;;  %v4460_v24 = vadd.f32 %v6213_v14, %v6209_v35  ;;  %v4571_v3 = vadd.f32 %v6235_v59, %v6233_v54  ;;  %v3679_v35 = vld [vmem:[%s6370_s3 + $0x8] sm:$0xff]  ;;  %v4537_v59 = vadd.f32 %v6245_v16, %v6241_v42  ;;  %v4500_v42 = vadd.f32 %v6215_v40, %v6211_v58  ;;  %v6390_v58 = vld [vmem:[#allocation8_spill] sm:$0xff] }
 0x1f4   : > { %6383 = vst [vmem:[#allocation13_spill] sm:$0xff] %v6255_v32  ;;  %v6266_v44 = vpop.f32.mrf.mxu0  ;;  %v4451_v32 = vadd.f32 %v4450_v21, %v4449_v7  ;;  %v3388_v62 = vadd.f32 %v4485_v6, %v3323_v55  ;;  %v4531_v21 = vadd.f32 %v4530_v23, %v4529_v29  ;;  %v4534_v29 = vadd.f32 %v4533_v5, %v4532_v1 }
 0x1f5   : > { %v6259_v53 = vpop.f32.mrf.mxu1  ;;  %v4540_v16 = vadd.f32 %v6253_v37, %v6249_v47  ;;  %v6391_v47 = vld [vmem:[#allocation10_spill] sm:$0xff] }
 0x1f6   : > { %6385 = vst [vmem:[#allocation15_spill] sm:$0xff] %v6259_v53  ;;  %v6271_v12 = vpop.f32.mrf.mxu0  ;;  %v3326_v53 = vadd.f32 %v4448_v41, %v6167_v11  ;;  %v3453_v19 = vadd.f32 %v4525_v15, %v3388_v62  ;;  %v3331_v9 = vadd.f32 %v4451_v32, %v6169_v36  ;;  %v4491_v11 = vadd.f32 %v6191_v34, %v6189_v49 }
 0x1f7   : > { %v6263_v26 = vpop.f32.mrf.mxu1  ;;  %v4457_v36 = vadd.f32 %v6205_v28, %v6201_v33  ;;  %v4494_v49 = vadd.f32 %v6199_v60, %v6195_v46  ;;  %v6392_v37 = vld [vmem:[#allocation11_spill] sm:$0xff] }
 0x1f8   : > { %6386 = vst [vmem:[#allocation16_spill] sm:$0xff] %v6263_v26  ;;  %v4488_v26 = vadd.f32 %v6187_v18, %v6185_v4  ;;  %v3518_v61 = vadd.f32 %v4565_v30, %v3453_v19  ;;  %v3396_v18 = vadd.f32 %v4491_v11, %v3331_v9 }
 0x1f9   : > { %v6268_v22 = vpop.f32.mrf.mxu1 }
 0x1fa   : > { %6387 = vst [vmem:[#allocation17_spill] sm:$0xff] %v6268_v22  ;;  %v3391_v22 = vadd.f32 %v4488_v26, %v3326_v53  ;;  %v3334_v26 = vadd.f32 %v4454_v56, %v6172_v38  ;;  %v3461_v34 = vadd.f32 %v4531_v21, %v3396_v18  ;;  %v3339_v38 = vadd.f32 %v4457_v36, %v6174_v51  ;;  %v6389_v18 = vld [vmem:[#allocation6_spill] sm:$0xff] }
 0x1fb   : > { %v6274_v43 = vpop.f32.mrf.mxu1  ;;  %v4497_v51 = vadd.f32 %v6207_v20, %v6203_v45  ;;  %v4463_v45 = vadd.f32 %v6221_v63, %v6217_v25  ;;  %v4574_v56 = vadd.f32 %v6239_v10, %v6237_v2  ;;  %v4466_v40 = vadd.f32 %v6390_v58, %v6389_v18 }
 0x1fc   : > { %v3456_v55 = vadd.f32 %v4528_v39, %v3391_v22  ;;  %v3678_v22 = vld [vmem:[%s6370_s3] sm:$0xff]  ;;  %v3399_v60 = vadd.f32 %v4494_v49, %v3334_v26  ;;  %v3526_v32 = vadd.f32 %v4571_v3, %v3461_v34  ;;  %v6394_v49 = vld [vmem:[#allocation5_spill] sm:$0xff]  ;;  %v6396_v3 = vld [vmem:[#allocation3_spill] sm:$0xff] }
 0x1fd   : > { %v3404_v9 = vadd.f32 %v4497_v51, %v3339_v38 }
 0x1fe   : > { %v4603_v13 = vpop.f32.mrf.mxu0  ;;  %v4643_v7 = vpop.f32.mrf.mxu1  ;;  %v3521_v52 = vadd.f32 %v4568_v17, %v3456_v55  ;;  %v3464_v54 = vadd.f32 %v4534_v29, %v3399_v60  ;;  %v6397_v60 = vld [vmem:[#allocation12_spill] sm:$0xff] }
 0x1ff   : > { %v3469_v63 = vadd.f32 %v4537_v59, %v3404_v9  ;;  %v6400_v59 = vld [vmem:[#allocation9_spill] sm:$0xff] }
 0x200   : > { %v4604_v48 = vpop.f32.mrf.mxu0  ;;  %v4644_v15 = vpop.f32.mrf.mxu1  ;;  %v3529_v25 = vadd.f32 %v4574_v56, %v3464_v54  ;;  %v6399_v54 = vld [vmem:[#allocation7_spill] sm:$0xff] }
 0x201   : > { %v4605_v4 = vadd.f32 %v4604_v48, %v4603_v13  ;;  %v4645_v50 = vadd.f32 %v4644_v15, %v4643_v7  ;;  %v3342_v13 = vadd.f32 %v4460_v24, %v6176_v57  ;;  %v3680_v57 = vld [vmem:[%s6370_s3 + $0x10] sm:$0xff] }
 0x202   : > { %v4606_v53 = vpop.f32.mrf.mxu0  ;;  %v4646_v27 = vpop.f32.mrf.mxu1 }
 0x203   : > { %v3583_v0 = vadd.f32 %v4605_v4, %v3518_v61  ;;  %v3407_v55 = vadd.f32 %v4500_v42, %v3342_v13  ;;  %v6388_v4 = vld [vmem:[#allocation2_spill] sm:$0xff]  ;;  %v4546_v13 = vadd.f32 %v6271_v12, %v6266_v44 }
 0x204   : > { %v4607_v8 = vpop.f32.mrf.mxu0  ;;  %v4647_v23 = vpop.f32.mrf.mxu1  ;;  %v3347_v15 = vadd.f32 %v4463_v45, %v6388_v4 }
 0x205   : > { %v3648_v33 = vadd.f32 %v4645_v50, %v3583_v0  ;;  %v4608_v28 = vadd.f32 %v4607_v8, %v4606_v53  ;;  %v4648_v41 = vadd.f32 %v4647_v23, %v4646_v27  ;;  %v4577_v53 = vadd.f32 %v6392_v37, %v6391_v47  ;;  %v6393_v27 = vld [vmem:[#allocation4_spill] sm:$0xff]  ;;  %v3681_v8 = vld [vmem:[%s6370_s3 + $0x18] sm:$0xff] }
 0x206   : > { %v4609_v46 = vpop.f32.mrf.mxu0  ;;  %v4649_v6 = vpop.f32.mrf.mxu1  ;;  %v4503_v34 = vadd.f32 %v6394_v49, %v6393_v27  ;;  %v3684_v37 = vld [vmem:[%s6370_s3 + $0x30] sm:$0xff] }
 0x207   : > { %v3686_v1 = vadd.f32 %v3678_v22, %v3648_v33  ;;  %v3586_v5 = vadd.f32 %v4608_v28, %v3521_v52  ;;  %v3472_v22 = vadd.f32 %v4540_v16, %v3407_v55  ;;  %v3534_v29 = vadd.f32 %v4577_v53, %v3469_v63  ;;  %v6395_v33 = vld [vmem:[#allocation14_spill] sm:$0xff]  ;;  %v3683_v63 = vld [vmem:[%s6370_s3 + $0x28] sm:$0xff] }
 0x208   : > { %v4610_v14 = vpop.f32.mrf.mxu0  ;;  %v4650_v39 = vpop.f32.mrf.mxu1  ;;  %v4543_v28 = vadd.f32 %v6261_v31, %v6395_v33 }
 0x209   : > { %3694 = vst [vmem:[%s6300_s29] sm:$0xff] %v3686_v1  ;;  %v3651_v62 = vadd.f32 %v4648_v41, %v3586_v5  ;;  %v4611_v19 = vadd.f32 %v4610_v14, %v4609_v46  ;;  %v4651_v11 = vadd.f32 %v4650_v39, %v4649_v6  ;;  %v3350_v46 = vadd.f32 %v4466_v40, %v6396_v3  ;;  %v6398_v1 = vld [vmem:[#allocation13_spill] sm:$0xff] }
 0x20a   : > { %v4612_v20 = vpop.f32.mrf.mxu0  ;;  %v4652_v21 = vpop.f32.mrf.mxu1  ;;  %v4580_v5 = vadd.f32 %v6398_v1, %v6397_v60  ;;  %v3412_v6 = vadd.f32 %v4503_v34, %v3347_v15  ;;  %v6403_v15 = vld [vmem:[#allocation17_spill] sm:$0xff] }
 0x20b   : > { %v3687_v30 = vadd.f32 %v3679_v35, %v3651_v62  ;;  %v3591_v7 = vadd.f32 %v4611_v19, %v3526_v32  ;;  %v4506_v62 = vadd.f32 %v6400_v59, %v6399_v54  ;;  %v3682_v19 = vld [vmem:[%s6370_s3 + $0x20] sm:$0xff]  ;;  %v4586_v18 = vadd.f32 %v6274_v43, %v6403_v15  ;;  %v3685_v43 = vld [vmem:[%s6370_s3 + $0x38] sm:$0xff] }
 0x20c   : > { %v4613_v48 = vpop.f32.mrf.mxu0  ;;  %v4653_v10 = vpop.f32.mrf.mxu1  ;;  %v3537_v31 = vadd.f32 %v4580_v5, %v3472_v22  ;;  %v3477_v9 = vadd.f32 %v4543_v28, %v3412_v6 }
 0x20d   : > { %3695 = vst [vmem:[%s6300_s29 + $0x8] sm:$0xff] %v3687_v30  ;;  %v3656_v61 = vadd.f32 %v4651_v11, %v3591_v7  ;;  %v4614_v2 = vadd.f32 %v4613_v48, %v4612_v20  ;;  %v4654_v0 = vadd.f32 %v4653_v10, %v4652_v21  ;;  %v3415_v30 = vadd.f32 %v4506_v62, %v3350_v46  ;;  %v6401_v11 = vld [vmem:[#allocation15_spill] sm:$0xff]  ;;  %v6402_v21 = vld [vmem:[#allocation16_spill] sm:$0xff] }
 0x20e   : > { %v4615_v36 = vpop.f32.mrf.mxu0  ;;  %v4655_v50 = vpop.f32.mrf.mxu1  ;;  %v4583_v42 = vadd.f32 %v6402_v21, %v6401_v11 }
 0x20f   : > { %v3688_v26 = vadd.f32 %v3680_v57, %v3656_v61  ;;  %v3594_v17 = vadd.f32 %v4614_v2, %v3529_v25  ;;  %v3480_v12 = vadd.f32 %v4546_v13, %v3415_v30 }
 0x210   : > { %v4616_v52 = vpop.f32.mrf.mxu0  ;;  %v4656_v24 = vpop.f32.mrf.mxu1  ;;  %v3542_v44 = vadd.f32 %v4583_v42, %v3477_v9 }
 0x211   : > { %3696 = vst [vmem:[%s6300_s29 + $0x10] sm:$0xff] %v3688_v26  ;;  %v3659_v23 = vadd.f32 %v4654_v0, %v3594_v17  ;;  %v4617_v38 = vadd.f32 %v4616_v52, %v4615_v36  ;;  %v4657_v35 = vadd.f32 %v4656_v24, %v4655_v50  ;;  %v3545_v26 = vadd.f32 %v4586_v18, %v3480_v12 }
 0x212   : > { %v4618_v41 = vpop.f32.mrf.mxu0  ;;  %v4658_v14 = vpop.f32.mrf.mxu1 }
 0x213   : > { %v3689_v51 = vadd.f32 %v3681_v8, %v3659_v23  ;;  %v3599_v32 = vadd.f32 %v4617_v38, %v3534_v29 }
 0x214   : > { %v4619_v39 = vpop.f32.mrf.mxu0  ;;  %v4659_v56 = vpop.f32.mrf.mxu1 }
 0x215   : > { %3697 = vst [vmem:[%s6300_s29 + $0x18] sm:$0xff] %v3689_v51  ;;  %v3664_v45 = vadd.f32 %v4657_v35, %v3599_v32  ;;  %v4620_v20 = vadd.f32 %v4619_v39, %v4618_v41  ;;  %v4660_v48 = vadd.f32 %v4659_v56, %v4658_v14 }
 0x216   : > { %v4621_v7 = vpop.f32.mrf.mxu0  ;;  %v4661_v25 = vpop.f32.mrf.mxu1 }
 0x217   : > { %v3690_v16 = vadd.f32 %v3682_v19, %v3664_v45  ;;  %v3602_v57 = vadd.f32 %v4620_v20, %v3537_v31 }
 0x218   : > { %v4622_v61 = vpop.f32.mrf.mxu0  ;;  %v4662_v55 = vpop.f32.mrf.mxu1 }
 0x219   : > { %3698 = vst [vmem:[%s6300_s29 + $0x20] sm:$0xff] %v3690_v16  ;;  %v3667_v2 = vadd.f32 %v4660_v48, %v3602_v57  ;;  %v4623_v10 = vadd.f32 %v4622_v61, %v4621_v7  ;;  %v4663_v36 = vadd.f32 %v4662_v55, %v4661_v25 }
 0x21a   : > { %v4624_v4 = vpop.f32.mrf.mxu0  ;;  %v4664_v47 = vpop.f32.mrf.mxu1 }
 0x21b   : > { %v3691_v58 = vadd.f32 %v3683_v63, %v3667_v2  ;;  %v3607_v40 = vadd.f32 %v4623_v10, %v3542_v44 }
 0x21c   : > { %v4625_v53 = vpop.f32.mrf.mxu0  ;;  %v4665_v50 = vpop.f32.mrf.mxu1 }
 0x21d   : > { %3699 = vst [vmem:[%s6300_s29 + $0x28] sm:$0xff] %v3691_v58  ;;  %v3672_v17 = vadd.f32 %v4663_v36, %v3607_v40  ;;  %v4626_v0 = vadd.f32 %v4625_v53, %v4624_v4  ;;  %v4666_v34 = vadd.f32 %v4665_v50, %v4664_v47 }
 0x21f   : > { %v3692_v27 = vadd.f32 %v3684_v37, %v3672_v17  ;;  %v3610_v49 = vadd.f32 %v4626_v0, %v3545_v26 }
 0x221   : > { %3700 = vst [vmem:[%s6300_s29 + $0x30] sm:$0xff] %v3692_v27  ;;  %v3675_v22 = vadd.f32 %v4666_v34, %v3610_v49 }
 0x223   : > { %v3693_v8 = vadd.f32 %v3685_v43, %v3675_v22 }
 0x225   : > { %3701 = vst [vmem:[%s6300_s29 + $0x38] sm:$0xff] %v3693_v8 }
 0x226 PF: > { %s14_s15 = sadd.s32 1, %s4937_s15  }
 0x227   : > { %p11_p4 = scmp.ge.s32.totalorder %s14_s15, 4  }
 0x229   :  { %13 = sbr.rel (!%p11_p4) target bundleno = 1 (0x1), region = 66 }

// kernel: transformer_forward.3
= control target key start
LH: loop header
LB: loop body
LE: loop exit
PB: predicated region body
PF: predicated region fallthrough
CT: control target
= control target key end

     0   :  { %s8115_s0 = inlined_call_operand.vmem [shape: f32[2,64,128], index: 0, kind: input, shape index: {}]   ;;  %s8116_s1 = inlined_call_operand.vmem [shape: f32[2,1,128], index: 1, kind: input, shape index: {}]   ;;  %s8117_s2 = inlined_call_operand.vmem [shape: f32[2,1,128], index: 2, kind: input, shape index: {}]   ;;  %s8118_s3 = inlined_call_operand.vmem [shape: bf16[2,4,128,32], index: 3, kind: input, shape index: {}]   ;;  %s8119_s4 = inlined_call_operand.vmem [shape: f32[2,4,1,32], index: 4, kind: input, shape index: {}]   ;;  %s8120_s5 = inlined_call_operand.vmem [shape: bf16[2,4,128,32], index: 5, kind: input, shape index: {}]   ;;  %s8121_s6 = inlined_call_operand.vmem [shape: f32[2,4,1,32], index: 6, kind: input, shape index: {}]   ;;  %s8122_s7 = inlined_call_operand.vmem [shape: bf16[2,4,128,32], index: 7, kind: input, shape index: {}]   ;;  %s8123_s8 = inlined_call_operand.vmem [shape: f32[2,4,1,32], index: 8, kind: input, shape index: {}]   ;;  %s8124_s9 = inlined_call_operand.vmem [shape: bf16[2,4,32,128], index: 9, kind: input, shape index: {}]   ;;  %s8125_s10 = inlined_call_operand.vmem [shape: f32[2,1,128], index: 10, kind: input, shape index: {}]   ;;  %s8126_s11 = inlined_call_operand.vmem [shape: f32[2,1,128], index: 11, kind: input, shape index: {}]   ;;  %s8127_s12 = inlined_call_operand.vmem [shape: f32[2,1,128], index: 12, kind: input, shape index: {}]   ;;  %s8128_s13 = inlined_call_operand.vmem [shape: bf16[2,128,256], index: 13, kind: input, shape index: {}]   ;;  %s8129_s14 = inlined_call_operand.vmem [shape: f32[2,1,256], index: 14, kind: input, shape index: {}]   ;;  %s8130_s15 = inlined_call_operand.vmem [shape: bf16[2,256,128], index: 15, kind: input, shape index: {}]   ;;  %s8131_s16 = inlined_call_operand.vmem [shape: f32[2,1,128], index: 16, kind: input, shape index: {}]   ;;  %s8132_s17 = inlined_call_operand.vmem [shape: f32[1,128], index: 17, kind: input, shape index: {}]   ;;  %s8133_s18 = inlined_call_operand.vmem [shape: f32[1,128], index: 18, kind: input, shape index: {}]   ;;  %s8134_s19 = inlined_call_operand.hbm [shape: f32[2,64,128], index: 19, kind: output, shape index: {}]  }
   0x1   :  { %8151 = sst [smem:[#allocation19_spill]] %s8115_s0 }
   0x2   :  { %8152 = sst [smem:[#allocation20_spill]] %s8116_s1 }
   0x3   :  { %8153 = sst [smem:[#allocation21_spill]] %s8117_s2 }
   0x4   :  { %8154 = sst [smem:[#allocation22_spill]] %s8118_s3 }
   0x5   :  { %8155 = sst [smem:[#allocation23_spill]] %s8119_s4 }
   0x6   :  { %8156 = sst [smem:[#allocation24_spill]] %s8120_s5 }
   0x7   :  { %8157 = sst [smem:[#allocation25_spill]] %s8121_s6 }
   0x8   :  { %8158 = sst [smem:[#allocation26_spill]] %s8122_s7 }
   0x9   :  { %8159 = sst [smem:[#allocation27_spill]] %s8123_s8 }
   0xa   :  { %8160 = sst [smem:[#allocation28_spill]] %s8124_s9 }
   0xb   :  { %8161 = sst [smem:[#allocation29_spill]] %s8127_s12 }
   0xc   :  { %8162 = sst [smem:[#allocation30_spill]] %s8130_s15 }
   0xd   :  { %8163 = sst [smem:[#allocation31_spill]] %s8131_s16 }
   0xe   :  { %8164 = sst [smem:[#allocation32_spill]] %s8132_s17 }
   0xf   :  { %8165 = sst [smem:[#allocation33_spill]] %s8133_s18 }
  0x10   :  { %8166 = sst [smem:[#allocation34_spill]] %s8134_s19 }
  0x11   :  { %24 = vsyncpa [#allocation3], 0 }
  0x12   :  { %26 = vsyncpa [#allocation3 + $0x1], 0  ;;  %s7029_s0 = smov 0   ;;  %s7031_s30 = smov 0  }
  0x13   :  { %s7033_s20 = smov 0   ;;  %s7035_s21 = smov 0  }
  0x14   :  { %s7037_s1 = smov 0   ;;  %s7039_s22 = smov 0  }
  0x15   :  { %s7041_s2 = smov 0   ;;  %s7043_s23 = smov 0  }
  0x16 LB: > { %8167 = sst [smem:[#allocation5_spill]] %s6895_s0  ;;  %s5237_s24 = sadd.s32 4294967295, %s6923_s23   ;;  %s6923_s23 = sphi %s7043_s23, %s32_s23   ;;  %s6919_s2 = sphi %s7041_s2, %s8224_s2   ;;  %s6915_s22 = sphi %s7039_s22, %s8223_s22   ;;  %s6911_s1 = sphi %s7037_s1, %s8222_s1   ;;  %s6907_s21 = sphi %s7035_s21, %s8221_s21   ;;  %s6903_s20 = sphi %s7033_s20, %s8220_s20   ;;  %s6899_s30 = sphi %s7031_s30, %s8219_s30   ;;  %s6895_s0 = sphi %s7029_s0, %s8218_s0  }
  0x17   : > { %8168 = sst [smem:[#allocation6_spill]] %s6899_s30  ;;  %s5238_s25 = sadd.s32 4294967294, %s6923_s23  }
  0x18   : > { %8169 = sst [smem:[#allocation7_spill]] %s6903_s20  ;;  %s41_s3 = sadd.s32 1, %s6915_s22 }
  0x19   : > { %8170 = sst [smem:[#allocation8_spill]] %s6907_s21  ;;  %p42_p0 = scmp.ge.s32.totalorder %s41_s3, 2 }
  0x1a   : > { %8171 = sst [smem:[#allocation9_spill]] %s6911_s1  ;;  %s44_s26 = sadd.s32 1, %s6919_s2 }
  0x1b   : > { %8172 = sst [smem:[#allocation10_spill]] %s6915_s22  ;;  %p545_p1 = scmp.ne.s32.totalorder %s6903_s20, %s6899_s30 }
  0x1c   : > { %8173 = sst [smem:[#allocation11_spill]] %s6919_s2  ;;  %p546_p2 = scmp.eq.s32.totalorder %s5237_s24, 3 }
  0x1d   : > { %8174 = sst [smem:[#allocation12_spill]] %s6923_s23  ;;  %s8226_s3 = smov (%p42_p0, %s41_s3), 0 }
  0x1e   : > { %8175 = sst [smem:[#allocation13_spill]] %s8226_s3  ;;  %s8228_s26 = smov (!%p42_p0, %s44_s26), %s6919_s2 }
  0x1f   : > { %p7078_p3 = por %p546_p2, %p545_p1  ;;  %p551_p4 = scmp.ne.s32.totalorder %s6899_s30, %s6895_s0 }
  0x20   : > { %p46_p5 = scmp.ge.s32.totalorder %s8228_s26, 2  ;;  %p552_p6 = scmp.eq.s32.totalorder %s5238_s25, 3 }
  0x21   : > { %s8176_s27 = scalar_select %p7078_p3, 1, 0 }
  0x22   : > { %p5241_p7 = scmp.ge.s32.totalorder %s6923_s23, 1  ;;  %p696_p8 = scmp.lt.s32.totalorder %s6923_s23, 5 }
  0x23   : > { %8177 = sst [smem:[#allocation14_spill]] %s8176_s27  ;;  %s8230_s26 = smov (%p46_p5, %s8228_s26), 0 }
  0x24   : > { %8178 = sst [smem:[#allocation15_spill]] %s8230_s26  ;;  %p7088_p9 = por %p552_p6, %p551_p4 }
  0x25   : > { %p697_p10 = pnand %p5241_p7, %p696_p8  ;;  %s532_s29 = ssub.s32 %s6919_s2, %s8230_s26 }
  0x26   : > { %s8179_s28 = scalar_select %p7088_p9, 1, 0 }
  0x27   : > { %s535_s24 = sadd.s32 1, %s6903_s20  ;;  %p533_p11 = scmp.eq.s32.totalorder %s532_s29, 0 }
  0x28   : > { %8180 = sst [smem:[#allocation16_spill]] %s8179_s28  ;;  %700 = sbr.rel (%p697_p10) target bundleno = 5428 (0x1534), region = 96 }
  0x29   : > { %s7096_s3 = scalar_select %p533_p11, %s6903_s20, %s535_s24  }
  0x2b   : > { %8181 = sst [smem:[#allocation17_spill]] %s7096_s3 }
  0x2d   : > { %s8141_s25 = sand.u32 1, %s6899_s30   ;;  %p816_p12 = scmp.lt.s32.totalorder %s6911_s1, 1 }
  0x2e   : > { %s5242_s22 = sshll.u32 %s8141_s25, 6  ;;  %p821_p13 = scmp.lt.s32.totalorder %s6907_s21, 1 }
  0x2f   : > { %s817_s0 = scalar_select %p816_p12, %s6911_s1, 1 }
  0x30   : > { %s7105_s28 = scalar_select %p821_p13, %s6907_s21, 1 }
  0x31   : > { %s5637_s29 = sshll.u32 %s817_s0, 6  ;;  %s8182_s2 = sld [smem:[#allocation19_spill]] }
  0x32   : > { %s5638_s17 = sshll.u32 %s7105_s28, 8  ;;  %s8185_s0 = sld [smem:[#allocation22_spill]] }
  0x33   : > { %s5247_s26 = sshll.u32 %s7105_s28, 2  ;;  %s8186_s4 = sld [smem:[#allocation23_spill]] }
  0x34   : > { %s8187_s5 = sld [smem:[#allocation24_spill]]  ;;  %s5641_s19 = sshll.u32 %s7105_s28, 6 }
  0x35   : > { %s8188_s6 = sld [smem:[#allocation25_spill]]  ;;  %s5258_s24 = sshll.u32 %s7105_s28, 1 }
  0x36   : > { %s8190_s7 = sld [smem:[#allocation26_spill]] }
  0x37   : > { %s7110_s3 = scalar_lea.vmem %s8182_s2, %s5637_s29  ;;  %s8191_s8 = sld [smem:[#allocation27_spill]] }
  0x38   : > { %s7124_s15 = scalar_lea.vmem %s8185_s0, %s5638_s17  ;;  %s8192_s9 = sld [smem:[#allocation28_spill]] }
  0x39   : > { %s7130_s29 = scalar_lea.vmem %s8186_s4, %s5247_s26  ;;  %s8195_s21 = sld [smem:[#allocation31_spill]] }
  0x3a   : > { %s7135_s25 = scalar_lea.vmem %s8187_s5, %s5638_s17  ;;  %s7180_s5 = scalar_lea.vmem %s8129_s14, %s5258_s24 }
  0x3b   : > { %s7140_s27 = scalar_lea.vmem %s8188_s6, %s5247_s26  ;;  %s8194_s6 = sld [smem:[#allocation30_spill]] }
  0x3c   : > { %8189 = sst [smem:[#allocation18_spill]] %s7140_s27  ;;  %s7145_s0 = scalar_lea.vmem %s8190_s7, %s5638_s17 }
  0x3d   : > { %s7150_s2 = scalar_lea.vmem %s8191_s8, %s5247_s26  ;;  %s5642_s26 = sshll.u32 %s7105_s28, 7 }
  0x3e   : > { %s7156_s23 = scalar_lea.vmem %s8192_s9, %s5641_s19  ;;  %s7175_s4 = scalar_lea.vmem %s8128_s13, %s5642_s26 }
  0x3f   : > { %s884_s18 = scalar_lea.vmem %s8195_s21, %s7105_s28  ;;  %s7191_s9 = scalar_lea.vmem [#allocation2], %s5242_s22 }
  0x40   : > { %s8196_s12 = sld [smem:[#allocation8_spill]] }
  0x41   : > { %s7185_s27 = scalar_lea.vmem %s8194_s6, %s5642_s26 }
  0x46   : > { %p5261_p0 = scmp.ne.s32.totalorder %s8196_s12, 0 }
  0x48   : > { %889 = sbr.rel (%p5261_p0) target bundleno = 82 (0x52), region = 100 }
  0x4d   : > { %v890_v0 = vld [vmem:[%s7110_s3] sm:$0xff]  ;;  %v891_v1 = vld [vmem:[%s7110_s3 + $0x8] sm:$0xff]  ;;  %v892_v2 = vld [vmem:[%s7110_s3 + $0x10] sm:$0xff] }
  0x4e   : > { %898 = vst [vmem:[%s7191_s9] sm:$0xff] %v890_v0  ;;  %899 = vst [vmem:[%s7191_s9 + $0x8] sm:$0xff] %v891_v1  ;;  %v893_v3 = vld [vmem:[%s7110_s3 + $0x18] sm:$0xff]  ;;  %v894_v4 = vld [vmem:[%s7110_s3 + $0x20] sm:$0xff] }
  0x4f   : > { %900 = vst [vmem:[%s7191_s9 + $0x10] sm:$0xff] %v892_v2  ;;  %v895_v5 = vld [vmem:[%s7110_s3 + $0x28] sm:$0xff]  ;;  %901 = vst [vmem:[%s7191_s9 + $0x18] sm:$0xff] %v893_v3  ;;  %v896_v6 = vld [vmem:[%s7110_s3 + $0x30] sm:$0xff] }
  0x50   : > { %902 = vst [vmem:[%s7191_s9 + $0x20] sm:$0xff] %v894_v4  ;;  %903 = vst [vmem:[%s7191_s9 + $0x28] sm:$0xff] %v895_v5  ;;  %v897_v7 = vld [vmem:[%s7110_s3 + $0x38] sm:$0xff] }
  0x51   : > { %904 = vst [vmem:[%s7191_s9 + $0x30] sm:$0xff] %v896_v6  ;;  %905 = vst [vmem:[%s7191_s9 + $0x38] sm:$0xff] %v897_v7 }
  0x52 PF: > { %v6471_v46 = vld [vmem:[%s7124_s15 + $0x38] sm:$0xff]   ;;  %v6473_v50 = vld [vmem:[%s7124_s15 + $0x30] sm:$0xff]   ;;  %v6475_v52 = vld [vmem:[%s7124_s15 + $0x28] sm:$0xff]   ;;  %s8197_s12 = sld [smem:[#allocation20_spill]]  ;;  %vm1453_vm0 = vcmask 261120   ;;  %vm1551_vm1 = vcmask 523264  }
  0x53   : > { %v6472_v48 = vld [vmem:[%s7135_s25 + $0x38] sm:$0xff]   ;;  %5917 = vmatprep.subr.bf16.mxu0 %v6471_v46  ;;  %v6474_v51 = vld [vmem:[%s7135_s25 + $0x30] sm:$0xff]   ;;  %v6476_v53 = vld [vmem:[%s7135_s25 + $0x28] sm:$0xff]   ;;  %s8199_s17 = sld [smem:[#allocation21_spill]] }
  0x54   : > { %5918 = vmatpush3.bf16.msra.mxu0 %v6471_v46  ;;  %5941 = vmatprep.subr.bf16.mxu1 %v6472_v48  ;;  %v6477_v54 = vld [vmem:[%s7124_s15 + $0x20] sm:$0xff]   ;;  %v6479_v56 = vld [vmem:[%s7124_s15 + $0x18] sm:$0xff]   ;;  %v6481_v58 = vld [vmem:[%s7124_s15 + $0x10] sm:$0xff]   ;;  %s8201_s24 = sld [smem:[#allocation18_spill]] }
  0x55   : > { %v906_v8 = vld [vmem:[%s7191_s9] sm:$0xff]  ;;  %v907_v10 = vld [vmem:[%s7191_s9 + $0x8] sm:$0xff]  ;;  %5942 = vmatpush3.bf16.msra.mxu1 %v6472_v48  ;;  %5919 = vmatprep.subr.bf16.mxu0 %v6473_v50  ;;  %v6480_v57 = vld [vmem:[%s7135_s25 + $0x18] sm:$0xff]   ;;  %s8204_s20 = sld [smem:[#allocation29_spill]] }
  0x56   : > { %v908_v9 = vld [vmem:[%s7191_s9 + $0x10] sm:$0xff]  ;;  %916 = vadd.xlane.f32.xlu0 %v906_v8  ;;  %v909_v11 = vld [vmem:[%s7191_s9 + $0x18] sm:$0xff]  ;;  %5943 = vmatprep.subr.bf16.mxu1 %v6474_v51  ;;  %v6478_v55 = vld [vmem:[%s7135_s25 + $0x20] sm:$0xff]  }
  0x57   : > { %920 = vadd.xlane.f32.xlu1 %v908_v9  ;;  %v910_v12 = vld [vmem:[%s7191_s9 + $0x20] sm:$0xff]  ;;  %v911_v13 = vld [vmem:[%s7191_s9 + $0x28] sm:$0xff]  ;;  %v6482_v59 = vld [vmem:[%s7135_s25 + $0x10] sm:$0xff]  }
  0x58   : > { %v912_v14 = vld [vmem:[%s7191_s9 + $0x30] sm:$0xff]  ;;  %v913_v15 = vld [vmem:[%s7191_s9 + $0x38] sm:$0xff]  ;;  %5920 = vmatpush3.bf16.msra.mxu0 %v6473_v50  ;;  %v6483_v60 = vld [vmem:[%s7124_s15 + $0x8] sm:$0xff]   ;;  %s8198_s22 = scalar_lea.vmem %s8197_s12, %s7105_s28 }
  0x59   : > { %5944 = vmatpush3.bf16.msra.mxu1 %v6474_v51  ;;  %5921 = vmatprep.subr.bf16.mxu0 %v6475_v52  ;;  %v6484_v61 = vld [vmem:[%s7135_s25 + $0x8] sm:$0xff]   ;;  %v6485_v62 = vld [vmem:[%s7124_s15] sm:$0xff]   ;;  %v7267_v0 = vld [vmem:[%s7145_s0 + $0x38] sm:$0xff]   ;;  %s8200_s26 = scalar_lea.vmem %s8199_s17, %s7105_s28 }
  0x5a   : > { %918 = vadd.xlane.f32.xlu0 %v907_v10  ;;  %5945 = vmatprep.subr.bf16.mxu1 %v6476_v53  ;;  %v6486_v63 = vld [vmem:[%s7135_s25] sm:$0xff]  }
  0x5b   : > { %922 = vadd.xlane.f32.xlu1 %v909_v11  ;;  %s8205_s30 = scalar_lea.vmem %s8204_s20, %s7105_s28 }
  0x5c   : > { %5922 = vmatpush3.bf16.msra.mxu0 %v6475_v52 }
  0x5d   : > { %5946 = vmatpush3.bf16.msra.mxu1 %v6476_v53  ;;  %5923 = vmatprep.subr.bf16.mxu0 %v6477_v54 }
  0x5e   : > { %924 = vadd.xlane.f32.xlu0 %v910_v12  ;;  %5947 = vmatprep.subr.bf16.mxu1 %v6478_v55 }
  0x5f   : > { %926 = vadd.xlane.f32.xlu1 %v911_v13 }
  0x60   : > { %5924 = vmatpush3.bf16.msra.mxu0 %v6477_v54 }
  0x61   : > { %5948 = vmatpush3.bf16.msra.mxu1 %v6478_v55  ;;  %5925 = vmatprep.subr.bf16.mxu0 %v6479_v56 }
  0x62   : > { %928 = vadd.xlane.f32.xlu0 %v912_v14  ;;  %5949 = vmatprep.subr.bf16.mxu1 %v6480_v57 }
  0x63   : > { %930 = vadd.xlane.f32.xlu1 %v913_v15 }
  0x64   : > { %5926 = vmatpush3.bf16.msra.mxu0 %v6479_v56  ;;  %v6488_v56 = vld [vmem:[%s7145_s0 + $0x30] sm:$0xff]  }
  0x65   : > { %5950 = vmatpush3.bf16.msra.mxu1 %v6480_v57  ;;  %5927 = vmatprep.subr.bf16.mxu0 %v6481_v58 }
  0x66   : > { %5951 = vmatprep.subr.bf16.mxu1 %v6482_v59 }
  0x68   : > { %5928 = vmatpush3.bf16.msra.mxu0 %v6481_v58 }
  0x69   : > { %5952 = vmatpush3.bf16.msra.mxu1 %v6482_v59  ;;  %5929 = vmatprep.subr.bf16.mxu0 %v6483_v60 }
  0x6a   : > { %5953 = vmatprep.subr.bf16.mxu1 %v6484_v61 }
  0x6c   : > { %5930 = vmatpush3.bf16.msra.mxu0 %v6483_v60 }
  0x6d   : > { %5954 = vmatpush3.bf16.msra.mxu1 %v6484_v61  ;;  %5931 = vmatprep.subr.bf16.mxu0 %v6485_v62 }
  0x6e   : > { %5955 = vmatprep.subr.bf16.mxu1 %v6486_v63 }
  0x70   : > { %5932 = vmatpush3.bf16.msra.mxu0 %v6485_v62  ;;  %v6489_v62 = vld [vmem:[%s7145_s0 + $0x28] sm:$0xff]  }
  0x71   : > { %5956 = vmatpush3.bf16.msra.mxu1 %v6486_v63  ;;  %5965 = vmatprep.subr.bf16.mxu0 %v7267_v0 }
  0xdf   : > { %v917_v16 = vpop.xlane.xlu0 %916 }
  0xe0   : > { %v921_v17 = vpop.xlane.xlu1 %920  ;;  %v933_v18 = vmul.f32 0.0078125, %v917_v16 }
  0xe1   : > { %v935_v19 = vmul.f32 0.0078125, %v921_v17 }
  0xe2   : > { %v7218_v20 = vsub.f32 %v906_v8, %v933_v18 }
  0xe3   : > { %v7220_v21 = vsub.f32 %v908_v9, %v935_v19  ;;  %v919_v22 = vpop.xlane.xlu0 %918 }
  0xe4   : > { %v923_v23 = vpop.xlane.xlu1 %922  ;;  %v934_v24 = vmul.f32 0.0078125, %v919_v22  ;;  %v949_v25 = vmul.f32 %v7218_v20, %v7218_v20 }
  0xe5   : > { %v936_v26 = vmul.f32 0.0078125, %v923_v23  ;;  %v951_v29 = vmul.f32 %v7220_v21, %v7220_v21 }
  0xe6   : > { %v7224_v27 = vsub.f32 %v907_v10, %v934_v24  ;;  %957 = vadd.xlane.f32.xlu0 %v949_v25 }
  0xe7   : > { %v7226_v28 = vsub.f32 %v909_v11, %v936_v26  ;;  %v925_v30 = vpop.xlane.xlu0 %924 }
  0xe8   : > { %v927_v31 = vpop.xlane.xlu1 %926  ;;  %v937_v32 = vmul.f32 0.0078125, %v925_v30  ;;  %v950_v33 = vmul.f32 %v7224_v27, %v7224_v27 }
  0xe9   : > { %v938_v34 = vmul.f32 0.0078125, %v927_v31  ;;  %v952_v37 = vmul.f32 %v7226_v28, %v7226_v28  ;;  %v5262_v31 = vld [vmem:[%s8198_s22] ss:$0 sm:$0xff] }
  0xea   : > { %v7232_v35 = vsub.f32 %v910_v12, %v937_v32  ;;  %961 = vadd.xlane.f32.xlu0 %v951_v29  ;;  %959 = vadd.xlane.f32.xlu1 %v950_v33 }
  0xeb   : > { %v7234_v36 = vsub.f32 %v911_v13, %v938_v34  ;;  %v929_v38 = vpop.xlane.xlu0 %928 }
  0xec   : > { %v931_v39 = vpop.xlane.xlu1 %930  ;;  %v939_v40 = vmul.f32 0.0078125, %v929_v38  ;;  %v953_v41 = vmul.f32 %v7232_v35, %v7232_v35  ;;  %v5263_v38 = vld [vmem:[%s8200_s26] ss:$0 sm:$0xff] }
  0xed   : > { %v940_v42 = vmul.f32 0.0078125, %v931_v39  ;;  %v954_v45 = vmul.f32 %v7234_v36, %v7234_v36 }
  0xee   : > { %v7240_v43 = vsub.f32 %v912_v14, %v939_v40  ;;  %963 = vadd.xlane.f32.xlu1 %v952_v37  ;;  %965 = vadd.xlane.f32.xlu0 %v953_v41 }
  0xef   : > { %v7242_v44 = vsub.f32 %v913_v15, %v940_v42 }
  0xf0   : > { %v955_v47 = vmul.f32 %v7240_v43, %v7240_v43 }
  0xf1   : > { %v956_v49 = vmul.f32 %v7242_v44, %v7242_v44 }
  0xf2   : > { %967 = vadd.xlane.f32.xlu1 %v954_v45  ;;  %969 = vadd.xlane.f32.xlu0 %v955_v47 }
  0xf6   : > { %971 = vadd.xlane.f32.xlu1 %v956_v49 }
 0x16f   : > { %v958_v1 = vpop.xlane.xlu0 %957 }
 0x170   : > { %v973_v2 = vmul.f32 0.0078125, %v958_v1 }
 0x172   : > { %v981_v3 = vadd.f32 1e-06, %v973_v2  ;;  %v6491_v2 = vld [vmem:[%s7145_s0 + $0x18] sm:$0xff]  }
 0x173   : > { %v960_v4 = vpop.xlane.xlu1 %959  ;;  %v962_v5 = vpop.xlane.xlu0 %961 }
 0x174   : > { %6615 = vrsqrt.f32 %v981_v3  ;;  %v974_v6 = vmul.f32 0.0078125, %v960_v4  ;;  %v975_v7 = vmul.f32 0.0078125, %v962_v5  ;;  %v6492_v3 = vld [vmem:[%s7145_s0 + $0x10] sm:$0xff]   ;;  %v6493_v4 = vld [vmem:[%s7145_s0 + $0x8] sm:$0xff]   ;;  %v6494_v5 = vld [vmem:[%s7145_s0] sm:$0xff]  }
 0x176   : > { %v982_v8 = vadd.f32 1e-06, %v974_v6  ;;  %v983_v9 = vadd.f32 1e-06, %v975_v7 }
 0x177   : > { %v964_v10 = vpop.xlane.xlu1 %963  ;;  %v966_v11 = vpop.xlane.xlu0 %965 }
 0x178   : > { %6617 = vrsqrt.f32 %v982_v8  ;;  %v976_v12 = vmul.f32 0.0078125, %v964_v10  ;;  %v977_v13 = vmul.f32 0.0078125, %v966_v11 }
 0x179   : > { %6619 = vrsqrt.f32 %v983_v9 }
 0x17a   : > { %v984_v14 = vadd.f32 1e-06, %v976_v12  ;;  %v985_v15 = vadd.f32 1e-06, %v977_v13  ;;  %v7317_v12 = vld [vmem:[%s7130_s29] ss:$0 sm:$0xff] }
 0x17b   : > { %v968_v16 = vpop.xlane.xlu1 %967  ;;  %v970_v17 = vpop.xlane.xlu0 %969 }
 0x17c   : > { %6621 = vrsqrt.f32 %v984_v14  ;;  %v978_v18 = vmul.f32 0.0078125, %v968_v16  ;;  %v979_v19 = vmul.f32 0.0078125, %v970_v17 }
 0x17d   : > { %6623 = vrsqrt.f32 %v985_v15 }
 0x17e   : > { %v986_v22 = vadd.f32 1e-06, %v978_v18  ;;  %v987_v23 = vadd.f32 1e-06, %v979_v19 }
 0x17f   : > { %v972_v24 = vpop.xlane.xlu1 %971 }
 0x180   : > { %6625 = vrsqrt.f32 %v986_v22  ;;  %v980_v25 = vmul.f32 0.0078125, %v972_v24  ;;  %v5273_v22 = vld [vmem:[%s8201_s24] ss:$0 sm:$0xff] }
 0x181   : > { %v6616_v26 = vpop.eup %6615  ;;  %6627 = vrsqrt.f32 %v987_v23 }
 0x182   : > { %v997_v29 = vmul.f32 %v6616_v26, %v7218_v20  ;;  %v988_v30 = vadd.f32 1e-06, %v980_v25 }
 0x184   : > { %6629 = vrsqrt.f32 %v988_v30  ;;  %v1011_v34 = vmul.f32 %v5262_v31, %v997_v29 }
 0x185   : > { %v6618_v32 = vpop.eup %6617 }
 0x186   : > { %v6620_v33 = vpop.eup %6619  ;;  %v998_v37 = vmul.f32 %v6618_v32, %v7224_v27  ;;  %v1025_v42 = vadd.f32 %v5263_v38, %v1011_v34 }
 0x187   : > { %v999_v39 = vmul.f32 %v6620_v33, %v7220_v21 }
 0x188   : > { %v1012_v20 = vmul.f32 %v5262_v31, %v998_v37 }
 0x189   : > { %v6622_v40 = vpop.eup %6621  ;;  %v1013_v46 = vmul.f32 %v5262_v31, %v999_v39 }
 0x18a   : > { %v6624_v41 = vpop.eup %6623  ;;  %v1026_v45 = vadd.f32 %v5263_v38, %v1012_v20  ;;  %v1000_v47 = vmul.f32 %v6622_v40, %v7226_v28 }
 0x18b   : > { %v1001_v48 = vmul.f32 %v6624_v41, %v7232_v35  ;;  %v1027_v53 = vadd.f32 %v5263_v38, %v1013_v46 }
 0x18c   : > { %v7285_v49 = vpack.c.bf16 %v1026_v45, %v1025_v42  ;;  %v1014_v27 = vmul.f32 %v5262_v31, %v1000_v47 }
 0x18d   : > { %v6626_v50 = vpop.eup %6625  ;;  %v1015_v51 = vmul.f32 %v5262_v31, %v1001_v48 }
 0x18e   : > { %v6628_v52 = vpop.eup %6627  ;;  %v1028_v54 = vadd.f32 %v5263_v38, %v1014_v27  ;;  %v1002_v21 = vmul.f32 %v6626_v50, %v7234_v36  ;;  %5933 = vmatprep.mubr.bf16.mxu0 %v7285_v49  ;;  %5957 = vmatprep.mubr.bf16.mxu1 %v7285_v49 }
 0x18f   : > { %v1003_v55 = vmul.f32 %v6628_v52, %v7240_v43  ;;  %v1029_v58 = vadd.f32 %v5263_v38, %v1015_v51 }
 0x190   : > { %v7291_v28 = vpack.c.bf16 %v1028_v54, %v1027_v53  ;;  %v1016_v35 = vmul.f32 %v5262_v31, %v1002_v21  ;;  %v6495_v53 = vld [vmem:[%s7124_s15 + $0x78] sm:$0xff]  }
 0x191   : > { %v6630_v57 = vpop.eup %6629  ;;  %v1017_v60 = vmul.f32 %v5262_v31, %v1003_v55 }
 0x192   : > { %v1030_v59 = vadd.f32 %v5263_v38, %v1016_v35  ;;  %v1004_v61 = vmul.f32 %v6630_v57, %v7242_v44  ;;  %5934 = vmatmul.mubr.bf16.vlgmr.msra.gmra.mxu0 %v7291_v28  ;;  %5958 = vmatmul.mubr.bf16.vlgmr.msra.gmra.mxu1 %v7291_v28  ;;  %v5282_v57 = vld [vmem:[%s7150_s2] ss:$0 sm:$0xff] }
 0x193   : > { %5966 = vmatpush3.bf16.msra.mxu0 %v7267_v0  ;;  %v1031_v63 = vadd.f32 %v5263_v38, %v1017_v60  ;;  %v6490_v0 = vld [vmem:[%s7145_s0 + $0x20] sm:$0xff]  }
 0x194   : > { %v7298_v36 = vpack.c.bf16 %v1030_v59, %v1029_v58  ;;  %v1018_v43 = vmul.f32 %v5262_v31, %v1004_v61  ;;  %5967 = vmatprep.subr.bf16.mxu0 %v6488_v56 }
 0x196   : > { %v1032_v1 = vadd.f32 %v5263_v38, %v1018_v43  ;;  %5937 = vmatprep.mubr.bf16.mxu0 %v7298_v36  ;;  %5961 = vmatprep.mubr.bf16.mxu1 %v7298_v36 }
 0x197   : > { %5968 = vmatpush3.bf16.msra.mxu0 %v6488_v56 }
 0x198   : > { %v7303_v44 = vpack.c.bf16 %v1032_v1, %v1031_v63  ;;  %5969 = vmatprep.subr.bf16.mxu0 %v6489_v62 }
 0x19a   : > { %5938 = vmatmul.mubr.bf16.gmra.mxu0 %v7303_v44  ;;  %5962 = vmatmul.mubr.bf16.gmra.mxu1 %v7303_v44 }
 0x19b   : > { %5970 = vmatpush3.bf16.msra.mxu0 %v6489_v62  ;;  %5981 = vmatprep.mubr.bf16.mxu0 %v7285_v49 }
 0x19c   : > { %5971 = vmatprep.subr.bf16.mxu0 %v6490_v0 }
 0x19f   : > { %5972 = vmatpush3.bf16.msra.mxu0 %v6490_v0 }
 0x1a0   : > { %5973 = vmatprep.subr.bf16.mxu0 %v6491_v2 }
 0x1a3   : > { %5974 = vmatpush3.bf16.msra.mxu0 %v6491_v2 }
 0x1a4   : > { %5975 = vmatprep.subr.bf16.mxu0 %v6492_v3 }
 0x1a7   : > { %5976 = vmatpush3.bf16.msra.mxu0 %v6492_v3 }
 0x1a8   : > { %5977 = vmatprep.subr.bf16.mxu0 %v6493_v4 }
 0x1ab   : > { %5978 = vmatpush3.bf16.msra.mxu0 %v6493_v4  ;;  %v6496_v4 = vld [vmem:[%s7124_s15 + $0x70] sm:$0xff]  }
 0x1ac   : > { %5979 = vmatprep.subr.bf16.mxu0 %v6494_v5 }
 0x1af   : > { %5980 = vmatpush3.bf16.msra.mxu0 %v6494_v5 }
 0x1b2   : > { %5982 = vmatmul.mubr.bf16.vlgmr.msra.gmra.mxu0 %v7291_v28 }
 0x1b3   : > { %5985 = vmatprep.mubr.bf16.mxu0 %v7298_v36 }
 0x1ba   : > { %5986 = vmatmul.mubr.bf16.gmra.mxu0 %v7303_v44 }
 0x252   : > { %v5935_v6 = vpop.f32.mrf.mxu0  ;;  %v5959_v7 = vpop.f32.mrf.mxu1 }
 0x253   : > { %v1287_v39 = vadd.f32 %v5959_v7, %v5273_v22  ;;  %v1151_v59 = vadd.f32 %v5935_v6, %v7317_v12 }
 0x254   : > { %v1142_v8 = vpop.f32.mrf.mxu0  ;;  %v1278_v9 = vpop.f32.mrf.mxu1 }
 0x255   : > { %v1143_v15 = vadd.f32 %v7317_v12, %v1142_v8  ;;  %v1279_v46 = vadd.f32 %v5273_v22, %v1278_v9  ;;  %v6497_v9 = vld [vmem:[%s7124_s15 + $0x68] sm:$0xff]  }
 0x256   : > { %v5936_v10 = vpop.f32.mrf.mxu0  ;;  %v5960_v11 = vpop.f32.mrf.mxu1 }
 0x257   : > { %v1290_v37 = vadd.f32 %v5960_v11, %v5273_v22  ;;  %v1154_v35 = vadd.f32 %v5936_v10, %v7317_v12 }
 0x258   : > { %v1145_v13 = vpop.f32.mrf.mxu0  ;;  %v1281_v14 = vpop.f32.mrf.mxu1 }
 0x259   : > { %v1146_v16 = vadd.f32 %v7317_v12, %v1145_v13  ;;  %v1450_v20 = vpack.c.bf16 %v1290_v37, %v1287_v39  ;;  %v1282_v42 = vadd.f32 %v5273_v22, %v1281_v14  ;;  %v1446_v63 = vpack.c.bf16 %v1154_v35, %v1151_v59 }
 0x25a   : > { %v5963_v17 = vpop.f32.mrf.mxu1  ;;  %v5939_v34 = vpop.f32.mrf.mxu0 }
 0x25b   : > { %v1445_v18 = vpack.c.bf16 %v1146_v16, %v1143_v15  ;;  %v1303_v24 = vadd.f32 %v5963_v17, %v5273_v22  ;;  %v1449_v48 = vpack.c.bf16 %v1282_v42, %v1279_v46  ;;  %v1470_v27 = vsel %vm1453_vm0, %v1450_v20, 0  ;;  %v6498_v16 = vld [vmem:[%s7124_s15 + $0x60] sm:$0xff]  }
 0x25c   : > { %v1294_v19 = vpop.f32.mrf.mxu1  ;;  %v1158_v38 = vpop.f32.mrf.mxu0  ;;  %v1167_v10 = vadd.f32 %v5939_v34, %v7317_v12 }
 0x25d   : > { %5997 = vmatprep.mubr.msk.bf16.mxu1 %vm1453_vm0, %v1445_v18  ;;  %v1295_v29 = vadd.f32 %v5273_v22, %v1294_v19  ;;  %v1467_v21 = vsel %vm1453_vm0, %v1449_v48, 0  ;;  %v1159_v43 = vadd.f32 %v7317_v12, %v1158_v38  ;;  %v6500_v18 = vld [vmem:[%s7124_s15 + $0x50] sm:$0xff]   ;;  %v6501_v19 = vld [vmem:[%s7124_s15 + $0x48] sm:$0xff]  }
 0x25e   : > { %v5964_v23 = vpop.f32.mrf.mxu1  ;;  %v5940_v41 = vpop.f32.mrf.mxu0 }
 0x25f   : > { %v1306_v25 = vadd.f32 %v5964_v23, %v5273_v22  ;;  %v1170_v6 = vadd.f32 %v5940_v41, %v7317_v12  ;;  %v6503_v23 = vld [vmem:[%s7145_s0 + $0x78] sm:$0xff]  }
 0x260   : > { %v1297_v26 = vpop.f32.mrf.mxu1  ;;  %v1161_v45 = vpop.f32.mrf.mxu0 }
 0x261   : > { %v1452_v30 = vpack.c.bf16 %v1306_v25, %v1303_v24  ;;  %v1298_v31 = vadd.f32 %v5273_v22, %v1297_v26  ;;  %v1162_v56 = vadd.f32 %v7317_v12, %v1161_v45  ;;  %v1448_v14 = vpack.c.bf16 %v1170_v6, %v1167_v10  ;;  %v6499_v12 = vld [vmem:[%s7124_s15 + $0x58] sm:$0xff]   ;;  %v6502_v22 = vld [vmem:[%s7124_s15 + $0x40] sm:$0xff]   ;;  %v6504_v24 = vld [vmem:[%s7145_s0 + $0x70] sm:$0xff]  }
 0x262   : > { %v6505_v25 = vld [vmem:[%s7145_s0 + $0x68] sm:$0xff]   ;;  %v6506_v26 = vld [vmem:[%s7145_s0 + $0x60] sm:$0xff]  }
 0x263   : > { %v1451_v32 = vpack.c.bf16 %v1298_v31, %v1295_v29  ;;  %6381 = vmatprep.subr.msk.bf16.mxu1 %vm1453_vm0, %v1452_v30  ;;  %v1476_v33 = vsel %vm1453_vm0, %v1452_v30, 0  ;;  %v1447_v3 = vpack.c.bf16 %v1162_v56, %v1159_v43  ;;  %v6507_v29 = vld [vmem:[%s7145_s0 + $0x58] sm:$0xff]   ;;  %v6508_v30 = vld [vmem:[%s7145_s0 + $0x50] sm:$0xff]   ;;  %v6509_v31 = vld [vmem:[%s7145_s0 + $0x48] sm:$0xff]  }
 0x264   : > { %5990 = vmatpush3.bf16.xpose.msra.mxu1 %v1476_v33 }
 0x265   : > { %6382 = vmatprep.subr.msk.bf16.mxu1 %vm1453_vm0, %v1451_v32  ;;  %v1473_v40 = vsel %vm1453_vm0, %v1451_v32, 0  ;;  %v6510_v32 = vld [vmem:[%s7145_s0 + $0x40] sm:$0xff]  }
 0x26c   : > { %5992 = vmatpush3.bf16.xpose.msra.mxu1 %v1473_v40 }
 0x26d   : > { %6383 = vmatprep.subr.msk.bf16.mxu1 %vm1453_vm0, %v1450_v20 }
 0x272   : > { %v5983_v47 = vpop.f32.mrf.mxu0 }
 0x273   : > { %v1423_v8 = vadd.f32 %v5983_v47, %v5282_v57 }
 0x274   : > { %v1414_v50 = vpop.f32.mrf.mxu0  ;;  %5994 = vmatpush3.bf16.xpose.msra.mxu1 %v1470_v27 }
 0x275   : > { %6384 = vmatprep.subr.msk.bf16.mxu1 %vm1453_vm0, %v1449_v48  ;;  %v1415_v15 = vadd.f32 %v5282_v57, %v1414_v50 }
 0x276   : > { %v5984_v51 = vpop.f32.mrf.mxu0 }
 0x277   : > { %v1426_v5 = vadd.f32 %v5984_v51, %v5282_v57 }
 0x278   : > { %v1417_v52 = vpop.f32.mrf.mxu0 }
 0x279   : > { %v1645_v11 = vpack.c.bf16 %v1426_v5, %v1423_v8  ;;  %v1418_v13 = vadd.f32 %v5282_v57, %v1417_v52 }
 0x27a   : > { %v5987_v54 = vpop.f32.mrf.mxu0 }
 0x27b   : > { %v1439_v60 = vadd.f32 %v5987_v54, %v5282_v57  ;;  %v1644_v17 = vpack.c.bf16 %v1418_v13, %v1415_v15 }
 0x27c   : > { %v1430_v55 = vpop.f32.mrf.mxu0  ;;  %5996 = vmatpush3.bf16.xpose.msra.mxu1 %v1467_v21 }
 0x27d   : > { %6021 = vmatprep.subr.bf16.mxu1 %v6495_v53  ;;  %v1431_v1 = vadd.f32 %v5282_v57, %v1430_v55 }
 0x27e   : > { %v5988_v58 = vpop.f32.mrf.mxu0 }
 0x27f   : > { %v1442_v61 = vadd.f32 %v5988_v58, %v5282_v57  ;;  %v5316_v58 = vld [vmem:[%s7130_s29 + $0x1] ss:$0 sm:$0xff] }
 0x280   : > { %v1433_v62 = vpop.f32.mrf.mxu0 }
 0x281   : > { %v1647_v0 = vpack.c.bf16 %v1442_v61, %v1439_v60  ;;  %v1434_v2 = vadd.f32 %v5282_v57, %v1433_v62 }
 0x283   : > { %v1646_v7 = vpack.c.bf16 %v1434_v2, %v1431_v1  ;;  %6005 = vmatprep.subr.bf16.mxu0 %v1647_v0  ;;  %5998 = vmatmul.mubr.msk.bf16.vlgmr.msra.gmra.mxu1 %vm1453_vm0, %v1446_v63 }
 0x284   : > { %6006 = vmatpush3.bf16.msra.mxu0 %v1647_v0  ;;  %6001 = vmatprep.mubr.msk.bf16.mxu1 %vm1453_vm0, %v1447_v3 }
 0x285   : > { %6007 = vmatprep.subr.bf16.mxu0 %v1646_v7  ;;  %6022 = vmatpush3.bf16.msra.mxu1 %v6495_v53 }
 0x286   : > { %6023 = vmatprep.subr.bf16.mxu1 %v6496_v4 }
 0x288   : > { %6008 = vmatpush3.bf16.msra.mxu0 %v1646_v7 }
 0x289   : > { %6009 = vmatprep.subr.bf16.mxu0 %v1645_v11  ;;  %6024 = vmatpush3.bf16.msra.mxu1 %v6496_v4 }
 0x28a   : > { %6025 = vmatprep.subr.bf16.mxu1 %v6497_v9 }
 0x28b   : > { %6002 = vmatmul.mubr.msk.bf16.gmra.mxu1 %vm1453_vm0, %v1448_v14 }
 0x28c   : > { %6010 = vmatpush3.bf16.msra.mxu0 %v1645_v11  ;;  %6037 = vmatprep.mubr.bf16.mxu1 %v7285_v49 }
 0x28d   : > { %6011 = vmatprep.subr.bf16.mxu0 %v1644_v17  ;;  %6026 = vmatpush3.bf16.msra.mxu1 %v6497_v9 }
 0x28e   : > { %6027 = vmatprep.subr.bf16.mxu1 %v6498_v16 }
 0x290   : > { %6012 = vmatpush3.bf16.msra.mxu0 %v1644_v17 }
 0x291   : > { %6028 = vmatpush3.bf16.msra.mxu1 %v6498_v16 }
 0x292   : > { %6029 = vmatprep.subr.bf16.mxu1 %v6499_v12 }
 0x295   : > { %6030 = vmatpush3.bf16.msra.mxu1 %v6499_v12 }
 0x296   : > { %6031 = vmatprep.subr.bf16.mxu1 %v6500_v18 }
 0x299   : > { %6032 = vmatpush3.bf16.msra.mxu1 %v6500_v18 }
 0x29a   : > { %6033 = vmatprep.subr.bf16.mxu1 %v6501_v19 }
 0x29d   : > { %6034 = vmatpush3.bf16.msra.mxu1 %v6501_v19 }
 0x29e   : > { %6035 = vmatprep.subr.bf16.mxu1 %v6502_v22 }
 0x2a1   : > { %6036 = vmatpush3.bf16.msra.mxu1 %v6502_v22  ;;  %v5368_v22 = vld [vmem:[%s7150_s2 + $0x1] ss:$0 sm:$0xff] }
 0x2a2   : > { %6069 = vmatprep.subr.bf16.mxu1 %v6503_v23 }
 0x2a4   : > { %6038 = vmatmul.mubr.bf16.vlgmr.msra.gmra.mxu1 %v7291_v28 }
 0x2a5   : > { %6041 = vmatprep.mubr.bf16.mxu1 %v7298_v36  ;;  %6070 = vmatpush3.bf16.msra.mxu1 %v6503_v23 }
 0x2a6   : > { %6071 = vmatprep.subr.bf16.mxu1 %v6504_v24 }
 0x2a9   : > { %6072 = vmatpush3.bf16.msra.mxu1 %v6504_v24 }
 0x2aa   : > { %6073 = vmatprep.subr.bf16.mxu1 %v6505_v25 }
 0x2ac   : > { %6042 = vmatmul.mubr.bf16.gmra.mxu1 %v7303_v44 }
 0x2ad   : > { %6074 = vmatpush3.bf16.msra.mxu1 %v6505_v25  ;;  %6085 = vmatprep.mubr.bf16.mxu1 %v7285_v49 }
 0x2ae   : > { %6075 = vmatprep.subr.bf16.mxu1 %v6506_v26 }
 0x2b1   : > { %6076 = vmatpush3.bf16.msra.mxu1 %v6506_v26 }
 0x2b2   : > { %6077 = vmatprep.subr.bf16.mxu1 %v6507_v29 }
 0x2b5   : > { %6078 = vmatpush3.bf16.msra.mxu1 %v6507_v29 }
 0x2b6   : > { %6079 = vmatprep.subr.bf16.mxu1 %v6508_v30 }
 0x2b9   : > { %6080 = vmatpush3.bf16.msra.mxu1 %v6508_v30 }
 0x2ba   : > { %6081 = vmatprep.subr.bf16.mxu1 %v6509_v31 }
 0x2bd   : > { %6082 = vmatpush3.bf16.msra.mxu1 %v6509_v31 }
 0x2be   : > { %6083 = vmatprep.subr.bf16.mxu1 %v6510_v32 }
 0x2c1   : > { %6084 = vmatpush3.bf16.msra.mxu1 %v6510_v32 }
 0x2c4   : > { %6086 = vmatmul.mubr.bf16.vlgmr.msra.gmra.mxu1 %v7291_v28 }
 0x2c5   : > { %6089 = vmatprep.mubr.bf16.mxu1 %v7298_v36 }
 0x2cc   : > { %6090 = vmatmul.mubr.bf16.gmra.mxu1 %v7303_v44 }
 0x343   : > { %v5999_v33 = vpop.f32.mrf.mxu1 }
 0x344   : > { %v7367_v39 = vmul.f32 0.17677669, %v5999_v33 }
 0x345   : > { %v1512_v34 = vpop.f32.mrf.mxu1 }
 0x346   : > { %v7365_v37 = vmul.f32 0.17677669, %v1512_v34  ;;  %v1558_v46 = vsel %vm1551_vm1, %v7367_v39, -inf }
 0x347   : > { %v6000_v38 = vpop.f32.mrf.mxu1 }
 0x348   : > { %v1552_v20 = vsel %vm1551_vm1, %v7365_v37, -inf  ;;  %v7373_v45 = vmul.f32 0.17677669, %v6000_v38 }
 0x349   : > { %1553 = vmax.xlane.f32.xlu0 %v1552_v20  ;;  %v1515_v40 = vpop.f32.mrf.mxu1 }
 0x34a   : > { %v7371_v41 = vmul.f32 0.17677669, %v1515_v40  ;;  %v1561_v52 = vsel %vm1551_vm1, %v7373_v45, -inf }
 0x34b   : > { %v6003_v42 = vpop.f32.mrf.mxu1 }
 0x34c   : > { %v1555_v47 = vsel %vm1551_vm1, %v7371_v41, -inf  ;;  %v7381_v51 = vmul.f32 0.17677669, %v6003_v42 }
 0x34d   : > { %1559 = vmax.xlane.f32.xlu0 %v1558_v46  ;;  %1556 = vmax.xlane.f32.xlu1 %v1555_v47  ;;  %v1528_v48 = vpop.f32.mrf.mxu1 }
 0x34e   : > { %v7379_v27 = vmul.f32 0.17677669, %v1528_v48  ;;  %v1570_v35 = vsel %vm1551_vm1, %v7381_v51, -inf }
 0x34f   : > { %v6004_v50 = vpop.f32.mrf.mxu1 }
 0x350   : > { %v1564_v53 = vsel %vm1551_vm1, %v7379_v27, -inf  ;;  %v7389_v55 = vmul.f32 0.17677669, %v6004_v50 }
 0x351   : > { %1562 = vmax.xlane.f32.xlu1 %v1561_v52  ;;  %1565 = vmax.xlane.f32.xlu0 %v1564_v53  ;;  %v1531_v54 = vpop.f32.mrf.mxu1 }
 0x352   : > { %v7387_v21 = vmul.f32 0.17677669, %v1531_v54  ;;  %v1573_v57 = vsel %vm1551_vm1, %v7389_v55, -inf }
 0x354   : > { %v1567_v56 = vsel %vm1551_vm1, %v7387_v21, -inf }
 0x355   : > { %1571 = vmax.xlane.f32.xlu0 %v1570_v35  ;;  %1568 = vmax.xlane.f32.xlu1 %v1567_v56 }
 0x359   : > { %1574 = vmax.xlane.f32.xlu1 %v1573_v57 }
 0x364   : > { %v6039_v59 = vpop.f32.mrf.mxu1 }
 0x365   : > { %v7398_v60 = vadd.f32 %v6039_v59, %v5316_v58 }
 0x366   : > { %v1840_v61 = vpop.f32.mrf.mxu1 }
 0x367   : > { %v7402_v1 = vadd.f32 %v5316_v58, %v1840_v61 }
 0x368   : > { %v6040_v43 = vpop.f32.mrf.mxu1 }
 0x369   : > { %v7400_v62 = vadd.f32 %v6040_v43, %v5316_v58 }
 0x36a   : > { %v1843_v63 = vpop.f32.mrf.mxu1 }
 0x36b   : > { %v2148_v0 = vpack.c.bf16 %v7400_v62, %v7398_v60  ;;  %v7406_v2 = vadd.f32 %v5316_v58, %v1843_v63 }
 0x36c   : > { %v6043_v3 = vpop.f32.mrf.mxu1 }
 0x36d   : > { %v2147_v4 = vpack.c.bf16 %v7406_v2, %v7402_v1  ;;  %v7410_v5 = vadd.f32 %v6043_v3, %v5316_v58 }
 0x36e   : > { %v1856_v7 = vpop.f32.mrf.mxu1 }
 0x36f   : > { %v7412_v6 = vadd.f32 %v5316_v58, %v1856_v7 }
 0x370   : > { %v6044_v8 = vpop.f32.mrf.mxu1 }
 0x371   : > { %v7414_v9 = vadd.f32 %v6044_v8, %v5316_v58 }
 0x372   : > { %v1859_v10 = vpop.f32.mrf.mxu1 }
 0x373   : > { %v2150_v11 = vpack.c.bf16 %v7414_v9, %v7410_v5  ;;  %v7418_v13 = vadd.f32 %v5316_v58, %v1859_v10 }
 0x375   : > { %v2149_v14 = vpack.c.bf16 %v7418_v13, %v7412_v6 }
 0x384   : > { %v6087_v15 = vpop.f32.mrf.mxu1 }
 0x385   : > { %v2125_v34 = vadd.f32 %v6087_v15, %v5368_v22 }
 0x386   : > { %v2116_v16 = vpop.f32.mrf.mxu1 }
 0x387   : > { %v2117_v40 = vadd.f32 %v5368_v22, %v2116_v16 }
 0x388   : > { %v6088_v17 = vpop.f32.mrf.mxu1 }
 0x389   : > { %v2128_v32 = vadd.f32 %v6088_v17, %v5368_v22 }
 0x38a   : > { %v2119_v12 = vpop.f32.mrf.mxu1 }
 0x38b   : > { %v2345_v38 = vpack.c.bf16 %v2128_v32, %v2125_v34  ;;  %v2120_v20 = vadd.f32 %v5368_v22, %v2119_v12 }
 0x38c   : > { %v6091_v18 = vpop.f32.mrf.mxu1 }
 0x38d   : > { %v2141_v24 = vadd.f32 %v6091_v18, %v5368_v22  ;;  %v2344_v42 = vpack.c.bf16 %v2120_v20, %v2117_v40 }
 0x38e   : > { %v2132_v19 = vpop.f32.mrf.mxu1 }
 0x38f   : > { %v2133_v29 = vadd.f32 %v5368_v22, %v2132_v19 }
 0x390   : > { %v6092_v23 = vpop.f32.mrf.mxu1 }
 0x391   : > { %v2144_v25 = vadd.f32 %v6092_v23, %v5368_v22 }
 0x392   : > { %v2135_v26 = vpop.f32.mrf.mxu1 }
 0x393   : > { %v2347_v30 = vpack.c.bf16 %v2144_v25, %v2141_v24  ;;  %v2136_v31 = vadd.f32 %v5368_v22, %v2135_v26 }
 0x395   : > { %v2346_v33 = vpack.c.bf16 %v2136_v31, %v2133_v29  ;;  %6109 = vmatprep.subr.bf16.mxu1 %v2347_v30  ;;  %v6511_v31 = vld [vmem:[%s7135_s25 + $0x78] sm:$0xff]  }
 0x396   : > { %6110 = vmatpush3.bf16.msra.mxu1 %v2347_v30  ;;  %6045 = vmatprep.subr.bf16.mxu0 %v6511_v31 }
 0x397   : > { %6111 = vmatprep.subr.bf16.mxu1 %v2346_v33 }
 0x39a   : > { %6112 = vmatpush3.bf16.msra.mxu1 %v2346_v33 }
 0x39b   : > { %6113 = vmatprep.subr.bf16.mxu1 %v2345_v38 }
 0x39e   : > { %6114 = vmatpush3.bf16.msra.mxu1 %v2345_v38 }
 0x39f   : > { %6115 = vmatprep.subr.bf16.mxu1 %v2344_v42 }
 0x3a2   : > { %6116 = vmatpush3.bf16.msra.mxu1 %v2344_v42 }
 0x3d2   : > { %v1554_v46 = vpop.xlane.xlu0 %1553 }
 0x3d3   : > { %v1576_v47 = vsub.f32 %v7365_v37, %v1554_v46 }
 0x3d5   : > { %v1584_v48 = vmul.f32 1.442695, %v1576_v47 }
 0x3d6   : > { %v1560_v50 = vpop.xlane.xlu0 %1559  ;;  %v1557_v52 = vpop.xlane.xlu1 %1556 }
 0x3d7   : > { %6631 = vpow2.f32 %v1584_v48  ;;  %v1578_v53 = vsub.f32 %v7367_v39, %v1560_v50  ;;  %v1577_v54 = vsub.f32 %v7371_v41, %v1557_v52 }
 0x3d9   : > { %v1588_v35 = vmul.f32 1.442695, %v1578_v53  ;;  %v1586_v56 = vmul.f32 1.442695, %v1577_v54 }
 0x3da   : > { %v1563_v57 = vpop.xlane.xlu1 %1562  ;;  %v1566_v58 = vpop.xlane.xlu0 %1565 }
 0x3db   : > { %6633 = vpow2.f32 %v1588_v35  ;;  %v1579_v59 = vsub.f32 %v7373_v45, %v1563_v57  ;;  %v1580_v61 = vsub.f32 %v7379_v27, %v1566_v58 }
 0x3dc   : > { %6635 = vpow2.f32 %v1586_v56 }
 0x3dd   : > { %v1590_v43 = vmul.f32 1.442695, %v1579_v59  ;;  %v1592_v37 = vmul.f32 1.442695, %v1580_v61  ;;  %v6512_v61 = vld [vmem:[%s7135_s25 + $0x70] sm:$0xff]  }
 0x3de   : > { %v1572_v63 = vpop.xlane.xlu0 %1571  ;;  %v1569_v3 = vpop.xlane.xlu1 %1568 }
 0x3df   : > { %6637 = vpow2.f32 %v1590_v43  ;;  %v1582_v7 = vsub.f32 %v7381_v51, %v1572_v63  ;;  %v1581_v39 = vsub.f32 %v7387_v21, %v1569_v3 }
 0x3e0   : > { %6639 = vpow2.f32 %v1592_v37 }
 0x3e1   : > { %v1596_v41 = vmul.f32 1.442695, %v1582_v7  ;;  %v1594_v8 = vmul.f32 1.442695, %v1581_v39 }
 0x3e2   : > { %v1575_v10 = vpop.xlane.xlu1 %1574 }
 0x3e3   : > { %6641 = vpow2.f32 %v1596_v41  ;;  %v1583_v15 = vsub.f32 %v7389_v55, %v1575_v10  ;;  %v6513_v41 = vld [vmem:[%s7135_s25 + $0x68] sm:$0xff]  }
 0x3e4   : > { %v6632_v45 = vpop.eup %6631  ;;  %6643 = vpow2.f32 %v1594_v8 }
 0x3e5   : > { %v1598_v27 = vmul.f32 1.442695, %v1583_v15  ;;  %v1600_v16 = vsel %vm1551_vm1, %v6632_v45, 0.0 }
 0x3e6   : > { %1601 = vadd.xlane.f32.xlu0 %v1600_v16  ;;  %v6516_v16 = vld [vmem:[%s7135_s25 + $0x50] sm:$0xff]  }
 0x3e7   : > { %6645 = vpow2.f32 %v1598_v27  ;;  %v6515_v27 = vld [vmem:[%s7135_s25 + $0x58] sm:$0xff]  }
 0x3e8   : > { %v6634_v17 = vpop.eup %6633 }
 0x3e9   : > { %v6636_v12 = vpop.eup %6635  ;;  %v1606_v51 = vsel %vm1551_vm1, %v6634_v17, 0.0 }
 0x3ea   : > { %1607 = vadd.xlane.f32.xlu0 %v1606_v51  ;;  %v1603_v21 = vsel %vm1551_vm1, %v6636_v12, 0.0 }
 0x3eb   : > { %1604 = vadd.xlane.f32.xlu1 %v1603_v21 }
 0x3ec   : > { %v6638_v18 = vpop.eup %6637 }
 0x3ed   : > { %v6640_v19 = vpop.eup %6639  ;;  %v1609_v55 = vsel %vm1551_vm1, %v6638_v18, 0.0 }
 0x3ee   : > { %v1612_v22 = vsel %vm1551_vm1, %v6640_v19, 0.0 }
 0x3ef   : > { %1613 = vadd.xlane.f32.xlu0 %v1612_v22  ;;  %1610 = vadd.xlane.f32.xlu1 %v1609_v55 }
 0x3f0   : > { %v6642_v23 = vpop.eup %6641 }
 0x3f1   : > { %v6644_v24 = vpop.eup %6643  ;;  %v1618_v25 = vsel %vm1551_vm1, %v6642_v23, 0.0 }
 0x3f2   : > { %v1615_v26 = vsel %vm1551_vm1, %v6644_v24, 0.0 }
 0x3f3   : > { %1619 = vadd.xlane.f32.xlu0 %v1618_v25  ;;  %1616 = vadd.xlane.f32.xlu1 %v1615_v26 }
 0x3f4   : > { %v6646_v29 = vpop.eup %6645 }
 0x3f5   : > { %v1621_v30 = vsel %vm1551_vm1, %v6646_v29, 0.0 }
 0x3f7   : > { %1622 = vadd.xlane.f32.xlu1 %v1621_v30 }
 0x46f   : > { %v1602_v32 = vpop.xlane.xlu0 %1601 }
 0x470   : > { %6647 = vrcp.f32 %v1602_v32 }
 0x473   : > { %v1608_v33 = vpop.xlane.xlu0 %1607 }
 0x474   : > { %v1605_v34 = vpop.xlane.xlu1 %1604 }
 0x475   : > { %6649 = vrcp.f32 %v1605_v34  ;;  %v5342_v34 = vld [vmem:[%s8201_s24 + $0x1] ss:$0 sm:$0xff] }
 0x476   : > { %6651 = vrcp.f32 %v1608_v33 }
 0x478   : > { %v1614_v38 = vpop.xlane.xlu0 %1613  ;;  %v1611_v20 = vpop.xlane.xlu1 %1610 }
 0x479   : > { %6653 = vrcp.f32 %v1611_v20 }
 0x47a   : > { %6655 = vrcp.f32 %v1614_v38 }
 0x47c   : > { %v1620_v40 = vpop.xlane.xlu0 %1619  ;;  %v1617_v42 = vpop.xlane.xlu1 %1616 }
 0x47d   : > { %6657 = vrcp.f32 %v1617_v42  ;;  %v6648_v46 = vpop.eup %6647 }
 0x47e   : > { %6659 = vrcp.f32 %v1620_v40  ;;  %v1632_v50 = vmul.f32 %v6648_v46, %v6632_v45  ;;  %v6514_v45 = vld [vmem:[%s7135_s25 + $0x60] sm:$0xff]  }
 0x480   : > { %v1623_v47 = vpop.xlane.xlu1 %1622 }
 0x481   : > { %6661 = vrcp.f32 %v1623_v47 }
 0x482   : > { %v6650_v48 = vpop.eup %6649 }
 0x483   : > { %v1633_v52 = vmul.f32 %v6650_v48, %v6636_v12  ;;  %v6652_v53 = vpop.eup %6651  ;;  %v6518_v12 = vld [vmem:[%s7135_s25 + $0x40] sm:$0xff]  }
 0x484   : > { %v1634_v56 = vmul.f32 %v6652_v53, %v6634_v17  ;;  %v6517_v17 = vld [vmem:[%s7135_s25 + $0x48] sm:$0xff]  }
 0x485   : > { %v1640_v54 = vpack.c.bf16 %v1633_v52, %v1632_v50 }
 0x486   : > { %v6654_v35 = vpop.eup %6653 }
 0x487   : > { %6013 = vmatprep.mubr.msk.bf16.mxu0 %vm1551_vm1, %v1640_v54  ;;  %v1635_v57 = vmul.f32 %v6654_v35, %v6638_v18  ;;  %v6656_v58 = vpop.eup %6655 }
 0x488   : > { %v1636_v63 = vmul.f32 %v6656_v58, %v6640_v19 }
 0x489   : > { %v1641_v59 = vpack.c.bf16 %v1635_v57, %v1634_v56 }
 0x48a   : > { %v6658_v43 = vpop.eup %6657 }
 0x48b   : > { %v6660_v37 = vpop.eup %6659  ;;  %6014 = vmatmul.mubr.msk.bf16.vlgmr.msra.gmra.mxu0 %vm1551_vm1, %v1641_v59  ;;  %v1637_v3 = vmul.f32 %v6658_v43, %v6644_v24 }
 0x48c   : > { %6046 = vmatpush3.bf16.msra.mxu0 %v6511_v31  ;;  %v1638_v8 = vmul.f32 %v6660_v37, %v6642_v23 }
 0x48d   : > { %6047 = vmatprep.subr.bf16.mxu0 %v6512_v61  ;;  %v1642_v39 = vpack.c.bf16 %v1637_v3, %v1636_v63 }
 0x48e   : > { %v6662_v7 = vpop.eup %6661 }
 0x48f   : > { %v1639_v10 = vmul.f32 %v6662_v7, %v6646_v29  ;;  %6017 = vmatprep.mubr.msk.bf16.mxu0 %vm1551_vm1, %v1642_v39 }
 0x490   : > { %6048 = vmatpush3.bf16.msra.mxu0 %v6512_v61 }
 0x491   : > { %v1643_v15 = vpack.c.bf16 %v1639_v10, %v1638_v8  ;;  %6049 = vmatprep.subr.bf16.mxu0 %v6513_v41 }
 0x493   : > { %6018 = vmatmul.mubr.msk.bf16.gmra.mxu0 %vm1551_vm1, %v1643_v15 }
 0x494   : > { %6050 = vmatpush3.bf16.msra.mxu0 %v6513_v41  ;;  %6061 = vmatprep.mubr.bf16.mxu0 %v7285_v49 }
 0x495   : > { %6051 = vmatprep.subr.bf16.mxu0 %v6514_v45 }
 0x498   : > { %6052 = vmatpush3.bf16.msra.mxu0 %v6514_v45 }
 0x499   : > { %6053 = vmatprep.subr.bf16.mxu0 %v6515_v27 }
 0x49c   : > { %6054 = vmatpush3.bf16.msra.mxu0 %v6515_v27 }
 0x49d   : > { %6055 = vmatprep.subr.bf16.mxu0 %v6516_v16 }
 0x4a0   : > { %6056 = vmatpush3.bf16.msra.mxu0 %v6516_v16 }
 0x4a1   : > { %6057 = vmatprep.subr.bf16.mxu0 %v6517_v17 }
 0x4a4   : > { %6058 = vmatpush3.bf16.msra.mxu0 %v6517_v17 }
 0x4a5   : > { %6059 = vmatprep.subr.bf16.mxu0 %v6518_v12 }
 0x4a8   : > { %6060 = vmatpush3.bf16.msra.mxu0 %v6518_v12 }
 0x4ab   : > { %6062 = vmatmul.mubr.bf16.vlgmr.msra.gmra.mxu0 %v7291_v28 }
 0x4ac   : > { %6065 = vmatprep.mubr.bf16.mxu0 %v7298_v36 }
 0x4b3   : > { %6066 = vmatmul.mubr.bf16.gmra.mxu0 %v7303_v44 }
 0x4b4   : > { %6101 = vmatprep.mubr.msk.bf16.mxu0 %vm1453_vm0, %v2147_v4 }
 0x54b   : > { %v7459_v51 = vpop.f32.mrf.mxu0 }
 0x54d   : > { %v7461_v21 = vpop.f32.mrf.mxu0 }
 0x54f   : > { %v7463_v18 = vpop.f32.mrf.mxu0 }
 0x550   : > { %v1730_v19 = vpack.c.bf16 %v7463_v18, %v7459_v51  ;;  %v6525_v51 = vld [vmem:[%s7135_s25 + $0x98] sm:$0xff]   ;;  %v6526_v18 = vld [vmem:[%s7135_s25 + $0x90] sm:$0xff]  }
 0x551   : > { %v7467_v55 = vpop.f32.mrf.mxu0 }
 0x552   : > { %v1729_v22 = vpack.c.bf16 %v7467_v55, %v7461_v21  ;;  %v6524_v21 = vld [vmem:[%s7135_s25 + $0xa0] sm:$0xff]  }
 0x553   : > { %v7471_v23 = vpop.f32.mrf.mxu0  ;;  %v6528_v55 = vld [vmem:[%s7135_s25 + $0x80] sm:$0xff]  }
 0x555   : > { %v7473_v1 = vpop.f32.mrf.mxu0 }
 0x557   : > { %v7475_v2 = vpop.f32.mrf.mxu0 }
 0x558   : > { %v1732_v4 = vpack.c.bf16 %v7475_v2, %v7471_v23  ;;  %v6531_v23 = vld [vmem:[%s7124_s15 + $0xb8] sm:$0xff]  }
 0x559   : > { %v7479_v24 = vpop.f32.mrf.mxu0 }
 0x55a   : > { %v1731_v25 = vpack.c.bf16 %v7479_v24, %v7473_v1 }
 0x56b   : > { %v6063_v26 = vpop.f32.mrf.mxu0 }
 0x56c   : > { %v1987_v54 = vadd.f32 %v6063_v26, %v5342_v34 }
 0x56d   : > { %v1978_v29 = vpop.f32.mrf.mxu0 }
 0x56e   : > { %v1979_v58 = vadd.f32 %v5342_v34, %v1978_v29 }
 0x56f   : > { %v6064_v30 = vpop.f32.mrf.mxu0 }
 0x570   : > { %v1990_v53 = vadd.f32 %v6064_v30, %v5342_v34 }
 0x571   : > { %v1981_v31 = vpop.f32.mrf.mxu0 }
 0x572   : > { %v2152_v35 = vpack.c.bf16 %v1990_v53, %v1987_v54  ;;  %v1982_v57 = vadd.f32 %v5342_v34, %v1981_v31 }
 0x573   : > { %v6067_v32 = vpop.f32.mrf.mxu0 }
 0x574   : > { %v2003_v20 = vadd.f32 %v6067_v32, %v5342_v34  ;;  %v2151_v59 = vpack.c.bf16 %v1982_v57, %v1979_v58  ;;  %v2171_v61 = vsel %vm1453_vm0, %v2152_v35, 0 }
 0x575   : > { %v1994_v33 = vpop.f32.mrf.mxu0 }
 0x576   : > { %v1995_v46 = vadd.f32 %v5342_v34, %v1994_v33  ;;  %v2168_v43 = vsel %vm1453_vm0, %v2151_v59, 0 }
 0x577   : > { %v6068_v38 = vpop.f32.mrf.mxu0 }
 0x578   : > { %v2006_v40 = vadd.f32 %v6068_v38, %v5342_v34 }
 0x579   : > { %v1997_v42 = vpop.f32.mrf.mxu0 }
 0x57a   : > { %v2154_v47 = vpack.c.bf16 %v2006_v40, %v2003_v20  ;;  %v1998_v48 = vadd.f32 %v5342_v34, %v1997_v42 }
 0x57c   : > { %v2153_v50 = vpack.c.bf16 %v1998_v48, %v1995_v46  ;;  %6385 = vmatprep.subr.msk.bf16.mxu0 %vm1453_vm0, %v2154_v47  ;;  %v2177_v52 = vsel %vm1453_vm0, %v2154_v47, 0 }
 0x57d   : > { %6094 = vmatpush3.bf16.xpose.msra.mxu0 %v2177_v52 }
 0x57e   : > { %6386 = vmatprep.subr.msk.bf16.mxu0 %vm1453_vm0, %v2153_v50  ;;  %v2174_v56 = vsel %vm1453_vm0, %v2153_v50, 0 }
 0x585   : > { %6096 = vmatpush3.bf16.xpose.msra.mxu0 %v2174_v56 }
 0x586   : > { %6387 = vmatprep.subr.msk.bf16.mxu0 %vm1453_vm0, %v2152_v35 }
 0x58d   : > { %6098 = vmatpush3.bf16.xpose.msra.mxu0 %v2171_v61 }
 0x58e   : > { %6388 = vmatprep.subr.msk.bf16.mxu0 %vm1453_vm0, %v2151_v59 }
 0x595   : > { %6100 = vmatpush3.bf16.xpose.msra.mxu0 %v2168_v43 }
 0x59c   : > { %6102 = vmatmul.mubr.msk.bf16.vlgmr.msra.gmra.mxu0 %vm1453_vm0, %v2148_v0 }
 0x59d   : > { %6105 = vmatprep.mubr.msk.bf16.mxu0 %vm1453_vm0, %v2149_v14 }
 0x5a4   : > { %6106 = vmatmul.mubr.msk.bf16.gmra.mxu0 %vm1453_vm0, %v2150_v11 }
 0x65c   : > { %v6103_v37 = vpop.f32.mrf.mxu0 }
 0x65d   : > { %v2246_v39 = vmul.f32 0.17677669, %v6103_v37 }
 0x65e   : > { %v2213_v63 = vpop.f32.mrf.mxu0 }
 0x65f   : > { %v2244_v3 = vmul.f32 0.17677669, %v2213_v63  ;;  %v2258_v6 = vsel %vm1551_vm1, %v2246_v39, -inf }
 0x660   : > { %v6104_v7 = vpop.f32.mrf.mxu0 }
 0x661   : > { %v2252_v41 = vsel %vm1551_vm1, %v2244_v3, -inf  ;;  %v2247_v8 = vmul.f32 0.17677669, %v6104_v7 }
 0x662   : > { %2253 = vmax.xlane.f32.xlu0 %v2252_v41  ;;  %v2216_v60 = vpop.f32.mrf.mxu0 }
 0x663   : > { %v2245_v62 = vmul.f32 0.17677669, %v2216_v60  ;;  %v2261_v10 = vsel %vm1551_vm1, %v2247_v8, -inf }
 0x664   : > { %v6107_v0 = vpop.f32.mrf.mxu0 }
 0x665   : > { %v2255_v13 = vsel %vm1551_vm1, %v2245_v62, -inf  ;;  %v2250_v14 = vmul.f32 0.17677669, %v6107_v0 }
 0x666   : > { %2259 = vmax.xlane.f32.xlu0 %v2258_v6  ;;  %2256 = vmax.xlane.f32.xlu1 %v2255_v13  ;;  %v2229_v5 = vpop.f32.mrf.mxu0 }
 0x667   : > { %v2248_v9 = vmul.f32 0.17677669, %v2229_v5  ;;  %v2270_v17 = vsel %vm1551_vm1, %v2250_v14, -inf }
 0x668   : > { %v6108_v11 = vpop.f32.mrf.mxu0 }
 0x669   : > { %v2264_v15 = vsel %vm1551_vm1, %v2248_v9, -inf  ;;  %v2251_v16 = vmul.f32 0.17677669, %v6108_v11 }
 0x66a   : > { %2262 = vmax.xlane.f32.xlu1 %v2261_v10  ;;  %2265 = vmax.xlane.f32.xlu0 %v2264_v15  ;;  %v2232_v45 = vpop.f32.mrf.mxu0  ;;  %v6519_v10 = vld [vmem:[%s7156_s23 + $0x8] sm:$0xff]   ;;  %v6529_v15 = vld [vmem:[%s7156_s23 + $0x18] sm:$0xff]  }
 0x66b   : > { %v2249_v27 = vmul.f32 0.17677669, %v2232_v45  ;;  %v2273_v26 = vsel %vm1551_vm1, %v2251_v16, -inf  ;;  %6137 = vmatprep.subr.bf16.mxu1 %v6519_v10  ;;  %6125 = vmatprep.subr.bf16.mxu0 %v6529_v15 }
 0x66c   : > { %6126 = vmatpush3.bf16.msra.mxu0 %v6529_v15  ;;  %v6537_v15 = vld [vmem:[%s7124_s15 + $0x88] sm:$0xff]  }
 0x66d   : > { %v2267_v12 = vsel %vm1551_vm1, %v2249_v27, -inf }
 0x66e   : > { %2271 = vmax.xlane.f32.xlu0 %v2270_v17  ;;  %2268 = vmax.xlane.f32.xlu1 %v2267_v12 }
 0x672   : > { %2274 = vmax.xlane.f32.xlu1 %v2273_v26 }
 0x6eb   : > { %v2254_v29 = vpop.xlane.xlu0 %2253 }
 0x6ec   : > { %v2276_v30 = vsub.f32 %v2244_v3, %v2254_v29 }
 0x6ee   : > { %v2284_v31 = vmul.f32 1.442695, %v2276_v30 }
 0x6ef   : > { %v2260_v32 = vpop.xlane.xlu0 %2259  ;;  %v2257_v33 = vpop.xlane.xlu1 %2256 }
 0x6f0   : > { %6663 = vpow2.f32 %v2284_v31  ;;  %v2278_v34 = vsub.f32 %v2246_v39, %v2260_v32  ;;  %v2277_v38 = vsub.f32 %v2245_v62, %v2257_v33 }
 0x6f2   : > { %v2288_v20 = vmul.f32 1.442695, %v2278_v34  ;;  %v2286_v40 = vmul.f32 1.442695, %v2277_v38 }
 0x6f3   : > { %v2263_v42 = vpop.xlane.xlu1 %2262  ;;  %v2266_v46 = vpop.xlane.xlu0 %2265 }
 0x6f4   : > { %6665 = vpow2.f32 %v2288_v20  ;;  %v2279_v47 = vsub.f32 %v2247_v8, %v2263_v42  ;;  %v2280_v48 = vsub.f32 %v2248_v9, %v2266_v46 }
 0x6f5   : > { %6667 = vpow2.f32 %v2286_v40 }
 0x6f6   : > { %v2290_v50 = vmul.f32 1.442695, %v2279_v47  ;;  %v2292_v52 = vmul.f32 1.442695, %v2280_v48 }
 0x6f7   : > { %v2272_v53 = vpop.xlane.xlu0 %2271  ;;  %v2269_v54 = vpop.xlane.xlu1 %2268 }
 0x6f8   : > { %6669 = vpow2.f32 %v2290_v50  ;;  %v2282_v35 = vsub.f32 %v2250_v14, %v2272_v53  ;;  %v2281_v56 = vsub.f32 %v2249_v27, %v2269_v54  ;;  %v6520_v50 = vld [vmem:[%s7156_s23] sm:$0xff]  }
 0x6f9   : > { %6671 = vpow2.f32 %v2292_v52 }
 0x6fa   : > { %v2296_v57 = vmul.f32 1.442695, %v2282_v35  ;;  %v2294_v58 = vmul.f32 1.442695, %v2281_v56 }
 0x6fb   : > { %v2275_v59 = vpop.xlane.xlu1 %2274 }
 0x6fc   : > { %6673 = vpow2.f32 %v2296_v57  ;;  %v2283_v61 = vsub.f32 %v2251_v16, %v2275_v59 }
 0x6fd   : > { %v6664_v43 = vpop.eup %6663  ;;  %6675 = vpow2.f32 %v2294_v58  ;;  %v6521_v58 = vld [vmem:[%s7135_s25 + $0xb8] sm:$0xff]  }
 0x6fe   : > { %v2298_v37 = vmul.f32 1.442695, %v2283_v61  ;;  %v2300_v63 = vsel %vm1551_vm1, %v6664_v43, 0.0 }
 0x6ff   : > { %2301 = vadd.xlane.f32.xlu0 %v2300_v63  ;;  %v6523_v63 = vld [vmem:[%s7135_s25 + $0xa8] sm:$0xff]  }
 0x700   : > { %6677 = vpow2.f32 %v2298_v37  ;;  %v6522_v37 = vld [vmem:[%s7135_s25 + $0xb0] sm:$0xff]  }
 0x701   : > { %v6666_v3 = vpop.eup %6665 }
 0x702   : > { %v6668_v7 = vpop.eup %6667  ;;  %v2306_v39 = vsel %vm1551_vm1, %v6666_v3, 0.0 }
 0x703   : > { %2307 = vadd.xlane.f32.xlu0 %v2306_v39  ;;  %v2303_v41 = vsel %vm1551_vm1, %v6668_v7, 0.0  ;;  %v6532_v39 = vld [vmem:[%s7124_s15 + $0xb0] sm:$0xff]  }
 0x704   : > { %2304 = vadd.xlane.f32.xlu1 %v2303_v41 }
 0x705   : > { %v6670_v60 = vpop.eup %6669 }
 0x706   : > { %v6672_v62 = vpop.eup %6671  ;;  %v2309_v0 = vsel %vm1551_vm1, %v6670_v60, 0.0 }
 0x707   : > { %v2312_v8 = vsel %vm1551_vm1, %v6672_v62, 0.0 }
 0x708   : > { %2313 = vadd.xlane.f32.xlu0 %v2312_v8  ;;  %2310 = vadd.xlane.f32.xlu1 %v2309_v0 }
 0x709   : > { %v6674_v6 = vpop.eup %6673 }
 0x70a   : > { %v6676_v13 = vpop.eup %6675  ;;  %v2318_v5 = vsel %vm1551_vm1, %v6674_v6, 0.0 }
 0x70b   : > { %v2315_v9 = vsel %vm1551_vm1, %v6676_v13, 0.0 }
 0x70c   : > { %2319 = vadd.xlane.f32.xlu0 %v2318_v5  ;;  %2316 = vadd.xlane.f32.xlu1 %v2315_v9  ;;  %v6535_v9 = vld [vmem:[%s7124_s15 + $0x98] sm:$0xff]  }
 0x70d   : > { %v6678_v11 = vpop.eup %6677 }
 0x70e   : > { %v2321_v14 = vsel %vm1551_vm1, %v6678_v11, 0.0 }
 0x710   : > { %2322 = vadd.xlane.f32.xlu1 %v2321_v14  ;;  %v6536_v14 = vld [vmem:[%s7124_s15 + $0x90] sm:$0xff]  }
 0x788   : > { %v2302_v45 = vpop.xlane.xlu0 %2301 }
 0x789   : > { %6679 = vrcp.f32 %v2302_v45 }
 0x78c   : > { %v2308_v27 = vpop.xlane.xlu0 %2307 }
 0x78d   : > { %v2305_v16 = vpop.xlane.xlu1 %2304 }
 0x78e   : > { %6681 = vrcp.f32 %v2305_v16 }
 0x78f   : > { %6683 = vrcp.f32 %v2308_v27  ;;  %v6538_v27 = vld [vmem:[%s7124_s15 + $0x80] sm:$0xff]  }
 0x791   : > { %v2314_v17 = vpop.xlane.xlu0 %2313  ;;  %v2311_v12 = vpop.xlane.xlu1 %2310 }
 0x792   : > { %6685 = vrcp.f32 %v2311_v12 }
 0x793   : > { %6687 = vrcp.f32 %v2314_v17  ;;  %v6539_v17 = vld [vmem:[%s7145_s0 + $0xb8] sm:$0xff]  }
 0x795   : > { %v2320_v26 = vpop.xlane.xlu0 %2319  ;;  %v2317_v29 = vpop.xlane.xlu1 %2316 }
 0x796   : > { %6689 = vrcp.f32 %v2317_v29  ;;  %v6680_v30 = vpop.eup %6679 }
 0x797   : > { %6691 = vrcp.f32 %v2320_v26  ;;  %v2332_v33 = vmul.f32 %v6680_v30, %v6664_v43  ;;  %v6540_v26 = vld [vmem:[%s7145_s0 + $0xb0] sm:$0xff]   ;;  %v6541_v30 = vld [vmem:[%s7145_s0 + $0xa8] sm:$0xff]  }
 0x799   : > { %v2323_v31 = vpop.xlane.xlu1 %2322 }
 0x79a   : > { %6693 = vrcp.f32 %v2323_v31 }
 0x79b   : > { %v6682_v32 = vpop.eup %6681 }
 0x79c   : > { %v2333_v34 = vmul.f32 %v6682_v32, %v6668_v7  ;;  %v6684_v38 = vpop.eup %6683 }
 0x79d   : > { %v2334_v42 = vmul.f32 %v6684_v38, %v6666_v3 }
 0x79e   : > { %v2340_v20 = vpack.c.bf16 %v2333_v34, %v2332_v33  ;;  %v6542_v33 = vld [vmem:[%s7145_s0 + $0xa0] sm:$0xff]  }
 0x79f   : > { %v6686_v40 = vpop.eup %6685 }
 0x7a0   : > { %6117 = vmatprep.mubr.msk.bf16.mxu1 %vm1551_vm1, %v2340_v20  ;;  %v2335_v46 = vmul.f32 %v6686_v40, %v6670_v60  ;;  %v6688_v47 = vpop.eup %6687  ;;  %v6543_v20 = vld [vmem:[%s7145_s0 + $0x98] sm:$0xff]  }
 0x7a1   : > { %v2336_v54 = vmul.f32 %v6688_v47, %v6672_v62  ;;  %v6533_v62 = vld [vmem:[%s7124_s15 + $0xa8] sm:$0xff]  }
 0x7a2   : > { %v2341_v48 = vpack.c.bf16 %v2335_v46, %v2334_v42  ;;  %v6544_v46 = vld [vmem:[%s7145_s0 + $0x90] sm:$0xff]  }
 0x7a3   : > { %v6690_v52 = vpop.eup %6689 }
 0x7a4   : > { %v6692_v53 = vpop.eup %6691  ;;  %6118 = vmatmul.mubr.msk.bf16.vlgmr.msra.gmra.mxu1 %vm1551_vm1, %v2341_v48  ;;  %v2337_v35 = vmul.f32 %v6690_v52, %v6676_v13  ;;  %v6534_v13 = vld [vmem:[%s7124_s15 + $0xa0] sm:$0xff]   ;;  %v6545_v52 = vld [vmem:[%s7145_s0 + $0x88] sm:$0xff]  }
 0x7a5   : > { %6138 = vmatpush3.bf16.msra.mxu1 %v6519_v10  ;;  %v2338_v59 = vmul.f32 %v6692_v53, %v6674_v6  ;;  %v5444_v48 = vld [vmem:[%s8201_s24 + $0x2] ss:$0 sm:$0xff] }
 0x7a6   : > { %v2342_v57 = vpack.c.bf16 %v2337_v35, %v2336_v54  ;;  %6139 = vmatprep.subr.bf16.mxu1 %v6520_v50 }
 0x7a7   : > { %v6694_v56 = vpop.eup %6693 }
 0x7a8   : > { %v2339_v61 = vmul.f32 %v6694_v56, %v6678_v11  ;;  %6121 = vmatprep.mubr.msk.bf16.mxu1 %vm1551_vm1, %v2342_v57 }
 0x7a9   : > { %6140 = vmatpush3.bf16.msra.mxu1 %v6520_v50 }
 0x7aa   : > { %v2343_v43 = vpack.c.bf16 %v2339_v61, %v2338_v59  ;;  %6173 = vmatprep.subr.bf16.mxu1 %v6521_v58  ;;  %v6546_v59 = vld [vmem:[%s7145_s0 + $0x80] sm:$0xff]  }
 0x7ac   : > { %6122 = vmatmul.mubr.msk.bf16.gmra.mxu1 %vm1551_vm1, %v2343_v43 }
 0x7ad   : > { %6141 = vmatprep.mubr.msk.bf16.mxu1 %vm1453_vm0, %v1729_v22  ;;  %v6530_v22 = vld [vmem:[%s7156_s23 + $0x10] sm:$0xff]  }
 0x7ae   : > { %6127 = vmatprep.subr.bf16.mxu0 %v6530_v22 }
 0x7af   : > { %6128 = vmatpush3.bf16.msra.mxu0 %v6530_v22 }
 0x7b0   : > { %6149 = vmatprep.subr.bf16.mxu0 %v6531_v23 }
 0x7b4   : > { %6142 = vmatmul.mubr.msk.bf16.vlgmr.msra.gmra.mxu1 %vm1453_vm0, %v1730_v19  ;;  %v6527_v19 = vld [vmem:[%s7135_s25 + $0x88] sm:$0xff]  }
 0x7b5   : > { %6174 = vmatpush3.bf16.msra.mxu1 %v6521_v58  ;;  %6145 = vmatprep.mubr.msk.bf16.mxu1 %vm1453_vm0, %v1731_v25 }
 0x7b6   : > { %6175 = vmatprep.subr.bf16.mxu1 %v6522_v37 }
 0x7b9   : > { %6176 = vmatpush3.bf16.msra.mxu1 %v6522_v37 }
 0x7ba   : > { %6177 = vmatprep.subr.bf16.mxu1 %v6523_v63 }
 0x7bc   : > { %6146 = vmatmul.mubr.msk.bf16.gmra.mxu1 %vm1453_vm0, %v1732_v4 }
 0x7bd   : > { %6178 = vmatpush3.bf16.msra.mxu1 %v6523_v63  ;;  %6189 = vmatprep.mubr.bf16.mxu1 %v7285_v49 }
 0x7be   : > { %6179 = vmatprep.subr.bf16.mxu1 %v6524_v21 }
 0x7c1   : > { %6180 = vmatpush3.bf16.msra.mxu1 %v6524_v21 }
 0x7c2   : > { %6181 = vmatprep.subr.bf16.mxu1 %v6525_v51 }
 0x7c5   : > { %6182 = vmatpush3.bf16.msra.mxu1 %v6525_v51 }
 0x7c6   : > { %6183 = vmatprep.subr.bf16.mxu1 %v6526_v18 }
 0x7c9   : > { %6184 = vmatpush3.bf16.msra.mxu1 %v6526_v18 }
 0x7ca   : > { %6185 = vmatprep.subr.bf16.mxu1 %v6527_v19 }
 0x7cd   : > { %6186 = vmatpush3.bf16.msra.mxu1 %v6527_v19 }
 0x7ce   : > { %6187 = vmatprep.subr.bf16.mxu1 %v6528_v55 }
 0x7d1   : > { %6188 = vmatpush3.bf16.msra.mxu1 %v6528_v55 }
 0x7d4   : > { %6190 = vmatmul.mubr.bf16.vlgmr.msra.gmra.mxu1 %v7291_v28 }
 0x7d5   : > { %6193 = vmatprep.mubr.bf16.mxu1 %v7298_v36 }
 0x7dc   : > { %6194 = vmatmul.mubr.bf16.gmra.mxu1 %v7303_v44 }
 0x864   : > { %v6119_v1 = vpop.f32.mrf.mxu1 }
 0x866   : > { %v2394_v2 = vpop.f32.mrf.mxu1 }
 0x868   : > { %v6120_v4 = vpop.f32.mrf.mxu1 }
 0x869   : > { %v2431_v3 = vpack.c.bf16 %v6120_v4, %v6119_v1 }
 0x86a   : > { %v2397_v24 = vpop.f32.mrf.mxu1 }
 0x86b   : > { %v2430_v25 = vpack.c.bf16 %v2397_v24, %v2394_v2 }
 0x86c   : > { %v6123_v7 = vpop.f32.mrf.mxu1 }
 0x86d   : > { %6129 = vmatprep.mubr.msk.bf16.mxu0 %vm1453_vm0, %v2430_v25 }
 0x86e   : > { %v2410_v41 = vpop.f32.mrf.mxu1  ;;  %6130 = vmatmul.mubr.msk.bf16.vlgmr.msra.gmra.mxu0 %vm1453_vm0, %v2431_v3 }
 0x86f   : > { %6150 = vmatpush3.bf16.msra.mxu0 %v6531_v23 }
 0x870   : > { %v6124_v60 = vpop.f32.mrf.mxu1  ;;  %6151 = vmatprep.subr.bf16.mxu0 %v6532_v39 }
 0x871   : > { %v2433_v6 = vpack.c.bf16 %v6124_v60, %v6123_v7 }
 0x872   : > { %v2413_v0 = vpop.f32.mrf.mxu1 }
 0x873   : > { %v2432_v8 = vpack.c.bf16 %v2413_v0, %v2410_v41  ;;  %6152 = vmatpush3.bf16.msra.mxu0 %v6532_v39  ;;  %v5418_v0 = vld [vmem:[%s7130_s29 + $0x2] ss:$0 sm:$0xff] }
 0x874   : > { %6153 = vmatprep.subr.bf16.mxu0 %v6533_v62  ;;  %v7563_v5 = vpop.f32.mrf.mxu1 }
 0x875   : > { %6133 = vmatprep.mubr.msk.bf16.mxu0 %vm1453_vm0, %v2432_v8 }
 0x876   : > { %6134 = vmatmul.mubr.msk.bf16.gmra.mxu0 %vm1453_vm0, %v2433_v6  ;;  %v7568_v11 = vpop.f32.mrf.mxu1 }
 0x877   : > { %6154 = vmatpush3.bf16.msra.mxu0 %v6533_v62  ;;  %6165 = vmatprep.mubr.bf16.mxu0 %v7285_v49 }
 0x878   : > { %6155 = vmatprep.subr.bf16.mxu0 %v6534_v13  ;;  %v7571_v10 = vpop.f32.mrf.mxu1 }
 0x87a   : > { %v7574_v45 = vpop.f32.mrf.mxu1 }
 0x87b   : > { %6156 = vmatpush3.bf16.msra.mxu0 %v6534_v13 }
 0x87c   : > { %6157 = vmatprep.subr.bf16.mxu0 %v6535_v9  ;;  %v7577_v16 = vpop.f32.mrf.mxu1 }
 0x87e   : > { %v7580_v12 = vpop.f32.mrf.mxu1 }
 0x87f   : > { %6158 = vmatpush3.bf16.msra.mxu0 %v6535_v9 }
 0x880   : > { %6159 = vmatprep.subr.bf16.mxu0 %v6536_v14  ;;  %v7583_v29 = vpop.f32.mrf.mxu1 }
 0x882   : > { %v7588_v31 = vpop.f32.mrf.mxu1 }
 0x883   : > { %6160 = vmatpush3.bf16.msra.mxu0 %v6536_v14 }
 0x884   : > { %6161 = vmatprep.subr.bf16.mxu0 %v6537_v15 }
 0x887   : > { %6162 = vmatpush3.bf16.msra.mxu0 %v6537_v15 }
 0x888   : > { %6163 = vmatprep.subr.bf16.mxu0 %v6538_v27 }
 0x88b   : > { %6164 = vmatpush3.bf16.msra.mxu0 %v6538_v27 }
 0x88c   : > { %6197 = vmatprep.subr.bf16.mxu0 %v6539_v17 }
 0x88e   : > { %6166 = vmatmul.mubr.bf16.vlgmr.msra.gmra.mxu0 %v7291_v28 }
 0x88f   : > { %6169 = vmatprep.mubr.bf16.mxu0 %v7298_v36  ;;  %6198 = vmatpush3.bf16.msra.mxu0 %v6539_v17 }
 0x890   : > { %6199 = vmatprep.subr.bf16.mxu0 %v6540_v26 }
 0x893   : > { %6200 = vmatpush3.bf16.msra.mxu0 %v6540_v26 }
 0x894   : > { %v6191_v32 = vpop.f32.mrf.mxu1  ;;  %6201 = vmatprep.subr.bf16.mxu0 %v6541_v30 }
 0x895   : > { %v2866_v63 = vadd.f32 %v6191_v32, %v5444_v48 }
 0x896   : > { %6170 = vmatmul.mubr.bf16.gmra.mxu0 %v7303_v44  ;;  %v2857_v34 = vpop.f32.mrf.mxu1 }
 0x897   : > { %6202 = vmatpush3.bf16.msra.mxu0 %v6541_v30  ;;  %6213 = vmatprep.mubr.bf16.mxu0 %v7285_v49  ;;  %v2858_v19 = vadd.f32 %v5444_v48, %v2857_v34 }
 0x898   : > { %v6192_v38 = vpop.f32.mrf.mxu1  ;;  %6203 = vmatprep.subr.bf16.mxu0 %v6542_v33 }
 0x899   : > { %v2869_v37 = vadd.f32 %v6192_v38, %v5444_v48 }
 0x89a   : > { %v2860_v40 = vpop.f32.mrf.mxu1 }
 0x89b   : > { %6204 = vmatpush3.bf16.msra.mxu0 %v6542_v33  ;;  %v3031_v21 = vpack.c.bf16 %v2869_v37, %v2866_v63  ;;  %v2861_v18 = vadd.f32 %v5444_v48, %v2860_v40 }
 0x89c   : > { %v6195_v42 = vpop.f32.mrf.mxu1  ;;  %6205 = vmatprep.subr.bf16.mxu0 %v6543_v20 }
 0x89d   : > { %v2882_v53 = vadd.f32 %v6195_v42, %v5444_v48  ;;  %v3030_v55 = vpack.c.bf16 %v2861_v18, %v2858_v19  ;;  %v3050_v22 = vsel %vm1453_vm0, %v3031_v21, 0 }
 0x89e   : > { %v2873_v47 = vpop.f32.mrf.mxu1 }
 0x89f   : > { %6206 = vmatpush3.bf16.msra.mxu0 %v6543_v20  ;;  %v2874_v56 = vadd.f32 %v5444_v48, %v2873_v47  ;;  %v3047_v23 = vsel %vm1453_vm0, %v3030_v55, 0 }
 0x8a0   : > { %v6196_v50 = vpop.f32.mrf.mxu1  ;;  %6207 = vmatprep.subr.bf16.mxu0 %v6544_v46 }
 0x8a1   : > { %v2885_v54 = vadd.f32 %v6196_v50, %v5444_v48 }
 0x8a2   : > { %v2876_v35 = vpop.f32.mrf.mxu1 }
 0x8a3   : > { %v3033_v57 = vpack.c.bf16 %v2885_v54, %v2882_v53  ;;  %v2877_v58 = vadd.f32 %v5444_v48, %v2876_v35  ;;  %6208 = vmatpush3.bf16.msra.mxu0 %v6544_v46  ;;  %v5470_v54 = vld [vmem:[%s7150_s2 + $0x2] ss:$0 sm:$0xff] }
 0x8a4   : > { %6209 = vmatprep.subr.bf16.mxu0 %v6545_v52 }
 0x8a5   : > { %v3032_v61 = vpack.c.bf16 %v2877_v58, %v2874_v56  ;;  %6389 = vmatprep.subr.msk.bf16.mxu1 %vm1453_vm0, %v3033_v57  ;;  %v3056_v43 = vsel %vm1453_vm0, %v3033_v57, 0 }
 0x8a6   : > { %6222 = vmatpush3.bf16.xpose.msra.mxu1 %v3056_v43 }
 0x8a7   : > { %6210 = vmatpush3.bf16.msra.mxu0 %v6545_v52  ;;  %6390 = vmatprep.subr.msk.bf16.mxu1 %vm1453_vm0, %v3032_v61  ;;  %v3053_v51 = vsel %vm1453_vm0, %v3032_v61, 0 }
 0x8a8   : > { %6211 = vmatprep.subr.bf16.mxu0 %v6546_v59 }
 0x8ab   : > { %6212 = vmatpush3.bf16.msra.mxu0 %v6546_v59 }
 0x8ae   : > { %6214 = vmatmul.mubr.bf16.vlgmr.msra.gmra.mxu0 %v7291_v28  ;;  %6224 = vmatpush3.bf16.xpose.msra.mxu1 %v3053_v51 }
 0x8af   : > { %6217 = vmatprep.mubr.bf16.mxu0 %v7298_v36  ;;  %6391 = vmatprep.subr.msk.bf16.mxu1 %vm1453_vm0, %v3031_v21 }
 0x8b6   : > { %6218 = vmatmul.mubr.bf16.gmra.mxu0 %v7303_v44  ;;  %6226 = vmatpush3.bf16.xpose.msra.mxu1 %v3050_v22 }
 0x8b7   : > { %6392 = vmatprep.subr.msk.bf16.mxu1 %vm1453_vm0, %v3030_v55 }
 0x8be   : > { %6228 = vmatpush3.bf16.xpose.msra.mxu1 %v3047_v23 }
 0x92e   : > { %v7609_v1 = vpop.f32.mrf.mxu0 }
 0x930   : > { %v7611_v2 = vpop.f32.mrf.mxu0 }
 0x932   : > { %v7613_v4 = vpop.f32.mrf.mxu0 }
 0x934   : > { %v7615_v24 = vpop.f32.mrf.mxu0 }
 0x936   : > { %v7617_v25 = vpop.f32.mrf.mxu0 }
 0x938   : > { %v7619_v3 = vpop.f32.mrf.mxu0 }
 0x93a   : > { %v7621_v7 = vpop.f32.mrf.mxu0 }
 0x93c   : > { %v7623_v39 = vpop.f32.mrf.mxu0 }
 0x94e   : > { %v6167_v41 = vpop.f32.mrf.mxu0 }
 0x94f   : > { %v2728_v14 = vadd.f32 %v6167_v41, %v5418_v0 }
 0x950   : > { %v2719_v60 = vpop.f32.mrf.mxu0 }
 0x951   : > { %v2720_v13 = vadd.f32 %v5418_v0, %v2719_v60 }
 0x952   : > { %v6168_v62 = vpop.f32.mrf.mxu0 }
 0x953   : > { %v2731_v8 = vadd.f32 %v6168_v62, %v5418_v0 }
 0x954   : > { %v2722_v6 = vpop.f32.mrf.mxu0 }
 0x955   : > { %v2723_v9 = vadd.f32 %v5418_v0, %v2722_v6  ;;  %v3027_v17 = vpack.c.bf16 %v2731_v8, %v2728_v14 }
 0x956   : > { %v6171_v15 = vpop.f32.mrf.mxu0 }
 0x957   : > { %v3026_v27 = vpack.c.bf16 %v2723_v9, %v2720_v13  ;;  %v2744_v20 = vadd.f32 %v6171_v15, %v5418_v0 }
 0x958   : > { %v2735_v26 = vpop.f32.mrf.mxu0 }
 0x959   : > { %6229 = vmatprep.mubr.msk.bf16.mxu1 %vm1453_vm0, %v3026_v27  ;;  %v2736_v34 = vadd.f32 %v5418_v0, %v2735_v26 }
 0x95a   : > { %v6172_v30 = vpop.f32.mrf.mxu0  ;;  %6230 = vmatmul.mubr.msk.bf16.vlgmr.msra.gmra.mxu1 %vm1453_vm0, %v3027_v17 }
 0x95b   : > { %v2747_v32 = vadd.f32 %v6172_v30, %v5418_v0 }
 0x95c   : > { %v2738_v33 = vpop.f32.mrf.mxu0 }
 0x95d   : > { %v2739_v38 = vadd.f32 %v5418_v0, %v2738_v33  ;;  %v3029_v42 = vpack.c.bf16 %v2747_v32, %v2744_v20 }
 0x95f   : > { %v3028_v40 = vpack.c.bf16 %v2739_v38, %v2736_v34 }
 0x961   : > { %6233 = vmatprep.mubr.msk.bf16.mxu1 %vm1453_vm0, %v3028_v40 }
 0x962   : > { %6234 = vmatmul.mubr.msk.bf16.gmra.mxu1 %vm1453_vm0, %v3029_v42 }
 0x96e   : > { %v6215_v46 = vpop.f32.mrf.mxu0 }
 0x96f   : > { %v3004_v21 = vadd.f32 %v6215_v46, %v5470_v54 }
 0x970   : > { %v2995_v47 = vpop.f32.mrf.mxu0 }
 0x971   : > { %v2996_v19 = vadd.f32 %v5470_v54, %v2995_v47 }
 0x972   : > { %v6216_v48 = vpop.f32.mrf.mxu0 }
 0x973   : > { %v3007_v37 = vadd.f32 %v6216_v48, %v5470_v54 }
 0x974   : > { %v2998_v50 = vpop.f32.mrf.mxu0 }
 0x975   : > { %v3224_v51 = vpack.c.bf16 %v3007_v37, %v3004_v21  ;;  %v2999_v18 = vadd.f32 %v5470_v54, %v2998_v50 }
 0x976   : > { %v6219_v52 = vpop.f32.mrf.mxu0 }
 0x977   : > { %v3020_v56 = vadd.f32 %v6219_v52, %v5470_v54  ;;  %v3223_v55 = vpack.c.bf16 %v2999_v18, %v2996_v19 }
 0x978   : > { %v3011_v53 = vpop.f32.mrf.mxu0 }
 0x979   : > { %v3012_v59 = vadd.f32 %v5470_v54, %v3011_v53 }
 0x97a   : > { %v6220_v35 = vpop.f32.mrf.mxu0 }
 0x97b   : > { %v3023_v57 = vadd.f32 %v6220_v35, %v5470_v54 }
 0x97c   : > { %v3014_v58 = vpop.f32.mrf.mxu0 }
 0x97d   : > { %v3226_v61 = vpack.c.bf16 %v3023_v57, %v3020_v56  ;;  %v3015_v43 = vadd.f32 %v5470_v54, %v3014_v58 }
 0x97f   : > { %v3225_v63 = vpack.c.bf16 %v3015_v43, %v3012_v59  ;;  %6237 = vmatprep.subr.bf16.mxu0 %v3226_v61 }
 0x980   : > { %6238 = vmatpush3.bf16.msra.mxu0 %v3226_v61 }
 0x981   : > { %6239 = vmatprep.subr.bf16.mxu0 %v3225_v63 }
 0x984   : > { %6240 = vmatpush3.bf16.msra.mxu0 %v3225_v63 }
 0x985   : > { %6241 = vmatprep.subr.bf16.mxu0 %v3224_v51 }
 0x988   : > { %6242 = vmatpush3.bf16.msra.mxu0 %v3224_v51 }
 0x989   : > { %6243 = vmatprep.subr.bf16.mxu0 %v3223_v55 }
 0x98c   : > { %6244 = vmatpush3.bf16.msra.mxu0 %v3223_v55 }
 0xa1a   : > { %v6231_v22 = vpop.f32.mrf.mxu1 }
 0xa1b   : > { %v3125_v62 = vmul.f32 0.17677669, %v6231_v22 }
 0xa1c   : > { %v3092_v23 = vpop.f32.mrf.mxu1 }
 0xa1d   : > { %v3123_v41 = vmul.f32 0.17677669, %v3092_v23  ;;  %v3137_v14 = vsel %vm1551_vm1, %v3125_v62, -inf }
 0xa1e   : > { %v6232_v60 = vpop.f32.mrf.mxu1 }
 0xa1f   : > { %v3131_v0 = vsel %vm1551_vm1, %v3123_v41, -inf  ;;  %v3126_v9 = vmul.f32 0.17677669, %v6232_v60 }
 0xa20   : > { %3132 = vmax.xlane.f32.xlu0 %v3131_v0  ;;  %v3095_v8 = vpop.f32.mrf.mxu1 }
 0xa21   : > { %v3124_v6 = vmul.f32 0.17677669, %v3095_v8  ;;  %v3140_v32 = vsel %vm1551_vm1, %v3126_v9, -inf }
 0xa22   : > { %v6235_v13 = vpop.f32.mrf.mxu1 }
 0xa23   : > { %v3134_v15 = vsel %vm1551_vm1, %v3124_v6, -inf  ;;  %v3129_v30 = vmul.f32 0.17677669, %v6235_v13 }
 0xa24   : > { %3138 = vmax.xlane.f32.xlu0 %v3137_v14  ;;  %3135 = vmax.xlane.f32.xlu1 %v3134_v15  ;;  %v3108_v27 = vpop.f32.mrf.mxu1 }
 0xa25   : > { %v3127_v17 = vmul.f32 0.17677669, %v3108_v27  ;;  %v3149_v40 = vsel %vm1551_vm1, %v3129_v30, -inf }
 0xa26   : > { %v6236_v26 = vpop.f32.mrf.mxu1 }
 0xa27   : > { %v3143_v33 = vsel %vm1551_vm1, %v3127_v17, -inf  ;;  %v3130_v20 = vmul.f32 0.17677669, %v6236_v26 }
 0xa28   : > { %3141 = vmax.xlane.f32.xlu1 %v3140_v32  ;;  %3144 = vmax.xlane.f32.xlu0 %v3143_v33  ;;  %v3111_v34 = vpop.f32.mrf.mxu1 }
 0xa29   : > { %v3128_v38 = vmul.f32 0.17677669, %v3111_v34  ;;  %v3152_v46 = vsel %vm1551_vm1, %v3130_v20, -inf }
 0xa2b   : > { %v3146_v42 = vsel %vm1551_vm1, %v3128_v38, -inf }
 0xa2c   : > { %3150 = vmax.xlane.f32.xlu0 %v3149_v40  ;;  %3147 = vmax.xlane.f32.xlu1 %v3146_v42  ;;  %v6563_v40 = vld [vmem:[%s7156_s23 + $0x28] sm:$0xff]  }
 0xa2d   : > { %6253 = vmatprep.subr.bf16.mxu1 %v6563_v40 }
 0xa2e   : > { %6254 = vmatpush3.bf16.msra.mxu1 %v6563_v40  ;;  %v6564_v40 = vld [vmem:[%s7156_s23 + $0x20] sm:$0xff]  }
 0xa2f   : > { %6255 = vmatprep.subr.bf16.mxu1 %v6564_v40 }
 0xa30   : > { %3153 = vmax.xlane.f32.xlu1 %v3152_v46 }
 0xa32   : > { %6256 = vmatpush3.bf16.msra.mxu1 %v6564_v40 }
 0xaa9   : > { %v3133_v47 = vpop.xlane.xlu0 %3132 }
 0xaaa   : > { %v3155_v48 = vsub.f32 %v3123_v41, %v3133_v47 }
 0xaac   : > { %v3163_v50 = vmul.f32 1.442695, %v3155_v48 }
 0xaad   : > { %v3139_v52 = vpop.xlane.xlu0 %3138  ;;  %v3136_v53 = vpop.xlane.xlu1 %3135 }
 0xaae   : > { %6695 = vpow2.f32 %v3163_v50  ;;  %v3157_v54 = vsub.f32 %v3125_v62, %v3139_v52  ;;  %v3156_v35 = vsub.f32 %v3124_v6, %v3136_v53 }
 0xab0   : > { %v3167_v56 = vmul.f32 1.442695, %v3157_v54  ;;  %v3165_v57 = vmul.f32 1.442695, %v3156_v35 }
 0xab1   : > { %v3142_v58 = vpop.xlane.xlu1 %3141  ;;  %v3145_v59 = vpop.xlane.xlu0 %3144 }
 0xab2   : > { %6697 = vpow2.f32 %v3167_v56  ;;  %v3158_v61 = vsub.f32 %v3126_v9, %v3142_v58  ;;  %v3159_v43 = vsub.f32 %v3127_v17, %v3145_v59 }
 0xab3   : > { %6699 = vpow2.f32 %v3165_v57 }
 0xab4   : > { %v3169_v37 = vmul.f32 1.442695, %v3158_v61  ;;  %v3171_v63 = vmul.f32 1.442695, %v3159_v43 }
 0xab5   : > { %v3151_v21 = vpop.xlane.xlu0 %3150  ;;  %v3148_v51 = vpop.xlane.xlu1 %3147 }
 0xab6   : > { %6701 = vpow2.f32 %v3169_v37  ;;  %v3161_v18 = vsub.f32 %v3129_v30, %v3151_v21  ;;  %v3160_v19 = vsub.f32 %v3128_v38, %v3148_v51 }
 0xab7   : > { %6703 = vpow2.f32 %v3171_v63 }
 0xab8   : > { %v3175_v55 = vmul.f32 1.442695, %v3161_v18  ;;  %v3173_v22 = vmul.f32 1.442695, %v3160_v19  ;;  %v6548_v18 = vld [vmem:[%s7124_s15 + $0xf0] sm:$0xff]  }
 0xab9   : > { %v3154_v23 = vpop.xlane.xlu1 %3153 }
 0xaba   : > { %6705 = vpow2.f32 %v3175_v55  ;;  %v3162_v41 = vsub.f32 %v3130_v20, %v3154_v23  ;;  %v6547_v20 = vld [vmem:[%s7124_s15 + $0xf8] sm:$0xff]  }
 0xabb   : > { %v6696_v60 = vpop.eup %6695  ;;  %6707 = vpow2.f32 %v3173_v22  ;;  %6265 = vmatprep.subr.bf16.mxu0 %v6547_v20 }
 0xabc   : > { %v3177_v62 = vmul.f32 1.442695, %v3162_v41  ;;  %v3179_v0 = vsel %vm1551_vm1, %v6696_v60, 0.0 }
 0xabd   : > { %3180 = vadd.xlane.f32.xlu0 %v3179_v0 }
 0xabe   : > { %6709 = vpow2.f32 %v3177_v62  ;;  %v6549_v62 = vld [vmem:[%s7124_s15 + $0xe8] sm:$0xff]  }
 0xabf   : > { %v6698_v8 = vpop.eup %6697 }
 0xac0   : > { %v6700_v6 = vpop.eup %6699  ;;  %v3185_v13 = vsel %vm1551_vm1, %v6698_v8, 0.0 }
 0xac1   : > { %3186 = vadd.xlane.f32.xlu0 %v3185_v13  ;;  %v3182_v9 = vsel %vm1551_vm1, %v6700_v6, 0.0  ;;  %v6550_v13 = vld [vmem:[%s7124_s15 + $0xe0] sm:$0xff]  }
 0xac2   : > { %3183 = vadd.xlane.f32.xlu1 %v3182_v9  ;;  %v6551_v9 = vld [vmem:[%s7124_s15 + $0xd8] sm:$0xff]  }
 0xac3   : > { %v6702_v14 = vpop.eup %6701 }
 0xac4   : > { %v6704_v15 = vpop.eup %6703  ;;  %v3188_v27 = vsel %vm1551_vm1, %v6702_v14, 0.0 }
 0xac5   : > { %v3191_v17 = vsel %vm1551_vm1, %v6704_v15, 0.0 }
 0xac6   : > { %3192 = vadd.xlane.f32.xlu0 %v3191_v17  ;;  %3189 = vadd.xlane.f32.xlu1 %v3188_v27  ;;  %v6554_v27 = vld [vmem:[%s7124_s15 + $0xc0] sm:$0xff]   ;;  %v6555_v17 = vld [vmem:[%s7145_s0 + $0xf8] sm:$0xff]  }
 0xac7   : > { %v6706_v26 = vpop.eup %6705 }
 0xac8   : > { %v6708_v30 = vpop.eup %6707  ;;  %v3197_v32 = vsel %vm1551_vm1, %v6706_v26, 0.0 }
 0xac9   : > { %v3194_v33 = vsel %vm1551_vm1, %v6708_v30, 0.0 }
 0xaca   : > { %3198 = vadd.xlane.f32.xlu0 %v3197_v32  ;;  %3195 = vadd.xlane.f32.xlu1 %v3194_v33  ;;  %v6558_v32 = vld [vmem:[%s7145_s0 + $0xe0] sm:$0xff]   ;;  %v6559_v33 = vld [vmem:[%s7145_s0 + $0xd8] sm:$0xff]  }
 0xacb   : > { %v6710_v34 = vpop.eup %6709 }
 0xacc   : > { %v3200_v38 = vsel %vm1551_vm1, %v6710_v34, 0.0 }
 0xace   : > { %3201 = vadd.xlane.f32.xlu1 %v3200_v38  ;;  %v6561_v38 = vld [vmem:[%s7145_s0 + $0xc8] sm:$0xff]  }
 0xb46   : > { %v3181_v42 = vpop.xlane.xlu0 %3180 }
 0xb47   : > { %6711 = vrcp.f32 %v3181_v42  ;;  %v6565_v42 = vld [vmem:[%s7135_s25 + $0xf8] sm:$0xff]  }
 0xb48   : > { %6289 = vmatprep.subr.bf16.mxu1 %v6565_v42 }
 0xb4a   : > { %v3187_v46 = vpop.xlane.xlu0 %3186 }
 0xb4b   : > { %v3184_v47 = vpop.xlane.xlu1 %3183 }
 0xb4c   : > { %6713 = vrcp.f32 %v3184_v47 }
 0xb4d   : > { %6715 = vrcp.f32 %v3187_v46 }
 0xb4f   : > { %v3193_v48 = vpop.xlane.xlu0 %3192  ;;  %v3190_v50 = vpop.xlane.xlu1 %3189 }
 0xb50   : > { %6717 = vrcp.f32 %v3190_v50 }
 0xb51   : > { %6719 = vrcp.f32 %v3193_v48 }
 0xb53   : > { %v3199_v52 = vpop.xlane.xlu0 %3198  ;;  %v3196_v53 = vpop.xlane.xlu1 %3195 }
 0xb54   : > { %6721 = vrcp.f32 %v3196_v53  ;;  %v6712_v54 = vpop.eup %6711 }
 0xb55   : > { %6723 = vrcp.f32 %v3199_v52  ;;  %v3211_v57 = vmul.f32 %v6712_v54, %v6696_v60 }
 0xb57   : > { %v3202_v35 = vpop.xlane.xlu1 %3201 }
 0xb58   : > { %6725 = vrcp.f32 %v3202_v35  ;;  %v6566_v35 = vld [vmem:[%s7135_s25 + $0xf0] sm:$0xff]  }
 0xb59   : > { %v6714_v56 = vpop.eup %6713 }
 0xb5a   : > { %v3212_v58 = vmul.f32 %v6714_v56, %v6700_v6  ;;  %v6716_v59 = vpop.eup %6715 }
 0xb5b   : > { %v3213_v37 = vmul.f32 %v6716_v59, %v6698_v8 }
 0xb5c   : > { %v3219_v61 = vpack.c.bf16 %v3212_v58, %v3211_v57  ;;  %v6567_v58 = vld [vmem:[%s7135_s25 + $0xe8] sm:$0xff]  }
 0xb5d   : > { %v6718_v43 = vpop.eup %6717 }
 0xb5e   : > { %6245 = vmatprep.mubr.msk.bf16.mxu0 %vm1551_vm1, %v3219_v61  ;;  %v3214_v63 = vmul.f32 %v6718_v43, %v6702_v14  ;;  %v6720_v21 = vpop.eup %6719  ;;  %v6552_v14 = vld [vmem:[%s7124_s15 + $0xd0] sm:$0xff]  }
 0xb5f   : > { %v3215_v22 = vmul.f32 %v6720_v21, %v6704_v15  ;;  %v6553_v15 = vld [vmem:[%s7124_s15 + $0xc8] sm:$0xff]   ;;  %v6570_v21 = vld [vmem:[%s7135_s25 + $0xd0] sm:$0xff]  }
 0xb60   : > { %v3220_v51 = vpack.c.bf16 %v3214_v63, %v3213_v37  ;;  %v6568_v37 = vld [vmem:[%s7135_s25 + $0xe0] sm:$0xff]   ;;  %v6569_v63 = vld [vmem:[%s7135_s25 + $0xd8] sm:$0xff]  }
 0xb61   : > { %v6722_v19 = vpop.eup %6721 }
 0xb62   : > { %v6724_v55 = vpop.eup %6723  ;;  %6246 = vmatmul.mubr.msk.bf16.vlgmr.msra.gmra.mxu0 %vm1551_vm1, %v3220_v51  ;;  %v3216_v23 = vmul.f32 %v6722_v19, %v6708_v30  ;;  %v6557_v30 = vld [vmem:[%s7145_s0 + $0xe8] sm:$0xff]  }
 0xb63   : > { %6266 = vmatpush3.bf16.msra.mxu0 %v6547_v20  ;;  %v3217_v0 = vmul.f32 %v6724_v55, %v6706_v26  ;;  %v6556_v26 = vld [vmem:[%s7145_s0 + $0xf0] sm:$0xff]   ;;  %v6562_v20 = vld [vmem:[%s7145_s0 + $0xc0] sm:$0xff]   ;;  %v6571_v51 = vld [vmem:[%s7135_s25 + $0xc8] sm:$0xff]  }
 0xb64   : > { %6267 = vmatprep.subr.bf16.mxu0 %v6548_v18  ;;  %v3221_v60 = vpack.c.bf16 %v3216_v23, %v3215_v22  ;;  %v6572_v55 = vld [vmem:[%s7135_s25 + $0xc0] sm:$0xff]   ;;  %s8202_s25 = scalar_lea.vmem %s8125_s10, %s7105_s28 }
 0xb65   : > { %v6726_v41 = vpop.eup %6725 }
 0xb66   : > { %v3218_v8 = vmul.f32 %v6726_v41, %v6710_v34  ;;  %6249 = vmatprep.mubr.msk.bf16.mxu0 %vm1551_vm1, %v3221_v60  ;;  %v6560_v34 = vld [vmem:[%s7145_s0 + $0xd0] sm:$0xff]  }
 0xb67   : > { %6268 = vmatpush3.bf16.msra.mxu0 %v6548_v18  ;;  %v5514_v18 = vld [vmem:[%s7130_s29 + $0x3] ss:$0 sm:$0xff] }
 0xb68   : > { %v3222_v6 = vpack.c.bf16 %v3218_v8, %v3217_v0  ;;  %6269 = vmatprep.subr.bf16.mxu0 %v6549_v62 }
 0xb6a   : > { %6250 = vmatmul.mubr.msk.bf16.gmra.mxu0 %vm1551_vm1, %v3222_v6 }
 0xb6b   : > { %6270 = vmatpush3.bf16.msra.mxu0 %v6549_v62  ;;  %6281 = vmatprep.mubr.bf16.mxu0 %v7285_v49 }
 0xb6c   : > { %6271 = vmatprep.subr.bf16.mxu0 %v6550_v13 }
 0xb6f   : > { %6272 = vmatpush3.bf16.msra.mxu0 %v6550_v13 }
 0xb70   : > { %6273 = vmatprep.subr.bf16.mxu0 %v6551_v9 }
 0xb73   : > { %6274 = vmatpush3.bf16.msra.mxu0 %v6551_v9 }
 0xb74   : > { %6275 = vmatprep.subr.bf16.mxu0 %v6552_v14 }
 0xb77   : > { %6276 = vmatpush3.bf16.msra.mxu0 %v6552_v14 }
 0xb78   : > { %6277 = vmatprep.subr.bf16.mxu0 %v6553_v15 }
 0xb7b   : > { %6278 = vmatpush3.bf16.msra.mxu0 %v6553_v15 }
 0xb7c   : > { %6279 = vmatprep.subr.bf16.mxu0 %v6554_v27 }
 0xb7f   : > { %6280 = vmatpush3.bf16.msra.mxu0 %v6554_v27 }
 0xb80   : > { %6313 = vmatprep.subr.bf16.mxu0 %v6555_v17 }
 0xb82   : > { %6282 = vmatmul.mubr.bf16.vlgmr.msra.gmra.mxu0 %v7291_v28 }
 0xb83   : > { %6285 = vmatprep.mubr.bf16.mxu0 %v7298_v36  ;;  %6314 = vmatpush3.bf16.msra.mxu0 %v6555_v17 }
 0xb84   : > { %6315 = vmatprep.subr.bf16.mxu0 %v6556_v26 }
 0xb87   : > { %6316 = vmatpush3.bf16.msra.mxu0 %v6556_v26 }
 0xb88   : > { %6317 = vmatprep.subr.bf16.mxu0 %v6557_v30 }
 0xb8a   : > { %6286 = vmatmul.mubr.bf16.gmra.mxu0 %v7303_v44 }
 0xb8b   : > { %6318 = vmatpush3.bf16.msra.mxu0 %v6557_v30  ;;  %6329 = vmatprep.mubr.bf16.mxu0 %v7285_v49 }
 0xb8c   : > { %6319 = vmatprep.subr.bf16.mxu0 %v6558_v32 }
 0xb8f   : > { %6320 = vmatpush3.bf16.msra.mxu0 %v6558_v32 }
 0xb90   : > { %6321 = vmatprep.subr.bf16.mxu0 %v6559_v33 }
 0xb93   : > { %6322 = vmatpush3.bf16.msra.mxu0 %v6559_v33 }
 0xb94   : > { %6323 = vmatprep.subr.bf16.mxu0 %v6560_v34 }
 0xb97   : > { %6324 = vmatpush3.bf16.msra.mxu0 %v6560_v34 }
 0xb98   : > { %6325 = vmatprep.subr.bf16.mxu0 %v6561_v38 }
 0xb9b   : > { %6326 = vmatpush3.bf16.msra.mxu0 %v6561_v38 }
 0xb9c   : > { %6327 = vmatprep.subr.bf16.mxu0 %v6562_v20 }
 0xb9f   : > { %6328 = vmatpush3.bf16.msra.mxu0 %v6562_v20 }
 0xba2   : > { %6330 = vmatmul.mubr.bf16.vlgmr.msra.gmra.mxu0 %v7291_v28 }
 0xba3   : > { %6333 = vmatprep.mubr.bf16.mxu0 %v7298_v36 }
 0xbaa   : > { %6334 = vmatmul.mubr.bf16.gmra.mxu0 %v7303_v44 }
 0xc22   : > { %v6247_v46 = vpop.f32.mrf.mxu0 }
 0xc24   : > { %v3273_v47 = vpop.f32.mrf.mxu0 }
 0xc26   : > { %v6248_v48 = vpop.f32.mrf.mxu0 }
 0xc27   : > { %v3310_v53 = vpack.c.bf16 %v6248_v48, %v6247_v46 }
 0xc28   : > { %v3276_v50 = vpop.f32.mrf.mxu0 }
 0xc29   : > { %v3309_v52 = vpack.c.bf16 %v3276_v50, %v3273_v47 }
 0xc2a   : > { %v6251_v54 = vpop.f32.mrf.mxu0 }
 0xc2b   : > { %6257 = vmatprep.mubr.msk.bf16.mxu1 %vm1453_vm0, %v3309_v52 }
 0xc2c   : > { %v3289_v56 = vpop.f32.mrf.mxu0  ;;  %6258 = vmatmul.mubr.msk.bf16.vlgmr.msra.gmra.mxu1 %vm1453_vm0, %v3310_v53 }
 0xc2d   : > { %6290 = vmatpush3.bf16.msra.mxu1 %v6565_v42  ;;  %v5566_v42 = vld [vmem:[%s7150_s2 + $0x3] ss:$0 sm:$0xff] }
 0xc2e   : > { %v6252_v57 = vpop.f32.mrf.mxu0  ;;  %6291 = vmatprep.subr.bf16.mxu1 %v6566_v35 }
 0xc2f   : > { %v3312_v43 = vpack.c.bf16 %v6252_v57, %v6251_v54 }
 0xc30   : > { %v3292_v59 = vpop.f32.mrf.mxu0 }
 0xc31   : > { %v3311_v61 = vpack.c.bf16 %v3292_v59, %v3289_v56  ;;  %6292 = vmatpush3.bf16.msra.mxu1 %v6566_v35 }
 0xc32   : > { %6293 = vmatprep.subr.bf16.mxu1 %v6567_v58 }
 0xc33   : > { %6261 = vmatprep.mubr.msk.bf16.mxu1 %vm1453_vm0, %v3311_v61 }
 0xc34   : > { %6262 = vmatmul.mubr.msk.bf16.gmra.mxu1 %vm1453_vm0, %v3312_v43  ;;  %v2590_v43 = vadd.f32 %v7563_v5, %v7609_v1  ;;  %v2606_v5 = vadd.f32 %v7577_v16, %v7617_v25 }
 0xc35   : > { %6294 = vmatpush3.bf16.msra.mxu1 %v6567_v58  ;;  %6305 = vmatprep.mubr.bf16.mxu1 %v7285_v49 }
 0xc36   : > { %6295 = vmatprep.subr.bf16.mxu1 %v6568_v37 }
 0xc39   : > { %6296 = vmatpush3.bf16.msra.mxu1 %v6568_v37 }
 0xc3a   : > { %6297 = vmatprep.subr.bf16.mxu1 %v6569_v63 }
 0xc3d   : > { %6298 = vmatpush3.bf16.msra.mxu1 %v6569_v63  ;;  %v2582_v63 = vadd.f32 %v7568_v11, %v7611_v2  ;;  %v2598_v2 = vadd.f32 %v7580_v12, %v7619_v3 }
 0xc3e   : > { %6299 = vmatprep.subr.bf16.mxu1 %v6570_v21 }
 0xc41   : > { %6300 = vmatpush3.bf16.msra.mxu1 %v6570_v21 }
 0xc42   : > { %v6283_v19 = vpop.f32.mrf.mxu0  ;;  %6301 = vmatprep.subr.bf16.mxu1 %v6571_v51 }
 0xc43   : > { %v7691_v22 = vadd.f32 %v6283_v19, %v5514_v18 }
 0xc44   : > { %v3517_v23 = vpop.f32.mrf.mxu0 }
 0xc45   : > { %6302 = vmatpush3.bf16.msra.mxu1 %v6571_v51  ;;  %v3518_v17 = vadd.f32 %v5514_v18, %v3517_v23  ;;  %v2585_v23 = vadd.f32 %v7574_v45, %v7615_v24 }
 0xc46   : > { %v6284_v41 = vpop.f32.mrf.mxu0  ;;  %6303 = vmatprep.subr.bf16.mxu1 %v6572_v55 }
 0xc47   : > { %v7693_v49 = vadd.f32 %v6284_v41, %v5514_v18 }
 0xc48   : > { %v3520_v60 = vpop.f32.mrf.mxu0 }
 0xc49   : > { %v3825_v62 = vpack.c.bf16 %v7693_v49, %v7691_v22  ;;  %6304 = vmatpush3.bf16.msra.mxu1 %v6572_v55  ;;  %v3521_v14 = vadd.f32 %v5514_v18, %v3520_v60 }
 0xc4a   : > { %v6287_v0 = vpop.f32.mrf.mxu0 }
 0xc4b   : > { %v7697_v8 = vadd.f32 %v6287_v0, %v5514_v18  ;;  %v3824_v32 = vpack.c.bf16 %v3521_v14, %v3518_v17  ;;  %v2609_v0 = vadd.f32 %v7583_v29, %v7621_v7 }
 0xc4c   : > { %v3533_v6 = vpop.f32.mrf.mxu0  ;;  %6306 = vmatmul.mubr.bf16.vlgmr.msra.gmra.mxu1 %v7291_v28 }
 0xc4d   : > { %v7700_v13 = vadd.f32 %v5514_v18, %v3533_v6  ;;  %6309 = vmatprep.mubr.bf16.mxu1 %v7298_v36  ;;  %v2601_v6 = vadd.f32 %v7588_v31, %v7623_v39 }
 0xc4e   : > { %v6288_v9 = vpop.f32.mrf.mxu0 }
 0xc4f   : > { %v7703_v15 = vadd.f32 %v6288_v9, %v5514_v18 }
 0xc50   : > { %v3536_v27 = vpop.f32.mrf.mxu0 }
 0xc51   : > { %v3827_v26 = vpack.c.bf16 %v7703_v15, %v7697_v8  ;;  %v7707_v30 = vadd.f32 %v5514_v18, %v3536_v27  ;;  %v2593_v18 = vadd.f32 %v7571_v10, %v7613_v4 }
 0xc53   : > { %v3826_v28 = vpack.c.bf16 %v7707_v30, %v7700_v13 }
 0xc54   : > { %6310 = vmatmul.mubr.bf16.gmra.mxu1 %v7303_v44 }
 0xc55   : > { %6345 = vmatprep.mubr.msk.bf16.mxu1 %vm1453_vm0, %v3824_v32 }
 0xc62   : > { %v6331_v36 = vpop.f32.mrf.mxu0 }
 0xc63   : > { %v3802_v44 = vadd.f32 %v6331_v36, %v5566_v42  ;;  %v5540_v36 = vld [vmem:[%s8201_s24 + $0x3] ss:$0 sm:$0xff] }
 0xc64   : > { %v3793_v33 = vpop.f32.mrf.mxu0 }
 0xc65   : > { %v3794_v59 = vadd.f32 %v5566_v42, %v3793_v33 }
 0xc66   : > { %v6332_v34 = vpop.f32.mrf.mxu0 }
 0xc67   : > { %v3805_v35 = vadd.f32 %v6332_v34, %v5566_v42 }
 0xc68   : > { %v3796_v38 = vpop.f32.mrf.mxu0 }
 0xc69   : > { %v4022_v57 = vpack.c.bf16 %v3805_v35, %v3802_v44  ;;  %v3797_v58 = vadd.f32 %v5566_v42, %v3796_v38 }
 0xc6a   : > { %v6335_v20 = vpop.f32.mrf.mxu0 }
 0xc6b   : > { %v3818_v47 = vadd.f32 %v6335_v20, %v5566_v42  ;;  %v4021_v61 = vpack.c.bf16 %v3797_v58, %v3794_v59 }
 0xc6c   : > { %v3809_v40 = vpop.f32.mrf.mxu0 }
 0xc6d   : > { %v3810_v52 = vadd.f32 %v5566_v42, %v3809_v40 }
 0xc6e   : > { %v6336_v46 = vpop.f32.mrf.mxu0 }
 0xc6f   : > { %v3821_v48 = vadd.f32 %v6336_v46, %v5566_v42 }
 0xc70   : > { %v3812_v50 = vpop.f32.mrf.mxu0 }
 0xc71   : > { %v4024_v53 = vpack.c.bf16 %v3821_v48, %v3818_v47  ;;  %v3813_v54 = vadd.f32 %v5566_v42, %v3812_v50 }
 0xc73   : > { %v4023_v56 = vpack.c.bf16 %v3813_v54, %v3810_v52  ;;  %6353 = vmatprep.subr.bf16.mxu0 %v4024_v53 }
 0xc74   : > { %6354 = vmatpush3.bf16.msra.mxu0 %v4024_v53 }
 0xc75   : > { %6355 = vmatprep.subr.bf16.mxu0 %v4023_v56 }
 0xc78   : > { %6356 = vmatpush3.bf16.msra.mxu0 %v4023_v56 }
 0xc79   : > { %6357 = vmatprep.subr.bf16.mxu0 %v4022_v57 }
 0xc7c   : > { %6358 = vmatpush3.bf16.msra.mxu0 %v4022_v57 }
 0xc7d   : > { %6359 = vmatprep.subr.bf16.mxu0 %v4021_v61 }
 0xc80   : > { %6360 = vmatpush3.bf16.msra.mxu0 %v4021_v61 }
 0xcec   : > { %v6259_v37 = vpop.f32.mrf.mxu1 }
 0xced   : > { %v7718_v21 = vadd.f32 %v6259_v37, %v2590_v43 }
 0xcee   : > { %v3371_v51 = vpop.f32.mrf.mxu1 }
 0xcef   : > { %v7722_v19 = vadd.f32 %v3371_v51, %v2582_v63 }
 0xcf0   : > { %v6260_v55 = vpop.f32.mrf.mxu1 }
 0xcf1   : > { %v7726_v41 = vadd.f32 %v6260_v55, %v2593_v18 }
 0xcf2   : > { %v3374_v60 = vpop.f32.mrf.mxu1 }
 0xcf3   : > { %v7730_v1 = vadd.f32 %v3374_v60, %v2585_v23 }
 0xcf4   : > { %v6263_v11 = vpop.f32.mrf.mxu1 }
 0xcf5   : > { %v7734_v10 = vadd.f32 %v6263_v11, %v2606_v5 }
 0xcf6   : > { %v3387_v4 = vpop.f32.mrf.mxu1 }
 0xcf7   : > { %v7738_v45 = vadd.f32 %v3387_v4, %v2598_v2 }
 0xcf8   : > { %v6264_v24 = vpop.f32.mrf.mxu1 }
 0xcf9   : > { %v7742_v16 = vadd.f32 %v6264_v24, %v2609_v0 }
 0xcfa   : > { %v3390_v25 = vpop.f32.mrf.mxu1 }
 0xcfb   : > { %v7744_v9 = vadd.f32 %v3390_v25, %v2601_v6 }
 0xd0c   : > { %v6307_v14 = vpop.f32.mrf.mxu1 }
 0xd0d   : > { %v3664_v46 = vadd.f32 %v6307_v14, %v5540_v36 }
 0xd0e   : > { %v3655_v12 = vpop.f32.mrf.mxu1 }
 0xd0f   : > { %v3656_v52 = vadd.f32 %v5540_v36, %v3655_v12 }
 0xd10   : > { %v6308_v3 = vpop.f32.mrf.mxu1 }
 0xd11   : > { %v3667_v42 = vadd.f32 %v6308_v3, %v5540_v36 }
 0xd12   : > { %v3658_v27 = vpop.f32.mrf.mxu1 }
 0xd13   : > { %v3829_v47 = vpack.c.bf16 %v3667_v42, %v3664_v46  ;;  %v3659_v50 = vadd.f32 %v5540_v36, %v3658_v27 }
 0xd14   : > { %v6311_v17 = vpop.f32.mrf.mxu1 }
 0xd15   : > { %v3680_v29 = vadd.f32 %v6311_v17, %v5540_v36  ;;  %v3828_v53 = vpack.c.bf16 %v3659_v50, %v3656_v52  ;;  %v3848_v54 = vsel %vm1453_vm0, %v3829_v47, 0 }
 0xd16   : > { %v3671_v32 = vpop.f32.mrf.mxu1 }
 0xd17   : > { %v3672_v38 = vadd.f32 %v5540_v36, %v3671_v32  ;;  %v3845_v35 = vsel %vm1453_vm0, %v3828_v53, 0 }
 0xd18   : > { %v6312_v33 = vpop.f32.mrf.mxu1 }
 0xd19   : > { %v3683_v7 = vadd.f32 %v6312_v33, %v5540_v36 }
 0xd1a   : > { %v3674_v34 = vpop.f32.mrf.mxu1 }
 0xd1b   : > { %v3831_v20 = vpack.c.bf16 %v3683_v7, %v3680_v29  ;;  %v3675_v40 = vadd.f32 %v5540_v36, %v3674_v34 }
 0xd1d   : > { %v3830_v31 = vpack.c.bf16 %v3675_v40, %v3672_v38  ;;  %6393 = vmatprep.subr.msk.bf16.mxu1 %vm1453_vm0, %v3831_v20  ;;  %v3854_v39 = vsel %vm1453_vm0, %v3831_v20, 0 }
 0xd1e   : > { %6338 = vmatpush3.bf16.xpose.msra.mxu1 %v3854_v39 }
 0xd1f   : > { %6394 = vmatprep.subr.msk.bf16.mxu1 %vm1453_vm0, %v3830_v31  ;;  %v3851_v48 = vsel %vm1453_vm0, %v3830_v31, 0 }
 0xd26   : > { %6340 = vmatpush3.bf16.xpose.msra.mxu1 %v3851_v48 }
 0xd27   : > { %6395 = vmatprep.subr.msk.bf16.mxu1 %vm1453_vm0, %v3829_v47 }
 0xd2e   : > { %6342 = vmatpush3.bf16.xpose.msra.mxu1 %v3848_v54 }
 0xd2f   : > { %6396 = vmatprep.subr.msk.bf16.mxu1 %vm1453_vm0, %v3828_v53 }
 0xd36   : > { %6344 = vmatpush3.bf16.xpose.msra.mxu1 %v3845_v35 }
 0xd3d   : > { %6346 = vmatmul.mubr.msk.bf16.vlgmr.msra.gmra.mxu1 %vm1453_vm0, %v3825_v62 }
 0xd3e   : > { %6349 = vmatprep.mubr.msk.bf16.mxu1 %vm1453_vm0, %v3826_v28 }
 0xd45   : > { %6350 = vmatmul.mubr.msk.bf16.gmra.mxu1 %vm1453_vm0, %v3827_v26 }
 0xdfd   : > { %v6347_v56 = vpop.f32.mrf.mxu1 }
 0xdfe   : > { %v3923_v59 = vmul.f32 0.17677669, %v6347_v56 }
 0xdff   : > { %v3890_v44 = vpop.f32.mrf.mxu1 }
 0xe00   : > { %v3921_v57 = vmul.f32 0.17677669, %v3890_v44  ;;  %v3935_v13 = vsel %vm1551_vm1, %v3923_v59, -inf }
 0xe01   : > { %v6348_v58 = vpop.f32.mrf.mxu1 }
 0xe02   : > { %v3929_v61 = vsel %vm1551_vm1, %v3921_v57, -inf  ;;  %v3924_v43 = vmul.f32 0.17677669, %v6348_v58 }
 0xe03   : > { %3930 = vmax.xlane.f32.xlu0 %v3929_v61  ;;  %v3893_v22 = vpop.f32.mrf.mxu1 }
 0xe04   : > { %v3922_v49 = vmul.f32 0.17677669, %v3893_v22  ;;  %v3938_v37 = vsel %vm1551_vm1, %v3924_v43, -inf }
 0xe05   : > { %v6351_v62 = vpop.f32.mrf.mxu1 }
 0xe06   : > { %v3932_v30 = vsel %vm1551_vm1, %v3922_v49, -inf  ;;  %v3927_v28 = vmul.f32 0.17677669, %v6351_v62  ;;  %v6573_v62 = vld [vmem:[%s7156_s23 + $0x38] sm:$0xff]  }
 0xe07   : > { %3936 = vmax.xlane.f32.xlu0 %v3935_v13  ;;  %3933 = vmax.xlane.f32.xlu1 %v3932_v30  ;;  %v3906_v8 = vpop.f32.mrf.mxu1 }
 0xe08   : > { %v3925_v15 = vmul.f32 0.17677669, %v3906_v8  ;;  %v3947_v23 = vsel %vm1551_vm1, %v3927_v28, -inf  ;;  %6369 = vmatprep.subr.bf16.mxu1 %v6573_v62 }
 0xe09   : > { %v6352_v26 = vpop.f32.mrf.mxu1  ;;  %6370 = vmatpush3.bf16.msra.mxu1 %v6573_v62 }
 0xe0a   : > { %v3941_v63 = vsel %vm1551_vm1, %v3925_v15, -inf  ;;  %v3928_v55 = vmul.f32 0.17677669, %v6352_v26 }
 0xe0b   : > { %3939 = vmax.xlane.f32.xlu1 %v3938_v37  ;;  %3942 = vmax.xlane.f32.xlu0 %v3941_v63  ;;  %v3909_v51 = vpop.f32.mrf.mxu1 }
 0xe0c   : > { %v3926_v18 = vmul.f32 0.17677669, %v3909_v51  ;;  %v3950_v5 = vsel %vm1551_vm1, %v3928_v55, -inf }
 0xe0e   : > { %v3944_v60 = vsel %vm1551_vm1, %v3926_v18, -inf }
 0xe0f   : > { %3948 = vmax.xlane.f32.xlu0 %v3947_v23  ;;  %3945 = vmax.xlane.f32.xlu1 %v3944_v60 }
 0xe13   : > { %3951 = vmax.xlane.f32.xlu1 %v3950_v5 }
 0xe8c   : > { %v3931_v11 = vpop.xlane.xlu0 %3930 }
 0xe8d   : > { %v3953_v2 = vsub.f32 %v3921_v57, %v3931_v11 }
 0xe8f   : > { %v3961_v4 = vmul.f32 1.442695, %v3953_v2 }
 0xe90   : > { %v3937_v0 = vpop.xlane.xlu0 %3936  ;;  %v3934_v24 = vpop.xlane.xlu1 %3933 }
 0xe91   : > { %6727 = vpow2.f32 %v3961_v4  ;;  %v3955_v6 = vsub.f32 %v3923_v59, %v3937_v0  ;;  %v3954_v25 = vsub.f32 %v3922_v49, %v3934_v24 }
 0xe93   : > { %v3965_v14 = vmul.f32 1.442695, %v3955_v6  ;;  %v3963_v12 = vmul.f32 1.442695, %v3954_v25 }
 0xe94   : > { %v3940_v3 = vpop.xlane.xlu1 %3939  ;;  %v3943_v27 = vpop.xlane.xlu0 %3942 }
 0xe95   : > { %6729 = vpow2.f32 %v3965_v14  ;;  %v3956_v17 = vsub.f32 %v3924_v43, %v3940_v3  ;;  %v3957_v32 = vsub.f32 %v3925_v15, %v3943_v27 }
 0xe96   : > { %6731 = vpow2.f32 %v3963_v12 }
 0xe97   : > { %v3967_v36 = vmul.f32 1.442695, %v3956_v17  ;;  %v3969_v33 = vmul.f32 1.442695, %v3957_v32 }
 0xe98   : > { %v3949_v29 = vpop.xlane.xlu0 %3948  ;;  %v3946_v7 = vpop.xlane.xlu1 %3945 }
 0xe99   : > { %6733 = vpow2.f32 %v3967_v36  ;;  %v3959_v34 = vsub.f32 %v3927_v28, %v3949_v29  ;;  %v3958_v38 = vsub.f32 %v3926_v18, %v3946_v7  ;;  %v6574_v36 = vld [vmem:[%s7156_s23 + $0x30] sm:$0xff]   ;;  %s8203_s23 = scalar_lea.vmem %s8126_s11, %s7105_s28  ;;  %s8207_s28 = sld [smem:[#allocation8_spill]] }
 0xe9a   : > { %6735 = vpow2.f32 %v3969_v33  ;;  %6371 = vmatprep.subr.bf16.mxu1 %v6574_v36 }
 0xe9b   : > { %v3973_v20 = vmul.f32 1.442695, %v3959_v34  ;;  %v3971_v40 = vmul.f32 1.442695, %v3958_v38  ;;  %6372 = vmatpush3.bf16.msra.mxu1 %v6574_v36 }
 0xe9c   : > { %v3952_v31 = vpop.xlane.xlu1 %3951 }
 0xe9d   : > { %6737 = vpow2.f32 %v3973_v20  ;;  %v3960_v39 = vsub.f32 %v3928_v55, %v3952_v31 }
 0xe9e   : > { %v6728_v42 = vpop.eup %6727  ;;  %6739 = vpow2.f32 %v3971_v40 }
 0xe9f   : > { %v3975_v46 = vmul.f32 1.442695, %v3960_v39  ;;  %v3977_v47 = vsel %vm1551_vm1, %v6728_v42, 0.0  ;;  %p5629_p1 = scmp.ne.s32.totalorder %s8207_s28, 1 }
 0xea0   : > { %3978 = vadd.xlane.f32.xlu0 %v3977_v47  ;;  %s8208_s21 = sld [smem:[#allocation32_spill]] (!%p5629_p1) }
 0xea1   : > { %6741 = vpow2.f32 %v3975_v46  ;;  %s8209_s12 = sld [smem:[#allocation33_spill]] (!%p5629_p1) }
 0xea2   : > { %v6730_v48 = vpop.eup %6729 }
 0xea3   : > { %v6732_v50 = vpop.eup %6731  ;;  %v3983_v52 = vsel %vm1551_vm1, %v6730_v48, 0.0 }
 0xea4   : > { %3984 = vadd.xlane.f32.xlu0 %v3983_v52  ;;  %v3980_v53 = vsel %vm1551_vm1, %v6732_v50, 0.0 }
 0xea5   : > { %3981 = vadd.xlane.f32.xlu1 %v3980_v53 }
 0xea6   : > { %v6734_v54 = vpop.eup %6733 }
 0xea7   : > { %v6736_v35 = vpop.eup %6735  ;;  %v3986_v56 = vsel %vm1551_vm1, %v6734_v54, 0.0 }
 0xea8   : > { %v3989_v44 = vsel %vm1551_vm1, %v6736_v35, 0.0 }
 0xea9   : > { %3990 = vadd.xlane.f32.xlu0 %v3989_v44  ;;  %3987 = vadd.xlane.f32.xlu1 %v3986_v56 }
 0xeaa   : > { %v6738_v57 = vpop.eup %6737 }
 0xeab   : > { %v6740_v58 = vpop.eup %6739  ;;  %v3995_v59 = vsel %vm1551_vm1, %v6738_v57, 0.0 }
 0xeac   : > { %v3992_v61 = vsel %vm1551_vm1, %v6740_v58, 0.0 }
 0xead   : > { %3996 = vadd.xlane.f32.xlu0 %v3995_v59  ;;  %3993 = vadd.xlane.f32.xlu1 %v3992_v61  ;;  %v6808_v59 = vld [vmem:[%s7191_s9 + $0x10] sm:$0xff] }
 0xeae   : > { %v6742_v22 = vpop.eup %6741 }
 0xeaf   : > { %v3998_v49 = vsel %vm1551_vm1, %v6742_v22, 0.0 }
 0xeb1   : > { %3999 = vadd.xlane.f32.xlu1 %v3998_v49 }
 0xf29   : > { %v3979_v43 = vpop.xlane.xlu0 %3978 }
 0xf2a   : > { %6743 = vrcp.f32 %v3979_v43 }
 0xf2d   : > { %v3985_v13 = vpop.xlane.xlu0 %3984 }
 0xf2e   : > { %v3982_v30 = vpop.xlane.xlu1 %3981 }
 0xf2f   : > { %6745 = vrcp.f32 %v3982_v30 }
 0xf30   : > { %6747 = vrcp.f32 %v3985_v13 }
 0xf32   : > { %v3991_v8 = vpop.xlane.xlu0 %3990  ;;  %v3988_v15 = vpop.xlane.xlu1 %3987 }
 0xf33   : > { %6749 = vrcp.f32 %v3988_v15 }
 0xf34   : > { %6751 = vrcp.f32 %v3991_v8 }
 0xf36   : > { %v3997_v26 = vpop.xlane.xlu0 %3996  ;;  %v3994_v28 = vpop.xlane.xlu1 %3993 }
 0xf37   : > { %6753 = vrcp.f32 %v3994_v28  ;;  %v6744_v37 = vpop.eup %6743  ;;  %v6811_v28 = vld [vmem:[%s7191_s9 + $0x20] sm:$0xff] }
 0xf38   : > { %6755 = vrcp.f32 %v3997_v26  ;;  %v4009_v18 = vmul.f32 %v6744_v37, %v6728_v42 }
 0xf3a   : > { %v4000_v63 = vpop.xlane.xlu1 %3999 }
 0xf3b   : > { %6757 = vrcp.f32 %v4000_v63 }
 0xf3c   : > { %v6746_v51 = vpop.eup %6745 }
 0xf3d   : > { %v4010_v55 = vmul.f32 %v6746_v51, %v6732_v50  ;;  %v6748_v23 = vpop.eup %6747 }
 0xf3e   : > { %v4011_v11 = vmul.f32 %v6748_v23, %v6730_v48 }
 0xf3f   : > { %v4017_v60 = vpack.c.bf16 %v4010_v55, %v4009_v18  ;;  %v6812_v18 = vld [vmem:[%s7191_s9 + $0x30] sm:$0xff] }
 0xf40   : > { %v6750_v5 = vpop.eup %6749 }
 0xf41   : > { %6361 = vmatprep.mubr.msk.bf16.mxu0 %vm1551_vm1, %v4017_v60  ;;  %v4012_v2 = vmul.f32 %v6750_v5, %v6734_v54  ;;  %v6752_v4 = vpop.eup %6751  ;;  %v6813_v60 = vld [vmem:[%s7191_s9 + $0x28] sm:$0xff] }
 0xf42   : > { %v4013_v25 = vmul.f32 %v6752_v4, %v6736_v35  ;;  %v6807_v35 = vld [vmem:[%s7191_s9] sm:$0xff] }
 0xf43   : > { %v4018_v0 = vpack.c.bf16 %v4012_v2, %v4011_v11  ;;  %v6814_v11 = vld [vmem:[%s7191_s9 + $0x38] sm:$0xff] }
 0xf44   : > { %v6754_v24 = vpop.eup %6753 }
 0xf45   : > { %v6756_v6 = vpop.eup %6755  ;;  %6362 = vmatmul.mubr.msk.bf16.vlgmr.msra.gmra.mxu0 %vm1551_vm1, %v4018_v0  ;;  %v4014_v14 = vmul.f32 %v6754_v24, %v6740_v58  ;;  %v5593_v58 = vld [vmem:[%s8202_s25] ss:$0 sm:$0xff]  ;;  %v6577_v24 = vld [vmem:[%s7175_s4 + $0x74] ss:$8 sps:$4 sm:$0xff]  }
 0xf46   : > { %v4015_v27 = vmul.f32 %v6756_v6, %v6738_v57  ;;  %4461 = vmatprep.subr.bf16.mxu0 %v6577_v24 }
 0xf47   : > { %v4019_v3 = vpack.c.bf16 %v4014_v14, %v4013_v25 }
 0xf48   : > { %v6758_v12 = vpop.eup %6757 }
 0xf49   : > { %v4016_v17 = vmul.f32 %v6758_v12, %v6742_v22  ;;  %6365 = vmatprep.mubr.msk.bf16.mxu0 %vm1551_vm1, %v4019_v3 }
 0xf4b   : > { %v4020_v32 = vpack.c.bf16 %v4016_v17, %v4015_v27 }
 0xf4d   : > { %6366 = vmatmul.mubr.msk.bf16.gmra.mxu0 %vm1551_vm1, %v4020_v32 }
0x1005   : > { %v6363_v33 = vpop.f32.mrf.mxu0 }
0x1007   : > { %v4071_v29 = vpop.f32.mrf.mxu0 }
0x1009   : > { %v6364_v7 = vpop.f32.mrf.mxu0 }
0x100a   : > { %v4108_v20 = vpack.c.bf16 %v6364_v7, %v6363_v33 }
0x100b   : > { %v4074_v34 = vpop.f32.mrf.mxu0 }
0x100c   : > { %v4107_v38 = vpack.c.bf16 %v4074_v34, %v4071_v29 }
0x100d   : > { %v6367_v40 = vpop.f32.mrf.mxu0 }
0x100e   : > { %6373 = vmatprep.mubr.msk.bf16.mxu1 %vm1453_vm0, %v4107_v38 }
0x100f   : > { %v4087_v31 = vpop.f32.mrf.mxu0  ;;  %6374 = vmatmul.mubr.msk.bf16.vlgmr.msra.gmra.mxu1 %vm1453_vm0, %v4108_v20 }
0x1011   : > { %v6368_v39 = vpop.f32.mrf.mxu0 }
0x1012   : > { %v4110_v47 = vpack.c.bf16 %v6368_v39, %v6367_v40 }
0x1013   : > { %v4090_v42 = vpop.f32.mrf.mxu0 }
0x1014   : > { %v4109_v46 = vpack.c.bf16 %v4090_v42, %v4087_v31 }
0x1016   : > { %6377 = vmatprep.mubr.msk.bf16.mxu1 %vm1453_vm0, %v4109_v46 }
0x1017   : > { %6378 = vmatmul.mubr.msk.bf16.gmra.mxu1 %vm1453_vm0, %v4110_v47 }
0x10cf   : > { %v6375_v48 = vpop.f32.mrf.mxu1 }
0x10d0   : > { %v4202_v52 = vadd.f32 %v6375_v48, %v7718_v21 }
0x10d1   : > { %v4169_v50 = vpop.f32.mrf.mxu1 }
0x10d2   : > { %v4200_v53 = vadd.f32 %v4169_v50, %v7722_v19  ;;  %v4210_v61 = vadd.f32 %v6808_v59, %v4202_v52  ;;  %v6809_v19 = vld [vmem:[%s7191_s9 + $0x8] sm:$0xff] }
0x10d3   : > { %v6376_v54 = vpop.f32.mrf.mxu1  ;;  %v6578_v59 = vld [vmem:[%s7175_s4 + $0x60] ss:$8 sps:$4 sm:$0xff]  }
0x10d4   : > { %v4208_v56 = vadd.f32 %v6807_v35, %v4200_v53  ;;  %v4203_v44 = vadd.f32 %v6376_v54, %v7726_v41  ;;  %v6810_v41 = vld [vmem:[%s7191_s9 + $0x18] sm:$0xff]  ;;  %v7811_v15 = vadd.f32 %v5593_v58, %v4210_v61 }
0x10d5   : > { %v4172_v57 = vpop.f32.mrf.mxu1 }
0x10d6   : > { %v4201_v22 = vadd.f32 %v4172_v57, %v7730_v1  ;;  %v7804_v21 = vadd.f32 %v5593_v58, %v4208_v56  ;;  %v4211_v43 = vadd.f32 %v6810_v41, %v4203_v44  ;;  %v6584_v41 = vld [vmem:[%s7175_s4 + $0x40] ss:$8 sps:$4 sm:$0xff]  }
0x10d7   : > { %v6379_v49 = vpop.f32.mrf.mxu1 }
0x10d8   : > { %v4209_v62 = vadd.f32 %v6809_v19, %v4201_v22  ;;  %4233 = vadd.xlane.f32.xlu0 %v7804_v21  ;;  %v4206_v30 = vadd.f32 %v6379_v49, %v7734_v10  ;;  %v7818_v51 = vadd.f32 %v5593_v58, %v4211_v43  ;;  %v6583_v49 = vld [vmem:[%s7175_s4 + $0x54] ss:$8 sps:$4 sm:$0xff]   ;;  %v6581_v19 = vld [vmem:[%s7175_s4 + $0x50] ss:$8 sps:$4 sm:$0xff]  }
0x10d9   : > { %v4185_v13 = vpop.f32.mrf.mxu1  ;;  %v6589_v43 = vld [vmem:[%s7175_s4 + $0x34] ss:$8 sps:$4 sm:$0xff]  }
0x10da   : > { %v4204_v8 = vadd.f32 %v4185_v13, %v7738_v45  ;;  %v7813_v26 = vadd.f32 %v5593_v58, %v4209_v62  ;;  %v4214_v10 = vadd.f32 %v6812_v18, %v4206_v30  ;;  %v6586_v62 = vld [vmem:[%s7175_s4 + $0x44] ss:$8 sps:$4 sm:$0xff]   ;;  %v6587_v13 = vld [vmem:[%s7175_s4 + $0x30] ss:$8 sps:$4 sm:$0xff]   ;;  %v6925_v18 = vmov 0  }
0x10db   : > { %v6380_v1 = vpop.f32.mrf.mxu1  ;;  %v6592_v30 = vld [vmem:[%s7175_s4 + $0x24] ss:$8 sps:$4 sm:$0xff]   ;;  %4493 = vmatprep.mubr.bf16.mxu0 %v6925_v18 }
0x10dc   : > { %v4212_v37 = vadd.f32 %v6811_v28, %v4204_v8  ;;  %4237 = vadd.xlane.f32.xlu0 %v7811_v15  ;;  %4235 = vadd.xlane.f32.xlu1 %v7813_v26  ;;  %v4207_v45 = vadd.f32 %v6380_v1, %v7742_v16  ;;  %v7831_v0 = vadd.f32 %v5593_v58, %v4214_v10  ;;  %v6590_v8 = vld [vmem:[%s7175_s4 + $0x20] ss:$8 sps:$4 sm:$0xff]   ;;  %v6595_v1 = vld [vmem:[%s7175_s4 + $0x14] ss:$8 sps:$4 sm:$0xff]   ;;  %v6593_v28 = vld [vmem:[%s7175_s4 + $0x10] ss:$8 sps:$4 sm:$0xff]  }
0x10dd   : > { %v4188_v63 = vpop.f32.mrf.mxu1 }
0x10de   : > { %v4205_v55 = vadd.f32 %v4188_v63, %v7744_v9  ;;  %v7823_v23 = vadd.f32 %v5593_v58, %v4212_v37  ;;  %v4215_v2 = vadd.f32 %v6814_v11, %v4207_v45  ;;  %v6575_v9 = vld [vmem:[%s7175_s4 + $0x70] ss:$8 sps:$4 sm:$0xff]   ;;  %v6598_v37 = vld [vmem:[%s7175_s4 + $0x4] ss:$8 sps:$4 sm:$0xff]   ;;  %v6596_v63 = vld [vmem:[%s7175_s4] ss:$8 sps:$4 sm:$0xff]  }
0x10df   : > { %4462 = vmatpush1.bf16.msra.mxu0 %v6575_v9 }
0x10e0   : > { %v4213_v5 = vadd.f32 %v6813_v60, %v4205_v55  ;;  %4239 = vadd.xlane.f32.xlu1 %v7818_v51  ;;  %4241 = vadd.xlane.f32.xlu0 %v7823_v23  ;;  %v7835_v16 = vadd.f32 %v5593_v58, %v4215_v2 }
0x10e2   : > { %v7829_v4 = vadd.f32 %v5593_v58, %v4213_v5  ;;  %v6580_v58 = vld [vmem:[%s7175_s4 + $0x64] ss:$8 sps:$4 sm:$0xff]  }
0x10e3   : > { %4463 = vmatprep.subr.bf16.mxu0 %v6580_v58 }
0x10e4   : > { %4243 = vadd.xlane.f32.xlu1 %v7829_v4  ;;  %4245 = vadd.xlane.f32.xlu0 %v7831_v0 }
0x10e5   : > { %4464 = vmatpush1.bf16.msra.mxu0 %v6578_v59 }
0x10e6   : > { %4465 = vmatprep.subr.bf16.mxu0 %v6583_v49 }
0x10e8   : > { %4247 = vadd.xlane.f32.xlu1 %v7835_v16 }
0x10e9   : > { %4466 = vmatpush1.bf16.msra.mxu0 %v6581_v19 }
0x10ea   : > { %4467 = vmatprep.subr.bf16.mxu0 %v6586_v62 }
0x10ed   : > { %4468 = vmatpush1.bf16.msra.mxu0 %v6584_v41 }
0x10ee   : > { %4469 = vmatprep.subr.bf16.mxu0 %v6589_v43 }
0x10f1   : > { %4470 = vmatpush1.bf16.msra.mxu0 %v6587_v13 }
0x10f2   : > { %4471 = vmatprep.subr.bf16.mxu0 %v6592_v30 }
0x10f5   : > { %4472 = vmatpush1.bf16.msra.mxu0 %v6590_v8 }
0x10f6   : > { %4473 = vmatprep.subr.bf16.mxu0 %v6595_v1 }
0x10f9   : > { %4474 = vmatpush1.bf16.msra.mxu0 %v6593_v28 }
0x10fa   : > { %4475 = vmatprep.subr.bf16.mxu0 %v6598_v37 }
0x10fd   : > { %4476 = vmatpush1.bf16.msra.mxu0 %v6596_v63 }
0x1161   : > { %v4234_v6 = vpop.xlane.xlu0 %4233 }
0x1162   : > { %v4249_v25 = vmul.f32 0.0078125, %v4234_v6 }
0x1164   : > { %v7841_v14 = vsub.f32 %v7804_v21, %v4249_v25 }
0x1165   : > { %v4238_v12 = vpop.xlane.xlu0 %4237  ;;  %v4236_v3 = vpop.xlane.xlu1 %4235 }
0x1166   : > { %v4251_v27 = vmul.f32 0.0078125, %v4238_v12  ;;  %v4250_v17 = vmul.f32 0.0078125, %v4236_v3  ;;  %v4265_v32 = vmul.f32 %v7841_v14, %v7841_v14 }
0x1168   : > { %v7846_v36 = vsub.f32 %v7811_v15, %v4251_v27  ;;  %v7849_v33 = vsub.f32 %v7813_v26, %v4250_v17  ;;  %4273 = vadd.xlane.f32.xlu0 %v4265_v32 }
0x1169   : > { %v4240_v29 = vpop.xlane.xlu1 %4239  ;;  %v4242_v7 = vpop.xlane.xlu0 %4241 }
0x116a   : > { %v4252_v34 = vmul.f32 0.0078125, %v4240_v29  ;;  %v4253_v38 = vmul.f32 0.0078125, %v4242_v7  ;;  %v4266_v20 = vmul.f32 %v7849_v33, %v7849_v33  ;;  %v4267_v40 = vmul.f32 %v7846_v36, %v7846_v36 }
0x116c   : > { %v7856_v31 = vsub.f32 %v7818_v51, %v4252_v34  ;;  %v7859_v39 = vsub.f32 %v7823_v23, %v4253_v38  ;;  %4275 = vadd.xlane.f32.xlu1 %v4266_v20  ;;  %4277 = vadd.xlane.f32.xlu0 %v4267_v40 }
0x116d   : > { %v4244_v42 = vpop.xlane.xlu1 %4243  ;;  %v4246_v46 = vpop.xlane.xlu0 %4245 }
0x116e   : > { %v4254_v47 = vmul.f32 0.0078125, %v4244_v42  ;;  %v4255_v48 = vmul.f32 0.0078125, %v4246_v46  ;;  %v4268_v50 = vmul.f32 %v7856_v31, %v7856_v31  ;;  %v4269_v52 = vmul.f32 %v7859_v39, %v7859_v39 }
0x1170   : > { %v7866_v53 = vsub.f32 %v7829_v4, %v4254_v47  ;;  %v7869_v54 = vsub.f32 %v7831_v0, %v4255_v48  ;;  %4279 = vadd.xlane.f32.xlu1 %v4268_v50  ;;  %4281 = vadd.xlane.f32.xlu0 %v4269_v52  ;;  %v5594_v47 = vld [vmem:[%s8203_s23] ss:$0 sm:$0xff] }
0x1171   : > { %v4248_v35 = vpop.xlane.xlu1 %4247 }
0x1172   : > { %v4256_v56 = vmul.f32 0.0078125, %v4248_v35  ;;  %v4270_v44 = vmul.f32 %v7866_v53, %v7866_v53  ;;  %v4271_v57 = vmul.f32 %v7869_v54, %v7869_v54 }
0x1174   : > { %v7878_v61 = vsub.f32 %v7835_v16, %v4256_v56  ;;  %4283 = vadd.xlane.f32.xlu1 %v4270_v44  ;;  %4285 = vadd.xlane.f32.xlu0 %v4271_v57  ;;  %v5595_v57 = vld [vmem:[%s8205_s30] ss:$0 sm:$0xff] }
0x1176   : > { %v4272_v22 = vmul.f32 %v7878_v61, %v7878_v61 }
0x1178   : > { %4287 = vadd.xlane.f32.xlu1 %v4272_v22 }
0x11f1   : > { %v4274_v10 = vpop.xlane.xlu0 %4273 }
0x11f2   : > { %v4289_v45 = vmul.f32 0.0078125, %v4274_v10 }
0x11f4   : > { %v4297_v55 = vadd.f32 1e-06, %v4289_v45 }
0x11f5   : > { %v4276_v60 = vpop.xlane.xlu1 %4275  ;;  %v4278_v5 = vpop.xlane.xlu0 %4277 }
0x11f6   : > { %6759 = vrsqrt.f32 %v4297_v55  ;;  %v4290_v11 = vmul.f32 0.0078125, %v4276_v60  ;;  %v4291_v2 = vmul.f32 0.0078125, %v4278_v5 }
0x11f8   : > { %v4298_v9 = vadd.f32 1e-06, %v4290_v11  ;;  %v4299_v24 = vadd.f32 1e-06, %v4291_v2 }
0x11f9   : > { %v4280_v6 = vpop.xlane.xlu1 %4279  ;;  %v4282_v25 = vpop.xlane.xlu0 %4281 }
0x11fa   : > { %6761 = vrsqrt.f32 %v4298_v9  ;;  %v4292_v12 = vmul.f32 0.0078125, %v4280_v6  ;;  %v4293_v27 = vmul.f32 0.0078125, %v4282_v25  ;;  %v6600_v6 = vld [vmem:[%s7185_s27 + $0x38] sm:$0xff]   ;;  %v6602_v25 = vld [vmem:[%s7185_s27 + $0x30] sm:$0xff]  }
0x11fb   : > { %6763 = vrsqrt.f32 %v4299_v24 }
0x11fc   : > { %v4300_v3 = vadd.f32 1e-06, %v4292_v12  ;;  %v4301_v29 = vadd.f32 1e-06, %v4293_v27  ;;  %v6603_v12 = vld [vmem:[%s7185_s27 + $0x68] sm:$0xff]   ;;  %v6606_v27 = vld [vmem:[%s7185_s27 + $0x20] sm:$0xff]  }
0x11fd   : > { %v4284_v17 = vpop.xlane.xlu1 %4283  ;;  %v4286_v34 = vpop.xlane.xlu0 %4285 }
0x11fe   : > { %6765 = vrsqrt.f32 %v4300_v3  ;;  %v4294_v32 = vmul.f32 0.0078125, %v4284_v17  ;;  %v4295_v42 = vmul.f32 0.0078125, %v4286_v34  ;;  %v6605_v3 = vld [vmem:[%s7185_s27 + $0x60] sm:$0xff]   ;;  %v6607_v17 = vld [vmem:[%s7185_s27 + $0x58] sm:$0xff]   ;;  %v6611_v34 = vld [vmem:[%s7185_s27 + $0x48] sm:$0xff]  }
0x1200   : > { %v4302_v7 = vadd.f32 1e-06, %v4294_v32  ;;  %v4303_v52 = vadd.f32 1e-06, %v4295_v42  ;;  %v6608_v32 = vld [vmem:[%s7185_s27 + $0x18] sm:$0xff]   ;;  %v4371_v42 = vlaneseq }
0x1201   : > { %v4288_v38 = vpop.xlane.xlu1 %4287 }
0x1202   : > { %6767 = vrsqrt.f32 %v4302_v7  ;;  %v4296_v20 = vmul.f32 0.0078125, %v4288_v38  ;;  %v6610_v7 = vld [vmem:[%s7185_s27 + $0x10] sm:$0xff]   ;;  %v6612_v38 = vld [vmem:[%s7185_s27 + $0x8] sm:$0xff]  }
0x1203   : > { %v6760_v40 = vpop.eup %6759  ;;  %6769 = vrsqrt.f32 %v4301_v29  ;;  %v6609_v29 = vld [vmem:[%s7185_s27 + $0x50] sm:$0xff]  }
0x1204   : > { %v4313_v46 = vmul.f32 %v6760_v40, %v7841_v14  ;;  %v4304_v48 = vadd.f32 1e-06, %v4296_v20  ;;  %v6613_v20 = vld [vmem:[%s7185_s27 + $0x40] sm:$0xff]  }
0x1205   : > { %v6614_v40 = vld [vmem:[%s7185_s27] sm:$0xff]  }
0x1206   : > { %v4327_v56 = vmul.f32 %v5594_v47, %v4313_v46  ;;  %6771 = vrsqrt.f32 %v4304_v48  ;;  %v4372_v46 = vshrl.u32 %v4371_v42, 7  ;;  %v4369_v48 = vld [vmem:[%s7180_s5] sm:$0x3] }
0x1207   : > { %v6762_v50 = vpop.eup %6761  ;;  %6773 = vrsqrt.f32 %v4303_v52 }
0x1208   : > { %v4314_v35 = vmul.f32 %v6762_v50, %v7849_v33  ;;  %v6764_v44 = vpop.eup %6763  ;;  %v4341_v59 = vadd.f32 %v5595_v57, %v4327_v56  ;;  %v4377_v50 = vsub.s32 1, %v4372_v46 }
0x1209   : > { %v4315_v49 = vmul.f32 %v6764_v44, %v7846_v36 }
0x120a   : > { %v4328_v14 = vmul.f32 %v5594_v47, %v4314_v35  ;;  %v7935_v35 = vrot.slane %v4369_v48, %v4377_v50 }
0x120b   : > { %v6766_v58 = vpop.eup %6765  ;;  %v4329_v43 = vmul.f32 %v5594_v47, %v4315_v49 }
0x120c   : > { %v4342_v22 = vadd.f32 %v5595_v57, %v4328_v14  ;;  %v4316_v19 = vmul.f32 %v6766_v58, %v7856_v31 }
0x120d   : > { %v4343_v1 = vadd.f32 %v5595_v57, %v4329_v43 }
0x120e   : > { %v4365_v62 = vpack.c.bf16 %v4342_v22, %v4341_v59  ;;  %v4330_v41 = vmul.f32 %v5594_v47, %v4316_v19 }
0x120f   : > { %v6768_v33 = vpop.eup %6767 }
0x1210   : > { %4494 = vmatmul.mubr.bf16.vlgmr.msra.gmra.mxu0 %v4365_v62  ;;  %v6770_v13 = vpop.eup %6769  ;;  %v4344_v30 = vadd.f32 %v5595_v57, %v4330_v41  ;;  %v4318_v8 = vmul.f32 %v6768_v33, %v7866_v53 }
0x1211   : > { %4503 = vmatprep.mubr.bf16.mxu0 %v6925_v18  ;;  %v4317_v28 = vmul.f32 %v6770_v13, %v7859_v39 }
0x1212   : > { %v4366_v37 = vpack.c.bf16 %v4344_v30, %v4343_v1  ;;  %v4332_v63 = vmul.f32 %v5594_v47, %v4318_v8 }
0x1213   : > { %v6772_v10 = vpop.eup %6771  ;;  %v4331_v31 = vmul.f32 %v5594_v47, %v4317_v28 }
0x1214   : > { %v6774_v36 = vpop.eup %6773  ;;  %v4346_v45 = vadd.f32 %v5595_v57, %v4332_v63  ;;  %v4320_v55 = vmul.f32 %v6772_v10, %v7878_v61  ;;  %v6599_v61 = vld [vmem:[%s7185_s27 + $0x78] sm:$0xff]  }
0x1215   : > { %v4345_v60 = vadd.f32 %v5595_v57, %v4331_v31  ;;  %v4319_v53 = vmul.f32 %v6774_v36, %v7869_v54  ;;  %5877 = vmatprep.subr.bf16.mxu1 %v6599_v61  ;;  %v6601_v54 = vld [vmem:[%s7185_s27 + $0x70] sm:$0xff]  }
0x1216   : > { %v4334_v39 = vmul.f32 %v5594_v47, %v4320_v55  ;;  %5878 = vmatpush3.bf16.msra.mxu1 %v6600_v6 }
0x1217   : > { %v4367_v5 = vpack.c.bf16 %v4346_v45, %v4345_v60  ;;  %v4333_v11 = vmul.f32 %v5594_v47, %v4319_v53  ;;  %5879 = vmatprep.subr.bf16.mxu1 %v6601_v54  ;;  %v4373_v47 = vsub.s32 0, %v4372_v46 }
0x1218   : > { %4504 = vmatmul.mubr.bf16.gmra.mxu0 %v4366_v37  ;;  %v4348_v2 = vadd.f32 %v5595_v57, %v4334_v39 }
0x1219   : > { %4513 = vmatprep.mubr.bf16.mxu0 %v6925_v18  ;;  %v4347_v9 = vadd.f32 %v5595_v57, %v4333_v11  ;;  %v7933_v52 = vrot.slane %v4369_v48, %v4373_v47 }
0x121a   : > { %5880 = vmatpush3.bf16.msra.mxu1 %v6602_v25 }
0x121b   : > { %v4368_v24 = vpack.c.bf16 %v4348_v2, %v4347_v9  ;;  %5881 = vmatprep.subr.bf16.mxu1 %v6603_v12 }
0x1220   : > { %4514 = vmatmul.mubr.bf16.gmra.mxu0 %v4367_v5 }
0x1221   : > { %4523 = vmatprep.mubr.bf16.mxu0 %v6925_v18  ;;  %v6604_v18 = vld [vmem:[%s7185_s27 + $0x28] sm:$0xff]  }
0x1222   : > { %5882 = vmatpush3.bf16.msra.mxu1 %v6604_v18 }
0x1223   : > { %5883 = vmatprep.subr.bf16.mxu1 %v6605_v3 }
0x1226   : > { %5884 = vmatpush3.bf16.msra.mxu1 %v6606_v27 }
0x1227   : > { %5885 = vmatprep.subr.bf16.mxu1 %v6607_v17 }
0x1228   : > { %4524 = vmatmul.mubr.bf16.gmra.mxu0 %v4368_v24 }
0x122a   : > { %5886 = vmatpush3.bf16.msra.mxu1 %v6608_v32 }
0x122b   : > { %5887 = vmatprep.subr.bf16.mxu1 %v6609_v29 }
0x122e   : > { %5888 = vmatpush3.bf16.msra.mxu1 %v6610_v7 }
0x122f   : > { %5889 = vmatprep.subr.bf16.mxu1 %v6611_v34 }
0x1232   : > { %5890 = vmatpush3.bf16.msra.mxu1 %v6612_v38 }
0x1233   : > { %5891 = vmatprep.subr.bf16.mxu1 %v6613_v20 }
0x1236   : > { %5892 = vmatpush3.bf16.msra.mxu1 %v6614_v40 }
0x12d0   : > { %v4495_v56 = vpop.f32.mrf.mxu0 }
0x12d1   : > { %v4496_v44 = vadd.f32 %v4495_v56, %v7933_v52 }
0x12d2   : > { %v4497_v57 = vpop.f32.mrf.mxu0 }
0x12d3   : > { %v4498_v14 = vadd.f32 %v4497_v57, %v7935_v35  ;;  %v4550_v58 = vmul.f32 0.70710677, %v4496_v44  ;;  %v4534_v40 = vmul.f32 0.5, %v4496_v44 }
0x12d4   : > { %v4499_v59 = vpop.f32.mrf.mxu0 }
0x12d5   : > { %v4551_v22 = vmul.f32 0.70710677, %v4498_v14  ;;  %v4500_v49 = vadd.f32 %v4499_v59, %v7933_v52  ;;  %v4535_v6 = vmul.f32 0.5, %v4498_v14 }
0x12d6   : > { %v4501_v19 = vpop.f32.mrf.mxu0 }
0x12d7   : > { %6775 = verf.f32 %v4551_v22  ;;  %v4552_v62 = vmul.f32 0.70710677, %v4500_v49  ;;  %v4502_v41 = vadd.f32 %v4501_v19, %v7935_v35  ;;  %v4536_v32 = vmul.f32 0.5, %v4500_v49 }
0x12d8   : > { %6777 = verf.f32 %v4550_v58  ;;  %v4505_v33 = vpop.f32.mrf.mxu0 }
0x12d9   : > { %6779 = verf.f32 %v4552_v62  ;;  %v4553_v43 = vmul.f32 0.70710677, %v4502_v41  ;;  %v7942_v13 = vadd.f32 %v4505_v33, %v7933_v52  ;;  %v4537_v34 = vmul.f32 0.5, %v4502_v41 }
0x12da   : > { %v4507_v30 = vpop.f32.mrf.mxu0 }
0x12db   : > { %6781 = verf.f32 %v4553_v43  ;;  %v7945_v8 = vadd.f32 %v4507_v30, %v7935_v35  ;;  %v4554_v1 = vmul.f32 0.70710677, %v7942_v13 }
0x12dc   : > { %v4509_v28 = vpop.f32.mrf.mxu0 }
0x12dd   : > { %v4555_v37 = vmul.f32 0.70710677, %v7945_v8  ;;  %v4510_v63 = vadd.f32 %v4509_v28, %v7933_v52 }
0x12de   : > { %v4511_v10 = vpop.f32.mrf.mxu0 }
0x12df   : > { %6783 = verf.f32 %v4555_v37  ;;  %v4556_v36 = vmul.f32 0.70710677, %v4510_v63  ;;  %v4512_v31 = vadd.f32 %v4511_v10, %v7935_v35  ;;  %v4540_v10 = vmul.f32 0.5, %v4510_v63 }
0x12e0   : > { %6785 = verf.f32 %v4554_v1  ;;  %v4515_v45 = vpop.f32.mrf.mxu0 }
0x12e1   : > { %6787 = verf.f32 %v4556_v36  ;;  %v4557_v55 = vmul.f32 0.70710677, %v4512_v31  ;;  %v7952_v60 = vadd.f32 %v4515_v45, %v7933_v52  ;;  %v4539_v45 = vmul.f32 0.5, %v7945_v8 }
0x12e2   : > { %v4517_v53 = vpop.f32.mrf.mxu0 }
0x12e3   : > { %6789 = verf.f32 %v4557_v55  ;;  %v4558_v5 = vmul.f32 0.70710677, %v7952_v60  ;;  %v7956_v11 = vadd.f32 %v4517_v53, %v7935_v35  ;;  %v4538_v53 = vmul.f32 0.5, %v7942_v13 }
0x12e4   : > { %v6776_v39 = vpop.eup %6775  ;;  %v4519_v2 = vpop.f32.mrf.mxu0 }
0x12e5   : > { %v6778_v9 = vpop.eup %6777  ;;  %v7959_v24 = vadd.f32 %v4519_v2, %v7933_v52  ;;  %v4559_v54 = vmul.f32 0.70710677, %v7956_v11  ;;  %v4583_v12 = vadd.f32 1.0, %v6776_v39  ;;  %6791 = verf.f32 %v4558_v5 }
0x12e6   : > { %v6780_v61 = vpop.eup %6779  ;;  %v4521_v25 = vpop.f32.mrf.mxu0  ;;  %v4582_v17 = vadd.f32 1.0, %v6778_v9  ;;  %v4543_v13 = vmul.f32 0.5, %v7956_v11 }
0x12e7   : > { %v4584_v18 = vadd.f32 1.0, %v6780_v61  ;;  %v4560_v3 = vmul.f32 0.70710677, %v7959_v24  ;;  %6793 = verf.f32 %v4559_v54  ;;  %v4522_v29 = vadd.f32 %v4521_v25, %v7935_v35 }
0x12e8   : > { %v6782_v27 = vpop.eup %6781  ;;  %v4525_v7 = vpop.f32.mrf.mxu0  ;;  %v4599_v48 = vmul.f32 %v4583_v12, %v4535_v6  ;;  %v4598_v57 = vmul.f32 %v4582_v17, %v4534_v40 }
0x12e9   : > { %v4585_v38 = vadd.f32 1.0, %v6782_v27  ;;  %6795 = verf.f32 %v4560_v3  ;;  %v7965_v20 = vadd.f32 %v4525_v7, %v7933_v52  ;;  %v4600_v42 = vmul.f32 %v4584_v18, %v4536_v32 }
0x12ea   : > { %v4561_v46 = vmul.f32 0.70710677, %v4522_v29  ;;  %v4527_v47 = vpop.f32.mrf.mxu0  ;;  %v4544_v3 = vmul.f32 0.5, %v7959_v24  ;;  %v4545_v27 = vmul.f32 0.5, %v4522_v29  ;;  %v4542_v32 = vmul.f32 0.5, %v7952_v60 }
0x12eb   : > { %v4601_v50 = vmul.f32 %v4585_v38, %v4537_v34  ;;  %v4562_v14 = vmul.f32 0.70710677, %v7965_v20  ;;  %v4528_v58 = vadd.f32 %v4527_v47, %v7935_v35  ;;  %v4646_v41 = vpack.c.bf16 %v4600_v42, %v4598_v57 }
0x12ec   : > { %v6784_v56 = vpop.eup %6783  ;;  %6797 = verf.f32 %v4561_v46  ;;  %v4529_v59 = vpop.f32.mrf.mxu0 }
0x12ed   : > { %v6786_v22 = vpop.eup %6785  ;;  %v4530_v49 = vadd.f32 %v4529_v59, %v7933_v52  ;;  %v4647_v19 = vpack.c.bf16 %v4601_v50, %v4599_v48  ;;  %v4563_v44 = vmul.f32 0.70710677, %v4528_v58  ;;  %v4587_v43 = vadd.f32 1.0, %v6784_v56 }
0x12ee   : > { %v6788_v62 = vpop.eup %6787  ;;  %v4531_v33 = vpop.f32.mrf.mxu0  ;;  %6799 = verf.f32 %v4562_v14  ;;  %v4586_v37 = vadd.f32 1.0, %v6786_v22  ;;  %v4541_v52 = vmul.f32 0.5, %v4512_v31  ;;  %v4547_v11 = vmul.f32 0.5, %v4528_v58  ;;  %v5628_v58 = vld [vmem:[%s884_s18] ss:$0 sm:$0xff] }
0x12ef   : > { %v4588_v30 = vadd.f32 1.0, %v6788_v62  ;;  %v4564_v1 = vmul.f32 0.70710677, %v4530_v49  ;;  %4782 = vmatprep.mubr.bf16.mxu1 %v4647_v19  ;;  %6801 = verf.f32 %v4563_v44  ;;  %v4532_v36 = vadd.f32 %v4531_v33, %v7935_v35 }
0x12f0   : > { %v6790_v28 = vpop.eup %6789  ;;  %4783 = vmatmul.mubr.bf16.vlgmr.msra.gmra.mxu1 %v4646_v41  ;;  %v4603_v2 = vmul.f32 %v4587_v43, %v4539_v45  ;;  %v4602_v6 = vmul.f32 %v4586_v37, %v4538_v53  ;;  %v4548_v59 = vmul.f32 0.5, %v4530_v49  ;;  %v4546_v22 = vmul.f32 0.5, %v7965_v20 }
0x12f1   : > { %v4589_v55 = vadd.f32 1.0, %v6790_v28  ;;  %6803 = verf.f32 %v4564_v1  ;;  %v4604_v5 = vmul.f32 %v4588_v30, %v4540_v10  ;;  %v4565_v39 = vmul.f32 0.70710677, %v4532_v36 }
0x12f2   : > { %v6792_v61 = vpop.eup %6791  ;;  %v4549_v29 = vmul.f32 0.5, %v4532_v36 }
0x12f3   : > { %v4605_v9 = vmul.f32 %v4589_v55, %v4541_v52  ;;  %6805 = verf.f32 %v4565_v39  ;;  %v4648_v12 = vpack.c.bf16 %v4604_v5, %v4602_v6  ;;  %v4590_v31 = vadd.f32 1.0, %v6792_v61 }
0x12f4   : > { %v6794_v54 = vpop.eup %6793 }
0x12f5   : > { %v4649_v63 = vpack.c.bf16 %v4605_v9, %v4603_v2  ;;  %v4591_v18 = vadd.f32 1.0, %v6794_v54  ;;  %v4606_v46 = vmul.f32 %v4590_v31, %v4542_v32 }
0x12f6   : > { %v6796_v25 = vpop.eup %6795 }
0x12f7   : > { %v4592_v35 = vadd.f32 1.0, %v6796_v25  ;;  %4790 = vmatprep.mubr.bf16.mxu1 %v4649_v63  ;;  %v4607_v38 = vmul.f32 %v4591_v18, %v4543_v13 }
0x12f8   : > { %4791 = vmatmul.mubr.bf16.gmra.mxu1 %v4648_v12 }
0x12f9   : > { %v6798_v8 = vpop.eup %6797  ;;  %v4608_v7 = vmul.f32 %v4592_v35, %v4544_v3 }
0x12fa   : > { %v4593_v17 = vadd.f32 1.0, %v6798_v8 }
0x12fb   : > { %v6800_v34 = vpop.eup %6799  ;;  %v4650_v56 = vpack.c.bf16 %v4608_v7, %v4606_v46 }
0x12fc   : > { %v4609_v40 = vmul.f32 %v4593_v17, %v4545_v27  ;;  %v6802_v42 = vpop.eup %6801  ;;  %v4594_v24 = vadd.f32 1.0, %v6800_v34 }
0x12fd   : > { %v4595_v57 = vadd.f32 1.0, %v6802_v42 }
0x12fe   : > { %v6804_v47 = vpop.eup %6803  ;;  %v4651_v48 = vpack.c.bf16 %v4609_v40, %v4607_v38  ;;  %v4610_v44 = vmul.f32 %v4594_v24, %v4546_v22 }
0x12ff   : > { %v4596_v50 = vadd.f32 1.0, %v6804_v47  ;;  %v4611_v62 = vmul.f32 %v4595_v57, %v4547_v11 }
0x1300   : > { %4798 = vmatprep.mubr.bf16.mxu1 %v4651_v48  ;;  %v6806_v14 = vpop.eup %6805 }
0x1301   : > { %4799 = vmatmul.mubr.bf16.gmra.mxu1 %v4650_v56  ;;  %v4597_v60 = vadd.f32 1.0, %v6806_v14  ;;  %v4612_v19 = vmul.f32 %v4596_v50, %v4548_v59 }
0x1303   : > { %v4613_v41 = vmul.f32 %v4597_v60, %v4549_v29  ;;  %v4652_v43 = vpack.c.bf16 %v4612_v19, %v4610_v44 }
0x1305   : > { %v4653_v33 = vpack.c.bf16 %v4613_v41, %v4611_v62 }
0x1307   : > { %4806 = vmatprep.mubr.bf16.mxu1 %v4653_v33 }
0x1309   : > { %4807 = vmatmul.mubr.bf16.gmra.mxu1 %v4652_v43 }
0x13b0   : > { %v5893_v30 = vpop.f32.mrf.mxu1 }
0x13b2   : > { %v5894_v1 = vpop.f32.mrf.mxu1 }
0x13b3   : > { %v5895_v49 = vadd.f32 %v5894_v1, %v5893_v30 }
0x13b4   : > { %v5896_v28 = vpop.f32.mrf.mxu1 }
0x13b5   : > { %v4815_v20 = vadd.f32 %v5895_v49, %v7804_v21 }
0x13b6   : > { %v5897_v37 = vpop.f32.mrf.mxu1 }
0x13b7   : > { %v4830_v10 = vadd.f32 %v5628_v58, %v4815_v20  ;;  %v5898_v36 = vadd.f32 %v5897_v37, %v5896_v28 }
0x13b8   : > { %v5899_v45 = vpop.f32.mrf.mxu1 }
0x13b9   : > { %4838 = vst [vmem:[%s7191_s9] sm:$0xff] %v4830_v10  ;;  %v4816_v52 = vadd.f32 %v5898_v36, %v7813_v26 }
0x13ba   : > { %v5900_v55 = vpop.f32.mrf.mxu1 }
0x13bb   : > { %v4831_v53 = vadd.f32 %v5628_v58, %v4816_v52  ;;  %v5901_v5 = vadd.f32 %v5900_v55, %v5899_v45 }
0x13bc   : > { %v5902_v39 = vpop.f32.mrf.mxu1 }
0x13bd   : > { %4839 = vst [vmem:[%s7191_s9 + $0x8] sm:$0xff] %v4831_v53  ;;  %v4817_v2 = vadd.f32 %v5901_v5, %v7811_v15 }
0x13be   : > { %v5903_v9 = vpop.f32.mrf.mxu1 }
0x13bf   : > { %v4832_v61 = vadd.f32 %v5628_v58, %v4817_v2  ;;  %v5904_v21 = vadd.f32 %v5903_v9, %v5902_v39 }
0x13c1   : > { %4840 = vst [vmem:[%s7191_s9 + $0x10] sm:$0xff] %v4832_v61  ;;  %v4818_v6 = vadd.f32 %v5904_v21, %v7818_v51  ;;  %v5905_v54 = vpop.f32.mrf.mxu1 }
0x13c3   : > { %v4833_v63 = vadd.f32 %v5628_v58, %v4818_v6  ;;  %v5906_v25 = vpop.f32.mrf.mxu1 }
0x13c4   : > { %v5907_v26 = vadd.f32 %v5906_v25, %v5905_v54 }
0x13c5   : > { %4841 = vst [vmem:[%s7191_s9 + $0x18] sm:$0xff] %v4833_v63  ;;  %v5908_v12 = vpop.f32.mrf.mxu1 }
0x13c6   : > { %v4819_v35 = vadd.f32 %v5907_v26, %v7823_v23 }
0x13c7   : > { %v5909_v18 = vpop.f32.mrf.mxu1 }
0x13c8   : > { %v4834_v8 = vadd.f32 %v5628_v58, %v4819_v35  ;;  %v5910_v15 = vadd.f32 %v5909_v18, %v5908_v12 }
0x13c9   : > { %v5911_v31 = vpop.f32.mrf.mxu1 }
0x13ca   : > { %4842 = vst [vmem:[%s7191_s9 + $0x20] sm:$0xff] %v4834_v8  ;;  %v4820_v3 = vadd.f32 %v5910_v15, %v7829_v4 }
0x13cb   : > { %v5912_v13 = vpop.f32.mrf.mxu1 }
0x13cc   : > { %v4835_v51 = vadd.f32 %v5628_v58, %v4820_v3  ;;  %v5913_v27 = vadd.f32 %v5912_v13, %v5911_v31 }
0x13cd   : > { %v5914_v17 = vpop.f32.mrf.mxu1 }
0x13ce   : > { %4843 = vst [vmem:[%s7191_s9 + $0x28] sm:$0xff] %v4835_v51  ;;  %v4821_v32 = vadd.f32 %v5913_v27, %v7831_v0 }
0x13cf   : > { %v5915_v7 = vpop.f32.mrf.mxu1 }
0x13d0   : > { %v4836_v34 = vadd.f32 %v5628_v58, %v4821_v32  ;;  %v5916_v38 = vadd.f32 %v5915_v7, %v5914_v17 }
0x13d2   : > { %4844 = vst [vmem:[%s7191_s9 + $0x30] sm:$0xff] %v4836_v34  ;;  %v4822_v23 = vadd.f32 %v5916_v38, %v7835_v16  ;;  %4849 = sbr.rel (%p5629_p1) target bundleno = 5402 (0x151a), region = 104 }
0x13d4   : > { %v4837_v40 = vadd.f32 %v5628_v58, %v4822_v23 }
0x13d6   : > { %4845 = vst [vmem:[%s7191_s9 + $0x38] sm:$0xff] %v4837_v40 }
0x13d7   : > { %4852 = vadd.xlane.f32.xlu0 %v4830_v10  ;;  %4856 = vadd.xlane.f32.xlu1 %v4832_v61  ;;  %v5630_v27 = vld [vmem:[%s8208_s21] ss:$0 sm:$0xff] }
0x13d8   : > { %v5631_v7 = vld [vmem:[%s8209_s12] ss:$0 sm:$0xff] }
0x13db   : > { %4854 = vadd.xlane.f32.xlu0 %v4831_v53  ;;  %4858 = vadd.xlane.f32.xlu1 %v4833_v63 }
0x13df   : > { %4860 = vadd.xlane.f32.xlu0 %v4834_v8  ;;  %4862 = vadd.xlane.f32.xlu1 %v4835_v51 }
0x13e3   : > { %4864 = vadd.xlane.f32.xlu0 %v4836_v34  ;;  %4866 = vadd.xlane.f32.xlu1 %v4837_v40 }
0x1460   : > { %v4853_v4 = vpop.xlane.xlu0 %4852  ;;  %v4857_v0 = vpop.xlane.xlu1 %4856 }
0x1461   : > { %v4868_v42 = vmul.f32 0.0078125, %v4853_v4  ;;  %v4870_v46 = vmul.f32 0.0078125, %v4857_v0 }
0x1463   : > { %v7999_v47 = vsub.f32 %v4830_v10, %v4868_v42  ;;  %v8001_v16 = vsub.f32 %v4832_v61, %v4870_v46 }
0x1464   : > { %v4855_v48 = vpop.xlane.xlu0 %4854  ;;  %v4859_v50 = vpop.xlane.xlu1 %4858 }
0x1465   : > { %v4869_v56 = vmul.f32 0.0078125, %v4855_v48  ;;  %v4884_v57 = vmul.f32 %v7999_v47, %v7999_v47  ;;  %v4871_v14 = vmul.f32 0.0078125, %v4859_v50  ;;  %v4886_v11 = vmul.f32 %v8001_v16, %v8001_v16 }
0x1467   : > { %v8005_v24 = vsub.f32 %v4831_v53, %v4869_v56  ;;  %4892 = vadd.xlane.f32.xlu0 %v4884_v57  ;;  %v8007_v59 = vsub.f32 %v4833_v63, %v4871_v14 }
0x1468   : > { %v4861_v29 = vpop.xlane.xlu0 %4860  ;;  %v4863_v60 = vpop.xlane.xlu1 %4862 }
0x1469   : > { %v4872_v22 = vmul.f32 0.0078125, %v4861_v29  ;;  %v4885_v19 = vmul.f32 %v8005_v24, %v8005_v24  ;;  %v4873_v62 = vmul.f32 0.0078125, %v4863_v60  ;;  %v4887_v33 = vmul.f32 %v8007_v59, %v8007_v59 }
0x146b   : > { %v8013_v41 = vsub.f32 %v4834_v8, %v4872_v22  ;;  %4896 = vadd.xlane.f32.xlu0 %v4886_v11  ;;  %4894 = vadd.xlane.f32.xlu1 %v4885_v19  ;;  %v8015_v44 = vsub.f32 %v4835_v51, %v4873_v62 }
0x146c   : > { %v4865_v43 = vpop.xlane.xlu0 %4864  ;;  %v4867_v30 = vpop.xlane.xlu1 %4866 }
0x146d   : > { %v4874_v1 = vmul.f32 0.0078125, %v4865_v43  ;;  %v4888_v49 = vmul.f32 %v8013_v41, %v8013_v41  ;;  %v4875_v58 = vmul.f32 0.0078125, %v4867_v30  ;;  %v4889_v37 = vmul.f32 %v8015_v44, %v8015_v44 }
0x146f   : > { %v8021_v28 = vsub.f32 %v4836_v34, %v4874_v1  ;;  %4898 = vadd.xlane.f32.xlu1 %v4887_v33  ;;  %4900 = vadd.xlane.f32.xlu0 %v4888_v49  ;;  %v8023_v20 = vsub.f32 %v4837_v40, %v4875_v58 }
0x1471   : > { %v4890_v10 = vmul.f32 %v8021_v28, %v8021_v28  ;;  %v4891_v36 = vmul.f32 %v8023_v20, %v8023_v20 }
0x1473   : > { %4902 = vadd.xlane.f32.xlu1 %v4889_v37  ;;  %4904 = vadd.xlane.f32.xlu0 %v4890_v10 }
0x1477   : > { %4906 = vadd.xlane.f32.xlu1 %v4891_v36 }
0x14f0   : > { %v4893_v45 = vpop.xlane.xlu0 %4892 }
0x14f1   : > { %v4908_v52 = vmul.f32 0.0078125, %v4893_v45 }
0x14f3   : > { %v4916_v55 = vadd.f32 1e-06, %v4908_v52 }
0x14f4   : > { %v4895_v53 = vpop.xlane.xlu1 %4894  ;;  %v4897_v5 = vpop.xlane.xlu0 %4896 }
0x14f5   : > { %6815 = vrsqrt.f32 %v4916_v55  ;;  %v4909_v39 = vmul.f32 0.0078125, %v4895_v53  ;;  %v4910_v2 = vmul.f32 0.0078125, %v4897_v5 }
0x14f7   : > { %v4917_v9 = vadd.f32 1e-06, %v4909_v39  ;;  %v4918_v61 = vadd.f32 1e-06, %v4910_v2 }
0x14f8   : > { %v4899_v21 = vpop.xlane.xlu1 %4898  ;;  %v4901_v6 = vpop.xlane.xlu0 %4900 }
0x14f9   : > { %6817 = vrsqrt.f32 %v4917_v9  ;;  %v4911_v54 = vmul.f32 0.0078125, %v4899_v21  ;;  %v4912_v63 = vmul.f32 0.0078125, %v4901_v6 }
0x14fa   : > { %6819 = vrsqrt.f32 %v4918_v61 }
0x14fb   : > { %v4919_v25 = vadd.f32 1e-06, %v4911_v54  ;;  %v4920_v26 = vadd.f32 1e-06, %v4912_v63 }
0x14fc   : > { %v4903_v12 = vpop.xlane.xlu1 %4902  ;;  %v4905_v35 = vpop.xlane.xlu0 %4904 }
0x14fd   : > { %6821 = vrsqrt.f32 %v4919_v25  ;;  %v4913_v18 = vmul.f32 0.0078125, %v4903_v12  ;;  %v4914_v8 = vmul.f32 0.0078125, %v4905_v35 }
0x14fe   : > { %6823 = vrsqrt.f32 %v4920_v26 }
0x14ff   : > { %v4921_v15 = vadd.f32 1e-06, %v4913_v18  ;;  %v4922_v31 = vadd.f32 1e-06, %v4914_v8 }
0x1500   : > { %v4907_v3 = vpop.xlane.xlu1 %4906 }
0x1501   : > { %6825 = vrsqrt.f32 %v4921_v15  ;;  %v4915_v13 = vmul.f32 0.0078125, %v4907_v3 }
0x1502   : > { %v6816_v51 = vpop.eup %6815  ;;  %6827 = vrsqrt.f32 %v4922_v31 }
0x1503   : > { %v4932_v17 = vmul.f32 %v6816_v51, %v7999_v47  ;;  %v4923_v32 = vadd.f32 1e-06, %v4915_v13 }
0x1505   : > { %v4946_v34 = vmul.f32 %v5630_v27, %v4932_v17  ;;  %6829 = vrsqrt.f32 %v4923_v32 }
0x1506   : > { %v6818_v38 = vpop.eup %6817 }
0x1507   : > { %v6820_v23 = vpop.eup %6819  ;;  %v4960_v40 = vadd.f32 %v5631_v7, %v4946_v34  ;;  %v4933_v4 = vmul.f32 %v6818_v38, %v8005_v24 }
0x1508   : > { %v4934_v0 = vmul.f32 %v6820_v23, %v8001_v16 }
0x1509   : > { %4968 = vst [vmem:[%s7191_s9] sm:$0xff] %v4960_v40  ;;  %v4947_v42 = vmul.f32 %v5630_v27, %v4933_v4 }
0x150a   : > { %v6822_v46 = vpop.eup %6821  ;;  %v4948_v47 = vmul.f32 %v5630_v27, %v4934_v0 }
0x150b   : > { %v6824_v48 = vpop.eup %6823  ;;  %v4961_v50 = vadd.f32 %v5631_v7, %v4947_v42  ;;  %v4935_v56 = vmul.f32 %v6822_v46, %v8007_v59 }
0x150c   : > { %v4962_v57 = vadd.f32 %v5631_v7, %v4948_v47  ;;  %v4936_v14 = vmul.f32 %v6824_v48, %v8013_v41 }
0x150d   : > { %4969 = vst [vmem:[%s7191_s9 + $0x8] sm:$0xff] %v4961_v50  ;;  %v4949_v11 = vmul.f32 %v5630_v27, %v4935_v56 }
0x150e   : > { %v6826_v29 = vpop.eup %6825  ;;  %4970 = vst [vmem:[%s7191_s9 + $0x10] sm:$0xff] %v4962_v57  ;;  %v4950_v24 = vmul.f32 %v5630_v27, %v4936_v14 }
0x150f   : > { %v6828_v16 = vpop.eup %6827  ;;  %v4963_v60 = vadd.f32 %v5631_v7, %v4949_v11  ;;  %v4937_v22 = vmul.f32 %v6826_v29, %v8015_v44 }
0x1510   : > { %v4964_v19 = vadd.f32 %v5631_v7, %v4950_v24  ;;  %v4938_v62 = vmul.f32 %v6828_v16, %v8021_v28 }
0x1511   : > { %4971 = vst [vmem:[%s7191_s9 + $0x18] sm:$0xff] %v4963_v60  ;;  %v4951_v59 = vmul.f32 %v5630_v27, %v4937_v22 }
0x1512   : > { %v6830_v33 = vpop.eup %6829  ;;  %4972 = vst [vmem:[%s7191_s9 + $0x20] sm:$0xff] %v4964_v19  ;;  %v4952_v41 = vmul.f32 %v5630_v27, %v4938_v62 }
0x1513   : > { %v4965_v43 = vadd.f32 %v5631_v7, %v4951_v59  ;;  %v4939_v30 = vmul.f32 %v6830_v33, %v8023_v20 }
0x1514   : > { %v4966_v1 = vadd.f32 %v5631_v7, %v4952_v41 }
0x1515   : > { %4973 = vst [vmem:[%s7191_s9 + $0x28] sm:$0xff] %v4965_v43  ;;  %v4953_v49 = vmul.f32 %v5630_v27, %v4939_v30 }
0x1516   : > { %4974 = vst [vmem:[%s7191_s9 + $0x30] sm:$0xff] %v4966_v1 }
0x1517   : > { %v4967_v58 = vadd.f32 %v5631_v7, %v4953_v49 }
0x1519   : > { %4975 = vst [vmem:[%s7191_s9 + $0x38] sm:$0xff] %v4967_v58 }
0x151a PF: > { %s8210_s22 = sld [smem:[#allocation9_spill]]  ;;  %s4990_s25 = sshll.u32 %s7191_s9, 4  ;;  %s8060_s25 = int_to_ptr.vmem [resolvable:$true] %s4990_s25 }
0x151b   : > { %s8211_s3 = sld [smem:[#allocation6_spill]]  ;;  %s6831_s23 = scalar_lea.vmem %s8060_s25, 1024 }
0x151c   : > { %s8213_s15 = sld [smem:[#allocation34_spill]]  ;;  %p6832_p2 = scmp.ne.s32.totalorder %s8060_s25, %s6831_s23 }
0x151d   : > { %s6926_s4 = smov [#allocation2]  }
0x151e   : > { %p6833_p4 = pnand %p6832_p2, %p7078_p3  ;;  %s6835_s19 = sshll.u32 %s6926_s4, 4  ;;  %s6836_s19 = int_to_ptr.vmem [resolvable:$false] %s6835_s19 }
0x151f   : > { %s6837_s20 = scalar_lea.vmem %s6836_s19, 2048  ;;  %p6838_p6 = scmp.lt.s32.totalorder %s8060_s25, %s6836_s19 }
0x1520   : > { %s5644_s17 = sshll.u32 %s8210_s22, 10  ;;  %p6834_p5 = pneg %p6833_p4 }
0x1521   : > { %s8214_s0 = sand.u32 1, %s8211_s3   ;;  %p6839_p7 = scmp.lt.s32.totalorder %s6837_s20, %s6831_s23 }
0x1522   : > { %s8057_s29 = scalar_lea.hbm %s8213_s15, %s5644_s17  ;;  %s8064_s2 = scalar_lea.sflag [#allocation3], %s8214_s0 }
0x1523   : > { %p6840_p8 = por %p6839_p7, %p6838_p6 }
0x1525   : > { %p6841_p10 = pnand %p6840_p8, %p6834_p5 }
0x1527   : > { %6844 = shalt.err (!%p6841_p10)
}
0x1528   : > { %s6845_s9 = scalar_lea.hbm %s8057_s29, 1024  ;;  %s6849_s6 = scalar_lea.hbm %s8213_s15, 2048 }
0x1529   : > { %p6846_p11 = scmp.ne.s32.totalorder %s8057_s29, %s6845_s9  ;;  %p6850_p0 = scmp.lt.s32.totalorder %s8057_s29, %s8213_s15 }
0x152a   : > { %p6851_p1 = scmp.lt.s32.totalorder %s6849_s6, %s6845_s9 }
0x152b   : > { %p6847_p12 = pnand %p6846_p11, %p7078_p3 }
0x152c   : > { %p6852_p2 = por %p6851_p1, %p6850_p0 }
0x152d   : > { %p6848_p13 = pneg %p6847_p12 }
0x152f   : > { %p6853_p4 = pnand %p6852_p2, %p6848_p13 }
0x1531   : > { %6856 = shalt.err (!%p6853_p4)
}
0x1532   : > { %s6927_s18 = smov 128   ;;  %s6928_s16 = smov 8  }
0x1533   : > { %6397 = dma.vmem_to_hbm [thread:$0]  (%p7078_p3), %s8060_s25, 1024, %s8057_s29, %s8064_s2, %s6927_s18, %s6927_s18, %s6928_s16  }
0x1534 PF: > { %s8215_s21 = sld [smem:[#allocation12_spill]] }
0x1535   : > { %s8216_s7 = sld [smem:[#allocation5_spill]] }
0x153a   : > { %p6403_p5 = scmp.ge.s32.totalorder %s8215_s21, 2 }
0x153b   : > { %s5005_s12 = sand.u32 1, %s8216_s7  }
0x153c   : > { %p6400_p6 = pnand %p6403_p5, %p7088_p9  ;;  %s5006_s22 = scalar_lea.sflag [#allocation3], %s5005_s12 }
0x153e   : > { %p6401_p7 = pneg %p6400_p6 }
0x1540   : > { %6890 = dma.done.wait (%p6401_p7), %s5006_s22, 1024  }
0x1541   : > { %6892 = vsyncadd (%p6401_p7), %s5006_s22, 4294966272  ;;  %s32_s23 = sadd.s32 1, %s8215_s21   ;;  %s8218_s0 = sld [smem:[#allocation6_spill]] }
0x1542   : > { %p29_p8 = scmp.ge.s32.totalorder %s32_s23, 6   ;;  %s8219_s30 = sld [smem:[#allocation7_spill]] }
0x1543   : > { %s8220_s20 = sld [smem:[#allocation17_spill]] }
0x1544   : > { %s8221_s21 = sld [smem:[#allocation10_spill]]  ;;  %31 = sbr.rel (!%p29_p8) target bundleno = 22 (0x16), region = 208 }
0x1545   : > { %s8222_s1 = sld [smem:[#allocation11_spill]] }
0x1546   : > { %s8223_s22 = sld [smem:[#allocation13_spill]] }
0x1547   : > { %s8224_s2 = sld [smem:[#allocation15_spill]] }
0x1549   :  { %5011 = vsyncpa [#allocation3], 1 }
0x154a   :  { %5013 = vsyncpa [#allocation3 + $0x1], 1 }

</bundles_post_ra>
